<compile_context>
chip_gen: v5e
topology: v5e:2x2
jax: 0.10.0
libtpu: 0.0.40
codegen_flags: <defaults>
</compile_context>

<pallas_src>
import functools

import jax
import jax.numpy as jnp
from jax.experimental import pallas as pl
from jax.experimental.pallas import tpu as pltpu

STRIDE = 4
KSIZE = 24
PAD = 10
HALO = 3                 # window covers input positions m-3 .. m+3
TAPS = 2 * HALO + 1      # 7 window taps (6 real taps per phase + 1 zero block)


# ----------------------------- dense kernel ---------------------------------

def _dense_kernel(z_ref, w_ref, b_ref, o_ref):
    acc = jnp.dot(z_ref[...], w_ref[...], preferred_element_type=jnp.float32)
    acc = acc + b_ref[...]
    o_ref[...] = jnp.maximum(acc, 0.0).astype(o_ref.dtype)


def dense_relu(z, w, b):
    """relu(z @ w + b).  z:(B,100), w:(100,N), b:(N,) -> (B,N).

    Output split into two lane-aligned halves (N/2 = 128*d) so the grid spans
    both TensorCores on v7x.
    """
    B, K = z.shape
    K2, N = w.shape
    assert K == K2 and N % 2 == 0
    NH = N // 2                                   # 128*d -> multiple of 128 lanes
    b2 = b.reshape(1, N).astype(jnp.float32)
    cost = pl.CostEstimate(flops=2 * B * K * N, transcendentals=0,
                           bytes_accessed=4 * (B * K + K * N + N + B * N))
    return pl.pallas_call(
        _dense_kernel,
        out_shape=jax.ShapeDtypeStruct((B, N), jnp.float32),
        grid=(2,),
        in_specs=[
            pl.BlockSpec((B, K), lambda j: (0, 0)),
            pl.BlockSpec((K, NH), lambda j: (0, j)),
            pl.BlockSpec((1, NH), lambda j: (0, j)),
        ],
        out_specs=pl.BlockSpec((B, NH), lambda j: (0, j)),
        compiler_params=pltpu.CompilerParams(dimension_semantics=("parallel",)),
        cost_estimate=cost,
    )(z.astype(jnp.float32), w.astype(jnp.float32), b2)


# -------------------------- polyphase deconv kernel --------------------------

def _deconv_poly_kernel(x_ref, w_ref, b_ref, o_ref, *, act):
    # x_ref: (Cin, L + 2*HALO)   halo-padded input, channels-first
    # w_ref: (TAPS, 4*Cout, Cin) polyphase weight blocks
    # b_ref: (4*Cout, 1)         bias (tiled over the 4 phases)
    # o_ref: (4*Cout, L)         phase-packed output: row p*Cout+co, col m -> y[co, 4m+p]
    N, L = o_ref.shape
    acc = jnp.zeros((N, L), jnp.float32)
    for s in range(TAPS):                      # static 7-tap halo window, all in VMEM
        acc = acc + jnp.dot(w_ref[s], x_ref[:, s:s + L],
                            preferred_element_type=jnp.float32)
    acc = acc + b_ref[...]
    if act == "relu":
        acc = jnp.maximum(acc, 0.0)
    else:
        acc = jnp.tanh(acc)
    o_ref[...] = acc.astype(o_ref.dtype)


def _poly_weight(w):
    """(Cin, Cout, 24) ConvTranspose1d weight -> (TAPS, 4*Cout, Cin) polyphase blocks.

    Output phase p at position m uses kernel tap k = p + PAD + STRIDE*HALO - STRIDE*s
    against input position m + s - HALO (zero block when k is out of range).
    """
    Cin, Cout, K = w.shape
    taps = []
    for s in range(TAPS):
        phase_blocks = []
        for p in range(STRIDE):
            k = p + PAD + STRIDE * HALO - STRIDE * s
            if 0 <= k < K:
                phase_blocks.append(w[:, :, k].T)               # (Cout, Cin)
            else:
                phase_blocks.append(jnp.zeros((Cout, Cin), w.dtype))
        taps.append(jnp.concatenate(phase_blocks, axis=0))       # (4*Cout, Cin)
    return jnp.stack(taps, axis=0)                               # (TAPS, 4*Cout, Cin)


def conv_transpose1d(x, w, b, act):
    """PyTorch ConvTranspose1d(Cin,Cout,24,stride=4,padding=10) + fused activation.

    x: (B, Cin, L) NCL  ->  (B, Cout, 4*L) NCL.
    """
    B, Cin, L = x.shape
    _, Cout, _ = w.shape
    N = STRIDE * Cout
    Lp = L + 2 * HALO

    x_pad = jnp.pad(x.astype(jnp.float32), ((0, 0), (0, 0), (HALO, HALO)))
    w_poly = _poly_weight(w).astype(jnp.float32)
    b_poly = jnp.tile(b.astype(jnp.float32), STRIDE).reshape(N, 1)

    cost = pl.CostEstimate(
        flops=2 * B * N * Cin * TAPS * L,
        transcendentals=(B * N * L if act == "tanh" else 0),
        bytes_accessed=4 * (B * Cin * Lp + TAPS * N * Cin + N + B * N * L))

    y = pl.pallas_call(
        functools.partial(_deconv_poly_kernel, act=act),
        out_shape=jax.ShapeDtypeStruct((B, N, L), jnp.float32),
        grid=(B,),
        in_specs=[
            pl.BlockSpec((None, Cin, Lp), lambda i: (i, 0, 0)),   # per-batch input
            pl.BlockSpec((TAPS, N, Cin), lambda i: (0, 0, 0)),    # whole weight
            pl.BlockSpec((N, 1), lambda i: (0, 0)),               # bias
        ],
        out_specs=pl.BlockSpec((None, N, L), lambda i: (i, 0, 0)),
        compiler_params=pltpu.CompilerParams(dimension_semantics=("parallel",)),
        cost_estimate=cost,
    )(x_pad, w_poly, b_poly)

    # Interleave phases: y[b, p*Cout+co, m] -> out[b, co, 4*m + p]  (tiny XLA glue).
    return y.reshape(B, STRIDE, Cout, L).transpose(0, 2, 3, 1).reshape(B, Cout, STRIDE * L)


# ------------------------------ parameters -----------------------------------

def init_params(key, d):
    def xavier(k, shape, fan_in, fan_out):
        bound = (6.0 / (fan_in + fan_out)) ** 0.5
        return jax.random.uniform(k, shape, jnp.float32, -bound, bound)

    keys = jax.random.split(key, 12)
    params = {}
    # nn.Linear(100, 256*d): weight (256d, 100), bias (256d,)
    params["dense_w"] = xavier(keys[0], (256 * d, 100), 100, 256 * d)
    params["dense_b"] = jax.random.uniform(keys[1], (256 * d,), jnp.float32, -0.1, 0.1)

    chans = [16 * d, 8 * d, 4 * d, 2 * d, d, 1]
    for i in range(5):
        cin, cout = chans[i], chans[i + 1]
        # ConvTranspose1d weight layout: (Cin, Cout, K)
        params[f"deconv{i + 1}_w"] = xavier(
            keys[2 + 2 * i], (cin, cout, KSIZE), cout * KSIZE, cin * KSIZE)
        params[f"deconv{i + 1}_b"] = jax.random.uniform(
            keys[3 + 2 * i], (cout,), jnp.float32, -0.05, 0.05)
    return params


# -------------------------------- forward ------------------------------------

def wavegan_generator(params, z, *, d):
    B = z.shape[0]
    h = dense_relu(z, params["dense_w"].T, params["dense_b"])   # (B, 256d), relu fused
    x = h.reshape(B, 16 * d, 16)                                # PyTorch NCL reshape
    for i in range(1, 5):
        x = conv_transpose1d(x, params[f"deconv{i}_w"], params[f"deconv{i}_b"], "relu")
    x = conv_transpose1d(x, params["deconv5_w"], params["deconv5_b"], "tanh")
    return x                                                    # (B, 1, 16384), NCL


# ------------------------- pure-JAX reference (check) -------------------------

def _ref_conv_transpose1d(x, w, b):
    B, Cin, L = x.shape
    _, Cout, K = w.shape
    L_out = (L - 1) * STRIDE - 2 * PAD + K
    L_up = STRIDE * (L - 1) + 1
    x_up = jnp.zeros((B, Cin, L_up), x.dtype).at[:, :, ::STRIDE].set(x)
    edge = K - 1 - PAD
    x_pad = jnp.pad(x_up, ((0, 0), (0, 0), (edge, edge)))
    wf = jnp.flip(w, axis=2)
    idx = jnp.arange(L_out)[:, None] + jnp.arange(K)[None, :]
    patches = x_pad[:, :, idx]                                   # (B, Cin, L_out, K)
    return jnp.einsum("bclk,cok->bol", patches, wf) + b[None, :, None]


def _ref_forward(params, z, *, d):
    h = jnp.maximum(z @ params["dense_w"].T + params["dense_b"], 0.0)
    x = h.reshape(-1, 16 * d, 16)
    for i in range(1, 5):
        x = jnp.maximum(
            _ref_conv_transpose1d(x, params[f"deconv{i}_w"], params[f"deconv{i}_b"]), 0.0)
    return jnp.tanh(_ref_conv_transpose1d(x, params["deconv5_w"], params["deconv5_b"]))


if __name__ == "__main__":
    d = 2          # model-size multiplier
    B = 2          # batch
    key = jax.random.PRNGKey(0)
    k_params, k_z = jax.random.split(key)
    params = init_params(k_params, d)
    z = jax.random.normal(k_z, (B, 100), jnp.float32)

    fwd = jax.jit(functools.partial(wavegan_generator, d=d))
    out = jax.block_until_ready(fwd(params, z))

    assert out.shape == (B, 1, 16384), out.shape
    assert out.dtype == jnp.float32
    assert bool(jnp.all(jnp.isfinite(out)))
    assert bool(jnp.all(jnp.abs(out) <= 1.0 + 1e-6))            # tanh output range

    # Numerical check against a plain-JAX zero-insertion reference of the module.
    ref = jax.block_until_ready(jax.jit(functools.partial(_ref_forward, d=d))(params, z))
    max_err = float(jnp.max(jnp.abs(out - ref)))
    assert max_err < 2e-2, max_err

    print("KERNEL_OK")
</pallas_src>

<mosaic_0001>
module attributes {stable_mosaic.version = 11 : i64} {
  func.func @_dense_kernel(%arg0: i32, %arg1: memref<2x100xf32, #tpu.memory_space<vmem>>, %arg2: memref<100x256xf32, #tpu.memory_space<vmem>>, %arg3: memref<1x256xf32, #tpu.memory_space<vmem>>, %arg4: memref<2x256xf32, #tpu.memory_space<vmem>>) attributes {dimension_semantics = [#tpu.dimension_semantics<parallel>], iteration_bounds = array<i64: 2>, scalar_prefetch = 0 : i64, scratch_operands = 0 : i64, tpu.core_type = #tpu.core_type<tc>, window_params = [{pipeline_mode = #tpu.pipeline_mode<synchronous>, transform_indices = @transform_0, window_bounds = array<i64: 2, 100>}, {transform_indices = @transform_1, window_bounds = array<i64: 100, 256>}, {transform_indices = @transform_2, window_bounds = array<i64: 1, 256>}, {transform_indices = @transform_3, window_bounds = array<i64: 2, 256>}]} {
    %c0 = arith.constant 0 : index
    %c0_0 = arith.constant 0 : index
    %0 = vector.load %arg1[%c0, %c0_0] : memref<2x100xf32, #tpu.memory_space<vmem>>, vector<2x100xf32>
    %c0_1 = arith.constant 0 : index
    %c0_2 = arith.constant 0 : index
    %1 = vector.load %arg2[%c0_1, %c0_2] : memref<100x256xf32, #tpu.memory_space<vmem>>, vector<100x256xf32>
    %cst = arith.constant dense<0.000000e+00> : vector<2x256xf32>
    %2 = tpu.matmul %0, %1, %cst {dimension_numbers = #tpu.dot_dimension_numbers<[1], [0], [0], [1], [0, 0, 1, 1], [], []>} : vector<2x100xf32>, vector<100x256xf32>, vector<2x256xf32> -> vector<2x256xf32>
    %c0_3 = arith.constant 0 : index
    %c0_4 = arith.constant 0 : index
    %3 = vector.load %arg3[%c0_3, %c0_4] : memref<1x256xf32, #tpu.memory_space<vmem>>, vector<1x256xf32>
    %4 = vector.broadcast %3 : vector<1x256xf32> to vector<2x256xf32>
    %5 = arith.addf %2, %4 : vector<2x256xf32>
    %cst_5 = arith.constant 0.000000e+00 : f32
    %6 = vector.broadcast %cst_5 : f32 to vector<2x256xf32>
    %7 = arith.maximumf %5, %6 : vector<2x256xf32>
    %c0_6 = arith.constant 0 : index
    %c0_7 = arith.constant 0 : index
    %8 = vector.load %arg4[%c0_6, %c0_7] : memref<2x256xf32, #tpu.memory_space<vmem>>, vector<2x256xf32>
    tpu.vector_store %arg4[%c0_6, %c0_7], %7 {strides = array<i32>} : memref<2x256xf32, #tpu.memory_space<vmem>>, vector<2x256xf32>,
    return
  }
  func.func @transform_0(%arg0: i32) -> (i32, i32) {
    %c0_i32 = arith.constant 0 : i32
    %c0_i32_0 = arith.constant 0 : i32
    %c0_i32_1 = arith.constant 0 : i32
    return %c0_i32, %c0_i32_0 : i32, i32
  }
  func.func @transform_1(%arg0: i32) -> (i32, i32) {
    %c0_i32 = arith.constant 0 : i32
    %c0_i32_0 = arith.constant 0 : i32
    return %c0_i32, %arg0 : i32, i32
  }
  func.func @transform_2(%arg0: i32) -> (i32, i32) {
    %c0_i32 = arith.constant 0 : i32
    %c0_i32_0 = arith.constant 0 : i32
    return %c0_i32, %arg0 : i32, i32
  }
  func.func @transform_3(%arg0: i32) -> (i32, i32) {
    %c0_i32 = arith.constant 0 : i32
    %c0_i32_0 = arith.constant 0 : i32
    return %c0_i32, %arg0 : i32, i32
  }
}

module attributes {stable_mosaic.version = 11 : i64} {
  func.func @_deconv_poly_kernel(%arg0: i32, %arg1: memref<1x32x22xf32, #tpu.memory_space<vmem>>, %arg2: memref<7x64x32xf32, #tpu.memory_space<vmem>>, %arg3: memref<64x1xf32, #tpu.memory_space<vmem>>, %arg4: memref<1x64x16xf32, #tpu.memory_space<vmem>>) attributes {dimension_semantics = [#tpu.dimension_semantics<parallel>], iteration_bounds = array<i64: 2>, scalar_prefetch = 0 : i64, scratch_operands = 0 : i64, tpu.core_type = #tpu.core_type<tc>, window_params = [{transform_indices = @transform_0, window_bounds = array<i64: 1, 32, 22>}, {pipeline_mode = #tpu.pipeline_mode<synchronous>, transform_indices = @transform_1, window_bounds = array<i64: 7, 64, 32>}, {pipeline_mode = #tpu.pipeline_mode<synchronous>, transform_indices = @transform_2, window_bounds = array<i64: 64, 1>}, {transform_indices = @transform_3, window_bounds = array<i64: 1, 64, 16>}]} {
    %cst = arith.constant 0.000000e+00 : f32
    %0 = vector.broadcast %cst : f32 to vector<64x16xf32>
    %c0 = arith.constant 0 : index
    %c0_0 = arith.constant 0 : index
    %c0_1 = arith.constant 0 : index
    %1 = vector.load %arg2[%c0, %c0_0, %c0_1] : memref<7x64x32xf32, #tpu.memory_space<vmem>>, vector<1x64x32xf32>
    %2 = vector.shape_cast %1 : vector<1x64x32xf32> to vector<64x32xf32>
    %c0_2 = arith.constant 0 : index
    %c0_3 = arith.constant 0 : index
    %c0_4 = arith.constant 0 : index
    %3 = vector.load %arg1[%c0_2, %c0_3, %c0_4] : memref<1x32x22xf32, #tpu.memory_space<vmem>>, vector<1x32x16xf32>
    %4 = vector.shape_cast %3 : vector<1x32x16xf32> to vector<32x16xf32>
    %cst_5 = arith.constant dense<0.000000e+00> : vector<64x16xf32>
    %5 = tpu.matmul %2, %4, %cst_5 {dimension_numbers = #tpu.dot_dimension_numbers<[1], [0], [0], [1], [0, 0, 1, 1], [], []>} : vector<64x32xf32>, vector<32x16xf32>, vector<64x16xf32> -> vector<64x16xf32>
    %6 = arith.addf %0, %5 : vector<64x16xf32>
    %c1 = arith.constant 1 : index
    %c0_6 = arith.constant 0 : index
    %c0_7 = arith.constant 0 : index
    %7 = vector.load %arg2[%c1, %c0_6, %c0_7] : memref<7x64x32xf32, #tpu.memory_space<vmem>>, vector<1x64x32xf32>
    %8 = vector.shape_cast %7 : vector<1x64x32xf32> to vector<64x32xf32>
    %c0_8 = arith.constant 0 : index
    %c0_9 = arith.constant 0 : index
    %c1_10 = arith.constant 1 : index
    %9 = vector.load %arg1[%c0_8, %c0_9, %c1_10] : memref<1x32x22xf32, #tpu.memory_space<vmem>>, vector<1x32x16xf32>
    %10 = vector.shape_cast %9 : vector<1x32x16xf32> to vector<32x16xf32>
    %cst_11 = arith.constant dense<0.000000e+00> : vector<64x16xf32>
    %11 = tpu.matmul %8, %10, %cst_11 {dimension_numbers = #tpu.dot_dimension_numbers<[1], [0], [0], [1], [0, 0, 1, 1], [], []>} : vector<64x32xf32>, vector<32x16xf32>, vector<64x16xf32> -> vector<64x16xf32>
    %12 = arith.addf %6, %11 : vector<64x16xf32>
    %c2 = arith.constant 2 : index
    %c0_12 = arith.constant 0 : index
    %c0_13 = arith.constant 0 : index
    %13 = vector.load %arg2[%c2, %c0_12, %c0_13] : memref<7x64x32xf32, #tpu.memory_space<vmem>>, vector<1x64x32xf32>
    %14 = vector.shape_cast %13 : vector<1x64x32xf32> to vector<64x32xf32>
    %c0_14 = arith.constant 0 : index
    %c0_15 = arith.constant 0 : index
    %c2_16 = arith.constant 2 : index
    %15 = vector.load %arg1[%c0_14, %c0_15, %c2_16] : memref<1x32x22xf32, #tpu.memory_space<vmem>>, vector<1x32x16xf32>
    %16 = vector.shape_cast %15 : vector<1x32x16xf32> to vector<32x16xf32>
    %cst_17 = arith.constant dense<0.000000e+00> : vector<64x16xf32>
    %17 = tpu.matmul %14, %16, %cst_17 {dimension_numbers = #tpu.dot_dimension_numbers<[1], [0], [0], [1], [0, 0, 1, 1], [], []>} : vector<64x32xf32>, vector<32x16xf32>, vector<64x16xf32> -> vector<64x16xf32>
    %18 = arith.addf %12, %17 : vector<64x16xf32>
    %c3 = arith.constant 3 : index
    %c0_18 = arith.constant 0 : index
    %c0_19 = arith.constant 0 : index
    %19 = vector.load %arg2[%c3, %c0_18, %c0_19] : memref<7x64x32xf32, #tpu.memory_space<vmem>>, vector<1x64x32xf32>
    %20 = vector.shape_cast %19 : vector<1x64x32xf32> to vector<64x32xf32>
    %c0_20 = arith.constant 0 : index
    %c0_21 = arith.constant 0 : index
    %c3_22 = arith.constant 3 : index
    %21 = vector.load %arg1[%c0_20, %c0_21, %c3_22] : memref<1x32x22xf32, #tpu.memory_space<vmem>>, vector<1x32x16xf32>
    %22 = vector.shape_cast %21 : vector<1x32x16xf32> to vector<32x16xf32>
    %cst_23 = arith.constant dense<0.000000e+00> : vector<64x16xf32>
    %23 = tpu.matmul %20, %22, %cst_23 {dimension_numbers = #tpu.dot_dimension_numbers<[1], [0], [0], [1], [0, 0, 1, 1], [], []>} : vector<64x32xf32>, vector<32x16xf32>, vector<64x16xf32> -> vector<64x16xf32>
    %24 = arith.addf %18, %23 : vector<64x16xf32>
    %c4 = arith.constant 4 : index
    %c0_24 = arith.constant 0 : index
    %c0_25 = arith.constant 0 : index
    %25 = vector.load %arg2[%c4, %c0_24, %c0_25] : memref<7x64x32xf32, #tpu.memory_space<vmem>>, vector<1x64x32xf32>
    %26 = vector.shape_cast %25 : vector<1x64x32xf32> to vector<64x32xf32>
    %c0_26 = arith.constant 0 : index
    %c0_27 = arith.constant 0 : index
    %c4_28 = arith.constant 4 : index
    %27 = vector.load %arg1[%c0_26, %c0_27, %c4_28] : memref<1x32x22xf32, #tpu.memory_space<vmem>>, vector<1x32x16xf32>
    %28 = vector.shape_cast %27 : vector<1x32x16xf32> to vector<32x16xf32>
    %cst_29 = arith.constant dense<0.000000e+00> : vector<64x16xf32>
    %29 = tpu.matmul %26, %28, %cst_29 {dimension_numbers = #tpu.dot_dimension_numbers<[1], [0], [0], [1], [0, 0, 1, 1], [], []>} : vector<64x32xf32>, vector<32x16xf32>, vector<64x16xf32> -> vector<64x16xf32>
    %30 = arith.addf %24, %29 : vector<64x16xf32>
    %c5 = arith.constant 5 : index
    %c0_30 = arith.constant 0 : index
    %c0_31 = arith.constant 0 : index
    %31 = vector.load %arg2[%c5, %c0_30, %c0_31] : memref<7x64x32xf32, #tpu.memory_space<vmem>>, vector<1x64x32xf32>
    %32 = vector.shape_cast %31 : vector<1x64x32xf32> to vector<64x32xf32>
    %c0_32 = arith.constant 0 : index
    %c0_33 = arith.constant 0 : index
    %c5_34 = arith.constant 5 : index
    %33 = vector.load %arg1[%c0_32, %c0_33, %c5_34] : memref<1x32x22xf32, #tpu.memory_space<vmem>>, vector<1x32x16xf32>
    %34 = vector.shape_cast %33 : vector<1x32x16xf32> to vector<32x16xf32>
    %cst_35 = arith.constant dense<0.000000e+00> : vector<64x16xf32>
    %35 = tpu.matmul %32, %34, %cst_35 {dimension_numbers = #tpu.dot_dimension_numbers<[1], [0], [0], [1], [0, 0, 1, 1], [], []>} : vector<64x32xf32>, vector<32x16xf32>, vector<64x16xf32> -> vector<64x16xf32>
    %36 = arith.addf %30, %35 : vector<64x16xf32>
    %c6 = arith.constant 6 : index
    %c0_36 = arith.constant 0 : index
    %c0_37 = arith.constant 0 : index
    %37 = vector.load %arg2[%c6, %c0_36, %c0_37] : memref<7x64x32xf32, #tpu.memory_space<vmem>>, vector<1x64x32xf32>
    %38 = vector.shape_cast %37 : vector<1x64x32xf32> to vector<64x32xf32>
    %c0_38 = arith.constant 0 : index
    %c0_39 = arith.constant 0 : index
    %c6_40 = arith.constant 6 : index
    %39 = vector.load %arg1[%c0_38, %c0_39, %c6_40] : memref<1x32x22xf32, #tpu.memory_space<vmem>>, vector<1x32x16xf32>
    %40 = vector.shape_cast %39 : vector<1x32x16xf32> to vector<32x16xf32>
    %cst_41 = arith.constant dense<0.000000e+00> : vector<64x16xf32>
    %41 = tpu.matmul %38, %40, %cst_41 {dimension_numbers = #tpu.dot_dimension_numbers<[1], [0], [0], [1], [0, 0, 1, 1], [], []>} : vector<64x32xf32>, vector<32x16xf32>, vector<64x16xf32> -> vector<64x16xf32>
    %42 = arith.addf %36, %41 : vector<64x16xf32>
    %c0_42 = arith.constant 0 : index
    %c0_43 = arith.constant 0 : index
    %43 = vector.load %arg3[%c0_42, %c0_43] : memref<64x1xf32, #tpu.memory_space<vmem>>, vector<64x1xf32>
    %44 = vector.broadcast %43 : vector<64x1xf32> to vector<64x16xf32>
    %45 = arith.addf %42, %44 : vector<64x16xf32>
    %cst_44 = arith.constant 0.000000e+00 : f32
    %46 = vector.broadcast %cst_44 : f32 to vector<64x16xf32>
    %47 = arith.maximumf %45, %46 : vector<64x16xf32>
    %c0_45 = arith.constant 0 : index
    %c0_46 = arith.constant 0 : index
    %c0_47 = arith.constant 0 : index
    %48 = vector.load %arg4[%c0_45, %c0_46, %c0_47] : memref<1x64x16xf32, #tpu.memory_space<vmem>>, vector<1x64x16xf32>
    %49 = vector.shape_cast %48 : vector<1x64x16xf32> to vector<64x16xf32>
    %50 = vector.shape_cast %47 : vector<64x16xf32> to vector<1x64x16xf32>
    tpu.vector_store %arg4[%c0_45, %c0_46, %c0_47], %50 {strides = array<i32>} : memref<1x64x16xf32, #tpu.memory_space<vmem>>, vector<1x64x16xf32>,
    return
  }
  func.func @transform_0(%arg0: i32) -> (i32, i32, i32) {
    %c0_i32 = arith.constant 0 : i32
    %c0_i32_0 = arith.constant 0 : i32
    %c0_i32_1 = arith.constant 0 : i32
    return %arg0, %c0_i32, %c0_i32_0 : i32, i32, i32
  }
  func.func @transform_1(%arg0: i32) -> (i32, i32, i32) {
    %c0_i32 = arith.constant 0 : i32
    %c0_i32_0 = arith.constant 0 : i32
    %c0_i32_1 = arith.constant 0 : i32
    %c0_i32_2 = arith.constant 0 : i32
    return %c0_i32, %c0_i32_0, %c0_i32_1 : i32, i32, i32
  }
  func.func @transform_2(%arg0: i32) -> (i32, i32) {
    %c0_i32 = arith.constant 0 : i32
    %c0_i32_0 = arith.constant 0 : i32
    %c0_i32_1 = arith.constant 0 : i32
    return %c0_i32, %c0_i32_0 : i32, i32
  }
  func.func @transform_3(%arg0: i32) -> (i32, i32, i32) {
    %c0_i32 = arith.constant 0 : i32
    %c0_i32_0 = arith.constant 0 : i32
    %c0_i32_1 = arith.constant 0 : i32
    return %arg0, %c0_i32, %c0_i32_0 : i32, i32, i32
  }
}

module attributes {stable_mosaic.version = 11 : i64} {
  func.func @_deconv_poly_kernel(%arg0: i32, %arg1: memref<1x16x70xf32, #tpu.memory_space<vmem>>, %arg2: memref<7x32x16xf32, #tpu.memory_space<vmem>>, %arg3: memref<32x1xf32, #tpu.memory_space<vmem>>, %arg4: memref<1x32x64xf32, #tpu.memory_space<vmem>>) attributes {dimension_semantics = [#tpu.dimension_semantics<parallel>], iteration_bounds = array<i64: 2>, scalar_prefetch = 0 : i64, scratch_operands = 0 : i64, tpu.core_type = #tpu.core_type<tc>, window_params = [{transform_indices = @transform_0, window_bounds = array<i64: 1, 16, 70>}, {pipeline_mode = #tpu.pipeline_mode<synchronous>, transform_indices = @transform_1, window_bounds = array<i64: 7, 32, 16>}, {pipeline_mode = #tpu.pipeline_mode<synchronous>, transform_indices = @transform_2, window_bounds = array<i64: 32, 1>}, {transform_indices = @transform_3, window_bounds = array<i64: 1, 32, 64>}]} {
    %cst = arith.constant 0.000000e+00 : f32
    %0 = vector.broadcast %cst : f32 to vector<32x64xf32>
    %c0 = arith.constant 0 : index
    %c0_0 = arith.constant 0 : index
    %c0_1 = arith.constant 0 : index
    %1 = vector.load %arg2[%c0, %c0_0, %c0_1] : memref<7x32x16xf32, #tpu.memory_space<vmem>>, vector<1x32x16xf32>
    %2 = vector.shape_cast %1 : vector<1x32x16xf32> to vector<32x16xf32>
    %c0_2 = arith.constant 0 : index
    %c0_3 = arith.constant 0 : index
    %c0_4 = arith.constant 0 : index
    %3 = vector.load %arg1[%c0_2, %c0_3, %c0_4] : memref<1x16x70xf32, #tpu.memory_space<vmem>>, vector<1x16x64xf32>
    %4 = vector.shape_cast %3 : vector<1x16x64xf32> to vector<16x64xf32>
    %cst_5 = arith.constant dense<0.000000e+00> : vector<32x64xf32>
    %5 = tpu.matmul %2, %4, %cst_5 {dimension_numbers = #tpu.dot_dimension_numbers<[1], [0], [0], [1], [0, 0, 1, 1], [], []>} : vector<32x16xf32>, vector<16x64xf32>, vector<32x64xf32> -> vector<32x64xf32>
    %6 = arith.addf %0, %5 : vector<32x64xf32>
    %c1 = arith.constant 1 : index
    %c0_6 = arith.constant 0 : index
    %c0_7 = arith.constant 0 : index
    %7 = vector.load %arg2[%c1, %c0_6, %c0_7] : memref<7x32x16xf32, #tpu.memory_space<vmem>>, vector<1x32x16xf32>
    %8 = vector.shape_cast %7 : vector<1x32x16xf32> to vector<32x16xf32>
    %c0_8 = arith.constant 0 : index
    %c0_9 = arith.constant 0 : index
    %c1_10 = arith.constant 1 : index
    %9 = vector.load %arg1[%c0_8, %c0_9, %c1_10] : memref<1x16x70xf32, #tpu.memory_space<vmem>>, vector<1x16x64xf32>
    %10 = vector.shape_cast %9 : vector<1x16x64xf32> to vector<16x64xf32>
    %cst_11 = arith.constant dense<0.000000e+00> : vector<32x64xf32>
    %11 = tpu.matmul %8, %10, %cst_11 {dimension_numbers = #tpu.dot_dimension_numbers<[1], [0], [0], [1], [0, 0, 1, 1], [], []>} : vector<32x16xf32>, vector<16x64xf32>, vector<32x64xf32> -> vector<32x64xf32>
    %12 = arith.addf %6, %11 : vector<32x64xf32>
    %c2 = arith.constant 2 : index
    %c0_12 = arith.constant 0 : index
    %c0_13 = arith.constant 0 : index
    %13 = vector.load %arg2[%c2, %c0_12, %c0_13] : memref<7x32x16xf32, #tpu.memory_space<vmem>>, vector<1x32x16xf32>
    %14 = vector.shape_cast %13 : vector<1x32x16xf32> to vector<32x16xf32>
    %c0_14 = arith.constant 0 : index
    %c0_15 = arith.constant 0 : index
    %c2_16 = arith.constant 2 : index
    %15 = vector.load %arg1[%c0_14, %c0_15, %c2_16] : memref<1x16x70xf32, #tpu.memory_space<vmem>>, vector<1x16x64xf32>
    %16 = vector.shape_cast %15 : vector<1x16x64xf32> to vector<16x64xf32>
    %cst_17 = arith.constant dense<0.000000e+00> : vector<32x64xf32>
    %17 = tpu.matmul %14, %16, %cst_17 {dimension_numbers = #tpu.dot_dimension_numbers<[1], [0], [0], [1], [0, 0, 1, 1], [], []>} : vector<32x16xf32>, vector<16x64xf32>, vector<32x64xf32> -> vector<32x64xf32>
    %18 = arith.addf %12, %17 : vector<32x64xf32>
    %c3 = arith.constant 3 : index
    %c0_18 = arith.constant 0 : index
    %c0_19 = arith.constant 0 : index
    %19 = vector.load %arg2[%c3, %c0_18, %c0_19] : memref<7x32x16xf32, #tpu.memory_space<vmem>>, vector<1x32x16xf32>
    %20 = vector.shape_cast %19 : vector<1x32x16xf32> to vector<32x16xf32>
    %c0_20 = arith.constant 0 : index
    %c0_21 = arith.constant 0 : index
    %c3_22 = arith.constant 3 : index
    %21 = vector.load %arg1[%c0_20, %c0_21, %c3_22] : memref<1x16x70xf32, #tpu.memory_space<vmem>>, vector<1x16x64xf32>
    %22 = vector.shape_cast %21 : vector<1x16x64xf32> to vector<16x64xf32>
    %cst_23 = arith.constant dense<0.000000e+00> : vector<32x64xf32>
    %23 = tpu.matmul %20, %22, %cst_23 {dimension_numbers = #tpu.dot_dimension_numbers<[1], [0], [0], [1], [0, 0, 1, 1], [], []>} : vector<32x16xf32>, vector<16x64xf32>, vector<32x64xf32> -> vector<32x64xf32>
    %24 = arith.addf %18, %23 : vector<32x64xf32>
    %c4 = arith.constant 4 : index
    %c0_24 = arith.constant 0 : index
    %c0_25 = arith.constant 0 : index
    %25 = vector.load %arg2[%c4, %c0_24, %c0_25] : memref<7x32x16xf32, #tpu.memory_space<vmem>>, vector<1x32x16xf32>
    %26 = vector.shape_cast %25 : vector<1x32x16xf32> to vector<32x16xf32>
    %c0_26 = arith.constant 0 : index
    %c0_27 = arith.constant 0 : index
    %c4_28 = arith.constant 4 : index
    %27 = vector.load %arg1[%c0_26, %c0_27, %c4_28] : memref<1x16x70xf32, #tpu.memory_space<vmem>>, vector<1x16x64xf32>
    %28 = vector.shape_cast %27 : vector<1x16x64xf32> to vector<16x64xf32>
    %cst_29 = arith.constant dense<0.000000e+00> : vector<32x64xf32>
    %29 = tpu.matmul %26, %28, %cst_29 {dimension_numbers = #tpu.dot_dimension_numbers<[1], [0], [0], [1], [0, 0, 1, 1], [], []>} : vector<32x16xf32>, vector<16x64xf32>, vector<32x64xf32> -> vector<32x64xf32>
    %30 = arith.addf %24, %29 : vector<32x64xf32>
    %c5 = arith.constant 5 : index
    %c0_30 = arith.constant 0 : index
    %c0_31 = arith.constant 0 : index
    %31 = vector.load %arg2[%c5, %c0_30, %c0_31] : memref<7x32x16xf32, #tpu.memory_space<vmem>>, vector<1x32x16xf32>
    %32 = vector.shape_cast %31 : vector<1x32x16xf32> to vector<32x16xf32>
    %c0_32 = arith.constant 0 : index
    %c0_33 = arith.constant 0 : index
    %c5_34 = arith.constant 5 : index
    %33 = vector.load %arg1[%c0_32, %c0_33, %c5_34] : memref<1x16x70xf32, #tpu.memory_space<vmem>>, vector<1x16x64xf32>
    %34 = vector.shape_cast %33 : vector<1x16x64xf32> to vector<16x64xf32>
    %cst_35 = arith.constant dense<0.000000e+00> : vector<32x64xf32>
    %35 = tpu.matmul %32, %34, %cst_35 {dimension_numbers = #tpu.dot_dimension_numbers<[1], [0], [0], [1], [0, 0, 1, 1], [], []>} : vector<32x16xf32>, vector<16x64xf32>, vector<32x64xf32> -> vector<32x64xf32>
    %36 = arith.addf %30, %35 : vector<32x64xf32>
    %c6 = arith.constant 6 : index
    %c0_36 = arith.constant 0 : index
    %c0_37 = arith.constant 0 : index
    %37 = vector.load %arg2[%c6, %c0_36, %c0_37] : memref<7x32x16xf32, #tpu.memory_space<vmem>>, vector<1x32x16xf32>
    %38 = vector.shape_cast %37 : vector<1x32x16xf32> to vector<32x16xf32>
    %c0_38 = arith.constant 0 : index
    %c0_39 = arith.constant 0 : index
    %c6_40 = arith.constant 6 : index
    %39 = vector.load %arg1[%c0_38, %c0_39, %c6_40] : memref<1x16x70xf32, #tpu.memory_space<vmem>>, vector<1x16x64xf32>
    %40 = vector.shape_cast %39 : vector<1x16x64xf32> to vector<16x64xf32>
    %cst_41 = arith.constant dense<0.000000e+00> : vector<32x64xf32>
    %41 = tpu.matmul %38, %40, %cst_41 {dimension_numbers = #tpu.dot_dimension_numbers<[1], [0], [0], [1], [0, 0, 1, 1], [], []>} : vector<32x16xf32>, vector<16x64xf32>, vector<32x64xf32> -> vector<32x64xf32>
    %42 = arith.addf %36, %41 : vector<32x64xf32>
    %c0_42 = arith.constant 0 : index
    %c0_43 = arith.constant 0 : index
    %43 = vector.load %arg3[%c0_42, %c0_43] : memref<32x1xf32, #tpu.memory_space<vmem>>, vector<32x1xf32>
    %44 = vector.broadcast %43 : vector<32x1xf32> to vector<32x64xf32>
    %45 = arith.addf %42, %44 : vector<32x64xf32>
    %cst_44 = arith.constant 0.000000e+00 : f32
    %46 = vector.broadcast %cst_44 : f32 to vector<32x64xf32>
    %47 = arith.maximumf %45, %46 : vector<32x64xf32>
    %c0_45 = arith.constant 0 : index
    %c0_46 = arith.constant 0 : index
    %c0_47 = arith.constant 0 : index
    %48 = vector.load %arg4[%c0_45, %c0_46, %c0_47] : memref<1x32x64xf32, #tpu.memory_space<vmem>>, vector<1x32x64xf32>
    %49 = vector.shape_cast %48 : vector<1x32x64xf32> to vector<32x64xf32>
    %50 = vector.shape_cast %47 : vector<32x64xf32> to vector<1x32x64xf32>
    tpu.vector_store %arg4[%c0_45, %c0_46, %c0_47], %50 {strides = array<i32>} : memref<1x32x64xf32, #tpu.memory_space<vmem>>, vector<1x32x64xf32>,
    return
  }
  func.func @transform_0(%arg0: i32) -> (i32, i32, i32) {
    %c0_i32 = arith.constant 0 : i32
    %c0_i32_0 = arith.constant 0 : i32
    %c0_i32_1 = arith.constant 0 : i32
    return %arg0, %c0_i32, %c0_i32_0 : i32, i32, i32
  }
  func.func @transform_1(%arg0: i32) -> (i32, i32, i32) {
    %c0_i32 = arith.constant 0 : i32
    %c0_i32_0 = arith.constant 0 : i32
    %c0_i32_1 = arith.constant 0 : i32
    %c0_i32_2 = arith.constant 0 : i32
    return %c0_i32, %c0_i32_0, %c0_i32_1 : i32, i32, i32
  }
  func.func @transform_2(%arg0: i32) -> (i32, i32) {
    %c0_i32 = arith.constant 0 : i32
    %c0_i32_0 = arith.constant 0 : i32
    %c0_i32_1 = arith.constant 0 : i32
    return %c0_i32, %c0_i32_0 : i32, i32
  }
  func.func @transform_3(%arg0: i32) -> (i32, i32, i32) {
    %c0_i32 = arith.constant 0 : i32
    %c0_i32_0 = arith.constant 0 : i32
    %c0_i32_1 = arith.constant 0 : i32
    return %arg0, %c0_i32, %c0_i32_0 : i32, i32, i32
  }
}

module attributes {stable_mosaic.version = 11 : i64} {
  func.func @_deconv_poly_kernel(%arg0: i32, %arg1: memref<1x8x262xf32, #tpu.memory_space<vmem>>, %arg2: memref<7x16x8xf32, #tpu.memory_space<vmem>>, %arg3: memref<16x1xf32, #tpu.memory_space<vmem>>, %arg4: memref<1x16x256xf32, #tpu.memory_space<vmem>>) attributes {dimension_semantics = [#tpu.dimension_semantics<parallel>], iteration_bounds = array<i64: 2>, scalar_prefetch = 0 : i64, scratch_operands = 0 : i64, tpu.core_type = #tpu.core_type<tc>, window_params = [{transform_indices = @transform_0, window_bounds = array<i64: 1, 8, 262>}, {pipeline_mode = #tpu.pipeline_mode<synchronous>, transform_indices = @transform_1, window_bounds = array<i64: 7, 16, 8>}, {pipeline_mode = #tpu.pipeline_mode<synchronous>, transform_indices = @transform_2, window_bounds = array<i64: 16, 1>}, {transform_indices = @transform_3, window_bounds = array<i64: 1, 16, 256>}]} {
    %cst = arith.constant 0.000000e+00 : f32
    %0 = vector.broadcast %cst : f32 to vector<16x256xf32>
    %c0 = arith.constant 0 : index
    %c0_0 = arith.constant 0 : index
    %c0_1 = arith.constant 0 : index
    %1 = vector.load %arg2[%c0, %c0_0, %c0_1] : memref<7x16x8xf32, #tpu.memory_space<vmem>>, vector<1x16x8xf32>
    %2 = vector.shape_cast %1 : vector<1x16x8xf32> to vector<16x8xf32>
    %c0_2 = arith.constant 0 : index
    %c0_3 = arith.constant 0 : index
    %c0_4 = arith.constant 0 : index
    %3 = vector.load %arg1[%c0_2, %c0_3, %c0_4] : memref<1x8x262xf32, #tpu.memory_space<vmem>>, vector<1x8x256xf32>
    %4 = vector.shape_cast %3 : vector<1x8x256xf32> to vector<8x256xf32>
    %cst_5 = arith.constant dense<0.000000e+00> : vector<16x256xf32>
    %5 = tpu.matmul %2, %4, %cst_5 {dimension_numbers = #tpu.dot_dimension_numbers<[1], [0], [0], [1], [0, 0, 1, 1], [], []>} : vector<16x8xf32>, vector<8x256xf32>, vector<16x256xf32> -> vector<16x256xf32>
    %6 = arith.addf %0, %5 : vector<16x256xf32>
    %c1 = arith.constant 1 : index
    %c0_6 = arith.constant 0 : index
    %c0_7 = arith.constant 0 : index
    %7 = vector.load %arg2[%c1, %c0_6, %c0_7] : memref<7x16x8xf32, #tpu.memory_space<vmem>>, vector<1x16x8xf32>
    %8 = vector.shape_cast %7 : vector<1x16x8xf32> to vector<16x8xf32>
    %c0_8 = arith.constant 0 : index
    %c0_9 = arith.constant 0 : index
    %c1_10 = arith.constant 1 : index
    %9 = vector.load %arg1[%c0_8, %c0_9, %c1_10] : memref<1x8x262xf32, #tpu.memory_space<vmem>>, vector<1x8x256xf32>
    %10 = vector.shape_cast %9 : vector<1x8x256xf32> to vector<8x256xf32>
    %cst_11 = arith.constant dense<0.000000e+00> : vector<16x256xf32>
    %11 = tpu.matmul %8, %10, %cst_11 {dimension_numbers = #tpu.dot_dimension_numbers<[1], [0], [0], [1], [0, 0, 1, 1], [], []>} : vector<16x8xf32>, vector<8x256xf32>, vector<16x256xf32> -> vector<16x256xf32>
    %12 = arith.addf %6, %11 : vector<16x256xf32>
    %c2 = arith.constant 2 : index
    %c0_12 = arith.constant 0 : index
    %c0_13 = arith.constant 0 : index
    %13 = vector.load %arg2[%c2, %c0_12, %c0_13] : memref<7x16x8xf32, #tpu.memory_space<vmem>>, vector<1x16x8xf32>
    %14 = vector.shape_cast %13 : vector<1x16x8xf32> to vector<16x8xf32>
    %c0_14 = arith.constant 0 : index
    %c0_15 = arith.constant 0 : index
    %c2_16 = arith.constant 2 : index
    %15 = vector.load %arg1[%c0_14, %c0_15, %c2_16] : memref<1x8x262xf32, #tpu.memory_space<vmem>>, vector<1x8x256xf32>
    %16 = vector.shape_cast %15 : vector<1x8x256xf32> to vector<8x256xf32>
    %cst_17 = arith.constant dense<0.000000e+00> : vector<16x256xf32>
    %17 = tpu.matmul %14, %16, %cst_17 {dimension_numbers = #tpu.dot_dimension_numbers<[1], [0], [0], [1], [0, 0, 1, 1], [], []>} : vector<16x8xf32>, vector<8x256xf32>, vector<16x256xf32> -> vector<16x256xf32>
    %18 = arith.addf %12, %17 : vector<16x256xf32>
    %c3 = arith.constant 3 : index
    %c0_18 = arith.constant 0 : index
    %c0_19 = arith.constant 0 : index
    %19 = vector.load %arg2[%c3, %c0_18, %c0_19] : memref<7x16x8xf32, #tpu.memory_space<vmem>>, vector<1x16x8xf32>
    %20 = vector.shape_cast %19 : vector<1x16x8xf32> to vector<16x8xf32>
    %c0_20 = arith.constant 0 : index
    %c0_21 = arith.constant 0 : index
    %c3_22 = arith.constant 3 : index
    %21 = vector.load %arg1[%c0_20, %c0_21, %c3_22] : memref<1x8x262xf32, #tpu.memory_space<vmem>>, vector<1x8x256xf32>
    %22 = vector.shape_cast %21 : vector<1x8x256xf32> to vector<8x256xf32>
    %cst_23 = arith.constant dense<0.000000e+00> : vector<16x256xf32>
    %23 = tpu.matmul %20, %22, %cst_23 {dimension_numbers = #tpu.dot_dimension_numbers<[1], [0], [0], [1], [0, 0, 1, 1], [], []>} : vector<16x8xf32>, vector<8x256xf32>, vector<16x256xf32> -> vector<16x256xf32>
    %24 = arith.addf %18, %23 : vector<16x256xf32>
    %c4 = arith.constant 4 : index
    %c0_24 = arith.constant 0 : index
    %c0_25 = arith.constant 0 : index
    %25 = vector.load %arg2[%c4, %c0_24, %c0_25] : memref<7x16x8xf32, #tpu.memory_space<vmem>>, vector<1x16x8xf32>
    %26 = vector.shape_cast %25 : vector<1x16x8xf32> to vector<16x8xf32>
    %c0_26 = arith.constant 0 : index
    %c0_27 = arith.constant 0 : index
    %c4_28 = arith.constant 4 : index
    %27 = vector.load %arg1[%c0_26, %c0_27, %c4_28] : memref<1x8x262xf32, #tpu.memory_space<vmem>>, vector<1x8x256xf32>
    %28 = vector.shape_cast %27 : vector<1x8x256xf32> to vector<8x256xf32>
    %cst_29 = arith.constant dense<0.000000e+00> : vector<16x256xf32>
    %29 = tpu.matmul %26, %28, %cst_29 {dimension_numbers = #tpu.dot_dimension_numbers<[1], [0], [0], [1], [0, 0, 1, 1], [], []>} : vector<16x8xf32>, vector<8x256xf32>, vector<16x256xf32> -> vector<16x256xf32>
    %30 = arith.addf %24, %29 : vector<16x256xf32>
    %c5 = arith.constant 5 : index
    %c0_30 = arith.constant 0 : index
    %c0_31 = arith.constant 0 : index
    %31 = vector.load %arg2[%c5, %c0_30, %c0_31] : memref<7x16x8xf32, #tpu.memory_space<vmem>>, vector<1x16x8xf32>
    %32 = vector.shape_cast %31 : vector<1x16x8xf32> to vector<16x8xf32>
    %c0_32 = arith.constant 0 : index
    %c0_33 = arith.constant 0 : index
    %c5_34 = arith.constant 5 : index
    %33 = vector.load %arg1[%c0_32, %c0_33, %c5_34] : memref<1x8x262xf32, #tpu.memory_space<vmem>>, vector<1x8x256xf32>
    %34 = vector.shape_cast %33 : vector<1x8x256xf32> to vector<8x256xf32>
    %cst_35 = arith.constant dense<0.000000e+00> : vector<16x256xf32>
    %35 = tpu.matmul %32, %34, %cst_35 {dimension_numbers = #tpu.dot_dimension_numbers<[1], [0], [0], [1], [0, 0, 1, 1], [], []>} : vector<16x8xf32>, vector<8x256xf32>, vector<16x256xf32> -> vector<16x256xf32>
    %36 = arith.addf %30, %35 : vector<16x256xf32>
    %c6 = arith.constant 6 : index
    %c0_36 = arith.constant 0 : index
    %c0_37 = arith.constant 0 : index
    %37 = vector.load %arg2[%c6, %c0_36, %c0_37] : memref<7x16x8xf32, #tpu.memory_space<vmem>>, vector<1x16x8xf32>
    %38 = vector.shape_cast %37 : vector<1x16x8xf32> to vector<16x8xf32>
    %c0_38 = arith.constant 0 : index
    %c0_39 = arith.constant 0 : index
    %c6_40 = arith.constant 6 : index
    %39 = vector.load %arg1[%c0_38, %c0_39, %c6_40] : memref<1x8x262xf32, #tpu.memory_space<vmem>>, vector<1x8x256xf32>
    %40 = vector.shape_cast %39 : vector<1x8x256xf32> to vector<8x256xf32>
    %cst_41 = arith.constant dense<0.000000e+00> : vector<16x256xf32>
    %41 = tpu.matmul %38, %40, %cst_41 {dimension_numbers = #tpu.dot_dimension_numbers<[1], [0], [0], [1], [0, 0, 1, 1], [], []>} : vector<16x8xf32>, vector<8x256xf32>, vector<16x256xf32> -> vector<16x256xf32>
    %42 = arith.addf %36, %41 : vector<16x256xf32>
    %c0_42 = arith.constant 0 : index
    %c0_43 = arith.constant 0 : index
    %43 = vector.load %arg3[%c0_42, %c0_43] : memref<16x1xf32, #tpu.memory_space<vmem>>, vector<16x1xf32>
    %44 = vector.broadcast %43 : vector<16x1xf32> to vector<16x256xf32>
    %45 = arith.addf %42, %44 : vector<16x256xf32>
    %cst_44 = arith.constant 0.000000e+00 : f32
    %46 = vector.broadcast %cst_44 : f32 to vector<16x256xf32>
    %47 = arith.maximumf %45, %46 : vector<16x256xf32>
    %c0_45 = arith.constant 0 : index
    %c0_46 = arith.constant 0 : index
    %c0_47 = arith.constant 0 : index
    %48 = vector.load %arg4[%c0_45, %c0_46, %c0_47] : memref<1x16x256xf32, #tpu.memory_space<vmem>>, vector<1x16x256xf32>
    %49 = vector.shape_cast %48 : vector<1x16x256xf32> to vector<16x256xf32>
    %50 = vector.shape_cast %47 : vector<16x256xf32> to vector<1x16x256xf32>
    tpu.vector_store %arg4[%c0_45, %c0_46, %c0_47], %50 {strides = array<i32>} : memref<1x16x256xf32, #tpu.memory_space<vmem>>, vector<1x16x256xf32>,
    return
  }
  func.func @transform_0(%arg0: i32) -> (i32, i32, i32) {
    %c0_i32 = arith.constant 0 : i32
    %c0_i32_0 = arith.constant 0 : i32
    %c0_i32_1 = arith.constant 0 : i32
    return %arg0, %c0_i32, %c0_i32_0 : i32, i32, i32
  }
  func.func @transform_1(%arg0: i32) -> (i32, i32, i32) {
    %c0_i32 = arith.constant 0 : i32
    %c0_i32_0 = arith.constant 0 : i32
    %c0_i32_1 = arith.constant 0 : i32
    %c0_i32_2 = arith.constant 0 : i32
    return %c0_i32, %c0_i32_0, %c0_i32_1 : i32, i32, i32
  }
  func.func @transform_2(%arg0: i32) -> (i32, i32) {
    %c0_i32 = arith.constant 0 : i32
    %c0_i32_0 = arith.constant 0 : i32
    %c0_i32_1 = arith.constant 0 : i32
    return %c0_i32, %c0_i32_0 : i32, i32
  }
  func.func @transform_3(%arg0: i32) -> (i32, i32, i32) {
    %c0_i32 = arith.constant 0 : i32
    %c0_i32_0 = arith.constant 0 : i32
    %c0_i32_1 = arith.constant 0 : i32
    return %arg0, %c0_i32, %c0_i32_0 : i32, i32, i32
  }
}

module attributes {stable_mosaic.version = 11 : i64} {
  func.func @_deconv_poly_kernel(%arg0: i32, %arg1: memref<1x4x1030xf32, #tpu.memory_space<vmem>>, %arg2: memref<7x8x4xf32, #tpu.memory_space<vmem>>, %arg3: memref<8x1xf32, #tpu.memory_space<vmem>>, %arg4: memref<1x8x1024xf32, #tpu.memory_space<vmem>>) attributes {dimension_semantics = [#tpu.dimension_semantics<parallel>], iteration_bounds = array<i64: 2>, scalar_prefetch = 0 : i64, scratch_operands = 0 : i64, tpu.core_type = #tpu.core_type<tc>, window_params = [{transform_indices = @transform_0, window_bounds = array<i64: 1, 4, 1030>}, {pipeline_mode = #tpu.pipeline_mode<synchronous>, transform_indices = @transform_1, window_bounds = array<i64: 7, 8, 4>}, {pipeline_mode = #tpu.pipeline_mode<synchronous>, transform_indices = @transform_2, window_bounds = array<i64: 8, 1>}, {transform_indices = @transform_3, window_bounds = array<i64: 1, 8, 1024>}]} {
    %cst = arith.constant 0.000000e+00 : f32
    %0 = vector.broadcast %cst : f32 to vector<8x1024xf32>
    %c0 = arith.constant 0 : index
    %c0_0 = arith.constant 0 : index
    %c0_1 = arith.constant 0 : index
    %1 = vector.load %arg2[%c0, %c0_0, %c0_1] : memref<7x8x4xf32, #tpu.memory_space<vmem>>, vector<1x8x4xf32>
    %2 = vector.shape_cast %1 : vector<1x8x4xf32> to vector<8x4xf32>
    %c0_2 = arith.constant 0 : index
    %c0_3 = arith.constant 0 : index
    %c0_4 = arith.constant 0 : index
    %3 = vector.load %arg1[%c0_2, %c0_3, %c0_4] : memref<1x4x1030xf32, #tpu.memory_space<vmem>>, vector<1x4x1024xf32>
    %4 = vector.shape_cast %3 : vector<1x4x1024xf32> to vector<4x1024xf32>
    %cst_5 = arith.constant dense<0.000000e+00> : vector<8x1024xf32>
    %5 = tpu.matmul %2, %4, %cst_5 {dimension_numbers = #tpu.dot_dimension_numbers<[1], [0], [0], [1], [0, 0, 1, 1], [], []>} : vector<8x4xf32>, vector<4x1024xf32>, vector<8x1024xf32> -> vector<8x1024xf32>
    %6 = arith.addf %0, %5 : vector<8x1024xf32>
    %c1 = arith.constant 1 : index
    %c0_6 = arith.constant 0 : index
    %c0_7 = arith.constant 0 : index
    %7 = vector.load %arg2[%c1, %c0_6, %c0_7] : memref<7x8x4xf32, #tpu.memory_space<vmem>>, vector<1x8x4xf32>
    %8 = vector.shape_cast %7 : vector<1x8x4xf32> to vector<8x4xf32>
    %c0_8 = arith.constant 0 : index
    %c0_9 = arith.constant 0 : index
    %c1_10 = arith.constant 1 : index
    %9 = vector.load %arg1[%c0_8, %c0_9, %c1_10] : memref<1x4x1030xf32, #tpu.memory_space<vmem>>, vector<1x4x1024xf32>
    %10 = vector.shape_cast %9 : vector<1x4x1024xf32> to vector<4x1024xf32>
    %cst_11 = arith.constant dense<0.000000e+00> : vector<8x1024xf32>
    %11 = tpu.matmul %8, %10, %cst_11 {dimension_numbers = #tpu.dot_dimension_numbers<[1], [0], [0], [1], [0, 0, 1, 1], [], []>} : vector<8x4xf32>, vector<4x1024xf32>, vector<8x1024xf32> -> vector<8x1024xf32>
    %12 = arith.addf %6, %11 : vector<8x1024xf32>
    %c2 = arith.constant 2 : index
    %c0_12 = arith.constant 0 : index
    %c0_13 = arith.constant 0 : index
    %13 = vector.load %arg2[%c2, %c0_12, %c0_13] : memref<7x8x4xf32, #tpu.memory_space<vmem>>, vector<1x8x4xf32>
    %14 = vector.shape_cast %13 : vector<1x8x4xf32> to vector<8x4xf32>
    %c0_14 = arith.constant 0 : index
    %c0_15 = arith.constant 0 : index
    %c2_16 = arith.constant 2 : index
    %15 = vector.load %arg1[%c0_14, %c0_15, %c2_16] : memref<1x4x1030xf32, #tpu.memory_space<vmem>>, vector<1x4x1024xf32>
    %16 = vector.shape_cast %15 : vector<1x4x1024xf32> to vector<4x1024xf32>
    %cst_17 = arith.constant dense<0.000000e+00> : vector<8x1024xf32>
    %17 = tpu.matmul %14, %16, %cst_17 {dimension_numbers = #tpu.dot_dimension_numbers<[1], [0], [0], [1], [0, 0, 1, 1], [], []>} : vector<8x4xf32>, vector<4x1024xf32>, vector<8x1024xf32> -> vector<8x1024xf32>
    %18 = arith.addf %12, %17 : vector<8x1024xf32>
    %c3 = arith.constant 3 : index
    %c0_18 = arith.constant 0 : index
    %c0_19 = arith.constant 0 : index
    %19 = vector.load %arg2[%c3, %c0_18, %c0_19] : memref<7x8x4xf32, #tpu.memory_space<vmem>>, vector<1x8x4xf32>
    %20 = vector.shape_cast %19 : vector<1x8x4xf32> to vector<8x4xf32>
    %c0_20 = arith.constant 0 : index
    %c0_21 = arith.constant 0 : index
    %c3_22 = arith.constant 3 : index
    %21 = vector.load %arg1[%c0_20, %c0_21, %c3_22] : memref<1x4x1030xf32, #tpu.memory_space<vmem>>, vector<1x4x1024xf32>
    %22 = vector.shape_cast %21 : vector<1x4x1024xf32> to vector<4x1024xf32>
    %cst_23 = arith.constant dense<0.000000e+00> : vector<8x1024xf32>
    %23 = tpu.matmul %20, %22, %cst_23 {dimension_numbers = #tpu.dot_dimension_numbers<[1], [0], [0], [1], [0, 0, 1, 1], [], []>} : vector<8x4xf32>, vector<4x1024xf32>, vector<8x1024xf32> -> vector<8x1024xf32>
    %24 = arith.addf %18, %23 : vector<8x1024xf32>
    %c4 = arith.constant 4 : index
    %c0_24 = arith.constant 0 : index
    %c0_25 = arith.constant 0 : index
    %25 = vector.load %arg2[%c4, %c0_24, %c0_25] : memref<7x8x4xf32, #tpu.memory_space<vmem>>, vector<1x8x4xf32>
    %26 = vector.shape_cast %25 : vector<1x8x4xf32> to vector<8x4xf32>
    %c0_26 = arith.constant 0 : index
    %c0_27 = arith.constant 0 : index
    %c4_28 = arith.constant 4 : index
    %27 = vector.load %arg1[%c0_26, %c0_27, %c4_28] : memref<1x4x1030xf32, #tpu.memory_space<vmem>>, vector<1x4x1024xf32>
    %28 = vector.shape_cast %27 : vector<1x4x1024xf32> to vector<4x1024xf32>
    %cst_29 = arith.constant dense<0.000000e+00> : vector<8x1024xf32>
    %29 = tpu.matmul %26, %28, %cst_29 {dimension_numbers = #tpu.dot_dimension_numbers<[1], [0], [0], [1], [0, 0, 1, 1], [], []>} : vector<8x4xf32>, vector<4x1024xf32>, vector<8x1024xf32> -> vector<8x1024xf32>
    %30 = arith.addf %24, %29 : vector<8x1024xf32>
    %c5 = arith.constant 5 : index
    %c0_30 = arith.constant 0 : index
    %c0_31 = arith.constant 0 : index
    %31 = vector.load %arg2[%c5, %c0_30, %c0_31] : memref<7x8x4xf32, #tpu.memory_space<vmem>>, vector<1x8x4xf32>
    %32 = vector.shape_cast %31 : vector<1x8x4xf32> to vector<8x4xf32>
    %c0_32 = arith.constant 0 : index
    %c0_33 = arith.constant 0 : index
    %c5_34 = arith.constant 5 : index
    %33 = vector.load %arg1[%c0_32, %c0_33, %c5_34] : memref<1x4x1030xf32, #tpu.memory_space<vmem>>, vector<1x4x1024xf32>
    %34 = vector.shape_cast %33 : vector<1x4x1024xf32> to vector<4x1024xf32>
    %cst_35 = arith.constant dense<0.000000e+00> : vector<8x1024xf32>
    %35 = tpu.matmul %32, %34, %cst_35 {dimension_numbers = #tpu.dot_dimension_numbers<[1], [0], [0], [1], [0, 0, 1, 1], [], []>} : vector<8x4xf32>, vector<4x1024xf32>, vector<8x1024xf32> -> vector<8x1024xf32>
    %36 = arith.addf %30, %35 : vector<8x1024xf32>
    %c6 = arith.constant 6 : index
    %c0_36 = arith.constant 0 : index
    %c0_37 = arith.constant 0 : index
    %37 = vector.load %arg2[%c6, %c0_36, %c0_37] : memref<7x8x4xf32, #tpu.memory_space<vmem>>, vector<1x8x4xf32>
    %38 = vector.shape_cast %37 : vector<1x8x4xf32> to vector<8x4xf32>
    %c0_38 = arith.constant 0 : index
    %c0_39 = arith.constant 0 : index
    %c6_40 = arith.constant 6 : index
    %39 = vector.load %arg1[%c0_38, %c0_39, %c6_40] : memref<1x4x1030xf32, #tpu.memory_space<vmem>>, vector<1x4x1024xf32>
    %40 = vector.shape_cast %39 : vector<1x4x1024xf32> to vector<4x1024xf32>
    %cst_41 = arith.constant dense<0.000000e+00> : vector<8x1024xf32>
    %41 = tpu.matmul %38, %40, %cst_41 {dimension_numbers = #tpu.dot_dimension_numbers<[1], [0], [0], [1], [0, 0, 1, 1], [], []>} : vector<8x4xf32>, vector<4x1024xf32>, vector<8x1024xf32> -> vector<8x1024xf32>
    %42 = arith.addf %36, %41 : vector<8x1024xf32>
    %c0_42 = arith.constant 0 : index
    %c0_43 = arith.constant 0 : index
    %43 = vector.load %arg3[%c0_42, %c0_43] : memref<8x1xf32, #tpu.memory_space<vmem>>, vector<8x1xf32>
    %44 = vector.broadcast %43 : vector<8x1xf32> to vector<8x1024xf32>
    %45 = arith.addf %42, %44 : vector<8x1024xf32>
    %cst_44 = arith.constant 0.000000e+00 : f32
    %46 = vector.broadcast %cst_44 : f32 to vector<8x1024xf32>
    %47 = arith.maximumf %45, %46 : vector<8x1024xf32>
    %c0_45 = arith.constant 0 : index
    %c0_46 = arith.constant 0 : index
    %c0_47 = arith.constant 0 : index
    %48 = vector.load %arg4[%c0_45, %c0_46, %c0_47] : memref<1x8x1024xf32, #tpu.memory_space<vmem>>, vector<1x8x1024xf32>
    %49 = vector.shape_cast %48 : vector<1x8x1024xf32> to vector<8x1024xf32>
    %50 = vector.shape_cast %47 : vector<8x1024xf32> to vector<1x8x1024xf32>
    tpu.vector_store %arg4[%c0_45, %c0_46, %c0_47], %50 {strides = array<i32>} : memref<1x8x1024xf32, #tpu.memory_space<vmem>>, vector<1x8x1024xf32>,
    return
  }
  func.func @transform_0(%arg0: i32) -> (i32, i32, i32) {
    %c0_i32 = arith.constant 0 : i32
    %c0_i32_0 = arith.constant 0 : i32
    %c0_i32_1 = arith.constant 0 : i32
    return %arg0, %c0_i32, %c0_i32_0 : i32, i32, i32
  }
  func.func @transform_1(%arg0: i32) -> (i32, i32, i32) {
    %c0_i32 = arith.constant 0 : i32
    %c0_i32_0 = arith.constant 0 : i32
    %c0_i32_1 = arith.constant 0 : i32
    %c0_i32_2 = arith.constant 0 : i32
    return %c0_i32, %c0_i32_0, %c0_i32_1 : i32, i32, i32
  }
  func.func @transform_2(%arg0: i32) -> (i32, i32) {
    %c0_i32 = arith.constant 0 : i32
    %c0_i32_0 = arith.constant 0 : i32
    %c0_i32_1 = arith.constant 0 : i32
    return %c0_i32, %c0_i32_0 : i32, i32
  }
  func.func @transform_3(%arg0: i32) -> (i32, i32, i32) {
    %c0_i32 = arith.constant 0 : i32
    %c0_i32_0 = arith.constant 0 : i32
    %c0_i32_1 = arith.constant 0 : i32
    return %arg0, %c0_i32, %c0_i32_0 : i32, i32, i32
  }
}

module attributes {stable_mosaic.version = 11 : i64} {
  func.func @_deconv_poly_kernel(%arg0: i32, %arg1: memref<1x2x4102xf32, #tpu.memory_space<vmem>>, %arg2: memref<7x4x2xf32, #tpu.memory_space<vmem>>, %arg3: memref<4x1xf32, #tpu.memory_space<vmem>>, %arg4: memref<1x4x4096xf32, #tpu.memory_space<vmem>>) attributes {dimension_semantics = [#tpu.dimension_semantics<parallel>], iteration_bounds = array<i64: 2>, scalar_prefetch = 0 : i64, scratch_operands = 0 : i64, tpu.core_type = #tpu.core_type<tc>, window_params = [{transform_indices = @transform_0, window_bounds = array<i64: 1, 2, 4102>}, {pipeline_mode = #tpu.pipeline_mode<synchronous>, transform_indices = @transform_1, window_bounds = array<i64: 7, 4, 2>}, {pipeline_mode = #tpu.pipeline_mode<synchronous>, transform_indices = @transform_2, window_bounds = array<i64: 4, 1>}, {transform_indices = @transform_3, window_bounds = array<i64: 1, 4, 4096>}]} {
    %cst = arith.constant 0.000000e+00 : f32
    %0 = vector.broadcast %cst : f32 to vector<4x4096xf32>
    %c0 = arith.constant 0 : index
    %c0_0 = arith.constant 0 : index
    %c0_1 = arith.constant 0 : index
    %1 = vector.load %arg2[%c0, %c0_0, %c0_1] : memref<7x4x2xf32, #tpu.memory_space<vmem>>, vector<1x4x2xf32>
    %2 = vector.shape_cast %1 : vector<1x4x2xf32> to vector<4x2xf32>
    %c0_2 = arith.constant 0 : index
    %c0_3 = arith.constant 0 : index
    %c0_4 = arith.constant 0 : index
    %3 = vector.load %arg1[%c0_2, %c0_3, %c0_4] : memref<1x2x4102xf32, #tpu.memory_space<vmem>>, vector<1x2x4096xf32>
    %4 = vector.shape_cast %3 : vector<1x2x4096xf32> to vector<2x4096xf32>
    %cst_5 = arith.constant dense<0.000000e+00> : vector<4x4096xf32>
    %5 = tpu.matmul %2, %4, %cst_5 {dimension_numbers = #tpu.dot_dimension_numbers<[1], [0], [0], [1], [0, 0, 1, 1], [], []>} : vector<4x2xf32>, vector<2x4096xf32>, vector<4x4096xf32> -> vector<4x4096xf32>
    %6 = arith.addf %0, %5 : vector<4x4096xf32>
    %c1 = arith.constant 1 : index
    %c0_6 = arith.constant 0 : index
    %c0_7 = arith.constant 0 : index
    %7 = vector.load %arg2[%c1, %c0_6, %c0_7] : memref<7x4x2xf32, #tpu.memory_space<vmem>>, vector<1x4x2xf32>
    %8 = vector.shape_cast %7 : vector<1x4x2xf32> to vector<4x2xf32>
    %c0_8 = arith.constant 0 : index
    %c0_9 = arith.constant 0 : index
    %c1_10 = arith.constant 1 : index
    %9 = vector.load %arg1[%c0_8, %c0_9, %c1_10] : memref<1x2x4102xf32, #tpu.memory_space<vmem>>, vector<1x2x4096xf32>
    %10 = vector.shape_cast %9 : vector<1x2x4096xf32> to vector<2x4096xf32>
    %cst_11 = arith.constant dense<0.000000e+00> : vector<4x4096xf32>
    %11 = tpu.matmul %8, %10, %cst_11 {dimension_numbers = #tpu.dot_dimension_numbers<[1], [0], [0], [1], [0, 0, 1, 1], [], []>} : vector<4x2xf32>, vector<2x4096xf32>, vector<4x4096xf32> -> vector<4x4096xf32>
    %12 = arith.addf %6, %11 : vector<4x4096xf32>
    %c2 = arith.constant 2 : index
    %c0_12 = arith.constant 0 : index
    %c0_13 = arith.constant 0 : index
    %13 = vector.load %arg2[%c2, %c0_12, %c0_13] : memref<7x4x2xf32, #tpu.memory_space<vmem>>, vector<1x4x2xf32>
    %14 = vector.shape_cast %13 : vector<1x4x2xf32> to vector<4x2xf32>
    %c0_14 = arith.constant 0 : index
    %c0_15 = arith.constant 0 : index
    %c2_16 = arith.constant 2 : index
    %15 = vector.load %arg1[%c0_14, %c0_15, %c2_16] : memref<1x2x4102xf32, #tpu.memory_space<vmem>>, vector<1x2x4096xf32>
    %16 = vector.shape_cast %15 : vector<1x2x4096xf32> to vector<2x4096xf32>
    %cst_17 = arith.constant dense<0.000000e+00> : vector<4x4096xf32>
    %17 = tpu.matmul %14, %16, %cst_17 {dimension_numbers = #tpu.dot_dimension_numbers<[1], [0], [0], [1], [0, 0, 1, 1], [], []>} : vector<4x2xf32>, vector<2x4096xf32>, vector<4x4096xf32> -> vector<4x4096xf32>
    %18 = arith.addf %12, %17 : vector<4x4096xf32>
    %c3 = arith.constant 3 : index
    %c0_18 = arith.constant 0 : index
    %c0_19 = arith.constant 0 : index
    %19 = vector.load %arg2[%c3, %c0_18, %c0_19] : memref<7x4x2xf32, #tpu.memory_space<vmem>>, vector<1x4x2xf32>
    %20 = vector.shape_cast %19 : vector<1x4x2xf32> to vector<4x2xf32>
    %c0_20 = arith.constant 0 : index
    %c0_21 = arith.constant 0 : index
    %c3_22 = arith.constant 3 : index
    %21 = vector.load %arg1[%c0_20, %c0_21, %c3_22] : memref<1x2x4102xf32, #tpu.memory_space<vmem>>, vector<1x2x4096xf32>
    %22 = vector.shape_cast %21 : vector<1x2x4096xf32> to vector<2x4096xf32>
    %cst_23 = arith.constant dense<0.000000e+00> : vector<4x4096xf32>
    %23 = tpu.matmul %20, %22, %cst_23 {dimension_numbers = #tpu.dot_dimension_numbers<[1], [0], [0], [1], [0, 0, 1, 1], [], []>} : vector<4x2xf32>, vector<2x4096xf32>, vector<4x4096xf32> -> vector<4x4096xf32>
    %24 = arith.addf %18, %23 : vector<4x4096xf32>
    %c4 = arith.constant 4 : index
    %c0_24 = arith.constant 0 : index
    %c0_25 = arith.constant 0 : index
    %25 = vector.load %arg2[%c4, %c0_24, %c0_25] : memref<7x4x2xf32, #tpu.memory_space<vmem>>, vector<1x4x2xf32>
    %26 = vector.shape_cast %25 : vector<1x4x2xf32> to vector<4x2xf32>
    %c0_26 = arith.constant 0 : index
    %c0_27 = arith.constant 0 : index
    %c4_28 = arith.constant 4 : index
    %27 = vector.load %arg1[%c0_26, %c0_27, %c4_28] : memref<1x2x4102xf32, #tpu.memory_space<vmem>>, vector<1x2x4096xf32>
    %28 = vector.shape_cast %27 : vector<1x2x4096xf32> to vector<2x4096xf32>
    %cst_29 = arith.constant dense<0.000000e+00> : vector<4x4096xf32>
    %29 = tpu.matmul %26, %28, %cst_29 {dimension_numbers = #tpu.dot_dimension_numbers<[1], [0], [0], [1], [0, 0, 1, 1], [], []>} : vector<4x2xf32>, vector<2x4096xf32>, vector<4x4096xf32> -> vector<4x4096xf32>
    %30 = arith.addf %24, %29 : vector<4x4096xf32>
    %c5 = arith.constant 5 : index
    %c0_30 = arith.constant 0 : index
    %c0_31 = arith.constant 0 : index
    %31 = vector.load %arg2[%c5, %c0_30, %c0_31] : memref<7x4x2xf32, #tpu.memory_space<vmem>>, vector<1x4x2xf32>
    %32 = vector.shape_cast %31 : vector<1x4x2xf32> to vector<4x2xf32>
    %c0_32 = arith.constant 0 : index
    %c0_33 = arith.constant 0 : index
    %c5_34 = arith.constant 5 : index
    %33 = vector.load %arg1[%c0_32, %c0_33, %c5_34] : memref<1x2x4102xf32, #tpu.memory_space<vmem>>, vector<1x2x4096xf32>
    %34 = vector.shape_cast %33 : vector<1x2x4096xf32> to vector<2x4096xf32>
    %cst_35 = arith.constant dense<0.000000e+00> : vector<4x4096xf32>
    %35 = tpu.matmul %32, %34, %cst_35 {dimension_numbers = #tpu.dot_dimension_numbers<[1], [0], [0], [1], [0, 0, 1, 1], [], []>} : vector<4x2xf32>, vector<2x4096xf32>, vector<4x4096xf32> -> vector<4x4096xf32>
    %36 = arith.addf %30, %35 : vector<4x4096xf32>
    %c6 = arith.constant 6 : index
    %c0_36 = arith.constant 0 : index
    %c0_37 = arith.constant 0 : index
    %37 = vector.load %arg2[%c6, %c0_36, %c0_37] : memref<7x4x2xf32, #tpu.memory_space<vmem>>, vector<1x4x2xf32>
    %38 = vector.shape_cast %37 : vector<1x4x2xf32> to vector<4x2xf32>
    %c0_38 = arith.constant 0 : index
    %c0_39 = arith.constant 0 : index
    %c6_40 = arith.constant 6 : index
    %39 = vector.load %arg1[%c0_38, %c0_39, %c6_40] : memref<1x2x4102xf32, #tpu.memory_space<vmem>>, vector<1x2x4096xf32>
    %40 = vector.shape_cast %39 : vector<1x2x4096xf32> to vector<2x4096xf32>
    %cst_41 = arith.constant dense<0.000000e+00> : vector<4x4096xf32>
    %41 = tpu.matmul %38, %40, %cst_41 {dimension_numbers = #tpu.dot_dimension_numbers<[1], [0], [0], [1], [0, 0, 1, 1], [], []>} : vector<4x2xf32>, vector<2x4096xf32>, vector<4x4096xf32> -> vector<4x4096xf32>
    %42 = arith.addf %36, %41 : vector<4x4096xf32>
    %c0_42 = arith.constant 0 : index
    %c0_43 = arith.constant 0 : index
    %43 = vector.load %arg3[%c0_42, %c0_43] : memref<4x1xf32, #tpu.memory_space<vmem>>, vector<4x1xf32>
    %44 = vector.broadcast %43 : vector<4x1xf32> to vector<4x4096xf32>
    %45 = arith.addf %42, %44 : vector<4x4096xf32>
    %46 = math.tanh %45 : vector<4x4096xf32>
    %c0_44 = arith.constant 0 : index
    %c0_45 = arith.constant 0 : index
    %c0_46 = arith.constant 0 : index
    %47 = vector.load %arg4[%c0_44, %c0_45, %c0_46] : memref<1x4x4096xf32, #tpu.memory_space<vmem>>, vector<1x4x4096xf32>
    %48 = vector.shape_cast %47 : vector<1x4x4096xf32> to vector<4x4096xf32>
    %49 = vector.shape_cast %46 : vector<4x4096xf32> to vector<1x4x4096xf32>
    tpu.vector_store %arg4[%c0_44, %c0_45, %c0_46], %49 {strides = array<i32>} : memref<1x4x4096xf32, #tpu.memory_space<vmem>>, vector<1x4x4096xf32>,
    return
  }
  func.func @transform_0(%arg0: i32) -> (i32, i32, i32) {
    %c0_i32 = arith.constant 0 : i32
    %c0_i32_0 = arith.constant 0 : i32
    %c0_i32_1 = arith.constant 0 : i32
    return %arg0, %c0_i32, %c0_i32_0 : i32, i32, i32
  }
  func.func @transform_1(%arg0: i32) -> (i32, i32, i32) {
    %c0_i32 = arith.constant 0 : i32
    %c0_i32_0 = arith.constant 0 : i32
    %c0_i32_1 = arith.constant 0 : i32
    %c0_i32_2 = arith.constant 0 : i32
    return %c0_i32, %c0_i32_0, %c0_i32_1 : i32, i32, i32
  }
  func.func @transform_2(%arg0: i32) -> (i32, i32) {
    %c0_i32 = arith.constant 0 : i32
    %c0_i32_0 = arith.constant 0 : i32
    %c0_i32_1 = arith.constant 0 : i32
    return %c0_i32, %c0_i32_0 : i32, i32
  }
  func.func @transform_3(%arg0: i32) -> (i32, i32, i32) {
    %c0_i32 = arith.constant 0 : i32
    %c0_i32_0 = arith.constant 0 : i32
    %c0_i32_1 = arith.constant 0 : i32
    return %arg0, %c0_i32, %c0_i32_0 : i32, i32, i32
  }
}

</mosaic_0001>

<bundles_post_ra>
// kernel: tile.32
= control target key start
LH: loop header
LB: loop body
LE: loop exit
PB: predicated region body
PF: predicated region fallthrough
CT: control target
= control target key end

     0   :  { %2 = vsyncpa [#allocation1], 0  ;;  %s48_s8 = smov [#allocation0]   ;;  %s65_s0 = inlined_call_operand.hbm [shape: f32[8], index: 0, kind: input, shape index: {}]   ;;  %s66_s1 = inlined_call_operand.vmem [shape: f32[4,8], index: 1, kind: output, shape index: {}]  }
   0x1   :  { %s8_s0 = sshll.u32 %s65_s0, 4  ;;  %s10_s9 = sshll.u32 %s48_s8, 4  ;;  %s9_s0 = int_to_ptr.hbm [resolvable:$true] %s8_s0  ;;  %s11_s9 = int_to_ptr.vmem [resolvable:$true] %s10_s9 }
   0x2   :  { %13 = dma.hbm_to_vmem [thread:$0]  %s9_s0, 16, %s11_s9, [#allocation1]  }
   0x3   :  { %46 = dma.done.wait [#allocation1], 16  }
   0x4   :  { %47 = vsyncadd [#allocation1], 4294967280  ;;  %v18_v0 = vld [vmem:[#allocation0] ss:$0 sm:$0xff] }
   0x5   :  { %19 = vst [vmem:[%s66_s1] sm:$0xf] %v18_v0 }
   0x6   :  { %20 = vsyncpa [#allocation1], 1 }

// kernel: tile.27
= control target key start
LH: loop header
LB: loop body
LE: loop exit
PB: predicated region body
PF: predicated region fallthrough
CT: control target
= control target key end

     0   :  { %2 = vsyncpa [#allocation1], 0  ;;  %s48_s8 = smov [#allocation0]   ;;  %s65_s0 = inlined_call_operand.hbm [shape: f32[16], index: 0, kind: input, shape index: {}]   ;;  %s66_s1 = inlined_call_operand.vmem [shape: f32[4,16], index: 1, kind: output, shape index: {}]  }
   0x1   :  { %s8_s0 = sshll.u32 %s65_s0, 4  ;;  %s10_s9 = sshll.u32 %s48_s8, 4  ;;  %s9_s0 = int_to_ptr.hbm [resolvable:$true] %s8_s0  ;;  %s11_s9 = int_to_ptr.vmem [resolvable:$true] %s10_s9 }
   0x2   :  { %13 = dma.hbm_to_vmem [thread:$0]  %s9_s0, 16, %s11_s9, [#allocation1]  }
   0x3   :  { %46 = dma.done.wait [#allocation1], 16  }
   0x4   :  { %47 = vsyncadd [#allocation1], 4294967280  ;;  %v18_v0 = vld [vmem:[#allocation0] ss:$0 sm:$0xff] }
   0x5   :  { %19 = vst [vmem:[%s66_s1] sm:$0xf] %v18_v0 }
   0x6   :  { %20 = vsyncpa [#allocation1], 1 }

// kernel: tile.47
= control target key start
LH: loop header
LB: loop body
LE: loop exit
PB: predicated region body
PF: predicated region fallthrough
CT: control target
= control target key end

     0   :  { %s20_s0 = inlined_call_operand.<no memory space> [shape: f32[], index: 0, kind: input, shape index: {}]   ;;  %s21_s1 = inlined_call_operand.vmem [shape: f32[4,1], index: 1, kind: output, shape index: {}]  }
   0x1   :  { %v2_v0 = vstv %s20_s0 }
   0x2   :  { %3 = vst [vmem:[%s21_s1] sm:$0xf] %v2_v0 }

// kernel: tile.37
= control target key start
LH: loop header
LB: loop body
LE: loop exit
PB: predicated region body
PF: predicated region fallthrough
CT: control target
= control target key end

     0   :  { %2 = vsyncpa [#allocation1], 0  ;;  %s48_s8 = smov [#allocation0]   ;;  %s65_s0 = inlined_call_operand.hbm [shape: f32[4], index: 0, kind: input, shape index: {}]   ;;  %s66_s1 = inlined_call_operand.vmem [shape: f32[4,4], index: 1, kind: output, shape index: {}]  }
   0x1   :  { %s8_s0 = sshll.u32 %s65_s0, 4  ;;  %s10_s9 = sshll.u32 %s48_s8, 4  ;;  %s9_s0 = int_to_ptr.hbm [resolvable:$true] %s8_s0  ;;  %s11_s9 = int_to_ptr.vmem [resolvable:$true] %s10_s9 }
   0x2   :  { %13 = dma.hbm_to_vmem [thread:$0]  %s9_s0, 16, %s11_s9, [#allocation1]  }
   0x3   :  { %46 = dma.done.wait [#allocation1], 16  }
   0x4   :  { %47 = vsyncadd [#allocation1], 4294967280  ;;  %v18_v0 = vld [vmem:[#allocation0] ss:$0 sm:$0xff] }
   0x5   :  { %19 = vst [vmem:[%s66_s1] sm:$0xf] %v18_v0 }
   0x6   :  { %20 = vsyncpa [#allocation1], 1 }

// kernel: tile.42
= control target key start
LH: loop header
LB: loop body
LE: loop exit
PB: predicated region body
PF: predicated region fallthrough
CT: control target
= control target key end

     0   :  { %2 = vsyncpa [#allocation1], 0  ;;  %s48_s8 = smov [#allocation0]   ;;  %s65_s0 = inlined_call_operand.hbm [shape: f32[2], index: 0, kind: input, shape index: {}]   ;;  %s66_s1 = inlined_call_operand.vmem [shape: f32[4,2], index: 1, kind: output, shape index: {}]  }
   0x1   :  { %s8_s0 = sshll.u32 %s65_s0, 4  ;;  %s10_s9 = sshll.u32 %s48_s8, 4  ;;  %s9_s0 = int_to_ptr.hbm [resolvable:$true] %s8_s0  ;;  %s11_s9 = int_to_ptr.vmem [resolvable:$true] %s10_s9 }
   0x2   :  { %13 = dma.hbm_to_vmem [thread:$0]  %s9_s0, 16, %s11_s9, [#allocation1]  }
   0x3   :  { %46 = dma.done.wait [#allocation1], 16  }
   0x4   :  { %47 = vsyncadd [#allocation1], 4294967280  ;;  %v18_v0 = vld [vmem:[#allocation0] ss:$0 sm:$0xff] }
   0x5   :  { %19 = vst [vmem:[%s66_s1] sm:$0xf] %v18_v0 }
   0x6   :  { %20 = vsyncpa [#allocation1], 1 }

// kernel: tile.3
= control target key start
LH: loop header
LB: loop body
LE: loop exit
PB: predicated region body
PF: predicated region fallthrough
CT: control target
= control target key end

     0   :  { %vm7_vm0 = vcmask 7168   ;;  %s37_s0 = inlined_call_operand.vmem [shape: f32[4,2], index: 0, kind: input, shape index: {}]   ;;  %s38_s1 = inlined_call_operand.vmem [shape: f32[8,1], index: 1, kind: output, shape index: {}]  }
   0x1   :  { %v4_v0 = vld [vmem:[%s37_s0] sm:$0xf]  ;;  %s17_s0 = smov 127  }
   0x2   :  { %5 = vst [vmem:[#allocation0] sm:$0xf] %v4_v0 }
   0x9   :  { %v9_v1 = vld [vmem:[#allocation0] sm:$0xf]  }
   0xa   :  { %v6_v2 = vld [vmem:[#allocation0] sm:$0xf]   ;;  %10 = vrot.lane.b32.xlu0 %v9_v1, %s17_s0 }
   0xb   :  { %8 = vst.msk [vmem:[%s38_s1] ss:$2 sm:$0xf] %vm7_vm0, %v6_v2  }
  0x7c   :  { %v11_v3 = vpop.permute.xlu0 %10  }
  0x7d   :  { %15 = vst.msk [vmem:[%s38_s1 + $0x1] ss:$2 sm:$0xf] %vm7_vm0, %v11_v3  }

// kernel: tile.2
= control target key start
LH: loop header
LB: loop body
LE: loop exit
PB: predicated region body
PF: predicated region fallthrough
CT: control target
= control target key end

     0   :  { %s34_s8 = smov 125   ;;  %s35_s9 = smov 126   ;;  %vm7_vm0 = vcmask 7168   ;;  %s61_s0 = inlined_call_operand.vmem [shape: f32[4,4], index: 0, kind: input, shape index: {}]   ;;  %s62_s1 = inlined_call_operand.vmem [shape: f32[16,1], index: 1, kind: output, shape index: {}]  }
   0x1   :  { %v4_v0 = vld [vmem:[%s61_s0] sm:$0xf]  ;;  %s33_s0 = smov 127  }
   0x2   :  { %5 = vst [vmem:[#allocation0] sm:$0xf] %v4_v0 }
   0x9   :  { %v9_v1 = vld [vmem:[#allocation0] sm:$0xf]  }
   0xa   :  { %v21_v2 = vld [vmem:[#allocation0] sm:$0xf]   ;;  %10 = vrot.lane.b32.xlu0 %v9_v1, %s33_s0 }
   0xb   :  { %22 = vrot.lane.b32.xlu1 %v21_v2, %s34_s8  ;;  %v15_v3 = vld [vmem:[#allocation0] sm:$0xf]  }
   0xc   :  { %v6_v4 = vld [vmem:[#allocation0] sm:$0xf]  }
   0xd   :  { %8 = vst.msk [vmem:[%s62_s1] ss:$4 sm:$0xf] %vm7_vm0, %v6_v4  }
  0x12   :  { %16 = vrot.lane.b32.xlu0 %v15_v3, %s35_s9 }
  0x7c   :  { %v11_v5 = vpop.permute.xlu0 %10  }
  0x7d   :  { %v23_v6 = vpop.permute.xlu1 %22   ;;  %27 = vst.msk [vmem:[%s62_s1 + $0x1] ss:$4 sm:$0xf] %vm7_vm0, %v11_v5  }
  0x7e   :  { %29 = vst.msk [vmem:[%s62_s1 + $0x3] ss:$4 sm:$0xf] %vm7_vm0, %v23_v6  }
  0x84   :  { %v17_v7 = vpop.permute.xlu0 %16  }
  0x85   :  { %28 = vst.msk [vmem:[%s62_s1 + $0x2] ss:$4 sm:$0xf] %vm7_vm0, %v17_v7  }

// kernel: tile.1
= control target key start
LH: loop header
LB: loop body
LE: loop exit
PB: predicated region body
PF: predicated region fallthrough
CT: control target
= control target key end

     0   :  { %s66_s8 = smov 125   ;;  %s67_s9 = smov 123   ;;  %vm7_vm0 = vcmask 7168   ;;  %s117_s0 = inlined_call_operand.vmem [shape: f32[4,8], index: 0, kind: input, shape index: {}]   ;;  %s118_s1 = inlined_call_operand.vmem [shape: f32[32,1], index: 1, kind: output, shape index: {}]  }
   0x1   :  { %v4_v0 = vld [vmem:[%s117_s0] sm:$0xf]  ;;  %s65_s0 = smov 127   ;;  %s68_s10 = smov 126  }
   0x2   :  { %5 = vst [vmem:[#allocation0] sm:$0xf] %v4_v0  ;;  %s69_s11 = smov 124   ;;  %s70_s12 = smov 122  }
   0x3   :  { %s71_s13 = smov 121  }
   0x9   :  { %v9_v1 = vld [vmem:[#allocation0] sm:$0xf]  }
   0xa   :  { %v21_v2 = vld [vmem:[#allocation0] sm:$0xf]   ;;  %10 = vrot.lane.b32.xlu0 %v9_v1, %s65_s0 }
   0xb   :  { %22 = vrot.lane.b32.xlu1 %v21_v2, %s66_s8  ;;  %v33_v3 = vld [vmem:[#allocation0] sm:$0xf]  }
   0xc   :  { %34 = vrot.lane.b32.xlu2 %v33_v3, %s67_s9  ;;  %v15_v4 = vld [vmem:[#allocation0] sm:$0xf]  }
   0xd   :  { %v27_v5 = vld [vmem:[#allocation0] sm:$0xf]  }
   0xe   :  { %v39_v6 = vld [vmem:[#allocation0] sm:$0xf]  }
   0xf   :  { %v45_v7 = vld [vmem:[#allocation0] sm:$0xf]  }
  0x10   :  { %v6_v8 = vld [vmem:[#allocation0] sm:$0xf]  }
  0x11   :  { %8 = vst.msk [vmem:[%s118_s1] ss:$8 sm:$0xf] %vm7_vm0, %v6_v8  }
  0x12   :  { %16 = vrot.lane.b32.xlu0 %v15_v4, %s68_s10 }
  0x13   :  { %28 = vrot.lane.b32.xlu1 %v27_v5, %s69_s11 }
  0x14   :  { %40 = vrot.lane.b32.xlu2 %v39_v6, %s70_s12 }
  0x1a   :  { %46 = vrot.lane.b32.xlu0 %v45_v7, %s71_s13 }
  0x66   :  { %v35_v9 = vpop.permute.xlu2 %34  }
  0x67   :  { %55 = vst.msk [vmem:[%s118_s1 + $0x5] ss:$8 sm:$0xf] %vm7_vm0, %v35_v9  }
  0x6e   :  { %v41_v10 = vpop.permute.xlu2 %40  }
  0x6f   :  { %56 = vst.msk [vmem:[%s118_s1 + $0x6] ss:$8 sm:$0xf] %vm7_vm0, %v41_v10  }
  0x7c   :  { %v11_v11 = vpop.permute.xlu0 %10  }
  0x7d   :  { %v23_v12 = vpop.permute.xlu1 %22   ;;  %51 = vst.msk [vmem:[%s118_s1 + $0x1] ss:$8 sm:$0xf] %vm7_vm0, %v11_v11  }
  0x7e   :  { %53 = vst.msk [vmem:[%s118_s1 + $0x3] ss:$8 sm:$0xf] %vm7_vm0, %v23_v12  }
  0x84   :  { %v17_v13 = vpop.permute.xlu0 %16  }
  0x85   :  { %v29_v14 = vpop.permute.xlu1 %28   ;;  %52 = vst.msk [vmem:[%s118_s1 + $0x2] ss:$8 sm:$0xf] %vm7_vm0, %v17_v13  }
  0x86   :  { %54 = vst.msk [vmem:[%s118_s1 + $0x4] ss:$8 sm:$0xf] %vm7_vm0, %v29_v14  }
  0x8c   :  { %v47_v15 = vpop.permute.xlu0 %46  }
  0x8d   :  { %57 = vst.msk [vmem:[%s118_s1 + $0x7] ss:$8 sm:$0xf] %vm7_vm0, %v47_v15  }

// kernel: tile.0
= control target key start
LH: loop header
LB: loop body
LE: loop exit
PB: predicated region body
PF: predicated region fallthrough
CT: control target
= control target key end

     0   :  { %s176_s8 = smov 127   ;;  %s177_s9 = smov 123   ;;  %vm7_vm0 = vcmask 7168   ;;  %s331_s0 = inlined_call_operand.vmem [shape: f32[4,16], index: 0, kind: input, shape index: {}]   ;;  %s332_s1 = inlined_call_operand.vmem [shape: f32[64,1], index: 1, kind: output, shape index: {}]  }
   0x1   :  { %v4_v0 = vld [vmem:[%s331_s0] sm:$0xf]  ;;  %s175_s0 = smov 125   ;;  %s178_s10 = smov 124  }
   0x2   :  { %5 = vst [vmem:[#allocation0] sm:$0xf] %v4_v0  ;;  %s179_s11 = smov 126   ;;  %s180_s12 = smov 122  }
   0x3   :  { %s181_s13 = smov 120   ;;  %s182_s14 = smov 121  }
   0x4   :  { %s183_s15 = smov 119   ;;  %s184_s16 = smov 117  }
   0x5   :  { %s185_s17 = smov 118   ;;  %s186_s18 = smov 116  }
   0x6   :  { %s187_s19 = smov 114   ;;  %s188_s20 = smov 115  }
   0x7   :  { %s189_s21 = smov 113  }
   0x9   :  { %v26_v1 = vld [vmem:[#allocation0] sm:$0xf]  }
   0xa   :  { %v10_v2 = vld [vmem:[#allocation0] sm:$0xf]   ;;  %27 = vrot.lane.b32.xlu1 %v26_v1, %s175_s0 }
   0xb   :  { %11 = vrot.lane.b32.xlu0 %v10_v2, %s176_s8  ;;  %v42_v3 = vld [vmem:[#allocation0] sm:$0xf]  }
   0xc   :  { %43 = vrot.lane.b32.xlu2 %v42_v3, %s177_s9  ;;  %v34_v4 = vld [vmem:[#allocation0] sm:$0xf]  }
   0xd   :  { %v18_v5 = vld [vmem:[#allocation0] sm:$0xf]  }
   0xe   :  { %v50_v6 = vld [vmem:[#allocation0] sm:$0xf]  }
   0xf   :  { %v66_v7 = vld [vmem:[#allocation0] sm:$0xf]  }
  0x10   :  { %v58_v8 = vld [vmem:[#allocation0] sm:$0xf]  }
  0x11   :  { %v74_v9 = vld [vmem:[#allocation0] sm:$0xf]  }
  0x12   :  { %35 = vrot.lane.b32.xlu1 %v34_v4, %s178_s10  ;;  %v90_v10 = vld [vmem:[#allocation0] sm:$0xf]  }
  0x13   :  { %19 = vrot.lane.b32.xlu0 %v18_v5, %s179_s11  ;;  %v82_v11 = vld [vmem:[#allocation0] sm:$0xf]  }
  0x14   :  { %51 = vrot.lane.b32.xlu2 %v50_v6, %s180_s12  ;;  %v98_v12 = vld [vmem:[#allocation0] sm:$0xf]  }
  0x15   :  { %v114_v13 = vld [vmem:[#allocation0] sm:$0xf]  }
  0x16   :  { %v106_v14 = vld [vmem:[#allocation0] sm:$0xf]  }
  0x17   :  { %v122_v15 = vld [vmem:[#allocation0] sm:$0xf]  }
  0x18   :  { %v6_v22 = vld [vmem:[#allocation0] sm:$0xf]  }
  0x19   :  { %8 = vst.msk [vmem:[%s332_s1] ss:$16 sm:$0x3] %vm7_vm0, %v6_v22  }
  0x1a   :  { %67 = vrot.lane.b32.xlu1 %v66_v7, %s181_s13  ;;  %9 = vst.msk [vmem:[%s332_s1] ss:$16 sm:$0xc] %vm7_vm0, %v6_v22  }
  0x1b   :  { %59 = vrot.lane.b32.xlu0 %v58_v8, %s182_s14 }
  0x1c   :  { %75 = vrot.lane.b32.xlu2 %v74_v9, %s183_s15 }
  0x22   :  { %91 = vrot.lane.b32.xlu1 %v90_v10, %s184_s16 }
  0x23   :  { %83 = vrot.lane.b32.xlu0 %v82_v11, %s185_s17 }
  0x24   :  { %99 = vrot.lane.b32.xlu2 %v98_v12, %s186_s18 }
  0x2a   :  { %115 = vrot.lane.b32.xlu1 %v114_v13, %s187_s19 }
  0x2b   :  { %107 = vrot.lane.b32.xlu0 %v106_v14, %s188_s20 }
  0x2c   :  { %123 = vrot.lane.b32.xlu2 %v122_v15, %s189_s21 }
  0x66   :  { %v44_v16 = vpop.permute.xlu2 %43  }
  0x67   :  { %138 = vst.msk [vmem:[%s332_s1 + $0x5] ss:$16 sm:$0x3] %vm7_vm0, %v44_v16  }
  0x68   :  { %139 = vst.msk [vmem:[%s332_s1 + $0x5] ss:$16 sm:$0xc] %vm7_vm0, %v44_v16  }
  0x6e   :  { %v52_v17 = vpop.permute.xlu2 %51  }
  0x6f   :  { %140 = vst.msk [vmem:[%s332_s1 + $0x6] ss:$16 sm:$0x3] %vm7_vm0, %v52_v17  }
  0x70   :  { %141 = vst.msk [vmem:[%s332_s1 + $0x6] ss:$16 sm:$0xc] %vm7_vm0, %v52_v17  }
  0x76   :  { %v76_v18 = vpop.permute.xlu2 %75  }
  0x77   :  { %146 = vst.msk [vmem:[%s332_s1 + $0x9] ss:$16 sm:$0x3] %vm7_vm0, %v76_v18  }
  0x78   :  { %147 = vst.msk [vmem:[%s332_s1 + $0x9] ss:$16 sm:$0xc] %vm7_vm0, %v76_v18  }
  0x7c   :  { %v28_v19 = vpop.permute.xlu1 %27  }
  0x7d   :  { %v12_v20 = vpop.permute.xlu0 %11   ;;  %134 = vst.msk [vmem:[%s332_s1 + $0x3] ss:$16 sm:$0x3] %vm7_vm0, %v28_v19  }
  0x7e   :  { %135 = vst.msk [vmem:[%s332_s1 + $0x3] ss:$16 sm:$0xc] %vm7_vm0, %v28_v19   ;;  %v100_v21 = vpop.permute.xlu2 %99  }
  0x7f   :  { %130 = vst.msk [vmem:[%s332_s1 + $0x1] ss:$16 sm:$0x3] %vm7_vm0, %v12_v20  }
  0x80   :  { %131 = vst.msk [vmem:[%s332_s1 + $0x1] ss:$16 sm:$0xc] %vm7_vm0, %v12_v20  }
  0x81   :  { %152 = vst.msk [vmem:[%s332_s1 + $0xc] ss:$16 sm:$0x3] %vm7_vm0, %v100_v21  }
  0x82   :  { %153 = vst.msk [vmem:[%s332_s1 + $0xc] ss:$16 sm:$0xc] %vm7_vm0, %v100_v21  }
  0x84   :  { %v36_v23 = vpop.permute.xlu1 %35  }
  0x85   :  { %v20_v24 = vpop.permute.xlu0 %19   ;;  %136 = vst.msk [vmem:[%s332_s1 + $0x4] ss:$16 sm:$0x3] %vm7_vm0, %v36_v23  }
  0x86   :  { %137 = vst.msk [vmem:[%s332_s1 + $0x4] ss:$16 sm:$0xc] %vm7_vm0, %v36_v23   ;;  %v124_v25 = vpop.permute.xlu2 %123  }
  0x87   :  { %132 = vst.msk [vmem:[%s332_s1 + $0x2] ss:$16 sm:$0x3] %vm7_vm0, %v20_v24  }
  0x88   :  { %133 = vst.msk [vmem:[%s332_s1 + $0x2] ss:$16 sm:$0xc] %vm7_vm0, %v20_v24  }
  0x89   :  { %158 = vst.msk [vmem:[%s332_s1 + $0xf] ss:$16 sm:$0x3] %vm7_vm0, %v124_v25  }
  0x8a   :  { %159 = vst.msk [vmem:[%s332_s1 + $0xf] ss:$16 sm:$0xc] %vm7_vm0, %v124_v25  }
  0x8c   :  { %v68_v26 = vpop.permute.xlu1 %67  }
  0x8d   :  { %v60_v27 = vpop.permute.xlu0 %59   ;;  %144 = vst.msk [vmem:[%s332_s1 + $0x8] ss:$16 sm:$0x3] %vm7_vm0, %v68_v26  }
  0x8e   :  { %145 = vst.msk [vmem:[%s332_s1 + $0x8] ss:$16 sm:$0xc] %vm7_vm0, %v68_v26  }
  0x8f   :  { %142 = vst.msk [vmem:[%s332_s1 + $0x7] ss:$16 sm:$0x3] %vm7_vm0, %v60_v27  }
  0x90   :  { %143 = vst.msk [vmem:[%s332_s1 + $0x7] ss:$16 sm:$0xc] %vm7_vm0, %v60_v27  }
  0x94   :  { %v92_v28 = vpop.permute.xlu1 %91  }
  0x95   :  { %v84_v29 = vpop.permute.xlu0 %83   ;;  %150 = vst.msk [vmem:[%s332_s1 + $0xb] ss:$16 sm:$0x3] %vm7_vm0, %v92_v28  }
  0x96   :  { %151 = vst.msk [vmem:[%s332_s1 + $0xb] ss:$16 sm:$0xc] %vm7_vm0, %v92_v28  }
  0x97   :  { %148 = vst.msk [vmem:[%s332_s1 + $0xa] ss:$16 sm:$0x3] %vm7_vm0, %v84_v29  }
  0x98   :  { %149 = vst.msk [vmem:[%s332_s1 + $0xa] ss:$16 sm:$0xc] %vm7_vm0, %v84_v29  }
  0x9c   :  { %v116_v30 = vpop.permute.xlu1 %115  }
  0x9d   :  { %v108_v31 = vpop.permute.xlu0 %107   ;;  %156 = vst.msk [vmem:[%s332_s1 + $0xe] ss:$16 sm:$0x3] %vm7_vm0, %v116_v30  }
  0x9e   :  { %157 = vst.msk [vmem:[%s332_s1 + $0xe] ss:$16 sm:$0xc] %vm7_vm0, %v116_v30  }
  0x9f   :  { %154 = vst.msk [vmem:[%s332_s1 + $0xd] ss:$16 sm:$0x3] %vm7_vm0, %v108_v31  }
  0xa0   :  { %155 = vst.msk [vmem:[%s332_s1 + $0xd] ss:$16 sm:$0xc] %vm7_vm0, %v108_v31  }

// kernel: wavegan_generator.6
= control target key start
LH: loop header
LB: loop body
LE: loop exit
PB: predicated region body
PF: predicated region fallthrough
CT: control target
= control target key end

     0   :  { %8 = vsyncpa [#allocation3], 0  ;;  %s839_s0 = inlined_call_operand.hbm [shape: f32[2,100], index: 0, kind: input, shape index: {}]   ;;  %s840_s1 = inlined_call_operand.hbm [shape: f32[100,512], index: 1, kind: input, shape index: {}]   ;;  %s841_s2 = inlined_call_operand.hbm [shape: f32[1,512], index: 2, kind: input, shape index: {}]   ;;  %s842_s3 = inlined_call_operand.vmem [shape: f32[2,512], index: 3, kind: output, shape index: {}]  }
   0x1   :  { %9 = vsyncpa [#allocation5], 0 }
   0x2   :  { %11 = vsyncpa [#allocation5 + $0x1], 0  ;;  %s674_s12 = smov 0   ;;  %s676_s13 = smov 0  }
   0x3   :  { %s678_s14 = smov 0   ;;  %s680_s15 = smov 0  }
   0x4 LB: > { %s695_s16 = sadd.s32 1, %s648_s15   ;;  %s45_s17 = sadd.s32 1, %s644_s14  ;;  %s648_s15 = sphi %s680_s15, %s849_s15   ;;  %s644_s14 = sphi %s678_s14, %s848_s14   ;;  %s640_s13 = sphi %s676_s13, %s847_s13   ;;  %s636_s12 = sphi %s674_s12, %s846_s12  }
   0x5   : > { %s42_s18 = ssub.s32 %s648_s15, %s695_s16  ;;  %p52_p0 = scmp.ne.s32.totalorder %s644_s14, %s640_s13 }
   0x6   : > { %p43_p1 = scmp.eq.s32.totalorder %s42_s18, 0  ;;  %p53_p2 = scmp.eq.s32.totalorder %s648_s15, 0 }
   0x7   : > { %p482_p3 = scmp.lt.s32.totalorder %s648_s15, 2  ;;  %s146_s20 = sand.u32 1, %s648_s15  }
   0x8   : > { %s705_s19 = scalar_select %p43_p1, %s644_s14, %s45_s17  }
   0x9   : > { %p54_p4 = por %p53_p2, %p52_p0  ;;  %s148_s21 = sand.u32 1, %s644_s14  }
   0xa   : > { %s460_s22 = smul.u32 208, %s148_s21  ;;  %s459_s23 = sshll.u32 %s648_s15, 4 }
   0xb   : > { %s155_s26 = scalar_lea.hbm %s840_s1, %s459_s23  ;;  %p715_p5 = pnand %p482_p3, %p54_p4 }
   0xc   : > { %s156_s28 = sshll.u32 %s155_s26, 4  ;;  %s150_s29 = scalar_lea.vmem [#allocation4], %s460_s22  ;;  %s157_s28 = int_to_ptr.hbm [resolvable:$true] %s156_s28 }
   0xd   : > { %s158_s30 = sshll.u32 %s150_s29, 4  ;;  %s719_s4 = scalar_lea.sflag [#allocation5], %s146_s20  ;;  %s159_s30 = int_to_ptr.vmem [resolvable:$true] %s158_s30 }
   0xe   : > { %s520_s5 = sshra.s32 %s157_s28, 4  ;;  %p524_p7 = pneg %p715_p5  ;;  %s521_s5 = int_to_ptr.hbm [resolvable:$true] %s520_s5 }
   0xf   : > { %s522_s6 = scalar_lea.hbm %s521_s5, 208  ;;  %s527_s9 = scalar_lea.hbm %s840_s1, 416 }
  0x10   : > { %p523_p6 = scmp.ne.s32.totalorder %s521_s5, %s522_s6  ;;  %p528_p10 = scmp.lt.s32.totalorder %s521_s5, %s840_s1 }
  0x11   : > { %p529_p11 = scmp.lt.s32.totalorder %s527_s9, %s522_s6 }
  0x12   : > { %p525_p8 = pnand %p524_p7, %p523_p6 }
  0x13   : > { %p530_p12 = por %p529_p11, %p528_p10 }
  0x14   : > { %p526_p9 = pneg %p525_p8 }
  0x16   : > { %p531_p13 = pnand %p530_p12, %p526_p9 }
  0x18   : > { %534 = shalt.err (!%p531_p13)
}
  0x19   : > { %s650_s17 = smov 512   ;;  %s651_s18 = smov 256  }
  0x1a   : > { %s652_s20 = smov 16   ;;  %s736_s22 = sadd.s32 4294967295, %s648_s15  }
  0x1b   : > { %477 = dma.hbm_to_vmem [thread:$0]  (!%p715_p5), %s157_s28, 3328, %s159_s30, %s719_s4, %s650_s17, %s651_s18, %s652_s20  }
  0x1c   : > { %p58_p0 = scmp.ne.s32.totalorder %s640_s13, %s636_s12  ;;  %p59_p1 = scmp.eq.s32.totalorder %s736_s22, 0 }
  0x1d   : > { %p441_p2 = scmp.ge.s32.totalorder %s648_s15, 1  ;;  %p121_p3 = scmp.lt.s32.totalorder %s648_s15, 3 }
  0x1e   : > { %p745_p4 = por %p59_p1, %p58_p0  ;;  %s133_s28 = sshll.u32 %s839_s0, 4  ;;  %s134_s28 = int_to_ptr.hbm [resolvable:$true] %s133_s28 }
  0x1f   : > { %p749_p6 = pnand %p441_p2, %p121_p3  ;;  %s653_s12 = smov [#allocation2]  }
  0x20   : > { %s135_s29 = sshll.u32 %s653_s12, 4  ;;  %s446_s30 = sshll.u32 %s148_s21, 1  ;;  %s136_s29 = int_to_ptr.vmem [resolvable:$true] %s135_s29 }
  0x21   : > { %p470_p8 = pneg %p749_p6  ;;  %s447_s5 = sshll.u32 %s648_s15, 1 }
  0x22   : > { %s172_s6 = scalar_lea.vmem [#allocation6], %s446_s30  ;;  %s176_s10 = scalar_lea.hbm %s841_s2, %s447_s5 }
  0x23   : > { %p471_p9 = pnand %p470_p8, %p59_p1  ;;  %s180_s7 = sshll.u32 %s172_s6, 4  ;;  %s181_s7 = int_to_ptr.vmem [resolvable:$true] %s180_s7 }
  0x24   : > { %s178_s11 = sshll.u32 %s176_s10, 4  ;;  %s587_s20 = scalar_lea.hbm %s841_s2, 4  ;;  %s179_s11 = int_to_ptr.hbm [resolvable:$true] %s178_s11 }
  0x25   : > { %473 = dma.hbm_to_vmem [thread:$0]  (!%p471_p9), %s134_s28, 32, %s136_s29, [#allocation3]  }
  0x26   : > { %s580_s17 = sshra.s32 %s179_s11, 4  ;;  %s581_s17 = int_to_ptr.hbm [resolvable:$true] %s580_s17 }
  0x27   : > { %s582_s18 = scalar_lea.hbm %s581_s17, 2  ;;  %p588_p13 = scmp.lt.s32.totalorder %s581_s17, %s841_s2 }
  0x28   : > { %p583_p10 = scmp.ne.s32.totalorder %s581_s17, %s582_s18  ;;  %p589_p0 = scmp.lt.s32.totalorder %s587_s20, %s582_s18 }
  0x2a   : > { %p585_p11 = pnand %p583_p10, %p524_p7  ;;  %p590_p2 = por %p589_p0, %p588_p13 }
  0x2c   : > { %p586_p12 = pneg %p585_p11 }
  0x2e   : > { %p591_p3 = pnand %p590_p2, %p586_p12 }
  0x30   : > { %594 = shalt.err (!%p591_p3)
}
  0x31   : > { %480 = dma.hbm_to_vmem [thread:$0]  (!%p715_p5), %s179_s11, 32, %s181_s7, %s719_s4  }
  0x32   : > { %189 = sbr.rel (%p749_p6) target bundleno = 221 (0xdd), region = 32 }
  0x37   : > { %627 = dma.done.wait (%p59_p1), [#allocation3], 32  }
  0x38   : > { %629 = vsyncadd (%p59_p1), [#allocation3], 4294967264  ;;  %s196_s28 = sand.u32 1, %s736_s22   ;;  %s198_s12 = sand.u32 1, %s640_s13  }
  0x39   : > { %s461_s29 = smul.u32 208, %s198_s12  ;;  %s197_s27 = scalar_lea.sflag [#allocation5], %s196_s28 }
  0x3b   : > { %s788_s30 = scalar_lea.vmem [#allocation4], %s461_s29 }
  0x3c   : > { %631 = dma.done.wait (%p745_p4), %s197_s27, 3360  }
  0x3d   : > { %633 = vsyncadd (%p745_p4), %s197_s27, 4294963936  ;;  %vm284_vm0 = vcmask 1043456   ;;  %v273_v0 = vld [vmem:[%s788_s30 + $0xc8] sm:$0xf]  ;;  %v272_v1 = vld [vmem:[%s788_s30 + $0xc0] sm:$0xf] }
  0x3e   : > { %v271_v2 = vld [vmem:[%s788_s30 + $0xb8] sm:$0xff]  ;;  %455 = vmatpush.msk.msra.mxu1 %vm284_vm0, %v273_v0  ;;  %453 = vmatpush.msk.msra.mxu0 %vm284_vm0, %v272_v1  ;;  %v270_v3 = vld [vmem:[%s788_s30 + $0xb0] sm:$0xff]  ;;  %v269_v4 = vld [vmem:[%s788_s30 + $0xa8] sm:$0xff]  ;;  %vm280_vm1 = vcmask 818176   ;;  %s450_s4 = sshll.u32 %s198_s12, 1  ;;  %s451_s23 = sshll.u32 %s736_s22, 1 }
  0x3f   : > { %v268_v5 = vld [vmem:[%s788_s30 + $0xa0] sm:$0xff]  ;;  %v267_v6 = vld [vmem:[%s788_s30 + $0x98] sm:$0xff]  ;;  %v266_v7 = vld [vmem:[%s788_s30 + $0x90] sm:$0xff]  ;;  %s210_s24 = scalar_lea.vmem [#allocation6], %s450_s4  ;;  %p242_p5 = scmp.lt.s32.totalorder %s451_s23, 3  ;;  %vm336_vm2 = vcmask 1041408  }
  0x40   : > { %315 = vmatpush.msra.mxu1 %v271_v2  ;;  %295 = vmatpush.msra.mxu0 %v270_v3  ;;  %v265_v8 = vld [vmem:[%s788_s30 + $0x88] sm:$0xff]  ;;  %v264_v9 = vld [vmem:[%s788_s30 + $0x80] sm:$0xff]  ;;  %v263_v10 = vld [vmem:[%s788_s30 + $0x78] sm:$0xff] }
  0x41   : > { %v262_v11 = vld [vmem:[%s788_s30 + $0x70] sm:$0xff]  ;;  %v261_v12 = vld [vmem:[%s788_s30 + $0x68] sm:$0xff]  ;;  %v260_v13 = vld [vmem:[%s788_s30 + $0x60] sm:$0xff]  ;;  %s851_s23 = smov (!%p242_p5, %s451_s23), 3 }
  0x42   : > { %316 = vmatpush.msra.mxu1 %v269_v4  ;;  %296 = vmatpush.msra.mxu0 %v268_v5  ;;  %v259_v14 = vld [vmem:[%s788_s30 + $0x58] sm:$0xff]  ;;  %v258_v15 = vld [vmem:[%s788_s30 + $0x50] sm:$0xff]  ;;  %v257_v16 = vld [vmem:[%s788_s30 + $0x48] sm:$0xff]  ;;  %s452_s5 = sshll.u32 %s851_s23, 1 }
  0x43   : > { %v256_v17 = vld [vmem:[%s788_s30 + $0x40] sm:$0xff]  ;;  %v255_v18 = vld [vmem:[%s788_s30 + $0x38] sm:$0xff]  ;;  %v254_v19 = vld [vmem:[%s788_s30 + $0x30] sm:$0xff]  ;;  %s245_s8 = scalar_lea.vmem %s842_s3, %s452_s5 }
  0x44   : > { %317 = vmatpush.msra.mxu1 %v267_v6  ;;  %297 = vmatpush.msra.mxu0 %v266_v7  ;;  %v253_v20 = vld [vmem:[%s788_s30 + $0x28] sm:$0xff]  ;;  %v252_v21 = vld [vmem:[%s788_s30 + $0x20] sm:$0xff]  ;;  %v251_v22 = vld [vmem:[%s788_s30 + $0x18] sm:$0xff] }
  0x45   : > { %v250_v23 = vld [vmem:[%s788_s30 + $0x10] sm:$0xff]  ;;  %v249_v24 = vld [vmem:[%s788_s30 + $0x8] sm:$0xff]  ;;  %v248_v25 = vld [vmem:[%s788_s30] sm:$0xff] }
  0x46   : > { %318 = vmatpush.msra.mxu1 %v265_v8  ;;  %298 = vmatpush.msra.mxu0 %v264_v9  ;;  %v247_v26 = vld [vmem:[#allocation2] sm:$0x3]  ;;  %v274_v27 = vld [vmem:[%s210_s24] sm:$0x3] }
  0x47   : > { %v277_v28 = vperm.slane %v274_v27, 1  ;;  %v276_v29 = vperm.slane %v274_v27, 0 }
  0x48   : > { %319 = vmatpush.msra.mxu1 %v263_v10  ;;  %299 = vmatpush.msra.mxu0 %v262_v11 }
  0x4a   : > { %320 = vmatpush.msra.mxu1 %v261_v12  ;;  %300 = vmatpush.msra.mxu0 %v260_v13 }
  0x4c   : > { %321 = vmatpush.msra.mxu1 %v259_v14  ;;  %301 = vmatpush.msra.mxu0 %v258_v15 }
  0x4e   : > { %322 = vmatpush.msra.mxu1 %v257_v16  ;;  %302 = vmatpush.msra.mxu0 %v256_v17 }
  0x50   : > { %323 = vmatpush.msra.mxu1 %v255_v18  ;;  %303 = vmatpush.msra.mxu0 %v254_v19 }
  0x52   : > { %324 = vmatpush.msra.mxu1 %v253_v20  ;;  %304 = vmatpush.msra.mxu0 %v252_v21 }
  0x54   : > { %325 = vmatpush.msra.mxu1 %v251_v22  ;;  %305 = vmatpush.msra.mxu0 %v250_v23 }
  0x56   : > { %326 = vmatpush.msra.mxu1 %v249_v24  ;;  %306 = vmatpush.msra.mxu0 %v248_v25 }
  0x57   : > { %456 = vmatmul.msk.f32.vlgmr.msra.gmra.mxu1 %vm280_vm1, %v247_v26  ;;  %454 = vmatmul.msk.f32.vlgmr.msra.gmra.mxu0 %vm280_vm1, %v247_v26 }
  0xd4   : > { %v328_v30 = vpop.f32.mrf.mxu1  ;;  %v308_v31 = vpop.f32.mrf.mxu0 }
  0xd5   : > { %v329_v32 = vadd.f32 %v328_v30, %v277_v28  ;;  %v309_v33 = vadd.f32 %v308_v31, %v276_v29 }
  0xd7   : > { %v332_v34 = vmax.f32 %v329_v32, 0.0  ;;  %v331_v35 = vmax.f32 %v309_v33, 0.0 }
  0xd9   : > { %v335_v36 = vrot.slane %v332_v34, 6 }
  0xdb   : > { %v337_v37 = vsel %vm336_vm2, %v331_v35, %v335_v36 }
  0xdc   : > { %339 = vst [vmem:[%s245_s8] sm:$0xf] %v337_v37 }
  0xdd PF: > { %p14_p7 = scmp.ge.s32.totalorder %s695_s16, 4   ;;  %s846_s12 = smov %s640_s13 }
  0xde   : > { %s847_s13 = smov %s644_s14  ;;  %s848_s14 = smov %s705_s19 }
  0xdf   : > { %s849_s15 = smov %s695_s16  ;;  %16 = sbr.rel (!%p14_p7) target bundleno = 4 (0x4), region = 88 }
  0xe4   :  { %362 = vsyncpa [#allocation3], 1 }
  0xe5   :  { %364 = vsyncpa [#allocation3 + $0x1], 1 }
  0xe6   :  { %365 = vsyncpa [#allocation5], 1 }
  0xe7   :  { %367 = vsyncpa [#allocation5 + $0x1], 1 }

// kernel: wavegan_generator.8
= control target key start
LH: loop header
LB: loop body
LE: loop exit
PB: predicated region body
PF: predicated region fallthrough
CT: control target
= control target key end

     0   :  { %s799_s12 = smov 0   ;;  %s954_s0 = inlined_call_operand.vmem [shape: f32[2,16,70], index: 0, kind: input, shape index: {}]   ;;  %s955_s1 = inlined_call_operand.vmem [shape: f32[7,32,16], index: 1, kind: input, shape index: {}]   ;;  %s956_s2 = inlined_call_operand.vmem [shape: f32[32,1], index: 2, kind: input, shape index: {}]   ;;  %s957_s3 = inlined_call_operand.vmem [shape: f32[2,32,64], index: 3, kind: output, shape index: {}]  }
   0x1 LB: > { %s645_s13 = sadd.s32 4294967295, %s770_s12   ;;  %p649_p0 = scmp.ge.s32.totalorder %s770_s12, 1  ;;  %s770_s12 = sphi %s799_s12, %s13_s12  }
   0x2   : > { %p137_p1 = scmp.lt.s32.totalorder %s770_s12, 3 }
   0x4   : > { %p138_p2 = pnand %p649_p0, %p137_p1 }
   0x5   : > { %p161_p3 = scmp.lt.s32.totalorder (!%p138_p2), %s645_s13, 1  ;;  %s772_s18 = smov (!%p138_p2), 127  }
   0x6   : > { %141 = sbr.rel (%p138_p2) target bundleno = 333 (0x14d), region = 32  ;;  %s773_s19 = smov (!%p138_p2), 125  }
   0x7   : > { %s774_s20 = smov (!%p138_p2), 124   ;;  %s775_s21 = smov (!%p138_p2), 126  }
   0x8   : > { %s776_s22 = smov (!%p138_p2), 122   ;;  %s777_s23 = smov (!%p138_p2), 123  }
   0xb   : > { %s959_s13 = smov (!%p161_p3, %s645_s13), 1  ;;  %vm190_vm0 = vcmask 130048   ;;  %v172_v4 = vld [vmem:[%s955_s1 + $0x8] sm:$0xff]  ;;  %v173_v8 = vld [vmem:[%s955_s1 + $0x10] sm:$0xff]  ;;  %v174_v9 = vld [vmem:[%s955_s1 + $0x18] sm:$0xff]  ;;  %v778_v36 = vmov 0  }
   0xc   : > { %s708_s14 = sshll.u32 %s959_s13, 4  ;;  %v654_v14 = vld [vmem:[%s955_s1 + $0x20] sm:$0xff]  ;;  %v655_v15 = vld [vmem:[%s955_s1 + $0x28] sm:$0xff]  ;;  %v656_v24 = vld [vmem:[%s955_s1 + $0x30] sm:$0xff]  ;;  %761 = vset.pattern.permute.xlu0 %v778_v36  ;;  %762 = vset.pattern.permute.xlu1 %v778_v36  ;;  %s709_s11 = sshll.u32 %s959_s13, 5  ;;  %vm585_vm1 = vcmask 523264  }
   0xd   : > { %s165_s17 = scalar_lea.vmem %s954_s0, %s708_s14  ;;  %v690_v18 = vld [vmem:[%s955_s1 + $0xa0] sm:$0xff]  ;;  %v667_v26 = vld [vmem:[%s955_s1 + $0x48] sm:$0xff]  ;;  %v657_v31 = vld [vmem:[%s955_s1 + $0x38] sm:$0xff]  ;;  %763 = vset.pattern.permute.xlu2 %v778_v36  ;;  %s941_s16 = scalar_lea.vmem %s957_s3, %s709_s11 }
   0xe   : > { %v175_v0 = vld [vmem:[%s165_s17] sm:$0xff]  ;;  %v176_v1 = vld [vmem:[%s165_s17 + $0x8] sm:$0xff]  ;;  %v668_v33 = vld [vmem:[%s955_s1 + $0x50] sm:$0xff] }
   0xf   : > { %v731_v2 = vpack.i.bf16 %v175_v0, %v176_v1  ;;  %712 = vmatpush.msra.mxu1 %v176_v1  ;;  %v171_v25 = vld [vmem:[%s955_s1] sm:$0xff]  ;;  %v691_v30 = vld [vmem:[%s955_s1 + $0xa8] sm:$0xff]  ;;  %v692_v34 = vld [vmem:[%s955_s1 + $0xb0] sm:$0xff] }
  0x10   : > { %v666_v32 = vld [vmem:[%s955_s1 + $0x40] sm:$0xff]  ;;  %v669_v39 = vld [vmem:[%s955_s1 + $0x58] sm:$0xff]  ;;  %v554_v41 = vld [vmem:[%s956_s2 + $0x8] sm:$0xff] }
  0x11   : > { %732 = vrot.lane.b32.xlu0 %v731_v2, %s772_s18  ;;  %742 = vrot.lane.b32.xlu1 %v731_v2, %s773_s19  ;;  %v553_v35 = vld [vmem:[%s956_s2] sm:$0xff]  ;;  %v693_v40 = vld [vmem:[%s955_s1 + $0xb8] sm:$0xff] }
  0x12   : > { %752 = vrot.lane.b32.xlu2 %v731_v2, %s774_s20  ;;  %713 = vmatpush.msra.mxu1 %v175_v0  ;;  %v674_v37 = vld [vmem:[%s955_s1 + $0x60] sm:$0xff]  ;;  %v555_v42 = vld [vmem:[%s956_s2 + $0x10] sm:$0xff]  ;;  %v675_v43 = vld [vmem:[%s955_s1 + $0x68] sm:$0xff] }
  0x13   : > { %663 = vmatmul.msk.f32.vlgmr.msra.gmra.mxu1 %vm190_vm0, %v172_v4  ;;  %v682_v38 = vld [vmem:[%s955_s1 + $0x80] sm:$0xff]  ;;  %v683_v44 = vld [vmem:[%s955_s1 + $0x88] sm:$0xff]  ;;  %v556_v46 = vld [vmem:[%s956_s2 + $0x18] sm:$0xff] }
  0x14   : > { %v698_v45 = vld [vmem:[%s955_s1 + $0xc0] sm:$0xff]  ;;  %v676_v47 = vld [vmem:[%s955_s1 + $0x70] sm:$0xff]  ;;  %v699_v49 = vld [vmem:[%s955_s1 + $0xc8] sm:$0xff] }
  0x15   : > { %v684_v48 = vld [vmem:[%s955_s1 + $0x90] sm:$0xff]  ;;  %v677_v50 = vld [vmem:[%s955_s1 + $0x78] sm:$0xff] }
  0x16   : > { %v685_v51 = vld [vmem:[%s955_s1 + $0x98] sm:$0xff]  ;;  %v700_v52 = vld [vmem:[%s955_s1 + $0xd0] sm:$0xff] }
  0x17   : > { %v701_v53 = vld [vmem:[%s955_s1 + $0xd8] sm:$0xff] }
  0x19   : > { %737 = vrot.lane.b32.xlu0 %v731_v2, %s775_s21  ;;  %747 = vrot.lane.b32.xlu1 %v731_v2, %s776_s22 }
  0x1a   : > { %757 = vrot.lane.b32.xlu2 %v731_v2, %s777_s23 }
  0x1b   : > { %664 = vmatmul.msk.f32.gmra.mxu1 %vm190_vm0, %v173_v8 }
  0x21   : > { %559 = vperm.xlu0 %761, %v553_v35   ;;  %564 = vperm.xlu1 %762, %v554_v41  }
  0x22   : > { %569 = vperm.xlu2 %763, %v555_v42  }
  0x23   : > { %665 = vmatmul.msk.f32.gmra.mxu1 %vm190_vm0, %v174_v9 }
  0x29   : > { %574 = vperm.xlu1 %762, %v556_v46  }
  0x6c   : > { %v753_v3 = vpop.permute.xlu2 %752 }
  0x6d   : > { %v754_v22 = vunpack.i.l.bf16 %v753_v3  ;;  %v755_v28 = vunpack.i.h.bf16 %v753_v3 }
  0x74   : > { %v758_v5 = vpop.permute.xlu2 %757 }
  0x75   : > { %v759_v6 = vunpack.i.l.bf16 %v758_v5  ;;  %v760_v7 = vunpack.i.h.bf16 %v758_v5 }
  0x77   : > { %478 = vmatpush.msrb.mxu1 %v759_v6 }
  0x79   : > { %479 = vmatpush.msrb.mxu1 %v760_v7 }
  0x7a   : > { %694 = vmatmul.msk.f32.vlgmr.msrb.gmra.mxu1 %vm190_vm0, %v690_v18 }
  0x82   : > { %695 = vmatmul.msk.f32.gmra.mxu1 %vm190_vm0, %v691_v30 }
  0x83   : > { %v733_v10 = vpop.permute.xlu0 %732  ;;  %v743_v11 = vpop.permute.xlu1 %742 }
  0x84   : > { %v734_v12 = vunpack.i.l.bf16 %v733_v10  ;;  %v735_v13 = vunpack.i.h.bf16 %v733_v10  ;;  %v744_v16 = vunpack.i.l.bf16 %v743_v11  ;;  %v745_v17 = vunpack.i.h.bf16 %v743_v11 }
  0x86   : > { %217 = vmatpush.msra.mxu0 %v734_v12  ;;  %710 = vmatpush.msra.mxu3 %v734_v12 }
  0x88   : > { %218 = vmatpush.msra.mxu0 %v735_v13  ;;  %711 = vmatpush.msra.mxu3 %v735_v13 }
  0x89   : > { %658 = vmatmul.msk.f32.vlgmr.msra.gmra.mxu0 %vm190_vm0, %v654_v14  ;;  %659 = vmatmul.msk.f32.vlgmr.msra.gmra.mxu3 %vm190_vm0, %v655_v15 }
  0x8a   : > { %366 = vmatpush.msrb.mxu3 %v744_v16  ;;  %258 = vmatpush.msrb.mxu0 %v176_v1 }
  0x8b   : > { %v738_v19 = vpop.permute.xlu0 %737  ;;  %v748_v21 = vpop.permute.xlu1 %747  ;;  %696 = vmatmul.msk.f32.gmra.mxu1 %vm190_vm0, %v692_v34 }
  0x8c   : > { %v739_v20 = vunpack.i.l.bf16 %v738_v19  ;;  %367 = vmatpush.msrb.mxu3 %v745_v17  ;;  %259 = vmatpush.msrb.mxu0 %v175_v0  ;;  %v740_v23 = vunpack.i.h.bf16 %v738_v19  ;;  %v749_v27 = vunpack.i.l.bf16 %v748_v21  ;;  %v750_v29 = vunpack.i.h.bf16 %v748_v21 }
  0x8e   : > { %310 = vmatpush.msra.mxu0 %v739_v20  ;;  %714 = vmatpush.msra.mxu2 %v739_v20 }
  0x90   : > { %311 = vmatpush.msra.mxu0 %v740_v23  ;;  %715 = vmatpush.msra.mxu2 %v740_v23  ;;  %v264_v55 = vpop.f32.mrf.mxu1 }
  0x91   : > { %660 = vmatmul.msk.f32.gmra.mxu3 %vm190_vm0, %v656_v24  ;;  %662 = vmatmul.msk.f32.vlgmr.msrb.gmra.mxu0 %vm190_vm0, %v171_v25 }
  0x92   : > { %671 = vmatmul.msk.f32.vlgmr.msra.gmra.mxu2 %vm190_vm0, %v667_v26  ;;  %422 = vmatpush.msrb.mxu0 %v754_v22 }
  0x93   : > { %534 = vmatpush.msrb.mxu2 %v749_v27  ;;  %697 = vmatmul.msk.f32.gmra.mxu1 %vm190_vm0, %v693_v40  ;;  %v560_v14 = vpop.permute.xlu0 %559 }
  0x94   : > { %423 = vmatpush.msrb.mxu0 %v755_v28 }
  0x95   : > { %535 = vmatpush.msrb.mxu2 %v750_v29  ;;  %v565_v29 = vpop.permute.xlu1 %564 }
  0x98   : > { %v267_v58 = vpop.f32.mrf.mxu1 }
  0x99   : > { %661 = vmatmul.msk.f32.gmra.mxu3 %vm190_vm0, %v657_v31  ;;  %670 = vmatmul.msk.f32.vlgmr.msra.gmra.mxu0 %vm190_vm0, %v666_v32 }
  0x9a   : > { %672 = vmatmul.msk.f32.gmra.mxu2 %vm190_vm0, %v668_v33 }
  0xa0   : > { %v270_v62 = vpop.f32.mrf.mxu1 }
  0xa1   : > { %678 = vmatmul.msk.f32.vlgmr.msrb.gmra.mxu3 %vm190_vm0, %v674_v37  ;;  %686 = vmatmul.msk.f32.vlgmr.msrb.gmra.mxu0 %vm190_vm0, %v682_v38 }
  0xa2   : > { %673 = vmatmul.msk.f32.gmra.mxu2 %vm190_vm0, %v669_v39  ;;  %v570_v39 = vpop.permute.xlu2 %569 }
  0xa9   : > { %679 = vmatmul.msk.f32.gmra.mxu3 %vm190_vm0, %v675_v43  ;;  %687 = vmatmul.msk.f32.gmra.mxu0 %vm190_vm0, %v683_v44 }
  0xaa   : > { %702 = vmatmul.msk.f32.vlgmr.msrb.gmra.mxu2 %vm190_vm0, %v698_v45 }
  0xb1   : > { %680 = vmatmul.msk.f32.gmra.mxu3 %vm190_vm0, %v676_v47  ;;  %688 = vmatmul.msk.f32.gmra.mxu0 %vm190_vm0, %v684_v48 }
  0xb2   : > { %703 = vmatmul.msk.f32.gmra.mxu2 %vm190_vm0, %v699_v49 }
  0xb9   : > { %681 = vmatmul.msk.f32.gmra.mxu3 %vm190_vm0, %v677_v50  ;;  %689 = vmatmul.msk.f32.gmra.mxu0 %vm190_vm0, %v685_v51  ;;  %v575_v51 = vpop.permute.xlu1 %574 }
  0xba   : > { %704 = vmatmul.msk.f32.gmra.mxu2 %vm190_vm0, %v700_v52 }
  0xc2   : > { %705 = vmatmul.msk.f32.gmra.mxu2 %vm190_vm0, %v701_v53 }
  0xf7   : > { %v481_v4 = vpop.f32.mrf.mxu1 }
  0xff   : > { %v484_v17 = vpop.f32.mrf.mxu1 }
 0x106   : > { %v220_v54 = vpop.f32.mrf.mxu0 }
 0x108   : > { %v487_v31 = vpop.f32.mrf.mxu1 }
 0x10c   : > { %v223_v56 = vpop.f32.mrf.mxu3 }
 0x10d   : > { %v265_v9 = vadd.f32 %v264_v55, %v223_v56 }
 0x10e   : > { %v261_v57 = vpop.f32.mrf.mxu0 }
 0x10f   : > { %v262_v2 = vadd.f32 %v261_v57, %v220_v54 }
 0x110   : > { %v490_v46 = vpop.f32.mrf.mxu1 }
 0x114   : > { %v226_v59 = vpop.f32.mrf.mxu3 }
 0x115   : > { %v316_v60 = vpop.f32.mrf.mxu2  ;;  %v268_v21 = vadd.f32 %v267_v58, %v226_v59 }
 0x116   : > { %v313_v61 = vpop.f32.mrf.mxu0  ;;  %v326_v11 = vadd.f32 %v316_v60, %v265_v9 }
 0x117   : > { %v325_v3 = vadd.f32 %v313_v61, %v262_v2 }
 0x11c   : > { %v229_v63 = vpop.f32.mrf.mxu3 }
 0x11d   : > { %v319_v0 = vpop.f32.mrf.mxu2  ;;  %v271_v34 = vadd.f32 %v270_v62, %v229_v63 }
 0x11e   : > { %v425_v1 = vpop.f32.mrf.mxu0  ;;  %v327_v23 = vadd.f32 %v319_v0, %v268_v21 }
 0x124   : > { %v369_v5 = vpop.f32.mrf.mxu3 }
 0x125   : > { %v322_v6 = vpop.f32.mrf.mxu2  ;;  %v381_v7 = vadd.f32 %v369_v5, %v325_v3 }
 0x126   : > { %v428_v10 = vpop.f32.mrf.mxu0  ;;  %v328_v36 = vadd.f32 %v322_v6, %v271_v34 }
 0x127   : > { %v437_v8 = vadd.f32 %v425_v1, %v381_v7 }
 0x129   : > { %v493_v12 = vadd.f32 %v481_v4, %v437_v8 }
 0x12c   : > { %v372_v13 = vpop.f32.mrf.mxu3 }
 0x12d   : > { %v382_v15 = vadd.f32 %v372_v13, %v326_v11  ;;  %v537_v16 = vpop.f32.mrf.mxu2 }
 0x12e   : > { %v549_v18 = vadd.f32 %v537_v16, %v493_v12  ;;  %v431_v24 = vpop.f32.mrf.mxu0 }
 0x12f   : > { %v438_v20 = vadd.f32 %v428_v10, %v382_v15 }
 0x130   : > { %v577_v19 = vadd.f32 %v560_v14, %v549_v18 }
 0x131   : > { %v494_v25 = vadd.f32 %v484_v17, %v438_v20 }
 0x132   : > { %v581_v22 = vmax.f32 %v577_v19, 0.0 }
 0x134   : > { %586 = vst.msk [vmem:[%s941_s16] sm:$0xff] %vm585_vm1, %v581_v22  ;;  %v375_v26 = vpop.f32.mrf.mxu3 }
 0x135   : > { %v383_v27 = vadd.f32 %v375_v26, %v327_v23  ;;  %v540_v28 = vpop.f32.mrf.mxu2 }
 0x136   : > { %v550_v30 = vadd.f32 %v540_v28, %v494_v25  ;;  %v434_v42 = vpop.f32.mrf.mxu0 }
 0x137   : > { %v439_v33 = vadd.f32 %v431_v24, %v383_v27 }
 0x138   : > { %v578_v32 = vadd.f32 %v565_v29, %v550_v30 }
 0x139   : > { %v495_v37 = vadd.f32 %v487_v31, %v439_v33 }
 0x13a   : > { %v582_v35 = vmax.f32 %v578_v32, 0.0 }
 0x13c   : > { %587 = vst.msk [vmem:[%s941_s16 + $0x8] sm:$0xff] %vm585_vm1, %v582_v35  ;;  %v378_v38 = vpop.f32.mrf.mxu3 }
 0x13d   : > { %v384_v40 = vadd.f32 %v378_v38, %v328_v36  ;;  %v543_v41 = vpop.f32.mrf.mxu2 }
 0x13e   : > { %v551_v43 = vadd.f32 %v543_v41, %v495_v37 }
 0x13f   : > { %v440_v45 = vadd.f32 %v434_v42, %v384_v40 }
 0x140   : > { %v579_v44 = vadd.f32 %v570_v39, %v551_v43 }
 0x141   : > { %v496_v48 = vadd.f32 %v490_v46, %v440_v45 }
 0x142   : > { %v583_v47 = vmax.f32 %v579_v44, 0.0 }
 0x144   : > { %588 = vst.msk [vmem:[%s941_s16 + $0x10] sm:$0xff] %vm585_vm1, %v583_v47 }
 0x145   : > { %v546_v49 = vpop.f32.mrf.mxu2 }
 0x146   : > { %v552_v50 = vadd.f32 %v546_v49, %v496_v48 }
 0x148   : > { %v580_v52 = vadd.f32 %v575_v51, %v552_v50 }
 0x14a   : > { %v584_v53 = vmax.f32 %v580_v52, 0.0 }
 0x14c   : > { %589 = vst.msk [vmem:[%s941_s16 + $0x18] sm:$0xff] %vm585_vm1, %v584_v53 }
 0x14d PF: > { %s13_s12 = sadd.s32 1, %s770_s12  }
 0x14e   : > { %p10_p4 = scmp.ge.s32.totalorder %s13_s12, 4  }
 0x150   :  { %12 = sbr.rel (!%p10_p4) target bundleno = 1 (0x1), region = 68 }

// kernel: wavegan_generator.7
= control target key start
LH: loop header
LB: loop body
LE: loop exit
PB: predicated region body
PF: predicated region fallthrough
CT: control target
= control target key end

     0   :  { %s1179_s12 = smov 0   ;;  %s1515_s0 = inlined_call_operand.vmem [shape: f32[2,32,22], index: 0, kind: input, shape index: {}]   ;;  %s1516_s1 = inlined_call_operand.vmem [shape: f32[7,64,32], index: 1, kind: input, shape index: {}]   ;;  %s1517_s2 = inlined_call_operand.vmem [shape: f32[64,1], index: 2, kind: input, shape index: {}]   ;;  %s1518_s3 = inlined_call_operand.vmem [shape: f32[2,64,16], index: 3, kind: output, shape index: {}]  }
   0x1 LB: > { %s937_s13 = sadd.s32 4294967295, %s1150_s12   ;;  %p941_p0 = scmp.ge.s32.totalorder %s1150_s12, 1  ;;  %s1150_s12 = sphi %s1179_s12, %s13_s12  }
   0x2   : > { %p137_p1 = scmp.lt.s32.totalorder %s1150_s12, 3 }
   0x4   : > { %p138_p2 = pnand %p941_p0, %p137_p1 }
   0x5   : > { %p161_p3 = scmp.lt.s32.totalorder (!%p138_p2), %s937_s13, 1  ;;  %s1152_s18 = smov (!%p138_p2), 127  }
   0x6   : > { %141 = sbr.rel (%p138_p2) target bundleno = 394 (0x18a), region = 32  ;;  %s1153_s19 = smov (!%p138_p2), 126  }
   0x7   : > { %s1154_s20 = smov (!%p138_p2), 125   ;;  %s1155_s21 = smov (!%p138_p2), 122  }
   0x8   : > { %s1156_s22 = smov (!%p138_p2), 124   ;;  %s1157_s23 = smov (!%p138_p2), 123  }
   0xb   : > { %s1520_s13 = smov (!%p161_p3, %s937_s13), 1  ;;  %vm208_vm0 = vcmask 261120   ;;  %v171_v8 = vld [vmem:[%s1516_s1] sm:$0xff]  ;;  %v172_v12 = vld [vmem:[%s1516_s1 + $0x8] sm:$0xff]  ;;  %v173_v19 = vld [vmem:[%s1516_s1 + $0x10] sm:$0xff]  ;;  %vm873_vm1 = vcmask 130048  }
   0xc   : > { %s1052_s14 = sshll.u32 %s1520_s13, 5  ;;  %v952_v26 = vld [vmem:[%s1516_s1 + $0x70] sm:$0xff]  ;;  %v970_v27 = vld [vmem:[%s1516_s1 + $0x80] sm:$0xff]  ;;  %v174_v30 = vld [vmem:[%s1516_s1 + $0x18] sm:$0xff]  ;;  %s1053_s27 = sshll.u32 %s1520_s13, 6 }
   0xd   : > { %s165_s17 = scalar_lea.vmem %s1515_s0, %s1052_s14  ;;  %v946_v29 = vld [vmem:[%s1516_s1 + $0x40] sm:$0xff]  ;;  %v953_v39 = vld [vmem:[%s1516_s1 + $0x78] sm:$0xff]  ;;  %v971_v40 = vld [vmem:[%s1516_s1 + $0x88] sm:$0xff]  ;;  %s1487_s30 = scalar_lea.vmem %s1518_s3, %s1053_s27 }
   0xe   : > { %v1193_v0 = vld [vmem:[%s165_s17 + $0x10] sm:$0xff]  ;;  %v1195_v1 = vld [vmem:[%s165_s17 + $0x18] sm:$0xff]  ;;  %v1200_v3 = vld [vmem:[%s165_s17] sm:$0xff] }
   0xf   : > { %v1081_v2 = vpack.i.bf16 %v1193_v0, %v1195_v1  ;;  %310 = vmatpush.msra.mxu1 %v1195_v1  ;;  %v1202_v4 = vld [vmem:[%s165_s17 + $0x8] sm:$0xff]  ;;  %v175_v42 = vld [vmem:[%s1516_s1 + $0x20] sm:$0xff]  ;;  %v177_v50 = vld [vmem:[%s1516_s1 + $0x30] sm:$0xff] }
  0x10   : > { %v1086_v5 = vpack.i.bf16 %v1200_v3, %v1202_v4  ;;  %v947_v41 = vld [vmem:[%s1516_s1 + $0x48] sm:$0xff]  ;;  %v972_v51 = vld [vmem:[%s1516_s1 + $0x90] sm:$0xff]  ;;  %v178_v57 = vld [vmem:[%s1516_s1 + $0x38] sm:$0xff] }
  0x11   : > { %1082 = vrot.lane.b32.xlu0 %v1081_v2, %s1152_s18  ;;  %1092 = vrot.lane.b32.xlu1 %v1081_v2, %s1153_s19  ;;  %v948_v52 = vld [vmem:[%s1516_s1 + $0x50] sm:$0xff]  ;;  %v176_v54 = vld [vmem:[%s1516_s1 + $0x28] sm:$0xff] }
  0x12   : > { %1102 = vrot.lane.b32.xlu2 %v1081_v2, %s1154_s20  ;;  %311 = vmatpush.msra.mxu1 %v1193_v0  ;;  %v973_v58 = vld [vmem:[%s1516_s1 + $0x98] sm:$0xff]  ;;  %v1018_v60 = vld [vmem:[%s1516_s1 + $0x140] sm:$0xff]  ;;  %v976_v61 = vld [vmem:[%s1516_s1 + $0xb0] sm:$0xff] }
  0x13   : > { %v949_v59 = vld [vmem:[%s1516_s1 + $0x58] sm:$0xff]  ;;  %v974_v62 = vld [vmem:[%s1516_s1 + $0xa0] sm:$0xff] }
  0x14   : > { %312 = vmatpush.msra.mxu1 %v1202_v4  ;;  %v950_v63 = vld [vmem:[%s1516_s1 + $0x60] sm:$0xff] }
  0x16   : > { %313 = vmatpush.msra.mxu1 %v1200_v3 }
  0x17   : > { %962 = vmatmul.msk.f32.vlgmr.msra.gmra.mxu1 %vm208_vm0, %v171_v8  ;;  %v1034_v8 = vld [vmem:[%s1516_s1 + $0x180] sm:$0xff] }
  0x19   : > { %1087 = vrot.lane.b32.xlu0 %v1086_v5, %s1152_s18  ;;  %1097 = vrot.lane.b32.xlu1 %v1086_v5, %s1153_s19 }
  0x1a   : > { %1107 = vrot.lane.b32.xlu2 %v1086_v5, %s1154_s20 }
  0x1f   : > { %963 = vmatmul.msk.f32.gmra.mxu1 %vm208_vm0, %v172_v12  ;;  %v987_v12 = vld [vmem:[%s1516_s1 + $0xc8] sm:$0xff] }
  0x21   : > { %1112 = vrot.lane.b32.xlu0 %v1081_v2, %s1155_s21  ;;  %1117 = vrot.lane.b32.xlu1 %v1081_v2, %s1156_s22 }
  0x22   : > { %1122 = vrot.lane.b32.xlu2 %v1081_v2, %s1157_s23  ;;  %v977_v2 = vld [vmem:[%s1516_s1 + $0xb8] sm:$0xff] }
  0x27   : > { %964 = vmatmul.msk.f32.gmra.mxu1 %vm208_vm0, %v173_v19  ;;  %v812_v19 = vld [vmem:[%s1517_s2 + $0x18] sm:$0xff] }
  0x29   : > { %1127 = vrot.lane.b32.xlu0 %v1086_v5, %s1155_s21  ;;  %1132 = vrot.lane.b32.xlu1 %v1086_v5, %s1156_s22 }
  0x2a   : > { %1137 = vrot.lane.b32.xlu2 %v1086_v5, %s1157_s23  ;;  %v809_v5 = vld [vmem:[%s1517_s2] sm:$0xff] }
  0x2f   : > { %965 = vmatmul.msk.f32.gmra.mxu1 %vm208_vm0, %v174_v30  ;;  %v1006_v30 = vld [vmem:[%s1516_s1 + $0x120] sm:$0xff] }
  0x37   : > { %966 = vmatmul.msk.f32.gmra.mxu1 %vm208_vm0, %v175_v42  ;;  %v1009_v42 = vld [vmem:[%s1516_s1 + $0x138] sm:$0xff] }
  0x3f   : > { %967 = vmatmul.msk.f32.gmra.mxu1 %vm208_vm0, %v176_v54 }
  0x6c   : > { %v1209_v6 = vpop.permute.xlu2 %1102 }
  0x6d   : > { %v1104_v49 = vunpack.i.l.bf16 %v1209_v6  ;;  %v1105_v53 = vunpack.i.h.bf16 %v1209_v6  ;;  %v1020_v6 = vld [vmem:[%s1516_s1 + $0x150] sm:$0xff] }
  0x74   : > { %v1211_v7 = vpop.permute.xlu2 %1107 }
  0x75   : > { %v1109_v55 = vunpack.i.l.bf16 %v1211_v7  ;;  %v1110_v56 = vunpack.i.h.bf16 %v1211_v7  ;;  %v986_v7 = vld [vmem:[%s1516_s1 + $0xc0] sm:$0xff] }
  0x7c   : > { %v1123_v9 = vpop.permute.xlu2 %1122 }
  0x7d   : > { %v1124_v10 = vunpack.i.l.bf16 %v1123_v9  ;;  %v1125_v11 = vunpack.i.h.bf16 %v1123_v9  ;;  %v1002_v9 = vld [vmem:[%s1516_s1 + $0x100] sm:$0xff] }
  0x7f   : > { %678 = vmatpush.msrb.mxu1 %v1124_v10  ;;  %v810_v10 = vld [vmem:[%s1517_s2 + $0x8] sm:$0xff] }
  0x81   : > { %679 = vmatpush.msrb.mxu1 %v1125_v11  ;;  %v1021_v11 = vld [vmem:[%s1516_s1 + $0x158] sm:$0xff] }
  0x83   : > { %v1083_v13 = vpop.permute.xlu0 %1082  ;;  %v1093_v14 = vpop.permute.xlu1 %1092 }
  0x84   : > { %v1084_v15 = vunpack.i.l.bf16 %v1083_v13  ;;  %v1094_v16 = vunpack.i.l.bf16 %v1093_v14  ;;  %v1095_v17 = vunpack.i.h.bf16 %v1093_v14  ;;  %v1085_v18 = vunpack.i.h.bf16 %v1083_v13  ;;  %v1138_v28 = vpop.permute.xlu2 %1137  ;;  %v1035_v13 = vld [vmem:[%s1516_s1 + $0x188] sm:$0xff] }
  0x85   : > { %v1139_v31 = vunpack.i.l.bf16 %v1138_v28  ;;  %v1140_v34 = vunpack.i.h.bf16 %v1138_v28  ;;  %v1003_v14 = vld [vmem:[%s1516_s1 + $0x108] sm:$0xff]  ;;  %v990_v28 = vld [vmem:[%s1516_s1 + $0xe0] sm:$0xff] }
  0x86   : > { %245 = vmatpush.msra.mxu0 %v1084_v15  ;;  %1054 = vmatpush.msra.mxu3 %v1084_v15  ;;  %v1022_v15 = vld [vmem:[%s1516_s1 + $0x160] sm:$0xff] }
  0x87   : > { %396 = vmatpush.msra.mxu2 %v1094_v16  ;;  %680 = vmatpush.msrb.mxu1 %v1139_v31  ;;  %v1025_v31 = vld [vmem:[%s1516_s1 + $0x178] sm:$0xff] }
  0x88   : > { %246 = vmatpush.msra.mxu0 %v1085_v18  ;;  %1055 = vmatpush.msra.mxu3 %v1085_v18  ;;  %v1004_v18 = vld [vmem:[%s1516_s1 + $0x110] sm:$0xff] }
  0x89   : > { %397 = vmatpush.msra.mxu2 %v1095_v17  ;;  %681 = vmatpush.msrb.mxu1 %v1140_v34  ;;  %v1039_v34 = vld [vmem:[%s1516_s1 + $0x1a8] sm:$0xff] }
  0x8a   : > { %1026 = vmatmul.msk.f32.vlgmr.msrb.gmra.mxu1 %vm208_vm0, %v1018_v60 }
  0x8b   : > { %v1088_v20 = vpop.permute.xlu0 %1087  ;;  %v1098_v21 = vpop.permute.xlu1 %1097 }
  0x8c   : > { %v1089_v22 = vunpack.i.l.bf16 %v1088_v20  ;;  %v1099_v23 = vunpack.i.l.bf16 %v1098_v21  ;;  %v1100_v24 = vunpack.i.h.bf16 %v1098_v21  ;;  %v1090_v25 = vunpack.i.h.bf16 %v1088_v20  ;;  %v1023_v20 = vld [vmem:[%s1516_s1 + $0x168] sm:$0xff]  ;;  %v989_v21 = vld [vmem:[%s1516_s1 + $0xd8] sm:$0xff] }
  0x8e   : > { %247 = vmatpush.msra.mxu0 %v1089_v22  ;;  %1056 = vmatpush.msra.mxu3 %v1089_v22  ;;  %v1037_v22 = vld [vmem:[%s1516_s1 + $0x198] sm:$0xff] }
  0x8f   : > { %398 = vmatpush.msra.mxu2 %v1099_v23 }
  0x90   : > { %248 = vmatpush.msra.mxu0 %v1090_v25  ;;  %1057 = vmatpush.msra.mxu3 %v1090_v25  ;;  %v811_v25 = vld [vmem:[%s1517_s2 + $0x10] sm:$0xff] }
  0x91   : > { %960 = vmatmul.msk.f32.vlgmr.msra.gmra.mxu3 %vm208_vm0, %v952_v26  ;;  %399 = vmatpush.msra.mxu2 %v1100_v24  ;;  %v815_v26 = vld [vmem:[%s1517_s2 + $0x30] sm:$0xff] }
  0x92   : > { %1058 = vmatpush.msrb.mxu3 %v1195_v1  ;;  %978 = vmatmul.msk.f32.vlgmr.msra.gmra.mxu2 %vm208_vm0, %v970_v27  ;;  %v1158_v1 = vmov 0   ;;  %v814_v27 = vld [vmem:[%s1517_s2 + $0x28] sm:$0xff] }
  0x93   : > { %v1113_v32 = vpop.permute.xlu0 %1112  ;;  %v1118_v33 = vpop.permute.xlu1 %1117  ;;  %954 = vmatmul.msk.f32.vlgmr.msra.gmra.mxu0 %vm208_vm0, %v946_v29  ;;  %1141 = vset.pattern.permute.xlu0 %v1158_v1  ;;  %v1038_v29 = vld [vmem:[%s1516_s1 + $0x1a0] sm:$0xff] }
  0x94   : > { %1059 = vmatpush.msrb.mxu3 %v1193_v0  ;;  %v1114_v35 = vunpack.i.l.bf16 %v1113_v32  ;;  %v1119_v36 = vunpack.i.l.bf16 %v1118_v33  ;;  %v1115_v37 = vunpack.i.h.bf16 %v1113_v32  ;;  %v1120_v38 = vunpack.i.h.bf16 %v1118_v33  ;;  %v1019_v0 = vld [vmem:[%s1516_s1 + $0x148] sm:$0xff]  ;;  %1142 = vset.pattern.permute.xlu1 %v1158_v1  ;;  %v813_v32 = vld [vmem:[%s1517_s2 + $0x20] sm:$0xff] }
  0x95   : > { %1027 = vmatmul.msk.f32.gmra.mxu1 %vm208_vm0, %v1019_v0  ;;  %1143 = vset.pattern.permute.xlu2 %v1158_v1  ;;  %v991_v33 = vld [vmem:[%s1516_s1 + $0xe8] sm:$0xff] }
  0x96   : > { %1060 = vmatpush.msrb.mxu3 %v1202_v4  ;;  %772 = vmatpush.msrb.mxu2 %v1114_v35  ;;  %v951_v4 = vld [vmem:[%s1516_s1 + $0x68] sm:$0xff] }
  0x97   : > { %584 = vmatpush.msrb.mxu0 %v1119_v36  ;;  %819 = vperm.xlu0 %1141, %v809_v5   ;;  %v1007_v35 = vld [vmem:[%s1516_s1 + $0x128] sm:$0xff]  ;;  %v992_v36 = vld [vmem:[%s1516_s1 + $0xf0] sm:$0xff] }
  0x98   : > { %1061 = vmatpush.msrb.mxu3 %v1200_v3  ;;  %773 = vmatpush.msrb.mxu2 %v1115_v37  ;;  %v975_v3 = vld [vmem:[%s1516_s1 + $0xa8] sm:$0xff]  ;;  %v1040_v37 = vld [vmem:[%s1516_s1 + $0x1b0] sm:$0xff] }
  0x99   : > { %585 = vmatpush.msrb.mxu0 %v1120_v38  ;;  %961 = vmatmul.msk.f32.gmra.mxu3 %vm208_vm0, %v953_v39  ;;  %v1008_v38 = vld [vmem:[%s1516_s1 + $0x130] sm:$0xff]  ;;  %v816_v39 = vld [vmem:[%s1517_s2 + $0x38] sm:$0xff] }
  0x9a   : > { %1062 = vmatpush.msra.mxu3 %v1094_v16  ;;  %979 = vmatmul.msk.f32.gmra.mxu2 %vm208_vm0, %v971_v40  ;;  %v988_v16 = vld [vmem:[%s1516_s1 + $0xd0] sm:$0xff]  ;;  %v993_v40 = vld [vmem:[%s1516_s1 + $0xf8] sm:$0xff] }
  0x9b   : > { %955 = vmatmul.msk.f32.gmra.mxu0 %vm208_vm0, %v947_v41  ;;  %v1128_v43 = vpop.permute.xlu0 %1127  ;;  %v1133_v44 = vpop.permute.xlu1 %1132  ;;  %824 = vperm.xlu1 %1142, %v810_v10   ;;  %v1041_v41 = vld [vmem:[%s1516_s1 + $0x1b8] sm:$0xff] }
  0x9c   : > { %1063 = vmatpush.msra.mxu3 %v1095_v17  ;;  %v1129_v45 = vunpack.i.l.bf16 %v1128_v43  ;;  %v1134_v46 = vunpack.i.l.bf16 %v1133_v44  ;;  %v1130_v47 = vunpack.i.h.bf16 %v1128_v43  ;;  %v1135_v48 = vunpack.i.h.bf16 %v1133_v44  ;;  %v1036_v17 = vld [vmem:[%s1516_s1 + $0x190] sm:$0xff]  ;;  %829 = vperm.xlu2 %1143, %v811_v25   ;;  %v315_v43 = vpop.f32.mrf.mxu1 }
  0x9d   : > { %1028 = vmatmul.msk.f32.gmra.mxu1 %vm208_vm0, %v1020_v6 }
  0x9e   : > { %1064 = vmatpush.msra.mxu3 %v1099_v23  ;;  %774 = vmatpush.msrb.mxu2 %v1129_v45  ;;  %v1005_v23 = vld [vmem:[%s1516_s1 + $0x118] sm:$0xff] }
  0x9f   : > { %586 = vmatpush.msrb.mxu0 %v1134_v46  ;;  %844 = vperm.xlu0 %1141, %v814_v27  }
  0xa0   : > { %1065 = vmatpush.msra.mxu3 %v1100_v24  ;;  %775 = vmatpush.msrb.mxu2 %v1130_v47  ;;  %v1024_v24 = vld [vmem:[%s1516_s1 + $0x170] sm:$0xff] }
  0xa1   : > { %587 = vmatpush.msrb.mxu0 %v1135_v48  ;;  %968 = vmatmul.msk.f32.vlgmr.msrb.gmra.mxu3 %vm208_vm0, %v177_v50 }
  0xa2   : > { %980 = vmatmul.msk.f32.gmra.mxu2 %vm208_vm0, %v972_v51  ;;  %490 = vmatpush.msrb.mxu3 %v1104_v49 }
  0xa3   : > { %956 = vmatmul.msk.f32.gmra.mxu0 %vm208_vm0, %v948_v52  ;;  %834 = vperm.xlu1 %1142, %v812_v19  }
  0xa4   : > { %491 = vmatpush.msrb.mxu3 %v1105_v53  ;;  %839 = vperm.xlu2 %1143, %v813_v32   ;;  %v318_v44 = vpop.f32.mrf.mxu1 }
  0xa5   : > { %1029 = vmatmul.msk.f32.gmra.mxu1 %vm208_vm0, %v1021_v11 }
  0xa6   : > { %492 = vmatpush.msrb.mxu3 %v1109_v55 }
  0xa8   : > { %493 = vmatpush.msrb.mxu3 %v1110_v56 }
  0xa9   : > { %969 = vmatmul.msk.f32.gmra.mxu3 %vm208_vm0, %v178_v57 }
  0xaa   : > { %981 = vmatmul.msk.f32.gmra.mxu2 %vm208_vm0, %v973_v58 }
  0xab   : > { %957 = vmatmul.msk.f32.gmra.mxu0 %vm208_vm0, %v949_v59  ;;  %849 = vperm.xlu1 %1142, %v815_v26  }
  0xac   : > { %854 = vperm.xlu2 %1143, %v816_v39   ;;  %v321_v46 = vpop.f32.mrf.mxu1 }
  0xad   : > { %1030 = vmatmul.msk.f32.gmra.mxu1 %vm208_vm0, %v1022_v15 }
  0xb1   : > { %984 = vmatmul.msk.f32.vlgmr.msra.gmra.mxu3 %vm208_vm0, %v976_v61 }
  0xb2   : > { %982 = vmatmul.msk.f32.gmra.mxu2 %vm208_vm0, %v974_v62 }
  0xb3   : > { %958 = vmatmul.msk.f32.gmra.mxu0 %vm208_vm0, %v950_v63 }
  0xb4   : > { %v324_v50 = vpop.f32.mrf.mxu1 }
  0xb5   : > { %1031 = vmatmul.msk.f32.gmra.mxu1 %vm208_vm0, %v1023_v20 }
  0xb9   : > { %985 = vmatmul.msk.f32.gmra.mxu3 %vm208_vm0, %v977_v2 }
  0xba   : > { %983 = vmatmul.msk.f32.gmra.mxu2 %vm208_vm0, %v975_v3 }
  0xbb   : > { %959 = vmatmul.msk.f32.gmra.mxu0 %vm208_vm0, %v951_v4 }
  0xbc   : > { %v327_v57 = vpop.f32.mrf.mxu1 }
  0xbd   : > { %1032 = vmatmul.msk.f32.gmra.mxu1 %vm208_vm0, %v1024_v24 }
  0xc1   : > { %994 = vmatmul.msk.f32.vlgmr.msrb.gmra.mxu3 %vm208_vm0, %v986_v7 }
  0xc2   : > { %1042 = vmatmul.msk.f32.vlgmr.msrb.gmra.mxu2 %vm208_vm0, %v1034_v8 }
  0xc3   : > { %1010 = vmatmul.msk.f32.vlgmr.msrb.gmra.mxu0 %vm208_vm0, %v1002_v9 }
  0xc4   : > { %v1473_v63 = vpop.f32.mrf.mxu1 }
  0xc5   : > { %1033 = vmatmul.msk.f32.gmra.mxu1 %vm208_vm0, %v1025_v31 }
  0xc9   : > { %995 = vmatmul.msk.f32.gmra.mxu3 %vm208_vm0, %v987_v12 }
  0xca   : > { %1043 = vmatmul.msk.f32.gmra.mxu2 %vm208_vm0, %v1035_v13 }
  0xcb   : > { %1011 = vmatmul.msk.f32.gmra.mxu0 %vm208_vm0, %v1003_v14 }
  0xd1   : > { %996 = vmatmul.msk.f32.gmra.mxu3 %vm208_vm0, %v988_v16 }
  0xd2   : > { %1044 = vmatmul.msk.f32.gmra.mxu2 %vm208_vm0, %v1036_v17 }
  0xd3   : > { %1012 = vmatmul.msk.f32.gmra.mxu0 %vm208_vm0, %v1004_v18 }
  0xd9   : > { %997 = vmatmul.msk.f32.gmra.mxu3 %vm208_vm0, %v989_v21 }
  0xda   : > { %1045 = vmatmul.msk.f32.gmra.mxu2 %vm208_vm0, %v1037_v22 }
  0xdb   : > { %1013 = vmatmul.msk.f32.gmra.mxu0 %vm208_vm0, %v1005_v23 }
  0xe1   : > { %998 = vmatmul.msk.f32.gmra.mxu3 %vm208_vm0, %v990_v28 }
  0xe2   : > { %1046 = vmatmul.msk.f32.gmra.mxu2 %vm208_vm0, %v1038_v29 }
  0xe3   : > { %1014 = vmatmul.msk.f32.gmra.mxu0 %vm208_vm0, %v1006_v30 }
  0xe9   : > { %999 = vmatmul.msk.f32.gmra.mxu3 %vm208_vm0, %v991_v33 }
  0xea   : > { %1047 = vmatmul.msk.f32.gmra.mxu2 %vm208_vm0, %v1039_v34 }
  0xeb   : > { %1015 = vmatmul.msk.f32.gmra.mxu0 %vm208_vm0, %v1007_v35 }
  0xf1   : > { %1000 = vmatmul.msk.f32.gmra.mxu3 %vm208_vm0, %v992_v36 }
  0xf2   : > { %1048 = vmatmul.msk.f32.gmra.mxu2 %vm208_vm0, %v1040_v37 }
  0xf3   : > { %1016 = vmatmul.msk.f32.gmra.mxu0 %vm208_vm0, %v1008_v38 }
  0xf9   : > { %1001 = vmatmul.msk.f32.gmra.mxu3 %vm208_vm0, %v993_v40 }
  0xfa   : > { %1049 = vmatmul.msk.f32.gmra.mxu2 %vm208_vm0, %v1041_v41 }
  0xfb   : > { %1017 = vmatmul.msk.f32.gmra.mxu0 %vm208_vm0, %v1009_v42 }
 0x107   : > { %v683_v3 = vpop.f32.mrf.mxu1 }
 0x109   : > { %v820_v17 = vpop.permute.xlu0 %819 }
 0x10d   : > { %v825_v30 = vpop.permute.xlu1 %824 }
 0x110   : > { %v250_v45 = vpop.f32.mrf.mxu0 }
 0x111   : > { %v316_v6 = vadd.f32 %v315_v43, %v250_v45  ;;  %v830_v43 = vpop.permute.xlu2 %829 }
 0x112   : > { %v686_v8 = vpop.f32.mrf.mxu1 }
 0x114   : > { %v268_v47 = vpop.f32.mrf.mxu3 }
 0x115   : > { %v401_v48 = vpop.f32.mrf.mxu2 }
 0x116   : > { %v425_v9 = vadd.f32 %v401_v48, %v316_v6 }
 0x118   : > { %v253_v49 = vpop.f32.mrf.mxu0 }
 0x119   : > { %v319_v13 = vadd.f32 %v318_v44, %v253_v49 }
 0x11a   : > { %v689_v20 = vpop.f32.mrf.mxu1 }
 0x11c   : > { %v271_v51 = vpop.f32.mrf.mxu3 }
 0x11d   : > { %v404_v52 = vpop.f32.mrf.mxu2 }
 0x11e   : > { %v426_v18 = vadd.f32 %v404_v52, %v319_v13 }
 0x120   : > { %v256_v53 = vpop.f32.mrf.mxu0 }
 0x121   : > { %v322_v25 = vadd.f32 %v321_v46, %v256_v53 }
 0x122   : > { %v692_v37 = vpop.f32.mrf.mxu1 }
 0x124   : > { %v333_v54 = vpop.f32.mrf.mxu3 }
 0x125   : > { %v407_v55 = vpop.f32.mrf.mxu2  ;;  %v1469_v56 = vadd.f32 %v333_v54, %v268_v47 }
 0x126   : > { %v427_v31 = vadd.f32 %v407_v55, %v322_v25 }
 0x128   : > { %v259_v58 = vpop.f32.mrf.mxu0 }
 0x129   : > { %v325_v38 = vadd.f32 %v324_v50, %v259_v58  ;;  %v835_v58 = vpop.permute.xlu1 %834 }
 0x12a   : > { %v695_v50 = vpop.f32.mrf.mxu1 }
 0x12c   : > { %v336_v59 = vpop.f32.mrf.mxu3 }
 0x12d   : > { %v410_v60 = vpop.f32.mrf.mxu2  ;;  %v1471_v61 = vadd.f32 %v336_v59, %v271_v51 }
 0x12e   : > { %v428_v44 = vadd.f32 %v410_v60, %v325_v38 }
 0x130   : > { %v262_v62 = vpop.f32.mrf.mxu0 }
 0x131   : > { %v328_v51 = vadd.f32 %v327_v57, %v262_v62 }
 0x132   : > { %v698_v13 = vpop.f32.mrf.mxu1 }
 0x134   : > { %v1475_v0 = vpop.f32.mrf.mxu3 }
 0x135   : > { %v413_v1 = vpop.f32.mrf.mxu2 }
 0x136   : > { %v429_v59 = vadd.f32 %v413_v1, %v328_v51 }
 0x138   : > { %v1477_v2 = vpop.f32.mrf.mxu0 }
 0x13a   : > { %v701_v25 = vpop.f32.mrf.mxu1 }
 0x13c   : > { %v1479_v4 = vpop.f32.mrf.mxu3 }
 0x13d   : > { %v1481_v5 = vpop.f32.mrf.mxu2 }
 0x140   : > { %v589_v7 = vpop.f32.mrf.mxu0 }
 0x144   : > { %v495_v10 = vpop.f32.mrf.mxu3 }
 0x145   : > { %v777_v11 = vpop.f32.mrf.mxu2  ;;  %v519_v12 = vadd.f32 %v495_v10, %v425_v9  ;;  %v331_v9 = vadd.f32 %v1473_v63, %v1477_v2  ;;  %v845_v2 = vpop.permute.xlu0 %844 }
 0x147   : > { %v613_v14 = vadd.f32 %v589_v7, %v519_v12  ;;  %v840_v12 = vpop.permute.xlu2 %839 }
 0x148   : > { %v592_v15 = vpop.f32.mrf.mxu0 }
 0x149   : > { %v707_v16 = vadd.f32 %v683_v3, %v613_v14  ;;  %v430_v14 = vadd.f32 %v1481_v5, %v331_v9 }
 0x14b   : > { %v801_v19 = vadd.f32 %v777_v11, %v707_v16 }
 0x14c   : > { %v498_v21 = vpop.f32.mrf.mxu3 }
 0x14d   : > { %v780_v22 = vpop.f32.mrf.mxu2  ;;  %v857_v23 = vadd.f32 %v820_v17, %v801_v19  ;;  %v520_v24 = vadd.f32 %v498_v21, %v426_v18 }
 0x14f   : > { %v865_v26 = vmax.f32 %v857_v23, 0.0  ;;  %v614_v27 = vadd.f32 %v592_v15, %v520_v24 }
 0x150   : > { %v595_v28 = vpop.f32.mrf.mxu0 }
 0x151   : > { %874 = vst.msk [vmem:[%s1487_s30] sm:$0xff] %vm873_vm1, %v865_v26  ;;  %v708_v29 = vadd.f32 %v686_v8, %v614_v27 }
 0x153   : > { %v802_v32 = vadd.f32 %v780_v22, %v708_v29  ;;  %v431_v22 = vadd.f32 %v1475_v0, %v1469_v56 }
 0x154   : > { %v501_v33 = vpop.f32.mrf.mxu3 }
 0x155   : > { %v783_v34 = vpop.f32.mrf.mxu2  ;;  %v858_v35 = vadd.f32 %v825_v30, %v802_v32  ;;  %v521_v36 = vadd.f32 %v501_v33, %v427_v31  ;;  %v432_v31 = vadd.f32 %v1479_v4, %v1471_v61  ;;  %v850_v32 = vpop.permute.xlu1 %849 }
 0x157   : > { %v866_v39 = vmax.f32 %v858_v35, 0.0  ;;  %v615_v40 = vadd.f32 %v595_v28, %v521_v36  ;;  %v704_v36 = vpop.f32.mrf.mxu1 }
 0x158   : > { %v598_v41 = vpop.f32.mrf.mxu0 }
 0x159   : > { %875 = vst.msk [vmem:[%s1487_s30 + $0x8] sm:$0xff] %vm873_vm1, %v866_v39  ;;  %v709_v42 = vadd.f32 %v689_v20, %v615_v40 }
 0x15b   : > { %v803_v45 = vadd.f32 %v783_v34, %v709_v42  ;;  %v855_v42 = vpop.permute.xlu2 %854 }
 0x15c   : > { %v504_v46 = vpop.f32.mrf.mxu3 }
 0x15d   : > { %v786_v47 = vpop.f32.mrf.mxu2  ;;  %v859_v48 = vadd.f32 %v830_v43, %v803_v45  ;;  %v522_v49 = vadd.f32 %v504_v46, %v428_v44 }
 0x15f   : > { %v867_v52 = vmax.f32 %v859_v48, 0.0  ;;  %v616_v53 = vadd.f32 %v598_v41, %v522_v49 }
 0x160   : > { %v601_v54 = vpop.f32.mrf.mxu0 }
 0x161   : > { %876 = vst.msk [vmem:[%s1487_s30 + $0x10] sm:$0xff] %vm873_vm1, %v867_v52  ;;  %v710_v55 = vadd.f32 %v692_v37, %v616_v53 }
 0x163   : > { %v804_v3 = vadd.f32 %v786_v47, %v710_v55 }
 0x164   : > { %v507_v6 = vpop.f32.mrf.mxu3 }
 0x165   : > { %v789_v7 = vpop.f32.mrf.mxu2  ;;  %v860_v60 = vadd.f32 %v835_v58, %v804_v3  ;;  %v523_v8 = vadd.f32 %v507_v6, %v429_v59 }
 0x167   : > { %v868_v57 = vmax.f32 %v860_v60, 0.0  ;;  %v617_v62 = vadd.f32 %v601_v54, %v523_v8 }
 0x168   : > { %v604_v10 = vpop.f32.mrf.mxu0 }
 0x169   : > { %877 = vst.msk [vmem:[%s1487_s30 + $0x18] sm:$0xff] %vm873_vm1, %v868_v57  ;;  %v711_v11 = vadd.f32 %v695_v50, %v617_v62 }
 0x16b   : > { %v805_v1 = vadd.f32 %v789_v7, %v711_v11 }
 0x16c   : > { %v510_v15 = vpop.f32.mrf.mxu3 }
 0x16d   : > { %v792_v16 = vpop.f32.mrf.mxu2  ;;  %v861_v17 = vadd.f32 %v840_v12, %v805_v1  ;;  %v524_v18 = vadd.f32 %v510_v15, %v430_v14 }
 0x16f   : > { %v869_v19 = vmax.f32 %v861_v17, 0.0  ;;  %v618_v20 = vadd.f32 %v604_v10, %v524_v18 }
 0x170   : > { %v607_v21 = vpop.f32.mrf.mxu0 }
 0x171   : > { %878 = vst.msk [vmem:[%s1487_s30 + $0x20] sm:$0xff] %vm873_vm1, %v869_v19  ;;  %v712_v63 = vadd.f32 %v698_v13, %v618_v20 }
 0x173   : > { %v806_v23 = vadd.f32 %v792_v16, %v712_v63 }
 0x174   : > { %v513_v24 = vpop.f32.mrf.mxu3 }
 0x175   : > { %v862_v5 = vadd.f32 %v845_v2, %v806_v23  ;;  %v525_v26 = vadd.f32 %v513_v24, %v431_v22  ;;  %v795_v27 = vpop.f32.mrf.mxu2 }
 0x177   : > { %v870_v28 = vmax.f32 %v862_v5, 0.0  ;;  %v619_v29 = vadd.f32 %v607_v21, %v525_v26 }
 0x178   : > { %v610_v56 = vpop.f32.mrf.mxu0 }
 0x179   : > { %879 = vst.msk [vmem:[%s1487_s30 + $0x28] sm:$0xff] %vm873_vm1, %v870_v28  ;;  %v713_v30 = vadd.f32 %v701_v25, %v619_v29 }
 0x17b   : > { %v807_v33 = vadd.f32 %v795_v27, %v713_v30 }
 0x17c   : > { %v516_v34 = vpop.f32.mrf.mxu3 }
 0x17d   : > { %v863_v0 = vadd.f32 %v850_v32, %v807_v33  ;;  %v526_v35 = vadd.f32 %v516_v34, %v432_v31  ;;  %v798_v39 = vpop.f32.mrf.mxu2 }
 0x17f   : > { %v871_v37 = vmax.f32 %v863_v0, 0.0  ;;  %v620_v38 = vadd.f32 %v610_v56, %v526_v35 }
 0x181   : > { %880 = vst.msk [vmem:[%s1487_s30 + $0x30] sm:$0xff] %vm873_vm1, %v871_v37  ;;  %v714_v40 = vadd.f32 %v704_v36, %v620_v38 }
 0x183   : > { %v808_v41 = vadd.f32 %v798_v39, %v714_v40 }
 0x185   : > { %v864_v43 = vadd.f32 %v855_v42, %v808_v41 }
 0x187   : > { %v872_v44 = vmax.f32 %v864_v43, 0.0 }
 0x189   : > { %881 = vst.msk [vmem:[%s1487_s30 + $0x38] sm:$0xff] %vm873_vm1, %v872_v44 }
 0x18a PF: > { %s13_s12 = sadd.s32 1, %s1150_s12  }
 0x18b   : > { %p10_p4 = scmp.ge.s32.totalorder %s13_s12, 4  }
 0x18d   :  { %12 = sbr.rel (!%p10_p4) target bundleno = 1 (0x1), region = 68 }

// kernel: wavegan_generator.9
= control target key start
LH: loop header
LB: loop body
LE: loop exit
PB: predicated region body
PF: predicated region fallthrough
CT: control target
= control target key end

     0   :  { %s863_s12 = smov 0   ;;  %s972_s0 = inlined_call_operand.vmem [shape: f32[2,8,262], index: 0, kind: input, shape index: {}]   ;;  %s973_s1 = inlined_call_operand.vmem [shape: f32[7,16,8], index: 1, kind: input, shape index: {}]   ;;  %s974_s2 = inlined_call_operand.vmem [shape: f32[16,1], index: 2, kind: input, shape index: {}]   ;;  %s975_s3 = inlined_call_operand.vmem [shape: f32[2,16,256], index: 3, kind: output, shape index: {}]  }
   0x1 LB: > { %s727_s13 = sadd.s32 4294967295, %s834_s12   ;;  %p731_p0 = scmp.ge.s32.totalorder %s834_s12, 1  ;;  %s834_s12 = sphi %s863_s12, %s13_s12  }
   0x2   : > { %p137_p1 = scmp.lt.s32.totalorder %s834_s12, 3 }
   0x4   : > { %p138_p2 = pnand %p731_p0, %p137_p1 }
   0x5   : > { %p161_p3 = scmp.lt.s32.totalorder (!%p138_p2), %s727_s13, 1  ;;  %s836_s18 = smov (!%p138_p2), 127  }
   0x6   : > { %141 = sbr.rel (%p138_p2) target bundleno = 332 (0x14c), region = 32  ;;  %s837_s19 = smov (!%p138_p2), 126  }
   0x7   : > { %s838_s20 = smov (!%p138_p2), 125   ;;  %s839_s21 = smov (!%p138_p2), 124  }
   0x8   : > { %s840_s22 = smov (!%p138_p2), 123   ;;  %s841_s23 = smov (!%p138_p2), 122  }
   0xb   : > { %s977_s13 = smov (!%p161_p3, %s727_s13), 1  ;;  %vm188_vm0 = vcmask 1039360   ;;  %vm377_vm1 = vcmask 1022976   ;;  %vm307_vm2 = vcmask 1031168   ;;  %v736_v14 = vld [vmem:[%s973_s1 + $0x18] sm:$0xff]  ;;  %vm193_vm3 = vcmask 64512  }
   0xc   : > { %s780_s14 = smul.u32 24, %s977_s13  ;;  %v735_v15 = vld [vmem:[%s973_s1 + $0x10] sm:$0xff]  ;;  %vm517_vm4 = vcmask 1006592   ;;  %v171_v27 = vld [vmem:[%s973_s1] sm:$0xff]  ;;  %vm447_vm5 = vcmask 1014784   ;;  %v172_v34 = vld [vmem:[%s973_s1 + $0x8] sm:$0xff] }
   0xd   : > { %v745_v28 = vld [vmem:[%s973_s1 + $0x20] sm:$0xff]  ;;  %v746_v37 = vld [vmem:[%s973_s1 + $0x28] sm:$0xff]  ;;  %vm587_vm6 = vcmask 998400   ;;  %v751_v44 = vld [vmem:[%s973_s1 + $0x30] sm:$0xff]  ;;  %v842_v50 = vmov 0   ;;  %s777_s4 = sshll.u32 %s977_s13, 5 }
   0xe   : > { %s165_s17 = scalar_lea.vmem %s972_s0, %s780_s14  ;;  %v757_v45 = vld [vmem:[%s973_s1 + $0x40] sm:$0xff]  ;;  %v649_v49 = vld [vmem:[%s974_s2 + $0x8] sm:$0xff]  ;;  %826 = vset.pattern.permute.xlu0 %v842_v50  ;;  %827 = vset.pattern.permute.xlu1 %v842_v50  ;;  %v752_v51 = vld [vmem:[%s973_s1 + $0x38] sm:$0xff]  ;;  %s170_s7 = scalar_lea.vmem %s975_s3, %s777_s4 }
   0xf   : > { %v173_v0 = vld [vmem:[%s165_s17] sm:$0xff]  ;;  %v877_v1 = vld [vmem:[%s165_s17 + $0x8] sm:$0xff]  ;;  %v178_v3 = vld [vmem:[%s165_s17 + $0x10] sm:$0xff] }
  0x10   : > { %v796_v2 = vpack.i.bf16 %v877_v1, %v173_v0  ;;  %v648_v48 = vld [vmem:[%s974_s2] sm:$0xff]  ;;  %v758_v52 = vld [vmem:[%s973_s1 + $0x48] sm:$0xff]  ;;  %v763_v53 = vld [vmem:[%s973_s1 + $0x50] sm:$0xff] }
  0x11   : > { %v769_v54 = vld [vmem:[%s973_s1 + $0x60] sm:$0xff]  ;;  %v764_v55 = vld [vmem:[%s973_s1 + $0x58] sm:$0xff]  ;;  %v770_v56 = vld [vmem:[%s973_s1 + $0x68] sm:$0xff] }
  0x12   : > { %797 = vrot.lane.b32.xlu0 %v796_v2, %s836_s18  ;;  %802 = vrot.lane.b32.xlu1 %v796_v2, %s837_s19 }
  0x13   : > { %807 = vrot.lane.b32.xlu2 %v796_v2, %s838_s20 }
  0x1a   : > { %186 = vrot.lane.b32.xlu0 %v178_v3, %s836_s18  ;;  %305 = vrot.lane.b32.xlu1 %v178_v3, %s837_s19 }
  0x1b   : > { %375 = vrot.lane.b32.xlu2 %v178_v3, %s838_s20 }
  0x22   : > { %812 = vrot.lane.b32.xlu0 %v796_v2, %s839_s21  ;;  %445 = vrot.lane.b32.xlu1 %v178_v3, %s839_s21 }
  0x23   : > { %817 = vrot.lane.b32.xlu2 %v796_v2, %s840_s22 }
  0x2a   : > { %515 = vrot.lane.b32.xlu0 %v178_v3, %s840_s22  ;;  %822 = vrot.lane.b32.xlu1 %v796_v2, %s841_s23 }
  0x2b   : > { %585 = vrot.lane.b32.xlu2 %v178_v3, %s841_s23 }
  0x32   : > { %652 = vperm.xlu0 %826, %v648_v48   ;;  %657 = vperm.xlu1 %827, %v649_v49  }
  0x6d   : > { %v808_v4 = vpop.permute.xlu2 %807 }
  0x6e   : > { %v810_v7 = vunpack.i.h.bf16 %v808_v4  ;;  %v809_v8 = vunpack.i.l.bf16 %v808_v4 }
  0x70   : > { %v378_v18 = vsel %vm377_vm1, %v809_v8, %v810_v7 }
  0x75   : > { %v376_v5 = vpop.permute.xlu2 %375 }
  0x76   : > { %v379_v26 = vsel %vm377_vm1, %v810_v7, %v376_v5 }
  0x7d   : > { %v818_v19 = vpop.permute.xlu2 %817 }
  0x7e   : > { %v820_v20 = vunpack.i.h.bf16 %v818_v19  ;;  %v819_v21 = vunpack.i.l.bf16 %v818_v19 }
  0x80   : > { %v518_v29 = vsel %vm517_vm4, %v819_v21, %v820_v20 }
  0x84   : > { %v798_v6 = vpop.permute.xlu0 %797  ;;  %v803_v9 = vpop.permute.xlu1 %802 }
  0x85   : > { %v800_v10 = vunpack.i.h.bf16 %v798_v6  ;;  %v799_v11 = vunpack.i.l.bf16 %v798_v6  ;;  %v805_v12 = vunpack.i.h.bf16 %v803_v9  ;;  %v804_v13 = vunpack.i.l.bf16 %v803_v9  ;;  %v586_v38 = vpop.permute.xlu2 %585 }
  0x87   : > { %v189_v16 = vsel %vm188_vm0, %v799_v11, %v800_v10  ;;  %v308_v17 = vsel %vm307_vm2, %v804_v13, %v805_v12 }
  0x88   : > { %215 = vmatpush.msra.mxu0 %v189_v16  ;;  %778 = vmatpush.msra.mxu2 %v189_v16 }
  0x89   : > { %738 = vmatmul.msk.f32.vlgmr.msra.gmra.mxu2 %vm193_vm3, %v736_v14  ;;  %737 = vmatmul.msk.f32.vlgmr.msra.gmra.mxu0 %vm193_vm3, %v735_v15 }
  0x8a   : > { %267 = vmatpush.msrb.mxu2 %v173_v0  ;;  %333 = vmatpush.msrb.mxu0 %v308_v17 }
  0x8c   : > { %403 = vmatpush.msra.mxu2 %v378_v18  ;;  %v187_v22 = vpop.permute.xlu0 %186  ;;  %v306_v23 = vpop.permute.xlu1 %305 }
  0x8d   : > { %v190_v24 = vsel %vm188_vm0, %v800_v10, %v187_v22  ;;  %v309_v25 = vsel %vm307_vm2, %v805_v12, %v306_v23 }
  0x8e   : > { %238 = vmatpush.msra.mxu1 %v190_v24  ;;  %779 = vmatpush.msra.mxu3 %v190_v24 }
  0x8f   : > { %740 = vmatmul.msk.f32.vlgmr.msra.gmra.mxu3 %vm193_vm3, %v736_v14  ;;  %739 = vmatmul.msk.f32.vlgmr.msra.gmra.mxu1 %vm193_vm3, %v735_v15 }
  0x90   : > { %356 = vmatpush.msrb.mxu1 %v309_v25  ;;  %290 = vmatpush.msrb.mxu3 %v877_v1 }
  0x91   : > { %741 = vmatmul.msk.f32.vlgmr.msrb.gmra.mxu2 %vm193_vm3, %v171_v27  ;;  %747 = vmatmul.msk.f32.vlgmr.msrb.gmra.mxu0 %vm193_vm3, %v745_v28 }
  0x92   : > { %426 = vmatpush.msra.mxu3 %v379_v26  ;;  %543 = vmatpush.msrb.mxu2 %v518_v29 }
  0x94   : > { %v813_v30 = vpop.permute.xlu0 %812  ;;  %v446_v31 = vpop.permute.xlu1 %445 }
  0x95   : > { %v815_v32 = vunpack.i.h.bf16 %v813_v30  ;;  %v814_v33 = vunpack.i.l.bf16 %v813_v30 }
  0x97   : > { %743 = vmatmul.msk.f32.vlgmr.msrb.gmra.mxu3 %vm193_vm3, %v171_v27  ;;  %v449_v35 = vsel %vm447_vm5, %v815_v32, %v446_v31  ;;  %v448_v36 = vsel %vm447_vm5, %v814_v33, %v815_v32  ;;  %749 = vmatmul.msk.f32.vlgmr.msrb.gmra.mxu1 %vm193_vm3, %v745_v28 }
  0x98   : > { %473 = vmatpush.msra.mxu0 %v448_v36  ;;  %496 = vmatpush.msra.mxu1 %v449_v35 }
  0x99   : > { %742 = vmatmul.msk.f32.gmra.mxu2 %vm193_vm3, %v172_v34  ;;  %748 = vmatmul.msk.f32.gmra.mxu0 %vm193_vm3, %v746_v37 }
  0x9c   : > { %v516_v39 = vpop.permute.xlu0 %515  ;;  %v823_v40 = vpop.permute.xlu1 %822 }
  0x9d   : > { %v519_v41 = vsel %vm517_vm4, %v820_v20, %v516_v39  ;;  %v825_v42 = vunpack.i.h.bf16 %v823_v40  ;;  %v824_v43 = vunpack.i.l.bf16 %v823_v40 }
  0x9e   : > { %566 = vmatpush.msrb.mxu3 %v519_v41 }
  0x9f   : > { %744 = vmatmul.msk.f32.gmra.mxu3 %vm193_vm3, %v172_v34  ;;  %v589_v46 = vsel %vm587_vm6, %v825_v42, %v586_v38  ;;  %v588_v47 = vsel %vm587_vm6, %v824_v43, %v825_v42  ;;  %750 = vmatmul.msk.f32.gmra.mxu1 %vm193_vm3, %v746_v37 }
  0xa0   : > { %613 = vmatpush.msrb.mxu0 %v588_v47  ;;  %636 = vmatpush.msrb.mxu1 %v589_v46 }
  0xa1   : > { %753 = vmatmul.msk.f32.vlgmr.msra.gmra.mxu2 %vm193_vm3, %v751_v44  ;;  %759 = vmatmul.msk.f32.vlgmr.msra.gmra.mxu0 %vm193_vm3, %v757_v45 }
  0xa4   : > { %v653_v25 = vpop.permute.xlu0 %652  ;;  %v658_v42 = vpop.permute.xlu1 %657 }
  0xa7   : > { %755 = vmatmul.msk.f32.vlgmr.msra.gmra.mxu3 %vm193_vm3, %v751_v44  ;;  %761 = vmatmul.msk.f32.vlgmr.msra.gmra.mxu1 %vm193_vm3, %v757_v45 }
  0xa9   : > { %754 = vmatmul.msk.f32.gmra.mxu2 %vm193_vm3, %v752_v51  ;;  %760 = vmatmul.msk.f32.gmra.mxu0 %vm193_vm3, %v758_v52 }
  0xaf   : > { %756 = vmatmul.msk.f32.gmra.mxu3 %vm193_vm3, %v752_v51  ;;  %762 = vmatmul.msk.f32.gmra.mxu1 %vm193_vm3, %v758_v52 }
  0xb1   : > { %765 = vmatmul.msk.f32.vlgmr.msrb.gmra.mxu2 %vm193_vm3, %v763_v53  ;;  %771 = vmatmul.msk.f32.vlgmr.msrb.gmra.mxu0 %vm193_vm3, %v769_v54 }
  0xb7   : > { %767 = vmatmul.msk.f32.vlgmr.msrb.gmra.mxu3 %vm193_vm3, %v763_v53  ;;  %773 = vmatmul.msk.f32.vlgmr.msrb.gmra.mxu1 %vm193_vm3, %v769_v54 }
  0xb9   : > { %766 = vmatmul.msk.f32.gmra.mxu2 %vm193_vm3, %v764_v55  ;;  %772 = vmatmul.msk.f32.gmra.mxu0 %vm193_vm3, %v770_v56 }
  0xbf   : > { %768 = vmatmul.msk.f32.gmra.mxu3 %vm193_vm3, %v764_v55  ;;  %774 = vmatmul.msk.f32.gmra.mxu1 %vm193_vm3, %v770_v56 }
 0x106   : > { %v217_v57 = vpop.f32.mrf.mxu0 }
 0x10c   : > { %v220_v58 = vpop.f32.mrf.mxu2  ;;  %v240_v59 = vpop.f32.mrf.mxu1 }
 0x10e   : > { %v335_v60 = vpop.f32.mrf.mxu0 }
 0x112   : > { %v243_v61 = vpop.f32.mrf.mxu3 }
 0x114   : > { %v269_v62 = vpop.f32.mrf.mxu2  ;;  %v358_v63 = vpop.f32.mrf.mxu1 }
 0x115   : > { %v270_v9 = vadd.f32 %v269_v62, %v217_v57 }
 0x116   : > { %v338_v0 = vpop.f32.mrf.mxu0 }
 0x117   : > { %v364_v12 = vadd.f32 %v335_v60, %v270_v9 }
 0x11a   : > { %v292_v1 = vpop.f32.mrf.mxu3 }
 0x11b   : > { %v293_v14 = vadd.f32 %v292_v1, %v240_v59 }
 0x11c   : > { %v272_v2 = vpop.f32.mrf.mxu2  ;;  %v361_v3 = vpop.f32.mrf.mxu1 }
 0x11d   : > { %v273_v16 = vadd.f32 %v272_v2, %v220_v58  ;;  %v365_v19 = vadd.f32 %v358_v63, %v293_v14 }
 0x11e   : > { %v475_v4 = vpop.f32.mrf.mxu0 }
 0x11f   : > { %v366_v22 = vadd.f32 %v338_v0, %v273_v16 }
 0x122   : > { %v295_v5 = vpop.f32.mrf.mxu3 }
 0x123   : > { %v296_v26 = vadd.f32 %v295_v5, %v243_v61 }
 0x124   : > { %v405_v6 = vpop.f32.mrf.mxu2  ;;  %v498_v7 = vpop.f32.mrf.mxu1 }
 0x125   : > { %v434_v15 = vadd.f32 %v405_v6, %v364_v12  ;;  %v367_v33 = vadd.f32 %v361_v3, %v296_v26 }
 0x126   : > { %v478_v8 = vpop.f32.mrf.mxu0 }
 0x127   : > { %v504_v20 = vadd.f32 %v475_v4, %v434_v15 }
 0x12a   : > { %v428_v10 = vpop.f32.mrf.mxu3 }
 0x12b   : > { %v435_v23 = vadd.f32 %v428_v10, %v365_v19 }
 0x12c   : > { %v408_v11 = vpop.f32.mrf.mxu2  ;;  %v501_v13 = vpop.f32.mrf.mxu1 }
 0x12d   : > { %v436_v27 = vadd.f32 %v408_v11, %v366_v22  ;;  %v505_v30 = vadd.f32 %v498_v7, %v435_v23 }
 0x12e   : > { %v615_v18 = vpop.f32.mrf.mxu0 }
 0x12f   : > { %v506_v34 = vadd.f32 %v478_v8, %v436_v27 }
 0x132   : > { %v431_v17 = vpop.f32.mrf.mxu3 }
 0x133   : > { %v437_v39 = vadd.f32 %v431_v17, %v367_v33 }
 0x134   : > { %v545_v21 = vpop.f32.mrf.mxu2  ;;  %v638_v29 = vpop.f32.mrf.mxu1 }
 0x135   : > { %v574_v24 = vadd.f32 %v545_v21, %v504_v20  ;;  %v507_v45 = vadd.f32 %v501_v13, %v437_v39 }
 0x136   : > { %v618_v38 = vpop.f32.mrf.mxu0 }
 0x137   : > { %v644_v28 = vadd.f32 %v615_v18, %v574_v24 }
 0x139   : > { %v660_v31 = vadd.f32 %v653_v25, %v644_v28 }
 0x13a   : > { %v568_v32 = vpop.f32.mrf.mxu3 }
 0x13b   : > { %v664_v35 = vmax.f32 %v660_v31, 0.0  ;;  %v575_v36 = vadd.f32 %v568_v32, %v505_v30 }
 0x13c   : > { %v548_v37 = vpop.f32.mrf.mxu2  ;;  %v641_v49 = vpop.f32.mrf.mxu1 }
 0x13d   : > { %668 = vst [vmem:[%s170_s7] sm:$0xff] %v664_v35  ;;  %v576_v40 = vadd.f32 %v548_v37, %v506_v34  ;;  %v645_v41 = vadd.f32 %v638_v29, %v575_v36 }
 0x13f   : > { %v661_v43 = vadd.f32 %v653_v25, %v645_v41  ;;  %v646_v44 = vadd.f32 %v618_v38, %v576_v40 }
 0x141   : > { %v665_v46 = vmax.f32 %v661_v43, 0.0  ;;  %v662_v47 = vadd.f32 %v658_v42, %v646_v44 }
 0x142   : > { %v571_v48 = vpop.f32.mrf.mxu3 }
 0x143   : > { %669 = vst [vmem:[%s170_s7 + $0x8] sm:$0xff] %v665_v46  ;;  %v666_v50 = vmax.f32 %v662_v47, 0.0  ;;  %v577_v51 = vadd.f32 %v571_v48, %v507_v45 }
 0x145   : > { %670 = vst [vmem:[%s170_s7 + $0x10] sm:$0xff] %v666_v50  ;;  %v647_v52 = vadd.f32 %v641_v49, %v577_v51 }
 0x147   : > { %v663_v53 = vadd.f32 %v658_v42, %v647_v52 }
 0x149   : > { %v667_v54 = vmax.f32 %v663_v53, 0.0 }
 0x14b   : > { %671 = vst [vmem:[%s170_s7 + $0x18] sm:$0xff] %v667_v54 }
 0x14c PF: > { %s13_s12 = sadd.s32 1, %s834_s12  }
 0x14d   : > { %p10_p4 = scmp.ge.s32.totalorder %s13_s12, 4  }
 0x14f   :  { %12 = sbr.rel (!%p10_p4) target bundleno = 1 (0x1), region = 68 }

// kernel: wavegan_generator.10
= control target key start
LH: loop header
LB: loop body
LE: loop exit
PB: predicated region body
PF: predicated region fallthrough
CT: control target
= control target key end

     0   :  { %s2084_s12 = smov 0   ;;  %s2441_s0 = inlined_call_operand.vmem [shape: f32[2,4,1030], index: 0, kind: input, shape index: {}]   ;;  %s2442_s1 = inlined_call_operand.vmem [shape: f32[7,8,4], index: 1, kind: input, shape index: {}]   ;;  %s2443_s2 = inlined_call_operand.vmem [shape: f32[8,1], index: 2, kind: input, shape index: {}]   ;;  %s2444_s3 = inlined_call_operand.vmem [shape: f32[2,8,1024], index: 3, kind: output, shape index: {}]  }
   0x1 LB: > { %s1903_s13 = sadd.s32 4294967295, %s2055_s12   ;;  %p1907_p0 = scmp.ge.s32.totalorder %s2055_s12, 1  ;;  %s2055_s12 = sphi %s2084_s12, %s13_s12  }
   0x2   : > { %p137_p1 = scmp.lt.s32.totalorder %s2055_s12, 3 }
   0x4   : > { %p138_p2 = pnand %p1907_p0, %p137_p1 }
   0x5   : > { %p161_p3 = scmp.lt.s32.totalorder (!%p138_p2), %s1903_s13, 1  ;;  %s2057_s18 = smov (!%p138_p2), 127  }
   0x6   : > { %141 = sbr.rel (%p138_p2) target bundleno = 419 (0x1a3), region = 32  ;;  %s2058_s19 = smov (!%p138_p2), 126  }
   0x7   : > { %s2059_s20 = smov (!%p138_p2), 125   ;;  %s2060_s21 = smov (!%p138_p2), 124  }
   0x8   : > { %s2061_s22 = smov (!%p138_p2), 123   ;;  %s2062_s25 = smov (!%p138_p2), 122  }
   0xb   : > { %s2446_s13 = smov (!%p161_p3, %s1903_s13), 1  ;;  %vm219_vm0 = vcmask 1039360   ;;  %vm232_vm1 = vcmask 1043456   ;;  %vm228_vm2 = vcmask 31744   ;;  %vm650_vm3 = vcmask 1031168  }
   0xc   : > { %s2032_s14 = smul.u32 36, %s2446_s13  ;;  %vm893_vm4 = vcmask 1022976   ;;  %vm1136_vm5 = vcmask 1014784   ;;  %vm1379_vm6 = vcmask 1006592   ;;  %vm1622_vm7 = vcmask 998400   ;;  %s2031_s15 = sshll.u32 %s2446_s13, 6 }
   0xe   : > { %s2098_s17 = scalar_lea.vmem %s2441_s0, %s2032_s14 }
   0xf   : > { %v2101_v0 = vld [vmem:[%s2098_s17 + $0x10] sm:$0xff]  ;;  %v2104_v1 = vld [vmem:[%s2098_s17 + $0x8] sm:$0xff]  ;;  %v2107_v2 = vld [vmem:[%s2098_s17] sm:$0xff] }
  0x10   : > { %188 = vst [vmem:[#allocation1 + $0x20] ss:$2 sm:$0xff] %v2101_v0  ;;  %v2111_v3 = vld [vmem:[%s2098_s17 + $0x18] sm:$0xff]  ;;  %v178_v5 = vld [vmem:[%s2098_s17 + $0x20] sm:$0xf] }
  0x11   : > { %186 = vst [vmem:[#allocation1 + $0x10] ss:$2 sm:$0xff] %v2104_v1  ;;  %v609_v30 = vld [vmem:[%s2098_s17 + $0x20] sm:$0xf] }
  0x12   : > { %184 = vst [vmem:[#allocation1] ss:$2 sm:$0xff] %v2107_v2  ;;  %v852_v40 = vld [vmem:[%s2098_s17 + $0x20] sm:$0xf] }
  0x13   : > { %190 = vst [vmem:[#allocation1 + $0x30] ss:$2 sm:$0xff] %v2111_v3  ;;  %v1095_v46 = vld [vmem:[%s2098_s17 + $0x20] sm:$0xf] }
  0x14   : > { %v1338_v54 = vld [vmem:[%s2098_s17 + $0x20] sm:$0xf] }
  0x17   : > { %v195_v4 = vld.sshfl [vmem:[#allocation1 + $0x20] sm:$0xff pattern:$0x75316420]  ;;  %v196_v8 = vld.sshfl [vmem:[#allocation1 + $0x28] sm:$0xff pattern:$0x75316420] }
  0x18   : > { %209 = vrot.lane.b32.xlu1 %v195_v4, %s2057_s18  ;;  %v193_v6 = vld.sshfl [vmem:[#allocation1 + $0x10] sm:$0xff pattern:$0x75316420]  ;;  %v194_v7 = vld.sshfl [vmem:[#allocation1 + $0x18] sm:$0xff pattern:$0x75316420] }
  0x19   : > { %205 = vrot.lane.b32.xlu0 %v193_v6, %s2057_s18  ;;  %411 = vst [vmem:[#allocation1 + $0x10] ss:$2 sm:$0xff] %v2104_v1  ;;  %v192_v9 = vld.sshfl [vmem:[#allocation1 + $0x8] sm:$0xff pattern:$0x75316420] }
  0x1a   : > { %203 = vrot.lane.b32.xlu2 %v192_v9, %s2057_s18  ;;  %v191_v10 = vld.sshfl [vmem:[#allocation1] sm:$0xff pattern:$0x75316420]  ;;  %v198_v11 = vld.sshfl [vmem:[#allocation1 + $0x38] sm:$0xff pattern:$0x75316420] }
  0x1b   : > { %v197_v12 = vld.sshfl [vmem:[#allocation1 + $0x30] sm:$0xff pattern:$0x75316420]  ;;  %199 = vst [vmem:[#allocation1] ss:$2 sm:$0xff] %v178_v5 }
  0x1c   : > { %415 = vst [vmem:[#allocation1 + $0x30] ss:$2 sm:$0xff] %v2111_v3  ;;  %v1581_v4 = vld [vmem:[%s2098_s17 + $0x20] sm:$0xf] }
  0x1d   : > { %413 = vst [vmem:[#allocation1 + $0x20] ss:$2 sm:$0xff] %v2101_v0 }
  0x20   : > { %v2123_v13 = vld.sshfl [vmem:[#allocation1 + $0x10] sm:$0xff pattern:$0x75316420]  ;;  %v2125_v14 = vld.sshfl [vmem:[#allocation1 + $0x18] sm:$0xff pattern:$0x75316420]  ;;  %201 = vrot.lane.b32.xlu1 %v191_v10, %s2057_s18 }
  0x21   : > { %207 = vrot.lane.b32.xlu0 %v194_v7, %s2057_s18  ;;  %617 = vst [vmem:[#allocation1 + $0x10] ss:$2 sm:$0xff] %v2104_v1 }
  0x22   : > { %213 = vrot.lane.b32.xlu2 %v197_v12, %s2057_s18  ;;  %v200_v15 = vld.sshfl [vmem:[#allocation1] sm:$0xff pattern:$0x75316420] }
  0x23   : > { %v2131_v16 = vld.sshfl [vmem:[#allocation1 + $0x30] sm:$0xff pattern:$0x75316420]  ;;  %v2133_v17 = vld.sshfl [vmem:[#allocation1 + $0x38] sm:$0xff pattern:$0x75316420] }
  0x24   : > { %621 = vst [vmem:[#allocation1 + $0x30] ss:$2 sm:$0xff] %v2111_v3  ;;  %v2136_v18 = vld.sshfl [vmem:[#allocation1 + $0x20] sm:$0xff pattern:$0x75316420] }
  0x25   : > { %409 = vst [vmem:[#allocation1] ss:$2 sm:$0xff] %v2107_v2  ;;  %v2139_v19 = vld.sshfl [vmem:[#allocation1 + $0x28] sm:$0xff pattern:$0x75316420] }
  0x26   : > { %619 = vst [vmem:[#allocation1 + $0x20] ss:$2 sm:$0xff] %v2101_v0 }
  0x28   : > { %217 = vrot.lane.b32.xlu1 %v200_v15, %s2057_s18  ;;  %v624_v20 = vld.sshfl [vmem:[#allocation1 + $0x10] sm:$0xff pattern:$0x75316420]  ;;  %v625_v21 = vld.sshfl [vmem:[#allocation1 + $0x18] sm:$0xff pattern:$0x75316420] }
  0x29   : > { %215 = vrot.lane.b32.xlu0 %v198_v11, %s2057_s18  ;;  %860 = vst [vmem:[#allocation1 + $0x10] ss:$2 sm:$0xff] %v2104_v1 }
  0x2a   : > { %211 = vrot.lane.b32.xlu2 %v196_v8, %s2057_s18  ;;  %s2419_s18 = scalar_lea.vmem %s2444_s3, %s2031_s15 }
  0x2b   : > { %v629_v22 = vld.sshfl [vmem:[#allocation1 + $0x38] sm:$0xff pattern:$0x75316420]  ;;  %v628_v23 = vld.sshfl [vmem:[#allocation1 + $0x30] sm:$0xff pattern:$0x75316420] }
  0x2c   : > { %v2146_v24 = vld.sshfl [vmem:[#allocation1] sm:$0xff pattern:$0x75316420]  ;;  %v2148_v25 = vld.sshfl [vmem:[#allocation1 + $0x8] sm:$0xff pattern:$0x75316420] }
  0x2d   : > { %615 = vst [vmem:[#allocation1] ss:$2 sm:$0xff] %v2107_v2  ;;  %v626_v26 = vld.sshfl [vmem:[#allocation1 + $0x20] sm:$0xff pattern:$0x75316420] }
  0x2e   : > { %864 = vst [vmem:[#allocation1 + $0x30] ss:$2 sm:$0xff] %v2111_v3  ;;  %v627_v27 = vld.sshfl [vmem:[#allocation1 + $0x28] sm:$0xff pattern:$0x75316420] }
  0x2f   : > { %862 = vst [vmem:[#allocation1 + $0x20] ss:$2 sm:$0xff] %v2101_v0 }
  0x30   : > { %638 = vrot.lane.b32.xlu1 %v625_v21, %s2058_s19  ;;  %v868_v28 = vld.sshfl [vmem:[#allocation1 + $0x18] sm:$0xff pattern:$0x75316420]  ;;  %v867_v29 = vld.sshfl [vmem:[#allocation1 + $0x10] sm:$0xff pattern:$0x75316420] }
  0x31   : > { %636 = vrot.lane.b32.xlu0 %v624_v20, %s2058_s19  ;;  %1103 = vst [vmem:[#allocation1 + $0x10] ss:$2 sm:$0xff] %v2104_v1 }
  0x32   : > { %640 = vrot.lane.b32.xlu2 %v626_v26, %s2058_s19 }
  0x34   : > { %v623_v31 = vld.sshfl [vmem:[#allocation1 + $0x8] sm:$0xff pattern:$0x75316420]  ;;  %v622_v32 = vld.sshfl [vmem:[#allocation1] sm:$0xff pattern:$0x75316420] }
  0x35   : > { %630 = vst [vmem:[#allocation1] ss:$2 sm:$0xff] %v609_v30  ;;  %v872_v33 = vld.sshfl [vmem:[#allocation1 + $0x38] sm:$0xff pattern:$0x75316420] }
  0x36   : > { %v871_v34 = vld.sshfl [vmem:[#allocation1 + $0x30] sm:$0xff pattern:$0x75316420]  ;;  %v869_v36 = vld.sshfl [vmem:[#allocation1 + $0x20] sm:$0xff pattern:$0x75316420] }
  0x37   : > { %1107 = vst [vmem:[#allocation1 + $0x30] ss:$2 sm:$0xff] %v2111_v3  ;;  %v870_v39 = vld.sshfl [vmem:[#allocation1 + $0x28] sm:$0xff pattern:$0x75316420] }
  0x38   : > { %634 = vrot.lane.b32.xlu1 %v623_v31, %s2058_s19  ;;  %v1110_v37 = vld.sshfl [vmem:[#allocation1 + $0x10] sm:$0xff pattern:$0x75316420]  ;;  %v1111_v38 = vld.sshfl [vmem:[#allocation1 + $0x18] sm:$0xff pattern:$0x75316420] }
  0x39   : > { %646 = vrot.lane.b32.xlu0 %v629_v22, %s2058_s19  ;;  %1346 = vst [vmem:[#allocation1 + $0x10] ss:$2 sm:$0xff] %v2104_v1 }
  0x3a   : > { %644 = vrot.lane.b32.xlu2 %v628_v23, %s2058_s19  ;;  %1105 = vst [vmem:[#allocation1 + $0x20] ss:$2 sm:$0xff] %v2101_v0 }
  0x3c   : > { %v631_v35 = vld.sshfl [vmem:[#allocation1] sm:$0xff pattern:$0x75316420] }
  0x3d   : > { %858 = vst [vmem:[#allocation1] ss:$2 sm:$0xff] %v2107_v2 }
  0x3e   : > { %v1115_v44 = vld.sshfl [vmem:[#allocation1 + $0x38] sm:$0xff pattern:$0x75316420]  ;;  %v1114_v45 = vld.sshfl [vmem:[#allocation1 + $0x30] sm:$0xff pattern:$0x75316420] }
  0x3f   : > { %1350 = vst [vmem:[#allocation1 + $0x30] ss:$2 sm:$0xff] %v2111_v3 }
  0x40   : > { %881 = vrot.lane.b32.xlu1 %v868_v28, %s2059_s20  ;;  %v1353_v50 = vld.sshfl [vmem:[#allocation1 + $0x10] sm:$0xff pattern:$0x75316420]  ;;  %v1354_v51 = vld.sshfl [vmem:[#allocation1 + $0x18] sm:$0xff pattern:$0x75316420] }
  0x41   : > { %632 = vrot.lane.b32.xlu0 %v622_v32, %s2058_s19  ;;  %v1112_v49 = vld.sshfl [vmem:[#allocation1 + $0x20] sm:$0xff pattern:$0x75316420]  ;;  %v1113_v52 = vld.sshfl [vmem:[#allocation1 + $0x28] sm:$0xff pattern:$0x75316420] }
  0x42   : > { %642 = vrot.lane.b32.xlu2 %v627_v27, %s2058_s19  ;;  %1589 = vst [vmem:[#allocation1 + $0x10] ss:$2 sm:$0xff] %v2104_v1 }
  0x43   : > { %1348 = vst [vmem:[#allocation1 + $0x20] ss:$2 sm:$0xff] %v2101_v0 }
  0x44   : > { %v866_v41 = vld.sshfl [vmem:[#allocation1 + $0x8] sm:$0xff pattern:$0x75316420]  ;;  %v865_v42 = vld.sshfl [vmem:[#allocation1] sm:$0xff pattern:$0x75316420] }
  0x45   : > { %873 = vst [vmem:[#allocation1] ss:$2 sm:$0xff] %v852_v40 }
  0x46   : > { %v1358_v57 = vld.sshfl [vmem:[#allocation1 + $0x38] sm:$0xff pattern:$0x75316420]  ;;  %v1357_v59 = vld.sshfl [vmem:[#allocation1 + $0x30] sm:$0xff pattern:$0x75316420] }
  0x47   : > { %1593 = vst [vmem:[#allocation1 + $0x30] ss:$2 sm:$0xff] %v2111_v3 }
  0x48   : > { %648 = vrot.lane.b32.xlu1 %v631_v35, %s2058_s19 }
  0x49   : > { %879 = vrot.lane.b32.xlu0 %v867_v29, %s2059_s20  ;;  %v1597_v10 = vld.sshfl [vmem:[#allocation1 + $0x18] sm:$0xff pattern:$0x75316420]  ;;  %v1596_v11 = vld.sshfl [vmem:[#allocation1 + $0x10] sm:$0xff pattern:$0x75316420] }
  0x4a   : > { %883 = vrot.lane.b32.xlu2 %v869_v36, %s2059_s20  ;;  %v1355_v61 = vld.sshfl [vmem:[#allocation1 + $0x20] sm:$0xff pattern:$0x75316420]  ;;  %v1356_v62 = vld.sshfl [vmem:[#allocation1 + $0x28] sm:$0xff pattern:$0x75316420] }
  0x4b   : > { %1591 = vst [vmem:[#allocation1 + $0x20] ss:$2 sm:$0xff] %v2101_v0  ;;  %v1911_v0 = vld [vmem:[%s2442_s1 + $0x8] sm:$0xff] }
  0x4c   : > { %v874_v43 = vld.sshfl [vmem:[#allocation1] sm:$0xff pattern:$0x75316420] }
  0x4d   : > { %1101 = vst [vmem:[#allocation1] ss:$2 sm:$0xff] %v2107_v2 }
  0x4e   : > { %v1600_v27 = vld.sshfl [vmem:[#allocation1 + $0x30] sm:$0xff pattern:$0x75316420] }
  0x50   : > { %877 = vrot.lane.b32.xlu1 %v866_v41, %s2059_s20  ;;  %v1944_v41 = vld [vmem:[%s2442_s1 + $0x10] sm:$0xff] }
  0x51   : > { %875 = vrot.lane.b32.xlu0 %v865_v42, %s2059_s20 }
  0x52   : > { %887 = vrot.lane.b32.xlu2 %v871_v34, %s2059_s20  ;;  %v1598_v12 = vld.sshfl [vmem:[#allocation1 + $0x20] sm:$0xff pattern:$0x75316420]  ;;  %v1599_v34 = vld.sshfl [vmem:[#allocation1 + $0x28] sm:$0xff pattern:$0x75316420] }
  0x54   : > { %v1109_v47 = vld.sshfl [vmem:[#allocation1 + $0x8] sm:$0xff pattern:$0x75316420]  ;;  %v1108_v48 = vld.sshfl [vmem:[#allocation1] sm:$0xff pattern:$0x75316420] }
  0x55   : > { %1116 = vst [vmem:[#allocation1] ss:$2 sm:$0xff] %v1095_v46 }
  0x58   : > { %891 = vrot.lane.b32.xlu1 %v874_v43, %s2059_s20 }
  0x59   : > { %889 = vrot.lane.b32.xlu0 %v872_v33, %s2059_s20 }
  0x5a   : > { %885 = vrot.lane.b32.xlu2 %v870_v39, %s2059_s20 }
  0x5c   : > { %v1117_v53 = vld.sshfl [vmem:[#allocation1] sm:$0xff pattern:$0x75316420] }
  0x5d   : > { %1344 = vst [vmem:[#allocation1] ss:$2 sm:$0xff] %v2107_v2 }
  0x60   : > { %1124 = vrot.lane.b32.xlu1 %v1111_v38, %s2060_s21 }
  0x61   : > { %1122 = vrot.lane.b32.xlu0 %v1110_v37, %s2060_s21 }
  0x62   : > { %1126 = vrot.lane.b32.xlu2 %v1112_v49, %s2060_s21 }
  0x64   : > { %v1352_v55 = vld.sshfl [vmem:[#allocation1 + $0x8] sm:$0xff pattern:$0x75316420]  ;;  %v1351_v56 = vld.sshfl [vmem:[#allocation1] sm:$0xff pattern:$0x75316420] }
  0x65   : > { %1359 = vst [vmem:[#allocation1] ss:$2 sm:$0xff] %v1338_v54  ;;  %v1961_v54 = vld [vmem:[%s2442_s1 + $0x18] sm:$0xff] }
  0x68   : > { %1120 = vrot.lane.b32.xlu1 %v1109_v47, %s2060_s21 }
  0x69   : > { %1118 = vrot.lane.b32.xlu0 %v1108_v48, %s2060_s21 }
  0x6a   : > { %1130 = vrot.lane.b32.xlu2 %v1114_v45, %s2060_s21 }
  0x6c   : > { %v1360_v58 = vld.sshfl [vmem:[#allocation1] sm:$0xff pattern:$0x75316420] }
  0x6d   : > { %1587 = vst [vmem:[#allocation1] ss:$2 sm:$0xff] %v2107_v2 }
  0x70   : > { %1134 = vrot.lane.b32.xlu1 %v1117_v53, %s2060_s21 }
  0x71   : > { %1132 = vrot.lane.b32.xlu0 %v1115_v44, %s2060_s21 }
  0x72   : > { %1128 = vrot.lane.b32.xlu2 %v1113_v52, %s2060_s21 }
  0x74   : > { %v204_v60 = vpop.permute.xlu2 %203  ;;  %v1595_v63 = vld.sshfl [vmem:[#allocation1 + $0x8] sm:$0xff pattern:$0x75316420]  ;;  %v1594_v1 = vld.sshfl [vmem:[#allocation1] sm:$0xff pattern:$0x75316420] }
  0x75   : > { %1602 = vst [vmem:[#allocation1] ss:$2 sm:$0xff] %v1581_v4 }
  0x78   : > { %1367 = vrot.lane.b32.xlu1 %v1354_v51, %s2061_s22 }
  0x79   : > { %1365 = vrot.lane.b32.xlu0 %v1353_v50, %s2061_s22 }
  0x7a   : > { %1369 = vrot.lane.b32.xlu2 %v1355_v61, %s2061_s22 }
  0x7c   : > { %v214_v5 = vpop.permute.xlu2 %213  ;;  %v1603_v33 = vld.sshfl [vmem:[#allocation1] sm:$0xff pattern:$0x75316420] }
  0x80   : > { %1363 = vrot.lane.b32.xlu1 %v1352_v55, %s2061_s22 }
  0x81   : > { %1361 = vrot.lane.b32.xlu0 %v1351_v56, %s2061_s22 }
  0x82   : > { %1373 = vrot.lane.b32.xlu2 %v1357_v59, %s2061_s22 }
  0x84   : > { %v212_v2 = vpop.permute.xlu2 %211 }
  0x85   : > { %v225_v9 = vsel %vm219_vm0, %v212_v2, %v214_v5 }
  0x88   : > { %1377 = vrot.lane.b32.xlu1 %v1360_v58, %s2061_s22 }
  0x89   : > { %1375 = vrot.lane.b32.xlu0 %v1358_v57, %s2061_s22 }
  0x8a   : > { %v210_v3 = vpop.permute.xlu1 %209  ;;  %1371 = vrot.lane.b32.xlu2 %v1356_v62, %s2061_s22 }
  0x8b   : > { %v206_v6 = vpop.permute.xlu0 %205 }
  0x8c   : > { %v221_v7 = vsel %vm219_vm0, %v204_v60, %v206_v6  ;;  %v2193_v8 = vpop.permute.xlu2 %640 }
  0x8d   : > { %1914 = vmatpush.msk.msra.mxu1 %vm232_vm1, %v221_v7 }
  0x8e   : > { %1915 = vmatmul.msk.f32.vlgmr.msra.gmra.mxu1 %vm228_vm2, %v1911_v0 }
  0x8f   : > { %1922 = vmatpush.msk.msrb.mxu1 %vm232_vm1, %v225_v9 }
  0x90   : > { %1610 = vrot.lane.b32.xlu1 %v1597_v10, %s2062_s25 }
  0x91   : > { %1930 = vmatpush.msk.msra.mxu1 %vm232_vm1, %v2148_v25  ;;  %1608 = vrot.lane.b32.xlu0 %v1596_v11, %s2062_s25  ;;  %v224_v25 = vsel %vm219_vm0, %v210_v3, %v212_v2 }
  0x92   : > { %v202_v15 = vpop.permute.xlu1 %201  ;;  %1612 = vrot.lane.b32.xlu2 %v1598_v12, %s2062_s25 }
  0x93   : > { %v208_v20 = vpop.permute.xlu0 %207  ;;  %v220_v21 = vsel %vm219_vm0, %v202_v15, %v204_v60 }
  0x94   : > { %1912 = vmatpush.msk.msra.mxu0 %vm232_vm1, %v220_v21  ;;  %v222_v22 = vsel %vm219_vm0, %v206_v6, %v208_v20  ;;  %v223_v23 = vsel %vm219_vm0, %v208_v20, %v210_v3  ;;  %v645_v26 = vpop.permute.xlu2 %644 }
  0x95   : > { %1916 = vmatpush.msk.msra.mxu2 %vm232_vm1, %v222_v22  ;;  %1918 = vmatpush.msk.msra.mxu3 %vm232_vm1, %v223_v23 }
  0x96   : > { %1913 = vmatmul.msk.f32.vlgmr.msra.gmra.mxu0 %vm228_vm2, %v1911_v0  ;;  %1917 = vmatmul.msk.f32.vlgmr.msra.gmra.mxu2 %vm228_vm2, %v1911_v0 }
  0x97   : > { %1919 = vmatmul.msk.f32.vlgmr.msra.gmra.mxu3 %vm228_vm2, %v1911_v0  ;;  %1920 = vmatpush.msk.msrb.mxu0 %vm232_vm1, %v224_v25 }
  0x98   : > { %1606 = vrot.lane.b32.xlu1 %v1595_v63, %s2062_s25  ;;  %1923 = vmatmul.msk.f32.vlgmr.msrb.gmra.mxu1 %vm228_vm2, %v1911_v0 }
  0x99   : > { %1604 = vrot.lane.b32.xlu0 %v1594_v1, %s2062_s25  ;;  %1928 = vmatpush.msk.msra.mxu0 %vm232_vm1, %v2146_v24  ;;  %v1601_v24 = vld.sshfl [vmem:[#allocation1 + $0x38] sm:$0xff pattern:$0x75316420] }
  0x9a   : > { %v218_v28 = vpop.permute.xlu1 %217  ;;  %1616 = vrot.lane.b32.xlu2 %v1600_v27, %s2062_s25  ;;  %1938 = vmatpush.msk.msrb.mxu1 %vm232_vm1, %v2139_v19  ;;  %v171_v19 = vld [vmem:[%s2442_s1] sm:$0xff] }
  0x9b   : > { %v216_v29 = vpop.permute.xlu0 %215 }
  0x9c   : > { %v226_v30 = vsel %vm219_vm0, %v214_v5, %v216_v29  ;;  %v227_v31 = vsel %vm219_vm0, %v216_v29, %v218_v28  ;;  %v643_v32 = vpop.permute.xlu2 %642 }
  0x9d   : > { %1924 = vmatpush.msk.msrb.mxu2 %vm232_vm1, %v226_v30  ;;  %1926 = vmatpush.msk.msrb.mxu3 %vm232_vm1, %v227_v31  ;;  %v655_v46 = vsel %vm650_vm3, %v2193_v8, %v643_v32  ;;  %v1995_v30 = vld [vmem:[%s2442_s1 + $0x28] sm:$0xff] }
  0x9e   : > { %1921 = vmatmul.msk.f32.vlgmr.msrb.gmra.mxu0 %vm228_vm2, %v1911_v0  ;;  %1925 = vmatmul.msk.f32.vlgmr.msrb.gmra.mxu2 %vm228_vm2, %v1911_v0 }
  0x9f   : > { %1927 = vmatmul.msk.f32.vlgmr.msrb.gmra.mxu3 %vm228_vm2, %v1911_v0  ;;  %1932 = vmatpush.msk.msra.mxu2 %vm232_vm1, %v2123_v13  ;;  %v1978_v0 = vld [vmem:[%s2442_s1 + $0x20] sm:$0xff] }
  0xa0   : > { %1620 = vrot.lane.b32.xlu1 %v1603_v33, %s2062_s25  ;;  %1934 = vmatpush.msk.msra.mxu3 %vm232_vm1, %v2125_v14 }
  0xa1   : > { %1618 = vrot.lane.b32.xlu0 %v1601_v24, %s2062_s25  ;;  %1940 = vmatpush.msk.msrb.mxu2 %vm232_vm1, %v2131_v16  ;;  %v656_v16 = vsel %vm650_vm3, %v643_v32, %v645_v26 }
  0xa2   : > { %v639_v35 = vpop.permute.xlu1 %638  ;;  %1942 = vmatpush.msk.msrb.mxu3 %vm232_vm1, %v2133_v17  ;;  %1931 = vmatmul.msk.f32.vlgmr.msra.gmra.mxu1 %vm228_vm2, %v171_v19 }
  0xa3   : > { %v637_v13 = vpop.permute.xlu0 %636  ;;  %1936 = vmatpush.msk.msrb.mxu0 %vm232_vm1, %v2136_v18  ;;  %1614 = vrot.lane.b32.xlu2 %v1599_v34, %s2062_s25  ;;  %v654_v37 = vsel %vm650_vm3, %v639_v35, %v2193_v8 }
  0xa4   : > { %v653_v14 = vsel %vm650_vm3, %v637_v13, %v639_v35  ;;  %v884_v36 = vpop.permute.xlu2 %883 }
  0xa6   : > { %1929 = vmatmul.msk.f32.vlgmr.msra.gmra.mxu0 %vm228_vm2, %v171_v19  ;;  %1933 = vmatmul.msk.f32.vlgmr.msra.gmra.mxu2 %vm228_vm2, %v171_v19 }
  0xa7   : > { %1935 = vmatmul.msk.f32.vlgmr.msra.gmra.mxu3 %vm228_vm2, %v171_v19  ;;  %1949 = vmatpush.msk.msra.mxu2 %vm232_vm1, %v653_v14  ;;  %v2063_v14 = vmov 0  }
  0xa8   : > { %1951 = vmatpush.msk.msra.mxu3 %vm232_vm1, %v654_v37  ;;  %2048 = vset.pattern.permute.xlu0 %v2063_v14  ;;  %v1818_v37 = vld [vmem:[%s2443_s2] sm:$0xff] }
  0xa9   : > { %1821 = vperm.xlu0 %2048, %v1818_v37  }
  0xaa   : > { %v635_v17 = vpop.permute.xlu1 %634  ;;  %1939 = vmatmul.msk.f32.vlgmr.msrb.gmra.mxu1 %vm228_vm2, %v171_v19 }
  0xab   : > { %v647_v18 = vpop.permute.xlu0 %646  ;;  %v652_v38 = vsel %vm650_vm3, %v635_v17, %v637_v13 }
  0xac   : > { %v657_v39 = vsel %vm650_vm3, %v645_v26, %v647_v18  ;;  %1947 = vmatpush.msk.msra.mxu1 %vm232_vm1, %v652_v38  ;;  %v888_v40 = vpop.permute.xlu2 %887 }
  0xae   : > { %1955 = vmatpush.msk.msrb.mxu1 %vm232_vm1, %v656_v16  ;;  %1937 = vmatmul.msk.f32.vlgmr.msrb.gmra.mxu0 %vm228_vm2, %v171_v19 }
  0xaf   : > { %1941 = vmatmul.msk.f32.vlgmr.msrb.gmra.mxu2 %vm228_vm2, %v171_v19  ;;  %1943 = vmatmul.msk.f32.vlgmr.msrb.gmra.mxu3 %vm228_vm2, %v171_v19 }
  0xb0   : > { %1957 = vmatpush.msk.msrb.mxu2 %vm232_vm1, %v657_v39 }
  0xb2   : > { %v882_v42 = vpop.permute.xlu1 %881  ;;  %1948 = vmatmul.msk.f32.vlgmr.msra.gmra.mxu1 %vm228_vm2, %v1944_v41 }
  0xb3   : > { %v633_v43 = vpop.permute.xlu0 %632  ;;  %v897_v50 = vsel %vm893_vm4, %v882_v42, %v884_v36 }
  0xb4   : > { %v651_v44 = vsel %vm650_vm3, %v633_v43, %v635_v17  ;;  %v886_v45 = vpop.permute.xlu2 %885  ;;  %v2012_v43 = vld [vmem:[%s2442_s1 + $0x30] sm:$0xff] }
  0xb5   : > { %1945 = vmatpush.msk.msra.mxu0 %vm232_vm1, %v651_v44  ;;  %v899_v59 = vsel %vm893_vm4, %v886_v45, %v888_v40  ;;  %v898_v60 = vsel %vm893_vm4, %v884_v36, %v886_v45 }
  0xb6   : > { %1946 = vmatmul.msk.f32.vlgmr.msra.gmra.mxu0 %vm228_vm2, %v1944_v41 }
  0xb7   : > { %1950 = vmatmul.msk.f32.vlgmr.msra.gmra.mxu2 %vm228_vm2, %v1944_v41  ;;  %1952 = vmatmul.msk.f32.vlgmr.msra.gmra.mxu3 %vm228_vm2, %v1944_v41 }
  0xb8   : > { %1953 = vmatpush.msk.msrb.mxu0 %vm232_vm1, %v655_v46 }
  0xba   : > { %v649_v47 = vpop.permute.xlu1 %648  ;;  %1956 = vmatmul.msk.f32.vlgmr.msrb.gmra.mxu1 %vm228_vm2, %v1944_v41 }
  0xbb   : > { %v880_v48 = vpop.permute.xlu0 %879  ;;  %v658_v49 = vsel %vm650_vm3, %v647_v18, %v649_v47 }
  0xbc   : > { %v896_v51 = vsel %vm893_vm4, %v880_v48, %v882_v42  ;;  %1959 = vmatpush.msk.msrb.mxu3 %vm232_vm1, %v658_v49  ;;  %v1127_v52 = vpop.permute.xlu2 %1126 }
  0xbd   : > { %1966 = vmatpush.msk.msra.mxu2 %vm232_vm1, %v896_v51 }
  0xbe   : > { %1968 = vmatpush.msk.msra.mxu3 %vm232_vm1, %v897_v50  ;;  %1954 = vmatmul.msk.f32.vlgmr.msrb.gmra.mxu0 %vm228_vm2, %v1944_v41 }
  0xbf   : > { %1958 = vmatmul.msk.f32.vlgmr.msrb.gmra.mxu2 %vm228_vm2, %v1944_v41  ;;  %1960 = vmatmul.msk.f32.vlgmr.msrb.gmra.mxu3 %vm228_vm2, %v1944_v41 }
  0xc2   : > { %v878_v53 = vpop.permute.xlu1 %877 }
  0xc3   : > { %v895_v55 = vsel %vm893_vm4, %v878_v53, %v880_v48  ;;  %v876_v56 = vpop.permute.xlu0 %875 }
  0xc4   : > { %v894_v57 = vsel %vm893_vm4, %v876_v56, %v878_v53  ;;  %1964 = vmatpush.msk.msra.mxu1 %vm232_vm1, %v895_v55  ;;  %v1131_v58 = vpop.permute.xlu2 %1130 }
  0xc5   : > { %1962 = vmatpush.msk.msra.mxu0 %vm232_vm1, %v894_v57  ;;  %1965 = vmatmul.msk.f32.vlgmr.msra.gmra.mxu1 %vm228_vm2, %v1961_v54 }
  0xc6   : > { %1963 = vmatmul.msk.f32.vlgmr.msra.gmra.mxu0 %vm228_vm2, %v1961_v54  ;;  %1972 = vmatpush.msk.msrb.mxu1 %vm232_vm1, %v899_v59 }
  0xc7   : > { %1967 = vmatmul.msk.f32.vlgmr.msra.gmra.mxu2 %vm228_vm2, %v1961_v54  ;;  %1969 = vmatmul.msk.f32.vlgmr.msra.gmra.mxu3 %vm228_vm2, %v1961_v54 }
  0xc8   : > { %1970 = vmatpush.msk.msrb.mxu0 %vm232_vm1, %v898_v60 }
  0xca   : > { %v892_v61 = vpop.permute.xlu1 %891 }
  0xcb   : > { %v890_v62 = vpop.permute.xlu0 %889 }
  0xcc   : > { %v900_v63 = vsel %vm893_vm4, %v888_v40, %v890_v62  ;;  %v901_v1 = vsel %vm893_vm4, %v890_v62, %v892_v61  ;;  %v1129_v4 = vpop.permute.xlu2 %1128 }
  0xcd   : > { %1974 = vmatpush.msk.msrb.mxu2 %vm232_vm1, %v900_v63  ;;  %1976 = vmatpush.msk.msrb.mxu3 %vm232_vm1, %v901_v1  ;;  %v1142_v9 = vsel %vm1136_vm5, %v1129_v4, %v1131_v58  ;;  %v1141_v15 = vsel %vm1136_vm5, %v1127_v52, %v1129_v4 }
  0xce   : > { %1971 = vmatmul.msk.f32.vlgmr.msrb.gmra.mxu0 %vm228_vm2, %v1961_v54  ;;  %1973 = vmatmul.msk.f32.vlgmr.msrb.gmra.mxu1 %vm228_vm2, %v1961_v54 }
  0xcf   : > { %1975 = vmatmul.msk.f32.vlgmr.msrb.gmra.mxu2 %vm228_vm2, %v1961_v54  ;;  %1977 = vmatmul.msk.f32.vlgmr.msrb.gmra.mxu3 %vm228_vm2, %v1961_v54 }
  0xd2   : > { %v1125_v5 = vpop.permute.xlu1 %1124 }
  0xd3   : > { %v1123_v2 = vpop.permute.xlu0 %1122  ;;  %v1140_v3 = vsel %vm1136_vm5, %v1125_v5, %v1127_v52 }
  0xd4   : > { %v1139_v6 = vsel %vm1136_vm5, %v1123_v2, %v1125_v5  ;;  %1985 = vmatpush.msk.msra.mxu3 %vm232_vm1, %v1140_v3  ;;  %v1370_v7 = vpop.permute.xlu2 %1369 }
  0xd5   : > { %1983 = vmatpush.msk.msra.mxu2 %vm232_vm1, %v1139_v6 }
  0xd7   : > { %1984 = vmatmul.msk.f32.vlgmr.msra.gmra.mxu2 %vm228_vm2, %v1978_v0  ;;  %1986 = vmatmul.msk.f32.vlgmr.msra.gmra.mxu3 %vm228_vm2, %v1978_v0 }
  0xda   : > { %v1121_v8 = vpop.permute.xlu1 %1120 }
  0xdb   : > { %v1138_v10 = vsel %vm1136_vm5, %v1121_v8, %v1123_v2  ;;  %v1119_v11 = vpop.permute.xlu0 %1118 }
  0xdc   : > { %v1137_v12 = vsel %vm1136_vm5, %v1119_v11, %v1121_v8  ;;  %1981 = vmatpush.msk.msra.mxu1 %vm232_vm1, %v1138_v10  ;;  %v1374_v21 = vpop.permute.xlu2 %1373 }
  0xdd   : > { %1979 = vmatpush.msk.msra.mxu0 %vm232_vm1, %v1137_v12  ;;  %1982 = vmatmul.msk.f32.vlgmr.msra.gmra.mxu1 %vm228_vm2, %v1978_v0 }
  0xde   : > { %1980 = vmatmul.msk.f32.vlgmr.msra.gmra.mxu0 %vm228_vm2, %v1978_v0  ;;  %1989 = vmatpush.msk.msrb.mxu1 %vm232_vm1, %v1142_v9 }
  0xdf   : > { %1987 = vmatpush.msk.msrb.mxu0 %vm232_vm1, %v1141_v15 }
  0xe2   : > { %v1135_v20 = vpop.permute.xlu1 %1134 }
  0xe3   : > { %v1133_v22 = vpop.permute.xlu0 %1132 }
  0xe4   : > { %v1143_v23 = vsel %vm1136_vm5, %v1131_v58, %v1133_v22  ;;  %v1144_v26 = vsel %vm1136_vm5, %v1133_v22, %v1135_v20  ;;  %v1372_v31 = vpop.permute.xlu2 %1371 }
  0xe5   : > { %1991 = vmatpush.msk.msrb.mxu2 %vm232_vm1, %v1143_v23  ;;  %1993 = vmatpush.msk.msrb.mxu3 %vm232_vm1, %v1144_v26  ;;  %v1385_v33 = vsel %vm1379_vm6, %v1372_v31, %v1374_v21  ;;  %v1384_v35 = vsel %vm1379_vm6, %v1370_v7, %v1372_v31 }
  0xe6   : > { %1988 = vmatmul.msk.f32.vlgmr.msrb.gmra.mxu0 %vm228_vm2, %v1978_v0  ;;  %1990 = vmatmul.msk.f32.vlgmr.msrb.gmra.mxu1 %vm228_vm2, %v1978_v0 }
  0xe7   : > { %1992 = vmatmul.msk.f32.vlgmr.msrb.gmra.mxu2 %vm228_vm2, %v1978_v0  ;;  %1994 = vmatmul.msk.f32.vlgmr.msrb.gmra.mxu3 %vm228_vm2, %v1978_v0 }
  0xea   : > { %v1368_v25 = vpop.permute.xlu1 %1367 }
  0xeb   : > { %v1366_v27 = vpop.permute.xlu0 %1365  ;;  %v1383_v28 = vsel %vm1379_vm6, %v1368_v25, %v1370_v7 }
  0xec   : > { %v1382_v29 = vsel %vm1379_vm6, %v1366_v27, %v1368_v25  ;;  %2002 = vmatpush.msk.msra.mxu3 %vm232_vm1, %v1383_v28  ;;  %v1613_v13 = vpop.permute.xlu2 %1612 }
  0xed   : > { %2000 = vmatpush.msk.msra.mxu2 %vm232_vm1, %v1382_v29 }
  0xef   : > { %2001 = vmatmul.msk.f32.vlgmr.msra.gmra.mxu2 %vm228_vm2, %v1995_v30  ;;  %2003 = vmatmul.msk.f32.vlgmr.msra.gmra.mxu3 %vm228_vm2, %v1995_v30 }
  0xf2   : > { %v1364_v32 = vpop.permute.xlu1 %1363 }
  0xf3   : > { %v1381_v24 = vsel %vm1379_vm6, %v1364_v32, %v1366_v27  ;;  %v1362_v19 = vpop.permute.xlu0 %1361 }
  0xf4   : > { %v1380_v34 = vsel %vm1379_vm6, %v1362_v19, %v1364_v32  ;;  %1998 = vmatpush.msk.msra.mxu1 %vm232_vm1, %v1381_v24  ;;  %v1617_v38 = vpop.permute.xlu2 %1616 }
  0xf5   : > { %1996 = vmatpush.msk.msra.mxu0 %vm232_vm1, %v1380_v34  ;;  %1999 = vmatmul.msk.f32.vlgmr.msra.gmra.mxu1 %vm228_vm2, %v1995_v30 }
  0xf6   : > { %1997 = vmatmul.msk.f32.vlgmr.msra.gmra.mxu0 %vm228_vm2, %v1995_v30  ;;  %2006 = vmatpush.msk.msrb.mxu1 %vm232_vm1, %v1385_v33 }
  0xf7   : > { %2004 = vmatpush.msk.msrb.mxu0 %vm232_vm1, %v1384_v35 }
  0xfa   : > { %v1378_v36 = vpop.permute.xlu1 %1377 }
  0xfb   : > { %v1376_v16 = vpop.permute.xlu0 %1375 }
  0xfc   : > { %v1386_v17 = vsel %vm1379_vm6, %v1374_v21, %v1376_v16  ;;  %v1387_v18 = vsel %vm1379_vm6, %v1376_v16, %v1378_v36 }
  0xfd   : > { %2008 = vmatpush.msk.msrb.mxu2 %vm232_vm1, %v1386_v17  ;;  %2010 = vmatpush.msk.msrb.mxu3 %vm232_vm1, %v1387_v18  ;;  %v1615_v44 = vpop.permute.xlu2 %1614 }
  0xfe   : > { %2005 = vmatmul.msk.f32.vlgmr.msrb.gmra.mxu0 %vm228_vm2, %v1995_v30  ;;  %2007 = vmatmul.msk.f32.vlgmr.msrb.gmra.mxu1 %vm228_vm2, %v1995_v30  ;;  %v1628_v46 = vsel %vm1622_vm7, %v1615_v44, %v1617_v38  ;;  %v1627_v51 = vsel %vm1622_vm7, %v1613_v13, %v1615_v44 }
  0xff   : > { %2009 = vmatmul.msk.f32.vlgmr.msrb.gmra.mxu2 %vm228_vm2, %v1995_v30  ;;  %2011 = vmatmul.msk.f32.vlgmr.msrb.gmra.mxu3 %vm228_vm2, %v1995_v30 }
 0x102   : > { %v1611_v39 = vpop.permute.xlu1 %1610 }
 0x103   : > { %v1609_v40 = vpop.permute.xlu0 %1608  ;;  %v1626_v41 = vsel %vm1622_vm7, %v1611_v39, %v1613_v13 }
 0x104   : > { %v1625_v42 = vsel %vm1622_vm7, %v1609_v40, %v1611_v39  ;;  %2019 = vmatpush.msk.msra.mxu3 %vm232_vm1, %v1626_v41 }
 0x105   : > { %2017 = vmatpush.msk.msra.mxu2 %vm232_vm1, %v1625_v42 }
 0x107   : > { %2018 = vmatmul.msk.f32.vlgmr.msra.gmra.mxu2 %vm228_vm2, %v2012_v43  ;;  %2020 = vmatmul.msk.f32.vlgmr.msra.gmra.mxu3 %vm228_vm2, %v2012_v43 }
 0x10a   : > { %v1607_v45 = vpop.permute.xlu1 %1606 }
 0x10b   : > { %v1624_v47 = vsel %vm1622_vm7, %v1607_v45, %v1609_v40  ;;  %v1605_v48 = vpop.permute.xlu0 %1604  ;;  %v286_v49 = vpop.f32.mrf.mxu1 }
 0x10c   : > { %v1623_v50 = vsel %vm1622_vm7, %v1605_v48, %v1607_v45  ;;  %2015 = vmatpush.msk.msra.mxu1 %vm232_vm1, %v1624_v47 }
 0x10d   : > { %2013 = vmatpush.msk.msra.mxu0 %vm232_vm1, %v1623_v50  ;;  %2016 = vmatmul.msk.f32.vlgmr.msra.gmra.mxu1 %vm228_vm2, %v2012_v43 }
 0x10e   : > { %2014 = vmatmul.msk.f32.vlgmr.msra.gmra.mxu0 %vm228_vm2, %v2012_v43  ;;  %2023 = vmatpush.msk.msrb.mxu1 %vm232_vm1, %v1628_v46 }
 0x10f   : > { %2021 = vmatpush.msk.msrb.mxu0 %vm232_vm1, %v1627_v51 }
 0x112   : > { %v1621_v52 = vpop.permute.xlu1 %1620 }
 0x113   : > { %v266_v53 = vpop.f32.mrf.mxu0  ;;  %v1619_v54 = vpop.permute.xlu0 %1618 }
 0x114   : > { %v1629_v55 = vsel %vm1622_vm7, %v1617_v38, %v1619_v54  ;;  %v1630_v56 = vsel %vm1622_vm7, %v1619_v54, %v1621_v52 }
 0x115   : > { %2025 = vmatpush.msk.msrb.mxu2 %vm232_vm1, %v1629_v55  ;;  %2027 = vmatpush.msk.msrb.mxu3 %vm232_vm1, %v1630_v56  ;;  %v366_v57 = vpop.f32.mrf.mxu1 }
 0x116   : > { %2022 = vmatmul.msk.f32.vlgmr.msrb.gmra.mxu0 %vm228_vm2, %v2012_v43  ;;  %2024 = vmatmul.msk.f32.vlgmr.msrb.gmra.mxu1 %vm228_vm2, %v2012_v43 }
 0x117   : > { %2026 = vmatmul.msk.f32.vlgmr.msrb.gmra.mxu2 %vm228_vm2, %v2012_v43  ;;  %2028 = vmatmul.msk.f32.vlgmr.msrb.gmra.mxu3 %vm228_vm2, %v2012_v43 }
 0x119   : > { %v306_v58 = vpop.f32.mrf.mxu2 }
 0x11a   : > { %v326_v59 = vpop.f32.mrf.mxu3 }
 0x11b   : > { %v346_v60 = vpop.f32.mrf.mxu0 }
 0x11f   : > { %v480_v61 = vpop.f32.mrf.mxu1 }
 0x120   : > { %v481_v62 = vadd.f32 %v480_v61, %v286_v49 }
 0x121   : > { %v386_v63 = vpop.f32.mrf.mxu2 }
 0x122   : > { %v406_v1 = vpop.f32.mrf.mxu3 }
 0x123   : > { %v460_v4 = vpop.f32.mrf.mxu0 }
 0x124   : > { %v461_v5 = vadd.f32 %v460_v4, %v266_v53 }
 0x127   : > { %v560_v2 = vpop.f32.mrf.mxu1 }
 0x128   : > { %v2394_v3 = vadd.f32 %v560_v2, %v366_v57 }
 0x129   : > { %v500_v6 = vpop.f32.mrf.mxu2 }
 0x12a   : > { %v501_v0 = vadd.f32 %v500_v6, %v306_v58  ;;  %v520_v7 = vpop.f32.mrf.mxu3 }
 0x12b   : > { %v521_v8 = vadd.f32 %v520_v7, %v326_v59  ;;  %v540_v9 = vpop.f32.mrf.mxu0 }
 0x12c   : > { %v541_v10 = vadd.f32 %v540_v9, %v346_v60 }
 0x12f   : > { %v715_v22 = vpop.f32.mrf.mxu1 }
 0x130   : > { %v839_v51 = vadd.f32 %v715_v22, %v481_v62 }
 0x132   : > { %v580_v11 = vpop.f32.mrf.mxu2  ;;  %v600_v15 = vpop.f32.mrf.mxu3 }
 0x133   : > { %v581_v12 = vadd.f32 %v580_v11, %v386_v63  ;;  %v2396_v20 = vadd.f32 %v600_v15, %v406_v1  ;;  %v695_v26 = vpop.f32.mrf.mxu0  ;;  %v1822_v63 = vpop.permute.xlu0 %1821 }
 0x134   : > { %v838_v50 = vadd.f32 %v695_v26, %v461_v5 }
 0x137   : > { %v795_v30 = vpop.f32.mrf.mxu1 }
 0x138   : > { %v843_v9 = vadd.f32 %v795_v30, %v2394_v3 }
 0x13a   : > { %v735_v21 = vpop.f32.mrf.mxu2  ;;  %v755_v23 = vpop.f32.mrf.mxu3 }
 0x13b   : > { %v775_v29 = vpop.f32.mrf.mxu0  ;;  %v840_v46 = vadd.f32 %v735_v21, %v501_v0  ;;  %v841_v47 = vadd.f32 %v755_v23, %v521_v8 }
 0x13c   : > { %v842_v8 = vadd.f32 %v775_v29, %v541_v10 }
 0x142   : > { %v815_v25 = vpop.f32.mrf.mxu2  ;;  %v2400_v28 = vpop.f32.mrf.mxu3 }
 0x143   : > { %v2398_v27 = vadd.f32 %v815_v25, %v581_v12  ;;  %v938_v33 = vpop.f32.mrf.mxu0  ;;  %v958_v24 = vpop.f32.mrf.mxu1 }
 0x144   : > { %v1081_v54 = vadd.f32 %v938_v33, %v838_v50  ;;  %v1082_v55 = vadd.f32 %v958_v24, %v839_v51 }
 0x14a   : > { %v978_v31 = vpop.f32.mrf.mxu2  ;;  %v998_v32 = vpop.f32.mrf.mxu3 }
 0x14b   : > { %v1018_v35 = vpop.f32.mrf.mxu0  ;;  %v1038_v13 = vpop.f32.mrf.mxu1  ;;  %v1083_v52 = vadd.f32 %v978_v31, %v840_v46  ;;  %v1084_v53 = vadd.f32 %v998_v32, %v841_v47 }
 0x14c   : > { %v1085_v22 = vadd.f32 %v1018_v35, %v842_v8  ;;  %v1086_v23 = vadd.f32 %v1038_v13, %v843_v9  ;;  %v845_v35 = vadd.f32 %v2400_v28, %v2396_v20 }
 0x152   : > { %v2402_v19 = vpop.f32.mrf.mxu2  ;;  %v2404_v34 = vpop.f32.mrf.mxu3 }
 0x15a   : > { %v1201_v36 = vpop.f32.mrf.mxu1  ;;  %v1221_v37 = vpop.f32.mrf.mxu2 }
 0x15b   : > { %v1181_v14 = vpop.f32.mrf.mxu0  ;;  %v1241_v16 = vpop.f32.mrf.mxu3  ;;  %v1326_v56 = vadd.f32 %v1221_v37, %v1083_v52  ;;  %v1325_v59 = vadd.f32 %v1201_v36, %v1082_v55 }
 0x15c   : > { %v1327_v57 = vadd.f32 %v1241_v16, %v1084_v53  ;;  %v1324_v58 = vadd.f32 %v1181_v14, %v1081_v54  ;;  %v1087_v16 = vadd.f32 %v2402_v19, %v2398_v27 }
 0x163   : > { %v1261_v38 = vpop.f32.mrf.mxu0  ;;  %v1281_v39 = vpop.f32.mrf.mxu1 }
 0x164   : > { %v1328_v3 = vadd.f32 %v1261_v38, %v1085_v22  ;;  %v1329_v30 = vadd.f32 %v1281_v39, %v1086_v23  ;;  %v1088_v38 = vadd.f32 %v2404_v34, %v845_v35 }
 0x16a   : > { %v2406_v17 = vpop.f32.mrf.mxu2  ;;  %v2408_v18 = vpop.f32.mrf.mxu3 }
 0x16b   : > { %v1331_v20 = vadd.f32 %v2408_v18, %v1088_v38 }
 0x172   : > { %v1444_v41 = vpop.f32.mrf.mxu1  ;;  %v1464_v42 = vpop.f32.mrf.mxu2 }
 0x173   : > { %v1424_v40 = vpop.f32.mrf.mxu0  ;;  %v1484_v43 = vpop.f32.mrf.mxu3  ;;  %v1569_v60 = vadd.f32 %v1464_v42, %v1326_v56  ;;  %v1568_v4 = vadd.f32 %v1444_v41, %v1325_v59  ;;  %v1330_v41 = vadd.f32 %v2406_v17, %v1087_v16 }
 0x174   : > { %v1570_v61 = vadd.f32 %v1484_v43, %v1327_v57  ;;  %v1567_v1 = vadd.f32 %v1424_v40, %v1324_v58 }
 0x17b   : > { %v1504_v48 = vpop.f32.mrf.mxu0  ;;  %v1524_v49 = vpop.f32.mrf.mxu1 }
 0x17c   : > { %v1571_v33 = vadd.f32 %v1504_v48, %v1328_v3  ;;  %v1572_v24 = vadd.f32 %v1524_v49, %v1329_v30 }
 0x182   : > { %v2410_v44 = vpop.f32.mrf.mxu2  ;;  %v2412_v45 = vpop.f32.mrf.mxu3 }
 0x183   : > { %v1573_v43 = vadd.f32 %v2410_v44, %v1330_v41  ;;  %v1574_v46 = vadd.f32 %v2412_v45, %v1331_v20 }
 0x18a   : > { %v1707_v2 = vpop.f32.mrf.mxu2  ;;  %v1727_v6 = vpop.f32.mrf.mxu3 }
 0x18b   : > { %v1812_v0 = vadd.f32 %v1707_v2, %v1569_v60  ;;  %v1813_v7 = vadd.f32 %v1727_v6, %v1570_v61  ;;  %v1687_v5 = vpop.f32.mrf.mxu1  ;;  %v1667_v62 = vpop.f32.mrf.mxu0 }
 0x18c   : > { %v1811_v11 = vadd.f32 %v1687_v5, %v1568_v4  ;;  %v1810_v12 = vadd.f32 %v1667_v62, %v1567_v1 }
 0x18d   : > { %v1826_v15 = vadd.f32 %v1822_v63, %v1812_v0  ;;  %v1827_v21 = vadd.f32 %v1822_v63, %v1813_v7 }
 0x18e   : > { %v1825_v26 = vadd.f32 %v1822_v63, %v1811_v11  ;;  %v1824_v25 = vadd.f32 %v1822_v63, %v1810_v12 }
 0x18f   : > { %v1834_v10 = vmax.f32 %v1826_v15, 0.0  ;;  %v1835_v29 = vmax.f32 %v1827_v21, 0.0 }
 0x190   : > { %v1833_v31 = vmax.f32 %v1825_v26, 0.0  ;;  %v1832_v32 = vmax.f32 %v1824_v25, 0.0 }
 0x191   : > { %1842 = vst [vmem:[%s2419_s18 + $0x10] sm:$0xff] %v1834_v10 }
 0x192   : > { %1841 = vst [vmem:[%s2419_s18 + $0x8] sm:$0xff] %v1833_v31 }
 0x193   : > { %1843 = vst [vmem:[%s2419_s18 + $0x18] sm:$0xff] %v1835_v29  ;;  %v1747_v13 = vpop.f32.mrf.mxu0  ;;  %v1767_v14 = vpop.f32.mrf.mxu1 }
 0x194   : > { %1840 = vst [vmem:[%s2419_s18] sm:$0xff] %v1832_v32  ;;  %v1814_v36 = vadd.f32 %v1747_v13, %v1571_v33  ;;  %v1815_v37 = vadd.f32 %v1767_v14, %v1572_v24 }
 0x196   : > { %v1828_v39 = vadd.f32 %v1822_v63, %v1814_v36  ;;  %v1829_v40 = vadd.f32 %v1822_v63, %v1815_v37 }
 0x198   : > { %v1836_v28 = vmax.f32 %v1828_v39, 0.0  ;;  %v1837_v42 = vmax.f32 %v1829_v40, 0.0 }
 0x19a   : > { %1844 = vst [vmem:[%s2419_s18 + $0x20] sm:$0xff] %v1836_v28  ;;  %v1787_v47 = vpop.f32.mrf.mxu2  ;;  %v1807_v48 = vpop.f32.mrf.mxu3 }
 0x19b   : > { %1845 = vst [vmem:[%s2419_s18 + $0x28] sm:$0xff] %v1837_v42  ;;  %v1816_v27 = vadd.f32 %v1787_v47, %v1573_v43  ;;  %v1817_v19 = vadd.f32 %v1807_v48, %v1574_v46 }
 0x19d   : > { %v1830_v34 = vadd.f32 %v1822_v63, %v1816_v27  ;;  %v1831_v49 = vadd.f32 %v1822_v63, %v1817_v19 }
 0x19f   : > { %v1838_v50 = vmax.f32 %v1830_v34, 0.0  ;;  %v1839_v17 = vmax.f32 %v1831_v49, 0.0 }
 0x1a1   : > { %1846 = vst [vmem:[%s2419_s18 + $0x30] sm:$0xff] %v1838_v50 }
 0x1a2   : > { %1847 = vst [vmem:[%s2419_s18 + $0x38] sm:$0xff] %v1839_v17 }
 0x1a3 PF: > { %s13_s12 = sadd.s32 1, %s2055_s12  }
 0x1a4   : > { %p10_p4 = scmp.ge.s32.totalorder %s13_s12, 4  }
 0x1a6   :  { %12 = sbr.rel (!%p10_p4) target bundleno = 1 (0x1), region = 89 }

// kernel: wavegan_generator.11
= control target key start
LH: loop header
LB: loop body
LE: loop exit
PB: predicated region body
PF: predicated region fallthrough
CT: control target
= control target key end

     0   :  { %s7099_s12 = smov 0   ;;  %s9688_s0 = inlined_call_operand.vmem [shape: f32[2,2,4102], index: 0, kind: input, shape index: {}]   ;;  %s9689_s1 = inlined_call_operand.vmem [shape: f32[7,4,2], index: 1, kind: input, shape index: {}]   ;;  %s9690_s2 = inlined_call_operand.vmem [shape: f32[4,1], index: 2, kind: input, shape index: {}]   ;;  %s9691_s3 = inlined_call_operand.vmem [shape: f32[2,4,4096], index: 3, kind: output, shape index: {}]  }
   0x1 LB: > { %s6518_s13 = sadd.s32 4294967295, %s7070_s12   ;;  %p6522_p0 = scmp.ge.s32.totalorder %s7070_s12, 1  ;;  %s7070_s12 = sphi %s7099_s12, %s13_s12  }
   0x2   : > { %p137_p1 = scmp.lt.s32.totalorder %s7070_s12, 3 }
   0x4   : > { %p138_p2 = pnand %p6522_p0, %p137_p1 }
   0x6   : > { %141 = sbr.rel (%p138_p2) target bundleno = 814 (0x32e), region = 32 }
   0xb   : > { %p161_p3 = scmp.lt.s32.totalorder %s6518_s13, 1  ;;  %s7072_s18 = smov 127   ;;  %vm301_vm0 = vcmask 1039360   ;;  %vm338_vm1 = vcmask 1041408   ;;  %vm334_vm2 = vcmask 15360   ;;  %vm1920_vm3 = vcmask 1031168  }
   0xc   : > { %s7073_s19 = smov 126   ;;  %s7074_s22 = smov 125   ;;  %vm2821_vm4 = vcmask 1022976   ;;  %vm3722_vm5 = vcmask 1014784   ;;  %vm4623_vm6 = vcmask 1006592   ;;  %vm5524_vm7 = vcmask 998400  }
   0xd   : > { %s9845_s13 = smov (!%p161_p3, %s6518_s13), 1  ;;  %s7075_s25 = smov 124   ;;  %vm6414_vm8 = vcmask 1043456  }
   0xe   : > { %s6983_s14 = smul.u32 66, %s9845_s13  ;;  %s7076_s30 = smov 123  }
   0xf   : > { %s7077_s6 = smov 122   ;;  %s6982_s15 = sshll.u32 %s9845_s13, 7 }
  0x10   : > { %s7113_s17 = scalar_lea.vmem %s9688_s0, %s6983_s14 }
  0x11   : > { %v7116_v0 = vld [vmem:[%s7113_s17] sm:$0xff]  ;;  %v7119_v1 = vld [vmem:[%s7113_s17 + $0x8] sm:$0xff]  ;;  %v7124_v2 = vld [vmem:[%s7113_s17 + $0x10] sm:$0xff] }
  0x12   : > { %192 = vst [vmem:[#allocation1] ss:$4 sm:$0xff] %v7116_v0  ;;  %v7129_v6 = vld [vmem:[%s7113_s17 + $0x18] sm:$0xff]  ;;  %v7137_v13 = vld [vmem:[%s7113_s17 + $0x20] sm:$0xff]  ;;  %v7140_v14 = vld [vmem:[%s7113_s17 + $0x28] sm:$0xff] }
  0x13   : > { %194 = vst [vmem:[#allocation1 + $0x20] ss:$4 sm:$0xff] %v7119_v1  ;;  %v7149_v22 = vld [vmem:[%s7113_s17 + $0x30] sm:$0xff]  ;;  %v7152_v26 = vld [vmem:[%s7113_s17 + $0x38] sm:$0xff]  ;;  %v182_v32 = vld [vmem:[%s7113_s17 + $0x40] sm:$0x3] }
  0x19   : > { %v198_v3 = vld.sshfl [vmem:[#allocation1 + $0x18] sm:$0xff pattern:$0x73625140]  ;;  %v197_v4 = vld.sshfl [vmem:[#allocation1 + $0x10] sm:$0xff pattern:$0x73625140] }
  0x1a   : > { %241 = vrot.lane.b32.xlu0 %v198_v3, %s7072_s18  ;;  %239 = vrot.lane.b32.xlu1 %v197_v4, %s7072_s18  ;;  %v200_v5 = vld.sshfl [vmem:[#allocation1 + $0x28] sm:$0xff pattern:$0x73625140]  ;;  %v195_v8 = vld.sshfl [vmem:[#allocation1] sm:$0xff pattern:$0x73625140] }
  0x1b   : > { %v196_v7 = vld.sshfl [vmem:[#allocation1 + $0x8] sm:$0xff pattern:$0x73625140]  ;;  %235 = vrot.lane.b32.xlu2 %v195_v8, %s7072_s18  ;;  %v201_v9 = vld.sshfl [vmem:[#allocation1 + $0x30] sm:$0xff pattern:$0x73625140] }
  0x1c   : > { %203 = vst [vmem:[#allocation1] ss:$4 sm:$0xff] %v7124_v2  ;;  %v199_v10 = vld.sshfl [vmem:[#allocation1 + $0x20] sm:$0xff pattern:$0x73625140] }
  0x1d   : > { %v202_v11 = vld.sshfl [vmem:[#allocation1 + $0x38] sm:$0xff pattern:$0x73625140] }
  0x1e   : > { %204 = vst [vmem:[#allocation1 + $0x20] ss:$4 sm:$0xff] %v7129_v6 }
  0x22   : > { %243 = vrot.lane.b32.xlu0 %v199_v10, %s7072_s18  ;;  %237 = vrot.lane.b32.xlu1 %v196_v7, %s7072_s18 }
  0x23   : > { %v208_v12 = vld.sshfl [vmem:[#allocation1 + $0x18] sm:$0xff pattern:$0x73625140]  ;;  %249 = vrot.lane.b32.xlu2 %v202_v11, %s7072_s18  ;;  %v206_v15 = vld.sshfl [vmem:[#allocation1 + $0x8] sm:$0xff pattern:$0x73625140] }
  0x24   : > { %v207_v16 = vld.sshfl [vmem:[#allocation1 + $0x10] sm:$0xff pattern:$0x73625140]  ;;  %v205_v17 = vld.sshfl [vmem:[#allocation1] sm:$0xff pattern:$0x73625140] }
  0x25   : > { %v209_v18 = vld.sshfl [vmem:[#allocation1 + $0x20] sm:$0xff pattern:$0x73625140]  ;;  %v210_v19 = vld.sshfl [vmem:[#allocation1 + $0x28] sm:$0xff pattern:$0x73625140] }
  0x26   : > { %v211_v20 = vld.sshfl [vmem:[#allocation1 + $0x30] sm:$0xff pattern:$0x73625140]  ;;  %v212_v21 = vld.sshfl [vmem:[#allocation1 + $0x38] sm:$0xff pattern:$0x73625140] }
  0x27   : > { %213 = vst [vmem:[#allocation1] ss:$4 sm:$0xff] %v7137_v13 }
  0x28   : > { %214 = vst [vmem:[#allocation1 + $0x20] ss:$4 sm:$0xff] %v7140_v14 }
  0x2a   : > { %247 = vrot.lane.b32.xlu1 %v201_v9, %s7072_s18  ;;  %251 = vrot.lane.b32.xlu0 %v205_v17, %s7072_s18 }
  0x2b   : > { %245 = vrot.lane.b32.xlu2 %v200_v5, %s7072_s18 }
  0x2e   : > { %v215_v23 = vld.sshfl [vmem:[#allocation1] sm:$0xff pattern:$0x73625140]  ;;  %v216_v24 = vld.sshfl [vmem:[#allocation1 + $0x8] sm:$0xff pattern:$0x73625140] }
  0x2f   : > { %v217_v25 = vld.sshfl [vmem:[#allocation1 + $0x10] sm:$0xff pattern:$0x73625140]  ;;  %v218_v27 = vld.sshfl [vmem:[#allocation1 + $0x18] sm:$0xff pattern:$0x73625140] }
  0x30   : > { %v222_v28 = vld.sshfl [vmem:[#allocation1 + $0x38] sm:$0xff pattern:$0x73625140]  ;;  %223 = vst [vmem:[#allocation1] ss:$4 sm:$0xff] %v7149_v22 }
  0x31   : > { %v220_v29 = vld.sshfl [vmem:[#allocation1 + $0x28] sm:$0xff pattern:$0x73625140]  ;;  %v219_v30 = vld.sshfl [vmem:[#allocation1 + $0x20] sm:$0xff pattern:$0x73625140] }
  0x32   : > { %259 = vrot.lane.b32.xlu1 %v209_v18, %s7072_s18  ;;  %257 = vrot.lane.b32.xlu0 %v208_v12, %s7072_s18  ;;  %v221_v31 = vld.sshfl [vmem:[#allocation1 + $0x30] sm:$0xff pattern:$0x73625140] }
  0x33   : > { %224 = vst [vmem:[#allocation1 + $0x20] ss:$4 sm:$0xff] %v7152_v26  ;;  %255 = vrot.lane.b32.xlu2 %v207_v16, %s7072_s18 }
  0x37   : > { %v225_v33 = vld.sshfl [vmem:[#allocation1] sm:$0xff pattern:$0x73625140]  ;;  %v228_v34 = vld.sshfl [vmem:[#allocation1 + $0x18] sm:$0xff pattern:$0x73625140] }
  0x38   : > { %v227_v35 = vld.sshfl [vmem:[#allocation1 + $0x10] sm:$0xff pattern:$0x73625140]  ;;  %v226_v36 = vld.sshfl [vmem:[#allocation1 + $0x8] sm:$0xff pattern:$0x73625140] }
  0x39   : > { %233 = vst [vmem:[#allocation1] ss:$4 sm:$0xff] %v182_v32 }
  0x3a   : > { %265 = vrot.lane.b32.xlu1 %v212_v21, %s7072_s18  ;;  %253 = vrot.lane.b32.xlu0 %v206_v15, %s7072_s18  ;;  %v229_v37 = vld.sshfl [vmem:[#allocation1 + $0x20] sm:$0xff pattern:$0x73625140]  ;;  %v7162_v38 = vld.sshfl [vmem:[#allocation1 + $0x30] sm:$0xff pattern:$0x73625140] }
  0x3b   : > { %v232_v39 = vld.sshfl [vmem:[#allocation1 + $0x38] sm:$0xff pattern:$0x73625140]  ;;  %267 = vrot.lane.b32.xlu2 %v215_v23, %s7072_s18  ;;  %v7165_v40 = vld.sshfl [vmem:[#allocation1 + $0x28] sm:$0xff pattern:$0x73625140] }
  0x3c   : > { %1045 = vst [vmem:[#allocation1 + $0x20] ss:$4 sm:$0xff] %v7119_v1 }
  0x40   : > { %v234_v41 = vld.sshfl [vmem:[#allocation1] sm:$0xff pattern:$0x73625140] }
  0x41   : > { %1043 = vst [vmem:[#allocation1] ss:$4 sm:$0xff] %v7116_v0 }
  0x42   : > { %261 = vrot.lane.b32.xlu1 %v210_v19, %s7072_s18  ;;  %263 = vrot.lane.b32.xlu0 %v211_v20, %s7072_s18 }
  0x43   : > { %273 = vrot.lane.b32.xlu2 %v218_v27, %s7072_s18  ;;  %v7172_v42 = vld.sshfl [vmem:[#allocation1 + $0x20] sm:$0xff pattern:$0x73625140]  ;;  %v7174_v43 = vld.sshfl [vmem:[#allocation1 + $0x28] sm:$0xff pattern:$0x73625140] }
  0x44   : > { %v7176_v44 = vld.sshfl [vmem:[#allocation1 + $0x30] sm:$0xff pattern:$0x73625140]  ;;  %v7178_v45 = vld.sshfl [vmem:[#allocation1 + $0x38] sm:$0xff pattern:$0x73625140] }
  0x45   : > { %1055 = vst [vmem:[#allocation1 + $0x20] ss:$4 sm:$0xff] %v7129_v6 }
  0x48   : > { %v7183_v46 = vld.sshfl [vmem:[#allocation1] sm:$0xff pattern:$0x73625140]  ;;  %v7185_v47 = vld.sshfl [vmem:[#allocation1 + $0x8] sm:$0xff pattern:$0x73625140] }
  0x49   : > { %v7187_v48 = vld.sshfl [vmem:[#allocation1 + $0x10] sm:$0xff pattern:$0x73625140]  ;;  %v7189_v49 = vld.sshfl [vmem:[#allocation1 + $0x18] sm:$0xff pattern:$0x73625140] }
  0x4a   : > { %275 = vrot.lane.b32.xlu0 %v219_v30, %s7072_s18  ;;  %271 = vrot.lane.b32.xlu1 %v217_v25, %s7072_s18  ;;  %1054 = vst [vmem:[#allocation1] ss:$4 sm:$0xff] %v7124_v2 }
  0x4b   : > { %269 = vrot.lane.b32.xlu2 %v216_v24, %s7072_s18 }
  0x4c   : > { %v7193_v50 = vld.sshfl [vmem:[#allocation1 + $0x20] sm:$0xff pattern:$0x73625140]  ;;  %v7195_v51 = vld.sshfl [vmem:[#allocation1 + $0x28] sm:$0xff pattern:$0x73625140] }
  0x4d   : > { %v7197_v52 = vld.sshfl [vmem:[#allocation1 + $0x30] sm:$0xff pattern:$0x73625140]  ;;  %v7199_v53 = vld.sshfl [vmem:[#allocation1 + $0x38] sm:$0xff pattern:$0x73625140] }
  0x4e   : > { %1065 = vst [vmem:[#allocation1 + $0x20] ss:$4 sm:$0xff] %v7140_v14 }
  0x51   : > { %v7204_v54 = vld.sshfl [vmem:[#allocation1] sm:$0xff pattern:$0x73625140]  ;;  %v7206_v55 = vld.sshfl [vmem:[#allocation1 + $0x8] sm:$0xff pattern:$0x73625140] }
  0x52   : > { %281 = vrot.lane.b32.xlu0 %v222_v28, %s7072_s18  ;;  %283 = vrot.lane.b32.xlu1 %v225_v33, %s7072_s18  ;;  %v7209_v56 = vld.sshfl [vmem:[#allocation1 + $0x10] sm:$0xff pattern:$0x73625140]  ;;  %v7211_v57 = vld.sshfl [vmem:[#allocation1 + $0x18] sm:$0xff pattern:$0x73625140] }
  0x53   : > { %279 = vrot.lane.b32.xlu2 %v221_v31, %s7072_s18  ;;  %1064 = vst [vmem:[#allocation1] ss:$4 sm:$0xff] %v7137_v13 }
  0x55   : > { %v7214_v58 = vld.sshfl [vmem:[#allocation1 + $0x20] sm:$0xff pattern:$0x73625140]  ;;  %v7216_v59 = vld.sshfl [vmem:[#allocation1 + $0x28] sm:$0xff pattern:$0x73625140] }
  0x56   : > { %v7218_v60 = vld.sshfl [vmem:[#allocation1 + $0x30] sm:$0xff pattern:$0x73625140]  ;;  %v7220_v61 = vld.sshfl [vmem:[#allocation1 + $0x38] sm:$0xff pattern:$0x73625140] }
  0x57   : > { %1075 = vst [vmem:[#allocation1 + $0x20] ss:$4 sm:$0xff] %v7152_v26 }
  0x5a   : > { %277 = vrot.lane.b32.xlu0 %v220_v29, %s7072_s18  ;;  %289 = vrot.lane.b32.xlu1 %v228_v34, %s7072_s18  ;;  %v7226_v62 = vld.sshfl [vmem:[#allocation1] sm:$0xff pattern:$0x73625140]  ;;  %v7228_v63 = vld.sshfl [vmem:[#allocation1 + $0x8] sm:$0xff pattern:$0x73625140] }
  0x5b   : > { %291 = vrot.lane.b32.xlu2 %v229_v37, %s7072_s18  ;;  %v7230_v3 = vld.sshfl [vmem:[#allocation1 + $0x10] sm:$0xff pattern:$0x73625140]  ;;  %v7232_v4 = vld.sshfl [vmem:[#allocation1 + $0x18] sm:$0xff pattern:$0x73625140] }
  0x5c   : > { %1074 = vst [vmem:[#allocation1] ss:$4 sm:$0xff] %v7149_v22 }
  0x5e   : > { %v7235_v5 = vld.sshfl [vmem:[#allocation1 + $0x20] sm:$0xff pattern:$0x73625140]  ;;  %v7237_v7 = vld.sshfl [vmem:[#allocation1 + $0x28] sm:$0xff pattern:$0x73625140] }
  0x5f   : > { %9692 = vst [vmem:[#allocation2_spill] sm:$0xff] %v7235_v5  ;;  %v7239_v8 = vld.sshfl [vmem:[#allocation1 + $0x30] sm:$0xff pattern:$0x73625140] }
  0x60   : > { %v7241_v9 = vld.sshfl [vmem:[#allocation1 + $0x38] sm:$0xff pattern:$0x73625140] }
  0x61   : > { %1813 = vst [vmem:[#allocation1 + $0x20] ss:$4 sm:$0xff] %v7119_v1 }
  0x62   : > { %287 = vrot.lane.b32.xlu0 %v227_v35, %s7072_s18  ;;  %285 = vrot.lane.b32.xlu1 %v226_v36, %s7072_s18 }
  0x63   : > { %297 = vrot.lane.b32.xlu2 %v232_v39, %s7072_s18  ;;  %v7247_v10 = vld.sshfl [vmem:[#allocation1] sm:$0xff pattern:$0x73625140]  ;;  %v7249_v11 = vld.sshfl [vmem:[#allocation1 + $0x8] sm:$0xff pattern:$0x73625140] }
  0x64   : > { %v7251_v12 = vld.sshfl [vmem:[#allocation1 + $0x10] sm:$0xff pattern:$0x73625140]  ;;  %v7253_v15 = vld.sshfl [vmem:[#allocation1 + $0x18] sm:$0xff pattern:$0x73625140] }
  0x65   : > { %1811 = vst [vmem:[#allocation1] ss:$4 sm:$0xff] %v7116_v0 }
  0x68   : > { %v1818_v16 = vld.sshfl [vmem:[#allocation1 + $0x20] sm:$0xff pattern:$0x73625140]  ;;  %v1819_v17 = vld.sshfl [vmem:[#allocation1 + $0x28] sm:$0xff pattern:$0x73625140] }
  0x69   : > { %v1820_v18 = vld.sshfl [vmem:[#allocation1 + $0x30] sm:$0xff pattern:$0x73625140]  ;;  %v1821_v19 = vld.sshfl [vmem:[#allocation1 + $0x38] sm:$0xff pattern:$0x73625140] }
  0x6a   : > { %295 = vrot.lane.b32.xlu1 %v7162_v38, %s7072_s18  ;;  %299 = vrot.lane.b32.xlu0 %v234_v41, %s7072_s18  ;;  %1823 = vst [vmem:[#allocation1 + $0x20] ss:$4 sm:$0xff] %v7129_v6 }
  0x6b   : > { %293 = vrot.lane.b32.xlu2 %v7165_v40, %s7072_s18  ;;  %s9597_s18 = scalar_lea.vmem %s9691_s3, %s6982_s15 }
  0x6c   : > { %v1817_v20 = vld.sshfl [vmem:[#allocation1 + $0x18] sm:$0xff pattern:$0x73625140]  ;;  %v1814_v21 = vld.sshfl [vmem:[#allocation1] sm:$0xff pattern:$0x73625140] }
  0x6d   : > { %v1815_v23 = vld.sshfl [vmem:[#allocation1 + $0x8] sm:$0xff pattern:$0x73625140]  ;;  %v1816_v24 = vld.sshfl [vmem:[#allocation1 + $0x10] sm:$0xff pattern:$0x73625140] }
  0x6e   : > { %1822 = vst [vmem:[#allocation1] ss:$4 sm:$0xff] %v7124_v2 }
  0x71   : > { %v1828_v29 = vld.sshfl [vmem:[#allocation1 + $0x20] sm:$0xff pattern:$0x73625140]  ;;  %v1829_v32 = vld.sshfl [vmem:[#allocation1 + $0x28] sm:$0xff pattern:$0x73625140] }
  0x72   : > { %1860 = vrot.lane.b32.xlu1 %v1817_v20, %s7073_s19  ;;  %1854 = vrot.lane.b32.xlu0 %v1814_v21, %s7073_s19  ;;  %v1831_v33 = vld.sshfl [vmem:[#allocation1 + $0x38] sm:$0xff pattern:$0x73625140]  ;;  %v1830_v34 = vld.sshfl [vmem:[#allocation1 + $0x30] sm:$0xff pattern:$0x73625140] }
  0x73   : > { %1862 = vrot.lane.b32.xlu2 %v1818_v16, %s7073_s19  ;;  %1833 = vst [vmem:[#allocation1 + $0x20] ss:$4 sm:$0xff] %v7140_v14 }
  0x75   : > { %v236_v25 = vpop.permute.xlu2 %235  ;;  %v1824_v27 = vld.sshfl [vmem:[#allocation1] sm:$0xff pattern:$0x73625140]  ;;  %v1827_v28 = vld.sshfl [vmem:[#allocation1 + $0x18] sm:$0xff pattern:$0x73625140] }
  0x76   : > { %v1825_v30 = vld.sshfl [vmem:[#allocation1 + $0x8] sm:$0xff pattern:$0x73625140]  ;;  %v1826_v31 = vld.sshfl [vmem:[#allocation1 + $0x10] sm:$0xff pattern:$0x73625140] }
  0x77   : > { %1832 = vst [vmem:[#allocation1] ss:$4 sm:$0xff] %v7137_v13 }
  0x7a   : > { %1856 = vrot.lane.b32.xlu1 %v1815_v23, %s7073_s19  ;;  %1858 = vrot.lane.b32.xlu0 %v1816_v24, %s7073_s19  ;;  %v1838_v20 = vld.sshfl [vmem:[#allocation1 + $0x20] sm:$0xff pattern:$0x73625140]  ;;  %v1841_v21 = vld.sshfl [vmem:[#allocation1 + $0x38] sm:$0xff pattern:$0x73625140] }
  0x7b   : > { %1868 = vrot.lane.b32.xlu2 %v1821_v19, %s7073_s19 }
  0x7d   : > { %v250_v35 = vpop.permute.xlu2 %249 }
  0x7e   : > { %v7271_v36 = vld.sshfl [vmem:[#allocation1 + $0x8] sm:$0xff pattern:$0x73625140]  ;;  %v7275_v37 = vld.sshfl [vmem:[#allocation1 + $0x10] sm:$0xff pattern:$0x73625140] }
  0x7f   : > { %v1834_v38 = vld.sshfl [vmem:[#allocation1] sm:$0xff pattern:$0x73625140]  ;;  %v1837_v39 = vld.sshfl [vmem:[#allocation1 + $0x18] sm:$0xff pattern:$0x73625140] }
  0x80   : > { %1842 = vst [vmem:[#allocation1] ss:$4 sm:$0xff] %v7149_v22 }
  0x82   : > { %1866 = vrot.lane.b32.xlu1 %v1820_v18, %s7073_s19  ;;  %1870 = vrot.lane.b32.xlu0 %v1824_v27, %s7073_s19  ;;  %v7285_v18 = vld [vmem:[%s9689_s1 + $0x4] sm:$0xf]  ;;  %v7296_v27 = vld.sshfl [vmem:[#allocation1 + $0x28] sm:$0xff pattern:$0x73625140] }
  0x83   : > { %1864 = vrot.lane.b32.xlu2 %v1819_v17, %s7073_s19 }
  0x85   : > { %v246_v40 = vpop.permute.xlu2 %245 }
  0x8a   : > { %1878 = vrot.lane.b32.xlu1 %v1828_v29, %s7073_s19  ;;  %1876 = vrot.lane.b32.xlu0 %v1827_v28, %s7073_s19  ;;  %v1840_v28 = vld.sshfl [vmem:[#allocation1 + $0x30] sm:$0xff pattern:$0x73625140] }
  0x8b   : > { %1874 = vrot.lane.b32.xlu2 %v1826_v31, %s7073_s19  ;;  %1843 = vst [vmem:[#allocation1 + $0x20] ss:$4 sm:$0xff] %v7152_v26 }
  0x8c   : > { %v242_v41 = vpop.permute.xlu0 %241  ;;  %v240_v16 = vpop.permute.xlu1 %239 }
  0x8d   : > { %v304_v17 = vsel %vm301_vm0, %v240_v16, %v242_v41  ;;  %v7289_v19 = vpop.permute.xlu2 %255 }
  0x8e   : > { %6531 = vmatpush.msk.msra.mxu2 %vm338_vm1, %v304_v17 }
  0x8f   : > { %6532 = vmatmul.msk.f32.vlgmr.msra.gmra.mxu2 %vm334_vm2, %v7285_v18 }
  0x92   : > { %1884 = vrot.lane.b32.xlu1 %v1831_v33, %s7073_s19  ;;  %1872 = vrot.lane.b32.xlu0 %v1825_v30, %s7073_s19  ;;  %v1844_v33 = vld.sshfl [vmem:[#allocation1] sm:$0xff pattern:$0x73625140] }
  0x93   : > { %1886 = vrot.lane.b32.xlu2 %v1834_v38, %s7073_s19  ;;  %v1847_v38 = vld.sshfl [vmem:[#allocation1 + $0x18] sm:$0xff pattern:$0x73625140] }
  0x94   : > { %v244_v23 = vpop.permute.xlu0 %243  ;;  %v238_v24 = vpop.permute.xlu1 %237 }
  0x95   : > { %v302_v29 = vsel %vm301_vm0, %v236_v25, %v238_v24  ;;  %v303_v31 = vsel %vm301_vm0, %v238_v24, %v240_v16  ;;  %v305_v17 = vsel %vm301_vm0, %v242_v41, %v244_v23  ;;  %v306_v5 = vsel %vm301_vm0, %v244_v23, %v246_v40  ;;  %v7305_v30 = vpop.permute.xlu2 %267  ;;  %v7313_v25 = vld.sshfl [vmem:[#allocation1 + $0x10] sm:$0xff pattern:$0x73625140]  ;;  %v7319_v41 = vld.sshfl [vmem:[#allocation1 + $0x8] sm:$0xff pattern:$0x73625140] }
  0x96   : > { %6527 = vmatpush.msk.msra.mxu0 %vm338_vm1, %v302_v29  ;;  %6529 = vmatpush.msk.msra.mxu1 %vm338_vm1, %v303_v31 }
  0x97   : > { %6533 = vmatpush.msk.msra.mxu3 %vm338_vm1, %v305_v17  ;;  %6528 = vmatmul.msk.f32.vlgmr.msra.gmra.mxu0 %vm334_vm2, %v7285_v18  ;;  %v1851_v17 = vld.sshfl [vmem:[#allocation1 + $0x38] sm:$0xff pattern:$0x73625140] }
  0x98   : > { %6535 = vmatpush.msk.msrb.mxu0 %vm338_vm1, %v306_v5  ;;  %6534 = vmatmul.msk.f32.vlgmr.msra.gmra.mxu3 %vm334_vm2, %v7285_v18  ;;  %v1801_v5 = vld [vmem:[%s7113_s17 + $0x40] sm:$0x3] }
  0x99   : > { %6530 = vmatmul.msk.f32.vlgmr.msra.gmra.mxu1 %vm334_vm2, %v7285_v18  ;;  %1852 = vst [vmem:[#allocation1] ss:$4 sm:$0xff] %v1801_v5 }
  0x9a   : > { %1880 = vrot.lane.b32.xlu1 %v1829_v32, %s7073_s19  ;;  %1882 = vrot.lane.b32.xlu0 %v1830_v34, %s7073_s19  ;;  %v7337_v34 = vld.sshfl [vmem:[#allocation1 + $0x28] sm:$0xff pattern:$0x73625140] }
  0x9b   : > { %1892 = vrot.lane.b32.xlu2 %v1837_v39, %s7073_s19  ;;  %v1848_v39 = vld.sshfl [vmem:[#allocation1 + $0x20] sm:$0xff pattern:$0x73625140] }
  0x9c   : > { %v248_v16 = vpop.permute.xlu1 %247  ;;  %v252_v23 = vpop.permute.xlu0 %251 }
  0x9d   : > { %v308_v24 = vsel %vm301_vm0, %v248_v16, %v250_v35  ;;  %v309_v29 = vsel %vm301_vm0, %v250_v35, %v252_v23  ;;  %v307_v31 = vsel %vm301_vm0, %v246_v40, %v248_v16  ;;  %v7328_v32 = vpop.permute.xlu2 %273  ;;  %v7339_v35 = vld.sshfl [vmem:[#allocation1 + $0x30] sm:$0xff pattern:$0x73625140] }
  0x9e   : > { %6539 = vmatpush.msk.msrb.mxu2 %vm338_vm1, %v308_v24  ;;  %6541 = vmatpush.msk.msrb.mxu3 %vm338_vm1, %v309_v29  ;;  %2714 = vst [vmem:[#allocation1 + $0x20] ss:$4 sm:$0xff] %v7119_v1 }
  0x9f   : > { %6537 = vmatpush.msk.msrb.mxu1 %vm338_vm1, %v307_v31  ;;  %6540 = vmatmul.msk.f32.vlgmr.msrb.gmra.mxu2 %vm334_vm2, %v7285_v18 }
  0xa0   : > { %6536 = vmatmul.msk.f32.vlgmr.msrb.gmra.mxu0 %vm334_vm2, %v7285_v18  ;;  %6542 = vmatmul.msk.f32.vlgmr.msrb.gmra.mxu3 %vm334_vm2, %v7285_v18  ;;  %v7346_v40 = vld.sshfl [vmem:[#allocation1] sm:$0xff pattern:$0x73625140] }
  0xa1   : > { %6538 = vmatmul.msk.f32.vlgmr.msrb.gmra.mxu1 %vm334_vm2, %v7285_v18  ;;  %2712 = vst [vmem:[#allocation1] ss:$4 sm:$0xff] %v7116_v0 }
  0xa2   : > { %1894 = vrot.lane.b32.xlu0 %v1838_v20, %s7073_s19  ;;  %1890 = vrot.lane.b32.xlu1 %v7275_v37, %s7073_s19 }
  0xa3   : > { %1888 = vrot.lane.b32.xlu2 %v7271_v36, %s7073_s19 }
  0xa4   : > { %v260_v5 = vpop.permute.xlu1 %259  ;;  %v258_v16 = vpop.permute.xlu0 %257 }
  0xa5   : > { %v312_v24 = vsel %vm301_vm0, %v7289_v19, %v258_v16  ;;  %v313_v20 = vsel %vm301_vm0, %v258_v16, %v260_v5  ;;  %v270_v37 = vpop.permute.xlu2 %269 }
  0xa6   : > { %6547 = vmatpush.msk.msra.mxu2 %vm338_vm1, %v312_v24  ;;  %6549 = vmatpush.msk.msra.mxu3 %vm338_vm1, %v313_v20 }
  0xa7   : > { %6548 = vmatmul.msk.f32.vlgmr.msra.gmra.mxu2 %vm334_vm2, %v7285_v18 }
  0xa8   : > { %6550 = vmatmul.msk.f32.vlgmr.msra.gmra.mxu3 %vm334_vm2, %v7285_v18 }
  0xaa   : > { %1900 = vrot.lane.b32.xlu0 %v1841_v21, %s7073_s19  ;;  %1902 = vrot.lane.b32.xlu1 %v1844_v33, %s7073_s19  ;;  %v7380_v21 = vld.sshfl [vmem:[#allocation1 + $0x8] sm:$0xff pattern:$0x73625140]  ;;  %v2717_v33 = vld.sshfl [vmem:[#allocation1 + $0x10] sm:$0xff pattern:$0x73625140] }
  0xab   : > { %1898 = vrot.lane.b32.xlu2 %v1840_v28, %s7073_s19  ;;  %v7385_v28 = vld.sshfl [vmem:[#allocation1] sm:$0xff pattern:$0x73625140] }
  0xac   : > { %v266_v0 = vpop.permute.xlu1 %265  ;;  %v254_v1 = vpop.permute.xlu0 %253 }
  0xad   : > { %v317_v36 = vsel %vm301_vm0, %v266_v0, %v7305_v30  ;;  %v310_v29 = vsel %vm301_vm0, %v252_v23, %v254_v1  ;;  %v311_v31 = vsel %vm301_vm0, %v254_v1, %v7289_v19  ;;  %v7371_v16 = vpop.permute.xlu2 %279  ;;  %v2718_v19 = vld.sshfl [vmem:[#allocation1 + $0x18] sm:$0xff pattern:$0x73625140] }
  0xae   : > { %6543 = vmatpush.msk.msra.mxu0 %vm338_vm1, %v310_v29  ;;  %6545 = vmatpush.msk.msra.mxu1 %vm338_vm1, %v311_v31  ;;  %2723 = vst [vmem:[#allocation1] ss:$4 sm:$0xff] %v7124_v2  ;;  %v7406_v2 = vld.sshfl [vmem:[#allocation1 + $0x28] sm:$0xff pattern:$0x73625140] }
  0xaf   : > { %6557 = vmatpush.msk.msrb.mxu3 %vm338_vm1, %v317_v36  ;;  %6544 = vmatmul.msk.f32.vlgmr.msra.gmra.mxu0 %vm334_vm2, %v7285_v18 }
  0xb0   : > { %6546 = vmatmul.msk.f32.vlgmr.msra.gmra.mxu1 %vm334_vm2, %v7285_v18  ;;  %6558 = vmatmul.msk.f32.vlgmr.msrb.gmra.mxu3 %vm334_vm2, %v7285_v18 }
  0xb2   : > { %1896 = vrot.lane.b32.xlu0 %v7296_v27, %s7073_s19  ;;  %1908 = vrot.lane.b32.xlu1 %v1847_v38, %s7073_s19  ;;  %v318_v27 = vsel %vm301_vm0, %v7305_v30, %v270_v37  ;;  %v7408_v30 = vld.sshfl [vmem:[#allocation1 + $0x30] sm:$0xff pattern:$0x73625140] }
  0xb3   : > { %1910 = vrot.lane.b32.xlu2 %v1848_v39, %s7073_s19  ;;  %v2719_v39 = vld.sshfl [vmem:[#allocation1 + $0x20] sm:$0xff pattern:$0x73625140] }
  0xb4   : > { %v262_v23 = vpop.permute.xlu1 %261  ;;  %v264_v24 = vpop.permute.xlu0 %263 }
  0xb5   : > { %v314_v20 = vsel %vm301_vm0, %v260_v5, %v262_v23  ;;  %v315_v1 = vsel %vm301_vm0, %v262_v23, %v264_v24  ;;  %v316_v36 = vsel %vm301_vm0, %v264_v24, %v266_v0  ;;  %v7396_v38 = vpop.permute.xlu2 %291  ;;  %v2722_v5 = vld.sshfl [vmem:[#allocation1 + $0x38] sm:$0xff pattern:$0x73625140] }
  0xb6   : > { %6551 = vmatpush.msk.msrb.mxu0 %vm338_vm1, %v314_v20  ;;  %6553 = vmatpush.msk.msrb.mxu1 %vm338_vm1, %v315_v1  ;;  %2724 = vst [vmem:[#allocation1 + $0x20] ss:$4 sm:$0xff] %v7129_v6  ;;  %v2728_v20 = vld.sshfl [vmem:[#allocation1 + $0x18] sm:$0xff pattern:$0x73625140] }
  0xb7   : > { %6555 = vmatpush.msk.msrb.mxu2 %vm338_vm1, %v316_v36  ;;  %6552 = vmatmul.msk.f32.vlgmr.msrb.gmra.mxu0 %vm334_vm2, %v7285_v18 }
  0xb8   : > { %6559 = vmatpush.msk.msra.mxu0 %vm338_vm1, %v318_v27  ;;  %6554 = vmatmul.msk.f32.vlgmr.msrb.gmra.mxu1 %vm334_vm2, %v7285_v18 }
  0xb9   : > { %6556 = vmatmul.msk.f32.vlgmr.msrb.gmra.mxu2 %vm334_vm2, %v7285_v18 }
  0xba   : > { %1906 = vrot.lane.b32.xlu0 %v7313_v25, %s7073_s19  ;;  %1904 = vrot.lane.b32.xlu1 %v7319_v41, %s7073_s19 }
  0xbb   : > { %1916 = vrot.lane.b32.xlu2 %v1851_v17, %s7073_s19 }
  0xbc   : > { %v276_v0 = vpop.permute.xlu0 %275  ;;  %v272_v29 = vpop.permute.xlu1 %271 }
  0xbd   : > { %v321_v31 = vsel %vm301_vm0, %v7328_v32, %v276_v0  ;;  %v319_v23 = vsel %vm301_vm0, %v270_v37, %v272_v29  ;;  %v320_v24 = vsel %vm301_vm0, %v272_v29, %v7328_v32  ;;  %v7423_v25 = vpop.permute.xlu2 %297  ;;  %v7457_v29 = vld.sshfl [vmem:[#allocation1 + $0x8] sm:$0xff pattern:$0x73625140] }
  0xbe   : > { %6563 = vmatpush.msk.msra.mxu2 %vm338_vm1, %v320_v24  ;;  %6565 = vmatpush.msk.msra.mxu3 %vm338_vm1, %v321_v31  ;;  %v2727_v31 = vld.sshfl [vmem:[#allocation1 + $0x10] sm:$0xff pattern:$0x73625140] }
  0xbf   : > { %6561 = vmatpush.msk.msra.mxu1 %vm338_vm1, %v319_v23  ;;  %6566 = vmatmul.msk.f32.vlgmr.msra.gmra.mxu3 %vm334_vm2, %v7285_v18 }
  0xc0   : > { %6560 = vmatmul.msk.f32.vlgmr.msra.gmra.mxu0 %vm334_vm2, %v7285_v18  ;;  %6562 = vmatmul.msk.f32.vlgmr.msra.gmra.mxu1 %vm334_vm2, %v7285_v18 }
  0xc1   : > { %6564 = vmatmul.msk.f32.vlgmr.msra.gmra.mxu2 %vm334_vm2, %v7285_v18 }
  0xc2   : > { %1914 = vrot.lane.b32.xlu1 %v7339_v35, %s7073_s19  ;;  %1918 = vrot.lane.b32.xlu0 %v7346_v40, %s7073_s19  ;;  %v2725_v40 = vld.sshfl [vmem:[#allocation1] sm:$0xff pattern:$0x73625140] }
  0xc3   : > { %1912 = vrot.lane.b32.xlu2 %v7337_v34, %s7073_s19  ;;  %2733 = vst [vmem:[#allocation1] ss:$4 sm:$0xff] %v7137_v13  ;;  %v2732_v13 = vld.sshfl [vmem:[#allocation1 + $0x38] sm:$0xff pattern:$0x73625140] }
  0xc4   : > { %v282_v6 = vpop.permute.xlu0 %281  ;;  %v284_v41 = vpop.permute.xlu1 %283 }
  0xc5   : > { %v324_v32 = vsel %vm301_vm0, %v7371_v16, %v282_v6  ;;  %v325_v17 = vsel %vm301_vm0, %v282_v6, %v284_v41  ;;  %v294_v37 = vpop.permute.xlu2 %293 }
  0xc6   : > { %6571 = vmatpush.msk.msrb.mxu2 %vm338_vm1, %v324_v32  ;;  %6573 = vmatpush.msk.msrb.mxu3 %vm338_vm1, %v325_v17 }
  0xc7   : > { %6574 = vmatmul.msk.f32.vlgmr.msrb.gmra.mxu3 %vm334_vm2, %v7285_v18 }
  0xc9   : > { %6572 = vmatmul.msk.f32.vlgmr.msrb.gmra.mxu2 %vm334_vm2, %v7285_v18 }
  0xca   : > { %2763 = vrot.lane.b32.xlu1 %v2719_v39, %s7074_s22  ;;  %2761 = vrot.lane.b32.xlu0 %v2718_v19, %s7074_s22  ;;  %v7477_v39 = vld.sshfl [vmem:[#allocation1 + $0x30] sm:$0xff pattern:$0x73625140] }
  0xcb   : > { %2759 = vrot.lane.b32.xlu2 %v2717_v33, %s7074_s22  ;;  %v7471_v33 = vld.sshfl [vmem:[#allocation1 + $0x28] sm:$0xff pattern:$0x73625140] }
  0xcc   : > { %v278_v34 = vpop.permute.xlu0 %277  ;;  %v290_v35 = vpop.permute.xlu1 %289 }
  0xcd   : > { %v322_v1 = vsel %vm301_vm0, %v276_v0, %v278_v34  ;;  %v323_v36 = vsel %vm301_vm0, %v278_v34, %v7371_v16  ;;  %v329_v27 = vsel %vm301_vm0, %v290_v35, %v7396_v38  ;;  %v7461_v19 = vpop.permute.xlu2 %1862  ;;  %v2729_v16 = vld.sshfl [vmem:[#allocation1 + $0x20] sm:$0xff pattern:$0x73625140] }
  0xce   : > { %6567 = vmatpush.msk.msrb.mxu0 %vm338_vm1, %v322_v1  ;;  %6569 = vmatpush.msk.msrb.mxu1 %vm338_vm1, %v323_v36  ;;  %2734 = vst [vmem:[#allocation1 + $0x20] ss:$4 sm:$0xff] %v7140_v14  ;;  %v330_v14 = vsel %vm301_vm0, %v7396_v38, %v294_v37  ;;  %v2735_v38 = vld.sshfl [vmem:[#allocation1] sm:$0xff pattern:$0x73625140] }
  0xcf   : > { %6568 = vmatmul.msk.f32.vlgmr.msrb.gmra.mxu0 %vm334_vm2, %v7285_v18  ;;  %6570 = vmatmul.msk.f32.vlgmr.msrb.gmra.mxu1 %vm334_vm2, %v7285_v18 }
  0xd0   : > { %6581 = vmatpush.msk.msra.mxu3 %vm338_vm1, %v329_v27  ;;  %v7650_v27 = vld [vmem:[%s7113_s17] sm:$0xff] }
  0xd1   : > { %6582 = vmatmul.msk.f32.vlgmr.msra.gmra.mxu3 %vm334_vm2, %v7285_v18 }
  0xd2   : > { %2757 = vrot.lane.b32.xlu0 %v7380_v21, %s7074_s22  ;;  %2755 = vrot.lane.b32.xlu1 %v7385_v28, %s7074_s22  ;;  %v7498_v28 = vld.sshfl [vmem:[#allocation1 + $0x8] sm:$0xff pattern:$0x73625140] }
  0xd3   : > { %2769 = vrot.lane.b32.xlu2 %v2722_v5, %s7074_s22  ;;  %v7503_v5 = vld.sshfl [vmem:[#allocation1 + $0x10] sm:$0xff pattern:$0x73625140] }
  0xd4   : > { %v288_v0 = vpop.permute.xlu0 %287  ;;  %v286_v23 = vpop.permute.xlu1 %285 }
  0xd5   : > { %v328_v24 = vsel %vm301_vm0, %v288_v0, %v290_v35  ;;  %v326_v6 = vsel %vm301_vm0, %v284_v41, %v286_v23  ;;  %v327_v32 = vsel %vm301_vm0, %v286_v23, %v288_v0  ;;  %v7486_v21 = vpop.permute.xlu2 %1868  ;;  %v2738_v41 = vld.sshfl [vmem:[#allocation1 + $0x18] sm:$0xff pattern:$0x73625140] }
  0xd6   : > { %6575 = vmatpush.msk.msra.mxu0 %vm338_vm1, %v326_v6  ;;  %6577 = vmatpush.msk.msra.mxu1 %vm338_vm1, %v327_v32  ;;  %2743 = vst [vmem:[#allocation1] ss:$4 sm:$0xff] %v7149_v22  ;;  %v7755_v6 = vld [vmem:[%s7113_s17 + $0x18] sm:$0xff] }
  0xd7   : > { %6579 = vmatpush.msk.msra.mxu2 %vm338_vm1, %v328_v24  ;;  %6576 = vmatmul.msk.f32.vlgmr.msra.gmra.mxu0 %vm334_vm2, %v7285_v18 }
  0xd8   : > { %6578 = vmatmul.msk.f32.vlgmr.msra.gmra.mxu1 %vm334_vm2, %v7285_v18  ;;  %6580 = vmatmul.msk.f32.vlgmr.msra.gmra.mxu2 %vm334_vm2, %v7285_v18 }
  0xd9   : > { %6583 = vmatpush.msk.msrb.mxu0 %vm338_vm1, %v330_v14 }
  0xda   : > { %2767 = vrot.lane.b32.xlu1 %v7408_v30, %s7074_s22  ;;  %2771 = vrot.lane.b32.xlu0 %v2725_v40, %s7074_s22 }
  0xdb   : > { %6591 = vmatpush.msk.msra.mxu0 %vm338_vm1, %v7183_v46  ;;  %2765 = vrot.lane.b32.xlu2 %v7406_v2, %s7074_s22 }
  0xdc   : > { %v296_v17 = vpop.permute.xlu1 %295  ;;  %v300_v34 = vpop.permute.xlu0 %299 }
  0xdd   : > { %v331_v35 = vsel %vm301_vm0, %v294_v37, %v296_v17  ;;  %v332_v30 = vsel %vm301_vm0, %v296_v17, %v7423_v25  ;;  %v333_v40 = vsel %vm301_vm0, %v7423_v25, %v300_v34  ;;  %v7517_v46 = vpop.permute.xlu2 %1864  ;;  %v2702_v37 = vld [vmem:[%s7113_s17 + $0x40] sm:$0x3] }
  0xde   : > { %6585 = vmatpush.msk.msrb.mxu1 %vm338_vm1, %v331_v35  ;;  %6587 = vmatpush.msk.msrb.mxu2 %vm338_vm1, %v332_v30 }
  0xdf   : > { %6589 = vmatpush.msk.msrb.mxu3 %vm338_vm1, %v333_v40  ;;  %6584 = vmatmul.msk.f32.vlgmr.msrb.gmra.mxu0 %vm334_vm2, %v7285_v18  ;;  %v1925_v40 = vsel %vm1920_vm3, %v7461_v19, %v7517_v46 }
  0xe0   : > { %6586 = vmatmul.msk.f32.vlgmr.msrb.gmra.mxu1 %vm334_vm2, %v7285_v18  ;;  %6588 = vmatmul.msk.f32.vlgmr.msrb.gmra.mxu2 %vm334_vm2, %v7285_v18 }
  0xe1   : > { %6590 = vmatmul.msk.f32.vlgmr.msrb.gmra.mxu3 %vm334_vm2, %v7285_v18  ;;  %6593 = vmatpush.msk.msra.mxu1 %vm338_vm1, %v7185_v47  ;;  %v7543_v18 = vld [vmem:[%s9689_s1] sm:$0xf] }
  0xe2   : > { %2779 = vrot.lane.b32.xlu1 %v2729_v16, %s7074_s22  ;;  %2777 = vrot.lane.b32.xlu0 %v2728_v20, %s7074_s22 }
  0xe3   : > { %6595 = vmatpush.msk.msra.mxu2 %vm338_vm1, %v7187_v48  ;;  %6597 = vmatpush.msk.msra.mxu3 %vm338_vm1, %v7189_v49  ;;  %v7580_v48 = vld.sshfl [vmem:[#allocation1 + $0x28] sm:$0xff pattern:$0x73625140]  ;;  %v2741_v49 = vld.sshfl [vmem:[#allocation1 + $0x30] sm:$0xff pattern:$0x73625140] }
  0xe4   : > { %v7536_v22 = vpop.permute.xlu1 %1860  ;;  %v7538_v2 = vpop.permute.xlu0 %1854  ;;  %2775 = vrot.lane.b32.xlu2 %v2727_v31, %s7074_s22  ;;  %6599 = vmatpush.msk.msrb.mxu0 %vm338_vm1, %v7172_v42 }
  0xe5   : > { %6601 = vmatpush.msk.msrb.mxu1 %vm338_vm1, %v7174_v43  ;;  %6603 = vmatpush.msk.msrb.mxu2 %vm338_vm1, %v7176_v44  ;;  %v7554_v47 = vpop.permute.xlu2 %1874  ;;  %v2739_v44 = vld.sshfl [vmem:[#allocation1 + $0x20] sm:$0xff pattern:$0x73625140] }
  0xe6   : > { %6605 = vmatpush.msk.msrb.mxu3 %vm338_vm1, %v7178_v45  ;;  %v2742_v45 = vld.sshfl [vmem:[#allocation1 + $0x38] sm:$0xff pattern:$0x73625140] }
  0xe7   : > { %6592 = vmatmul.msk.f32.vlgmr.msra.gmra.mxu0 %vm334_vm2, %v7543_v18  ;;  %2744 = vst [vmem:[#allocation1 + $0x20] ss:$4 sm:$0xff] %v7152_v26 }
  0xe8   : > { %6594 = vmatmul.msk.f32.vlgmr.msra.gmra.mxu1 %vm334_vm2, %v7543_v18  ;;  %6596 = vmatmul.msk.f32.vlgmr.msra.gmra.mxu2 %vm334_vm2, %v7543_v18 }
  0xe9   : > { %6598 = vmatmul.msk.f32.vlgmr.msra.gmra.mxu3 %vm334_vm2, %v7543_v18  ;;  %6607 = vmatpush.msk.msra.mxu0 %vm338_vm1, %v7204_v54 }
  0xea   : > { %2785 = vrot.lane.b32.xlu1 %v2732_v13, %s7074_s22  ;;  %2773 = vrot.lane.b32.xlu0 %v7457_v29, %s7074_s22 }
  0xeb   : > { %6609 = vmatpush.msk.msra.mxu1 %vm338_vm1, %v7206_v55  ;;  %6611 = vmatpush.msk.msra.mxu2 %vm338_vm1, %v7209_v56  ;;  %v7612_v56 = vld.sshfl [vmem:[#allocation1 + $0x8] sm:$0xff pattern:$0x73625140] }
  0xec   : > { %v7573_v42 = vpop.permute.xlu1 %1856  ;;  %v7575_v43 = vpop.permute.xlu0 %1858  ;;  %2787 = vrot.lane.b32.xlu2 %v2735_v38, %s7074_s22  ;;  %6613 = vmatpush.msk.msra.mxu3 %vm338_vm1, %v7211_v57  ;;  %v2745_v57 = vld.sshfl [vmem:[#allocation1] sm:$0xff pattern:$0x73625140]  ;;  %v1924_v38 = vsel %vm1920_vm3, %v7536_v22, %v7461_v19 }
  0xed   : > { %v7582_v54 = vpop.permute.xlu2 %1886  ;;  %v1922_v32 = vsel %vm1920_vm3, %v7573_v42, %v7575_v43  ;;  %v1923_v14 = vsel %vm1920_vm3, %v7575_v43, %v7536_v22  ;;  %v7840_v43 = vld [vmem:[%s9689_s1 + $0x8] sm:$0xf] }
  0xee   : > { %v2752_v36 = vld.sshfl [vmem:[#allocation1 + $0x38] sm:$0xff pattern:$0x73625140] }
  0xef   : > { %6600 = vmatmul.msk.f32.vlgmr.msrb.gmra.mxu0 %vm334_vm2, %v7543_v18 }
  0xf0   : > { %6602 = vmatmul.msk.f32.vlgmr.msrb.gmra.mxu1 %vm334_vm2, %v7543_v18  ;;  %6604 = vmatmul.msk.f32.vlgmr.msrb.gmra.mxu2 %vm334_vm2, %v7543_v18 }
  0xf1   : > { %6606 = vmatmul.msk.f32.vlgmr.msrb.gmra.mxu3 %vm334_vm2, %v7543_v18  ;;  %6615 = vmatpush.msk.msrb.mxu0 %vm338_vm1, %v7193_v50  ;;  %v7610_v50 = vld.sshfl [vmem:[#allocation1 + $0x10] sm:$0xff pattern:$0x73625140] }
  0xf2   : > { %2781 = vrot.lane.b32.xlu1 %v7471_v33, %s7074_s22  ;;  %2783 = vrot.lane.b32.xlu0 %v7477_v39, %s7074_s22  ;;  %v9693_v39 = vld [vmem:[#allocation2_spill] sm:$0xff] }
  0xf3   : > { %6617 = vmatpush.msk.msrb.mxu1 %vm338_vm1, %v7195_v51  ;;  %6619 = vmatpush.msk.msrb.mxu2 %vm338_vm1, %v7197_v52  ;;  %v2748_v51 = vld.sshfl [vmem:[#allocation1 + $0x18] sm:$0xff pattern:$0x73625140]  ;;  %v7634_v52 = vld.sshfl [vmem:[#allocation1 + $0x28] sm:$0xff pattern:$0x73625140] }
  0xf4   : > { %v7603_v26 = vpop.permute.xlu1 %1866  ;;  %v7605_v55 = vpop.permute.xlu0 %1870  ;;  %2793 = vrot.lane.b32.xlu2 %v2738_v41, %s7074_s22  ;;  %6621 = vmatpush.msk.msrb.mxu3 %vm338_vm1, %v7199_v53  ;;  %2753 = vst [vmem:[#allocation1] ss:$4 sm:$0xff] %v2702_v37  ;;  %v7636_v53 = vld.sshfl [vmem:[#allocation1 + $0x30] sm:$0xff pattern:$0x73625140] }
  0xf5   : > { %v7614_v25 = vpop.permute.xlu2 %1892  ;;  %v1926_v22 = vsel %vm1920_vm3, %v7517_v46, %v7603_v26  ;;  %v1928_v19 = vsel %vm1920_vm3, %v7486_v21, %v7605_v55 }
  0xf7   : > { %6608 = vmatmul.msk.f32.vlgmr.msra.gmra.mxu0 %vm334_vm2, %v7543_v18 }
  0xf8   : > { %6610 = vmatmul.msk.f32.vlgmr.msra.gmra.mxu1 %vm334_vm2, %v7543_v18  ;;  %6612 = vmatmul.msk.f32.vlgmr.msra.gmra.mxu2 %vm334_vm2, %v7543_v18 }
  0xf9   : > { %6614 = vmatmul.msk.f32.vlgmr.msra.gmra.mxu3 %vm334_vm2, %v7543_v18  ;;  %6623 = vmatpush.msk.msra.mxu0 %vm338_vm1, %v7226_v62  ;;  %v2749_v62 = vld.sshfl [vmem:[#allocation1 + $0x20] sm:$0xff pattern:$0x73625140] }
  0xfa   : > { %2795 = vrot.lane.b32.xlu0 %v2739_v44, %s7074_s22  ;;  %2791 = vrot.lane.b32.xlu1 %v7503_v5, %s7074_s22 }
  0xfb   : > { %6625 = vmatpush.msk.msra.mxu1 %vm338_vm1, %v7228_v63  ;;  %6627 = vmatpush.msk.msra.mxu2 %vm338_vm1, %v7230_v3  ;;  %v7647_v63 = vld [vmem:[%s7113_s17 + $0x8] sm:$0xff]  ;;  %v7654_v29 = vld.sshfl [vmem:[#allocation1] sm:$0xff pattern:$0x73625140] }
  0xfc   : > { %v7638_v20 = vpop.permute.xlu1 %1878  ;;  %v7640_v1 = vpop.permute.xlu0 %1876  ;;  %2789 = vrot.lane.b32.xlu2 %v7498_v28, %s7074_s22  ;;  %6629 = vmatpush.msk.msra.mxu3 %vm338_vm1, %v7232_v4  ;;  %3615 = vst [vmem:[#allocation1 + $0x20] ss:$4 sm:$0xff] %v7647_v63 }
  0xfd   : > { %v7652_v3 = vpop.permute.xlu2 %1888  ;;  %3613 = vst [vmem:[#allocation1] ss:$4 sm:$0xff] %v7650_v27 }
  0xff   : > { %6616 = vmatmul.msk.f32.vlgmr.msrb.gmra.mxu0 %vm334_vm2, %v7543_v18 }
 0x100   : > { %6618 = vmatmul.msk.f32.vlgmr.msrb.gmra.mxu1 %vm334_vm2, %v7543_v18  ;;  %6620 = vmatmul.msk.f32.vlgmr.msrb.gmra.mxu2 %vm334_vm2, %v7543_v18 }
 0x101   : > { %6622 = vmatmul.msk.f32.vlgmr.msrb.gmra.mxu3 %vm334_vm2, %v7543_v18  ;;  %6631 = vmatpush.msk.msrb.mxu0 %vm338_vm1, %v7214_v58 }
 0x102   : > { %2801 = vrot.lane.b32.xlu0 %v2742_v45, %s7074_s22  ;;  %2803 = vrot.lane.b32.xlu1 %v2745_v57, %s7074_s22 }
 0x103   : > { %6633 = vmatpush.msk.msrb.mxu1 %vm338_vm1, %v7216_v59  ;;  %6635 = vmatpush.msk.msrb.mxu2 %vm338_vm1, %v7218_v60  ;;  %v7748_v0 = vld.sshfl [vmem:[#allocation1 + $0x30] sm:$0xff pattern:$0x73625140]  ;;  %v7750_v23 = vld.sshfl [vmem:[#allocation1 + $0x38] sm:$0xff pattern:$0x73625140] }
 0x104   : > { %v7674_v4 = vpop.permute.xlu1 %1884  ;;  %v7676_v31 = vpop.permute.xlu0 %1872  ;;  %2799 = vrot.lane.b32.xlu2 %v2741_v49, %s7074_s22  ;;  %6637 = vmatpush.msk.msrb.mxu3 %vm338_vm1, %v7220_v61  ;;  %v7700_v59 = vld.sshfl [vmem:[#allocation1 + $0x8] sm:$0xff pattern:$0x73625140]  ;;  %v7711_v16 = vld.sshfl [vmem:[#allocation1] sm:$0xff pattern:$0x73625140] }
 0x105   : > { %v7681_v58 = vpop.permute.xlu2 %1898  ;;  %v7713_v33 = vld.sshfl [vmem:[#allocation1 + $0x10] sm:$0xff pattern:$0x73625140]  ;;  %v1929_v57 = vsel %vm1920_vm3, %v7605_v55, %v7676_v31  ;;  %v1930_v37 = vsel %vm1920_vm3, %v7676_v31, %v7554_v47 }
 0x107   : > { %6624 = vmatmul.msk.f32.vlgmr.msra.gmra.mxu0 %vm334_vm2, %v7543_v18 }
 0x108   : > { %6626 = vmatmul.msk.f32.vlgmr.msra.gmra.mxu1 %vm334_vm2, %v7543_v18  ;;  %6628 = vmatmul.msk.f32.vlgmr.msra.gmra.mxu2 %vm334_vm2, %v7543_v18 }
 0x109   : > { %6630 = vmatmul.msk.f32.vlgmr.msra.gmra.mxu3 %vm334_vm2, %v7543_v18  ;;  %6639 = vmatpush.msk.msra.mxu0 %vm338_vm1, %v7247_v10  ;;  %v7709_v10 = vld.sshfl [vmem:[#allocation1 + $0x18] sm:$0xff pattern:$0x73625140] }
 0x10a   : > { %2797 = vrot.lane.b32.xlu0 %v7580_v48, %s7074_s22  ;;  %2809 = vrot.lane.b32.xlu1 %v2748_v51, %s7074_s22  ;;  %v1931_v51 = vsel %vm1920_vm3, %v7554_v47, %v7640_v1 }
 0x10b   : > { %6641 = vmatpush.msk.msra.mxu1 %vm338_vm1, %v7249_v11  ;;  %6643 = vmatpush.msk.msra.mxu2 %vm338_vm1, %v7251_v12  ;;  %v7716_v11 = vld [vmem:[%s7113_s17 + $0x10] sm:$0xff] }
 0x10c   : > { %v7702_v60 = vpop.permute.xlu1 %1880  ;;  %v7704_v61 = vpop.permute.xlu0 %1882  ;;  %2811 = vrot.lane.b32.xlu2 %v2749_v62, %s7074_s22  ;;  %6645 = vmatpush.msk.msra.mxu3 %vm338_vm1, %v7253_v15  ;;  %3624 = vst [vmem:[#allocation1] ss:$4 sm:$0xff] %v7716_v11 }
 0x10d   : > { %v7718_v12 = vpop.permute.xlu2 %1910 }
 0x10f   : > { %6632 = vmatmul.msk.f32.vlgmr.msrb.gmra.mxu0 %vm334_vm2, %v7543_v18 }
 0x110   : > { %6634 = vmatmul.msk.f32.vlgmr.msrb.gmra.mxu1 %vm334_vm2, %v7543_v18  ;;  %6636 = vmatmul.msk.f32.vlgmr.msrb.gmra.mxu2 %vm334_vm2, %v7543_v18 }
 0x111   : > { %6638 = vmatmul.msk.f32.vlgmr.msrb.gmra.mxu3 %vm334_vm2, %v7543_v18  ;;  %6649 = vmatpush.msk.msrb.mxu1 %vm338_vm1, %v7237_v7  ;;  %v7746_v7 = vld.sshfl [vmem:[#allocation1 + $0x28] sm:$0xff pattern:$0x73625140] }
 0x112   : > { %2807 = vrot.lane.b32.xlu0 %v7610_v50, %s7074_s22  ;;  %2805 = vrot.lane.b32.xlu1 %v7612_v56, %s7074_s22  ;;  %v7802_v30 = vpop.f32.mrf.mxu2  ;;  %v7857_v56 = vld [vmem:[%s7113_s17 + $0x20] sm:$0xff] }
 0x113   : > { %6651 = vmatpush.msk.msrb.mxu2 %vm338_vm1, %v7239_v8  ;;  %6653 = vmatpush.msk.msrb.mxu3 %vm338_vm1, %v7241_v9  ;;  %v3620_v8 = vld.sshfl [vmem:[#allocation1 + $0x20] sm:$0xff pattern:$0x73625140]  ;;  %v1921_v9 = vsel %vm1920_vm3, %v7538_v2, %v7573_v42  ;;  %v1927_v2 = vsel %vm1920_vm3, %v7603_v26, %v7486_v21  ;;  %v7844_v44 = vld.sshfl [vmem:[#allocation1 + $0x10] sm:$0xff pattern:$0x73625140] }
 0x114   : > { %v7739_v15 = vpop.permute.xlu0 %1894  ;;  %v7741_v13 = vpop.permute.xlu1 %1890  ;;  %6647 = vmatpush.msk.msrb.mxu0 %vm338_vm1, %v9693_v39  ;;  %2817 = vrot.lane.b32.xlu2 %v2752_v36, %s7074_s22  ;;  %3625 = vst [vmem:[#allocation1 + $0x20] ss:$4 sm:$0xff] %v7755_v6  ;;  %v3626_v48 = vld.sshfl [vmem:[#allocation1] sm:$0xff pattern:$0x73625140]  ;;  %v1934_v39 = vsel %vm1920_vm3, %v7702_v60, %v7704_v61 }
 0x115   : > { %v7752_v24 = vpop.permute.xlu2 %1916  ;;  %v7776_v28 = vpop.f32.mrf.mxu0  ;;  %v7848_v49 = vld.sshfl [vmem:[#allocation1 + $0x18] sm:$0xff pattern:$0x73625140]  ;;  %v7854_v50 = vld.sshfl [vmem:[#allocation1 + $0x8] sm:$0xff pattern:$0x73625140] }
 0x116   : > { %9694 = vst [vmem:[#allocation2_spill] sm:$0xff] %v7776_v28  ;;  %v7778_v5 = vpop.f32.mrf.mxu1 }
 0x117   : > { %6640 = vmatmul.msk.f32.vlgmr.msra.gmra.mxu0 %vm334_vm2, %v7543_v18  ;;  %9695 = vst [vmem:[#allocation3_spill] sm:$0xff] %v7778_v5 }
 0x118   : > { %6642 = vmatmul.msk.f32.vlgmr.msra.gmra.mxu1 %vm334_vm2, %v7543_v18  ;;  %6644 = vmatmul.msk.f32.vlgmr.msra.gmra.mxu2 %vm334_vm2, %v7543_v18  ;;  %3634 = vst [vmem:[#allocation1] ss:$4 sm:$0xff] %v7857_v56 }
 0x119   : > { %6646 = vmatmul.msk.f32.vlgmr.msra.gmra.mxu3 %vm334_vm2, %v7543_v18  ;;  %6656 = vmatpush.msk.msra.mxu0 %vm338_vm1, %v1921_v9 }
 0x11a   : > { %6658 = vmatpush.msk.msra.mxu1 %vm338_vm1, %v1922_v32  ;;  %6660 = vmatpush.msk.msra.mxu2 %vm338_vm1, %v1923_v14 }
 0x11b   : > { %6662 = vmatpush.msk.msra.mxu3 %vm338_vm1, %v1924_v38  ;;  %2815 = vrot.lane.b32.xlu1 %v7636_v53, %s7074_s22  ;;  %v7796_v34 = vpop.f32.mrf.mxu3  ;;  %v7886_v47 = vld.sshfl [vmem:[#allocation1 + $0x28] sm:$0xff pattern:$0x73625140]  ;;  %v7888_v53 = vld.sshfl [vmem:[#allocation1 + $0x30] sm:$0xff pattern:$0x73625140] }
 0x11c   : > { %2819 = vrot.lane.b32.xlu0 %v7654_v29, %s7074_s22  ;;  %v7790_v41 = vpop.permute.xlu0 %1900  ;;  %v7792_v17 = vpop.permute.xlu1 %1902  ;;  %2813 = vrot.lane.b32.xlu2 %v7634_v52, %s7074_s22  ;;  %v1932_v52 = vsel %vm1920_vm3, %v7640_v1, %v7638_v20  ;;  %v3630_v1 = vld.sshfl [vmem:[#allocation1 + $0x20] sm:$0xff pattern:$0x73625140]  ;;  %v7900_v31 = vld.sshfl [vmem:[#allocation1 + $0x38] sm:$0xff pattern:$0x73625140] }
 0x11d   : > { %v7798_v35 = vpop.permute.xlu2 %1912  ;;  %v7827_v46 = vpop.f32.mrf.mxu0 }
 0x11e   : > { %9696 = vst [vmem:[#allocation4_spill] sm:$0xff] %v7827_v46  ;;  %v7829_v42 = vpop.f32.mrf.mxu1 }
 0x11f   : > { %6648 = vmatmul.msk.f32.vlgmr.msrb.gmra.mxu0 %vm334_vm2, %v7543_v18  ;;  %9697 = vst [vmem:[#allocation5_spill] sm:$0xff] %v7829_v42  ;;  %v7949_v32 = vld.sshfl [vmem:[#allocation1 + $0x10] sm:$0xff pattern:$0x73625140] }
 0x120   : > { %6650 = vmatmul.msk.f32.vlgmr.msrb.gmra.mxu1 %vm334_vm2, %v7543_v18  ;;  %6652 = vmatmul.msk.f32.vlgmr.msrb.gmra.mxu2 %vm334_vm2, %v7543_v18  ;;  %v7951_v14 = vld.sshfl [vmem:[#allocation1 + $0x18] sm:$0xff pattern:$0x73625140] }
 0x121   : > { %6654 = vmatmul.msk.f32.vlgmr.msrb.gmra.mxu3 %vm334_vm2, %v7543_v18  ;;  %6664 = vmatpush.msk.msrb.mxu0 %vm338_vm1, %v1925_v40  ;;  %v7956_v40 = vld [vmem:[%s7113_s17 + $0x30] sm:$0xff] }
 0x122   : > { %6666 = vmatpush.msk.msrb.mxu1 %vm338_vm1, %v1926_v22  ;;  %6668 = vmatpush.msk.msrb.mxu2 %vm338_vm1, %v1927_v2  ;;  %v7876_v55 = vpop.f32.mrf.mxu2 }
 0x123   : > { %6670 = vmatpush.msk.msrb.mxu3 %vm338_vm1, %v1928_v19  ;;  %3664 = vrot.lane.b32.xlu1 %v3620_v8, %s7075_s25  ;;  %v7852_v26 = vpop.f32.mrf.mxu3  ;;  %v1936_v8 = vsel %vm1920_vm3, %v7674_v4, %v7582_v54  ;;  %v1938_v19 = vsel %vm1920_vm3, %v7652_v3, %v7741_v13 }
 0x124   : > { %3662 = vrot.lane.b32.xlu0 %v7709_v10, %s7075_s25  ;;  %v7833_v18 = vpop.permute.xlu0 %1896  ;;  %v7835_v21 = vpop.permute.xlu1 %1908  ;;  %3660 = vrot.lane.b32.xlu2 %v7713_v33, %s7075_s25  ;;  %v7903_v10 = vld [vmem:[%s7113_s17 + $0x28] sm:$0xff] }
 0x125   : > { %v7846_v45 = vpop.permute.xlu2 %2759  ;;  %3635 = vst [vmem:[#allocation1 + $0x20] ss:$4 sm:$0xff] %v7903_v10 }
 0x127   : > { %6657 = vmatmul.msk.f32.vlgmr.msra.gmra.mxu0 %vm334_vm2, %v7840_v43 }
 0x128   : > { %6659 = vmatmul.msk.f32.vlgmr.msra.gmra.mxu1 %vm334_vm2, %v7840_v43  ;;  %6661 = vmatmul.msk.f32.vlgmr.msra.gmra.mxu2 %vm334_vm2, %v7840_v43 }
 0x129   : > { %6663 = vmatmul.msk.f32.vlgmr.msra.gmra.mxu3 %vm334_vm2, %v7840_v43  ;;  %6672 = vmatpush.msk.msra.mxu0 %vm338_vm1, %v1929_v57 }
 0x12a   : > { %6674 = vmatpush.msk.msra.mxu1 %vm338_vm1, %v1930_v37  ;;  %6676 = vmatpush.msk.msra.mxu2 %vm338_vm1, %v1931_v51  ;;  %v1941_v37 = vsel %vm1920_vm3, %v7739_v15, %v7833_v18 }
 0x12b   : > { %6678 = vmatpush.msk.msra.mxu3 %vm338_vm1, %v1932_v52  ;;  %3656 = vrot.lane.b32.xlu1 %v7711_v16, %s7075_s25 }
 0x12c   : > { %3658 = vrot.lane.b32.xlu0 %v7700_v59, %s7075_s25  ;;  %v7892_v62 = vpop.permute.xlu0 %1906  ;;  %v7894_v36 = vpop.permute.xlu1 %1904  ;;  %3670 = vrot.lane.b32.xlu2 %v7750_v23, %s7075_s25  ;;  %v1933_v59 = vsel %vm1920_vm3, %v7638_v20, %v7702_v60  ;;  %v1935_v23 = vsel %vm1920_vm3, %v7704_v61, %v7674_v4  ;;  %v7947_v4 = vld.sshfl [vmem:[#allocation1 + $0x8] sm:$0xff pattern:$0x73625140] }
 0x12d   : > { %v7898_v29 = vpop.f32.mrf.mxu0  ;;  %v7905_v16 = vpop.f32.mrf.mxu1 }
 0x12e   : > { %9698 = vst [vmem:[#allocation6_spill] sm:$0xff] %v7898_v29  ;;  %v7907_v33 = vpop.permute.xlu2 %2769  ;;  %v7928_v20 = vpop.f32.mrf.mxu3 }
 0x12f   : > { %9699 = vst [vmem:[#allocation7_spill] sm:$0xff] %v7905_v16  ;;  %6665 = vmatmul.msk.f32.vlgmr.msrb.gmra.mxu0 %vm334_vm2, %v7840_v43  ;;  %v7938_v60 = vpop.f32.mrf.mxu2  ;;  %v4504_v16 = vld [vmem:[%s7113_s17 + $0x40] sm:$0x3] }
 0x130   : > { %6667 = vmatmul.msk.f32.vlgmr.msrb.gmra.mxu1 %vm334_vm2, %v7840_v43  ;;  %6669 = vmatmul.msk.f32.vlgmr.msrb.gmra.mxu2 %vm334_vm2, %v7840_v43 }
 0x131   : > { %6671 = vmatmul.msk.f32.vlgmr.msrb.gmra.mxu3 %vm334_vm2, %v7840_v43  ;;  %6680 = vmatpush.msk.msrb.mxu0 %vm338_vm1, %v1933_v59 }
 0x132   : > { %6682 = vmatpush.msk.msrb.mxu1 %vm338_vm1, %v1934_v39  ;;  %6684 = vmatpush.msk.msrb.mxu2 %vm338_vm1, %v1935_v23  ;;  %v8043_v23 = vld.sshfl [vmem:[#allocation1 + $0x38] sm:$0xff pattern:$0x73625140] }
 0x133   : > { %6686 = vmatpush.msk.msrb.mxu3 %vm338_vm1, %v1936_v8  ;;  %3668 = vrot.lane.b32.xlu1 %v7748_v0, %s7075_s25  ;;  %v3636_v0 = vld.sshfl [vmem:[#allocation1] sm:$0xff pattern:$0x73625140]  ;;  %v8045_v8 = vld.sshfl [vmem:[#allocation1 + $0x28] sm:$0xff pattern:$0x73625140] }
 0x134   : > { %3672 = vrot.lane.b32.xlu0 %v3626_v48, %s7075_s25  ;;  %v7941_v61 = vpop.permute.xlu1 %1914  ;;  %v7943_v9 = vpop.permute.xlu0 %1918  ;;  %3666 = vrot.lane.b32.xlu2 %v7746_v7, %s7075_s25  ;;  %3644 = vst [vmem:[#allocation1] ss:$4 sm:$0xff] %v7956_v40  ;;  %v1937_v7 = vsel %vm1920_vm3, %v7582_v54, %v7652_v3  ;;  %v1939_v48 = vsel %vm1920_vm3, %v7741_v13, %v7614_v25 }
 0x135   : > { %v7968_v22 = vpop.f32.mrf.mxu0  ;;  %v7970_v2 = vpop.f32.mrf.mxu1  ;;  %v1940_v54 = vsel %vm1920_vm3, %v7614_v25, %v7739_v15  ;;  %v1944_v15 = vsel %vm1920_vm3, %v7790_v41, %v7792_v17 }
 0x136   : > { %v7953_v38 = vpop.permute.xlu2 %2765  ;;  %9700 = vst [vmem:[#allocation8_spill] sm:$0xff] %v7968_v22  ;;  %v7988_v3 = vpop.f32.mrf.mxu3 }
 0x137   : > { %6673 = vmatmul.msk.f32.vlgmr.msra.gmra.mxu0 %vm334_vm2, %v7840_v43  ;;  %9701 = vst [vmem:[#allocation9_spill] sm:$0xff] %v7970_v2 }
 0x138   : > { %6675 = vmatmul.msk.f32.vlgmr.msra.gmra.mxu1 %vm334_vm2, %v7840_v43  ;;  %6677 = vmatmul.msk.f32.vlgmr.msra.gmra.mxu2 %vm334_vm2, %v7840_v43 }
 0x139   : > { %6679 = vmatmul.msk.f32.vlgmr.msra.gmra.mxu3 %vm334_vm2, %v7840_v43  ;;  %6688 = vmatpush.msk.msra.mxu0 %vm338_vm1, %v1937_v7  ;;  %v8054_v7 = vld [vmem:[%s7113_s17 + $0x38] sm:$0xff] }
 0x13a   : > { %6690 = vmatpush.msk.msra.mxu1 %vm338_vm1, %v1938_v19  ;;  %6692 = vmatpush.msk.msra.mxu2 %vm338_vm1, %v1939_v48  ;;  %v1947_v19 = vsel %vm1920_vm3, %v7892_v62, %v7835_v21  ;;  %v1946_v48 = vsel %vm1920_vm3, %v7894_v36, %v7892_v62 }
 0x13b   : > { %6694 = vmatpush.msk.msra.mxu3 %vm338_vm1, %v1940_v54  ;;  %3680 = vrot.lane.b32.xlu1 %v3630_v1, %s7075_s25 }
 0x13c   : > { %3678 = vrot.lane.b32.xlu0 %v7848_v49, %s7075_s25  ;;  %v7992_v13 = vpop.permute.xlu1 %2763  ;;  %v7994_v57 = vpop.permute.xlu0 %2761  ;;  %3676 = vrot.lane.b32.xlu2 %v7844_v44, %s7075_s25  ;;  %v1943_v44 = vsel %vm1920_vm3, %v7681_v58, %v7790_v41  ;;  %v1942_v49 = vsel %vm1920_vm3, %v7833_v18, %v7681_v58  ;;  %v3640_v18 = vld.sshfl [vmem:[#allocation1 + $0x20] sm:$0xff pattern:$0x73625140] }
 0x13d   : > { %v7998_v25 = vpop.f32.mrf.mxu2  ;;  %v8025_v52 = vpop.f32.mrf.mxu0 }
 0x13e   : > { %v8000_v51 = vpop.permute.xlu2 %2775  ;;  %v8027_v1 = vpop.f32.mrf.mxu1 }
 0x13f   : > { %6681 = vmatmul.msk.f32.vlgmr.msrb.gmra.mxu0 %vm334_vm2, %v7840_v43 }
 0x140   : > { %6683 = vmatmul.msk.f32.vlgmr.msrb.gmra.mxu1 %vm334_vm2, %v7840_v43  ;;  %6685 = vmatmul.msk.f32.vlgmr.msrb.gmra.mxu2 %vm334_vm2, %v7840_v43 }
 0x141   : > { %6687 = vmatmul.msk.f32.vlgmr.msrb.gmra.mxu3 %vm334_vm2, %v7840_v43  ;;  %6696 = vmatpush.msk.msrb.mxu0 %vm338_vm1, %v1941_v37  ;;  %v8093_v37 = vld.sshfl [vmem:[#allocation1 + $0x10] sm:$0xff pattern:$0x73625140] }
 0x142   : > { %6698 = vmatpush.msk.msrb.mxu1 %vm338_vm1, %v1942_v49  ;;  %6700 = vmatpush.msk.msrb.mxu2 %vm338_vm1, %v1943_v44  ;;  %v8039_v59 = vpop.f32.mrf.mxu3  ;;  %v8095_v44 = vld.sshfl [vmem:[#allocation1 + $0x8] sm:$0xff pattern:$0x73625140] }
 0x143   : > { %6702 = vmatpush.msk.msrb.mxu3 %vm338_vm1, %v1944_v15  ;;  %3686 = vrot.lane.b32.xlu1 %v7900_v31, %s7075_s25  ;;  %v8102_v15 = vld.sshfl [vmem:[#allocation1 + $0x18] sm:$0xff pattern:$0x73625140] }
 0x144   : > { %3674 = vrot.lane.b32.xlu0 %v7854_v50, %s7075_s25  ;;  %v8034_v58 = vpop.permute.xlu0 %2757  ;;  %v8036_v41 = vpop.permute.xlu1 %2755  ;;  %3688 = vrot.lane.b32.xlu2 %v3636_v0, %s7075_s25  ;;  %v8051_v50 = vld.sshfl [vmem:[#allocation1 + $0x30] sm:$0xff pattern:$0x73625140]  ;;  %v1945_v0 = vsel %vm1920_vm3, %v7792_v17, %v7894_v36  ;;  %v1948_v17 = vsel %vm1920_vm3, %v7835_v21, %v7718_v12 }
 0x145   : > { %v8049_v31 = vpop.f32.mrf.mxu2  ;;  %3645 = vst [vmem:[#allocation1 + $0x20] ss:$4 sm:$0xff] %v8054_v7 }
 0x146   : > { %v8041_v39 = vpop.permute.xlu2 %2787 }
 0x147   : > { %6689 = vmatmul.msk.f32.vlgmr.msra.gmra.mxu0 %vm334_vm2, %v7840_v43 }
 0x148   : > { %6691 = vmatmul.msk.f32.vlgmr.msra.gmra.mxu1 %vm334_vm2, %v7840_v43  ;;  %6693 = vmatmul.msk.f32.vlgmr.msra.gmra.mxu2 %vm334_vm2, %v7840_v43 }
 0x149   : > { %6695 = vmatmul.msk.f32.vlgmr.msra.gmra.mxu3 %vm334_vm2, %v7840_v43  ;;  %6704 = vmatpush.msk.msra.mxu0 %vm338_vm1, %v1945_v0 }
 0x14a   : > { %6706 = vmatpush.msk.msra.mxu1 %vm338_vm1, %v1946_v48  ;;  %6708 = vmatpush.msk.msra.mxu2 %vm338_vm1, %v1947_v19  ;;  %v8111_v0 = vpop.f32.mrf.mxu3  ;;  %v1950_v19 = vsel %vm1920_vm3, %v7798_v35, %v7941_v61  ;;  %v1951_v48 = vsel %vm1920_vm3, %v7941_v61, %v7752_v24 }
 0x14b   : > { %6710 = vmatpush.msk.msra.mxu3 %vm338_vm1, %v1948_v17  ;;  %3682 = vrot.lane.b32.xlu1 %v7886_v47, %s7075_s25  ;;  %v3603_v47 = vld [vmem:[%s7113_s17 + $0x40] sm:$0x3]  ;;  %9704 = vst [vmem:[#allocation12_spill] sm:$0xff] %v8111_v0  ;;  %v1952_v17 = vsel %vm1920_vm3, %v7752_v24, %v7943_v9 }
 0x14c   : > { %3684 = vrot.lane.b32.xlu0 %v7888_v53, %s7075_s25  ;;  %v8083_v62 = vpop.f32.mrf.mxu0  ;;  %v8085_v36 = vpop.f32.mrf.mxu1  ;;  %3694 = vrot.lane.b32.xlu2 %v7951_v14, %s7075_s25  ;;  %v3646_v53 = vld.sshfl [vmem:[#allocation1] sm:$0xff pattern:$0x73625140]  ;;  %v1949_v14 = vsel %vm1920_vm3, %v7718_v12, %v7798_v35  ;;  %v8132_v35 = vld.sshfl [vmem:[#allocation1 + $0x28] sm:$0xff pattern:$0x73625140] }
 0x14d   : > { %9702 = vst [vmem:[#allocation10_spill] sm:$0xff] %v8083_v62  ;;  %v8089_v21 = vpop.permute.xlu1 %2767  ;;  %v8091_v54 = vpop.permute.xlu0 %2771 }
 0x14e   : > { %9703 = vst [vmem:[#allocation11_spill] sm:$0xff] %v8085_v36  ;;  %v8097_v49 = vpop.permute.xlu2 %2793  ;;  %v8122_v12 = vpop.f32.mrf.mxu2 }
 0x14f   : > { %6697 = vmatmul.msk.f32.vlgmr.msrb.gmra.mxu0 %vm334_vm2, %v7840_v43  ;;  %3654 = vst [vmem:[#allocation1] ss:$4 sm:$0xff] %v3603_v47  ;;  %v3650_v47 = vld.sshfl [vmem:[#allocation1 + $0x20] sm:$0xff pattern:$0x73625140] }
 0x150   : > { %6699 = vmatmul.msk.f32.vlgmr.msrb.gmra.mxu1 %vm334_vm2, %v7840_v43  ;;  %6701 = vmatmul.msk.f32.vlgmr.msrb.gmra.mxu2 %vm334_vm2, %v7840_v43 }
 0x151   : > { %6703 = vmatmul.msk.f32.vlgmr.msrb.gmra.mxu3 %vm334_vm2, %v7840_v43  ;;  %6712 = vmatpush.msk.msrb.mxu0 %vm338_vm1, %v1949_v14  ;;  %v8143_v14 = vld.sshfl [vmem:[#allocation1 + $0x30] sm:$0xff pattern:$0x73625140] }
 0x152   : > { %6714 = vmatpush.msk.msrb.mxu1 %vm338_vm1, %v1950_v19  ;;  %6716 = vmatpush.msk.msrb.mxu2 %vm338_vm1, %v1951_v48  ;;  %v8145_v19 = vld.sshfl [vmem:[#allocation1 + $0x38] sm:$0xff pattern:$0x73625140] }
 0x153   : > { %6718 = vmatpush.msk.msrb.mxu3 %vm338_vm1, %v1952_v17  ;;  %3692 = vrot.lane.b32.xlu1 %v7949_v32, %s7075_s25  ;;  %4516 = vst [vmem:[#allocation1 + $0x20] ss:$4 sm:$0xff] %v7647_v63  ;;  %v2824_v63 = vsel %vm2821_vm4, %v7846_v45, %v7994_v57  ;;  %v2823_v17 = vsel %vm2821_vm4, %v8034_v58, %v7846_v45 }
 0x154   : > { %3696 = vrot.lane.b32.xlu0 %v3640_v18, %s7075_s25  ;;  %v8135_v61 = vpop.f32.mrf.mxu0  ;;  %3690 = vrot.lane.b32.xlu2 %v7947_v4, %s7075_s25  ;;  %v2822_v18 = vsel %vm2821_vm4, %v8036_v41, %v8034_v58  ;;  %v2825_v41 = vsel %vm2821_vm4, %v7994_v57, %v7992_v13 }
 0x155   : > { %9705 = vst [vmem:[#allocation13_spill] sm:$0xff] %v8135_v61  ;;  %v8139_v24 = vpop.f32.mrf.mxu1  ;;  %v8141_v9 = vpop.permute.xlu1 %2779 }
 0x156   : > { %9706 = vst [vmem:[#allocation14_spill] sm:$0xff] %v8139_v24  ;;  %v8147_v32 = vpop.permute.xlu0 %2777  ;;  %v8149_v48 = vpop.permute.xlu2 %2789  ;;  %v8154_v4 = vld.sshfl [vmem:[#allocation1] sm:$0xff pattern:$0x73625140] }
 0x157   : > { %6705 = vmatmul.msk.f32.vlgmr.msra.gmra.mxu0 %vm334_vm2, %v7840_v43  ;;  %4514 = vst [vmem:[#allocation1] ss:$4 sm:$0xff] %v7650_v27  ;;  %v8178_v27 = vpop.f32.mrf.mxu3  ;;  %v2832_v46 = vsel %vm2821_vm4, %v8000_v51, %v8147_v32 }
 0x158   : > { %6707 = vmatmul.msk.f32.vlgmr.msra.gmra.mxu1 %vm334_vm2, %v7840_v43  ;;  %6709 = vmatmul.msk.f32.vlgmr.msra.gmra.mxu2 %vm334_vm2, %v7840_v43 }
 0x159   : > { %6711 = vmatmul.msk.f32.vlgmr.msra.gmra.mxu3 %vm334_vm2, %v7840_v43  ;;  %6721 = vmatpush.msk.msra.mxu0 %vm338_vm1, %v2822_v18 }
 0x15a   : > { %6723 = vmatpush.msk.msra.mxu1 %vm338_vm1, %v2823_v17  ;;  %6725 = vmatpush.msk.msra.mxu2 %vm338_vm1, %v2824_v63  ;;  %v8289_v5 = vld.sshfl [vmem:[#allocation1 + $0x38] sm:$0xff pattern:$0x73625140] }
 0x15b   : > { %6727 = vmatpush.msk.msra.mxu3 %vm338_vm1, %v2825_v41  ;;  %v8181_v42 = vpop.f32.mrf.mxu2  ;;  %3704 = vrot.lane.b32.xlu1 %v3646_v53, %s7075_s25  ;;  %v2826_v53 = vsel %vm2821_vm4, %v7992_v13, %v7953_v38  ;;  %v2829_v13 = vsel %vm2821_vm4, %v7907_v33, %v8091_v54 }
 0x15c   : > { %9707 = vst [vmem:[#allocation15_spill] sm:$0xff] %v8181_v42  ;;  %3702 = vrot.lane.b32.xlu0 %v8043_v23, %s7075_s25  ;;  %v8186_v45 = vpop.f32.mrf.mxu0  ;;  %3700 = vrot.lane.b32.xlu2 %v8051_v50, %s7075_s25  ;;  %v2827_v23 = vsel %vm2821_vm4, %v7953_v38, %v8089_v21  ;;  %v2828_v50 = vsel %vm2821_vm4, %v8089_v21, %v7907_v33  ;;  %v8233_v33 = vld [vmem:[%s9689_s1 + $0xc] sm:$0xf] }
 0x15d   : > { %9708 = vst [vmem:[#allocation16_spill] sm:$0xff] %v8186_v45  ;;  %v8190_v57 = vpop.f32.mrf.mxu1  ;;  %v8192_v58 = vpop.permute.xlu1 %2785 }
 0x15e   : > { %9709 = vst [vmem:[#allocation17_spill] sm:$0xff] %v8190_v57  ;;  %v2774_v18 = vpop.permute.xlu0 %2773  ;;  %v8194_v63 = vpop.permute.xlu2 %2799 }
 0x15f   : > { %6713 = vmatmul.msk.f32.vlgmr.msrb.gmra.mxu0 %vm334_vm2, %v7840_v43 }
 0x160   : > { %6715 = vmatmul.msk.f32.vlgmr.msrb.gmra.mxu1 %vm334_vm2, %v7840_v43  ;;  %6717 = vmatmul.msk.f32.vlgmr.msrb.gmra.mxu2 %vm334_vm2, %v7840_v43 }
 0x161   : > { %6719 = vmatmul.msk.f32.vlgmr.msrb.gmra.mxu3 %vm334_vm2, %v7840_v43  ;;  %6729 = vmatpush.msk.msrb.mxu0 %vm338_vm1, %v2826_v53  ;;  %v8238_v53 = vld.sshfl [vmem:[#allocation1 + $0x8] sm:$0xff pattern:$0x73625140] }
 0x162   : > { %6731 = vmatpush.msk.msrb.mxu1 %vm338_vm1, %v2827_v23  ;;  %6733 = vmatpush.msk.msrb.mxu2 %vm338_vm1, %v2828_v50 }
 0x163   : > { %6735 = vmatpush.msk.msrb.mxu3 %vm338_vm1, %v2829_v13  ;;  %v8220_v38 = vpop.f32.mrf.mxu2  ;;  %3710 = vrot.lane.b32.xlu1 %v8102_v15, %s7075_s25  ;;  %v8240_v15 = vld.sshfl [vmem:[#allocation1] sm:$0xff pattern:$0x73625140]  ;;  %v8246_v13 = vld.sshfl [vmem:[#allocation1 + $0x10] sm:$0xff pattern:$0x73625140] }
 0x164   : > { %9710 = vst [vmem:[#allocation18_spill] sm:$0xff] %v8220_v38  ;;  %v8224_v21 = vpop.f32.mrf.mxu3  ;;  %3698 = vrot.lane.b32.xlu0 %v8045_v8, %s7075_s25  ;;  %v8228_v43 = vpop.f32.mrf.mxu0  ;;  %3712 = vrot.lane.b32.xlu2 %v3650_v47, %s7075_s25  ;;  %v8244_v8 = vld.sshfl [vmem:[#allocation1 + $0x18] sm:$0xff pattern:$0x73625140]  ;;  %v2830_v47 = vsel %vm2821_vm4, %v8091_v54, %v2774_v18 }
 0x165   : > { %9711 = vst [vmem:[#allocation19_spill] sm:$0xff] %v8224_v21  ;;  %v8236_v17 = vpop.f32.mrf.mxu1  ;;  %v2782_v41 = vpop.permute.xlu1 %2781 }
 0x166   : > { %9712 = vst [vmem:[#allocation20_spill] sm:$0xff] %v8228_v43  ;;  %v2784_v23 = vpop.permute.xlu0 %2783  ;;  %v8242_v50 = vpop.permute.xlu2 %2811 }
 0x167   : > { %9713 = vst [vmem:[#allocation21_spill] sm:$0xff] %v8236_v17  ;;  %6722 = vmatmul.msk.f32.vlgmr.msra.gmra.mxu0 %vm334_vm2, %v8233_v33  ;;  %v2831_v17 = vsel %vm2821_vm4, %v2774_v18, %v8000_v51  ;;  %v8275_v51 = vld.sshfl [vmem:[#allocation1 + $0x28] sm:$0xff pattern:$0x73625140] }
 0x168   : > { %4525 = vst [vmem:[#allocation1] ss:$4 sm:$0xff] %v7716_v11  ;;  %6724 = vmatmul.msk.f32.vlgmr.msra.gmra.mxu1 %vm334_vm2, %v8233_v33  ;;  %6726 = vmatmul.msk.f32.vlgmr.msra.gmra.mxu2 %vm334_vm2, %v8233_v33  ;;  %v2833_v11 = vsel %vm2821_vm4, %v8147_v32, %v8141_v9 }
 0x169   : > { %6728 = vmatmul.msk.f32.vlgmr.msra.gmra.mxu3 %vm334_vm2, %v8233_v33  ;;  %6737 = vmatpush.msk.msra.mxu0 %vm338_vm1, %v2830_v47 }
 0x16a   : > { %6739 = vmatpush.msk.msra.mxu1 %vm338_vm1, %v2831_v17  ;;  %6741 = vmatpush.msk.msra.mxu2 %vm338_vm1, %v2832_v46  ;;  %v4521_v46 = vld.sshfl [vmem:[#allocation1 + $0x20] sm:$0xff pattern:$0x73625140] }
 0x16b   : > { %6743 = vmatpush.msk.msra.mxu3 %vm338_vm1, %v2833_v11  ;;  %v8271_v54 = vpop.f32.mrf.mxu2  ;;  %3706 = vrot.lane.b32.xlu1 %v8095_v44, %s7075_s25  ;;  %v8287_v11 = vld.sshfl [vmem:[#allocation1 + $0x30] sm:$0xff pattern:$0x73625140] }
 0x16c   : > { %v8277_v18 = vpop.f32.mrf.mxu3  ;;  %3708 = vrot.lane.b32.xlu0 %v8093_v37, %s7075_s25  ;;  %v8281_v47 = vpop.f32.mrf.mxu0  ;;  %3718 = vrot.lane.b32.xlu2 %v8145_v19, %s7075_s25  ;;  %4526 = vst [vmem:[#allocation1 + $0x20] ss:$4 sm:$0xff] %v7755_v6  ;;  %v2834_v37 = vsel %vm2821_vm4, %v8141_v9, %v2782_v41  ;;  %v2835_v19 = vsel %vm2821_vm4, %v2782_v41, %v2784_v23 }
 0x16d   : > { %9714 = vst [vmem:[#allocation22_spill] sm:$0xff] %v8281_v47  ;;  %v8285_v32 = vpop.f32.mrf.mxu1  ;;  %v2792_v17 = vpop.permute.xlu1 %2791  ;;  %v2837_v6 = vsel %vm2821_vm4, %v8192_v58, %v8041_v39 }
 0x16e   : > { %9715 = vst [vmem:[#allocation23_spill] sm:$0xff] %v8285_v32  ;;  %v2796_v44 = vpop.permute.xlu0 %2795  ;;  %v8291_v43 = vpop.permute.xlu2 %2817  ;;  %v2836_v32 = vsel %vm2821_vm4, %v2784_v23, %v8192_v58 }
 0x16f   : > { %6730 = vmatmul.msk.f32.vlgmr.msrb.gmra.mxu0 %vm334_vm2, %v8233_v33  ;;  %v8367_v47 = vld.sshfl [vmem:[#allocation1 + $0x18] sm:$0xff pattern:$0x73625140] }
 0x170   : > { %6732 = vmatmul.msk.f32.vlgmr.msrb.gmra.mxu1 %vm334_vm2, %v8233_v33  ;;  %6734 = vmatmul.msk.f32.vlgmr.msrb.gmra.mxu2 %vm334_vm2, %v8233_v33 }
 0x171   : > { %6736 = vmatmul.msk.f32.vlgmr.msrb.gmra.mxu3 %vm334_vm2, %v8233_v33  ;;  %6745 = vmatpush.msk.msrb.mxu0 %vm338_vm1, %v2834_v37 }
 0x172   : > { %6747 = vmatpush.msk.msrb.mxu1 %vm338_vm1, %v2835_v19  ;;  %6749 = vmatpush.msk.msrb.mxu2 %vm338_vm1, %v2836_v32 }
 0x173   : > { %6751 = vmatpush.msk.msrb.mxu3 %vm338_vm1, %v2837_v6  ;;  %v8314_v9 = vpop.f32.mrf.mxu2  ;;  %3716 = vrot.lane.b32.xlu1 %v8143_v14, %s7075_s25  ;;  %v2838_v14 = vsel %vm2821_vm4, %v8041_v39, %v8149_v48  ;;  %v2841_v39 = vsel %vm2821_vm4, %v8097_v49, %v2796_v44 }
 0x174   : > { %v8318_v41 = vpop.f32.mrf.mxu3  ;;  %3720 = vrot.lane.b32.xlu0 %v8154_v4, %s7075_s25  ;;  %v8322_v23 = vpop.f32.mrf.mxu0  ;;  %3714 = vrot.lane.b32.xlu2 %v8132_v35, %s7075_s25  ;;  %v2839_v35 = vsel %vm2821_vm4, %v8149_v48, %v2792_v17  ;;  %v2840_v4 = vsel %vm2821_vm4, %v2792_v17, %v8097_v49 }
 0x175   : > { %9716 = vst [vmem:[#allocation24_spill] sm:$0xff] %v8322_v23  ;;  %v8326_v58 = vpop.f32.mrf.mxu1  ;;  %v2804_v32 = vpop.permute.xlu1 %2803 }
 0x176   : > { %9717 = vst [vmem:[#allocation25_spill] sm:$0xff] %v8326_v58  ;;  %v2802_v37 = vpop.permute.xlu0 %2801  ;;  %v8328_v19 = vpop.permute.xlu2 %2813 }
 0x177   : > { %6738 = vmatmul.msk.f32.vlgmr.msra.gmra.mxu0 %vm334_vm2, %v8233_v33 }
 0x178   : > { %6740 = vmatmul.msk.f32.vlgmr.msra.gmra.mxu1 %vm334_vm2, %v8233_v33  ;;  %6742 = vmatmul.msk.f32.vlgmr.msra.gmra.mxu2 %vm334_vm2, %v8233_v33 }
 0x179   : > { %6744 = vmatmul.msk.f32.vlgmr.msra.gmra.mxu3 %vm334_vm2, %v8233_v33  ;;  %6753 = vmatpush.msk.msra.mxu0 %vm338_vm1, %v2838_v14 }
 0x17a   : > { %6755 = vmatpush.msk.msra.mxu1 %vm338_vm1, %v2839_v35  ;;  %6757 = vmatpush.msk.msra.mxu2 %vm338_vm1, %v2840_v4 }
 0x17b   : > { %6759 = vmatpush.msk.msra.mxu3 %vm338_vm1, %v2841_v39  ;;  %v1368_v6 = vpop.f32.mrf.mxu2  ;;  %4565 = vrot.lane.b32.xlu1 %v4521_v46, %s7076_s30  ;;  %v4527_v46 = vld.sshfl [vmem:[#allocation1] sm:$0xff pattern:$0x73625140] }
 0x17c   : > { %v8353_v48 = vadd.f32 %v1368_v6, %v7938_v60  ;;  %v8355_v17 = vpop.f32.mrf.mxu3  ;;  %4563 = vrot.lane.b32.xlu0 %v8244_v8, %s7076_s30  ;;  %v8359_v14 = vpop.f32.mrf.mxu0  ;;  %4561 = vrot.lane.b32.xlu2 %v8246_v13, %s7076_s30  ;;  %v8374_v8 = vld.sshfl [vmem:[#allocation1 + $0x8] sm:$0xff pattern:$0x73625140]  ;;  %v8376_v13 = vld.sshfl [vmem:[#allocation1 + $0x10] sm:$0xff pattern:$0x73625140] }
 0x17d   : > { %9718 = vst [vmem:[#allocation26_spill] sm:$0xff] %v8359_v14  ;;  %v8363_v49 = vpop.f32.mrf.mxu1  ;;  %v2810_v35 = vpop.permute.xlu1 %2809 }
 0x17e   : > { %9719 = vst [vmem:[#allocation27_spill] sm:$0xff] %v8363_v49  ;;  %v2798_v4 = vpop.permute.xlu0 %2797  ;;  %v8365_v39 = vpop.permute.xlu2 %3660 }
 0x17f   : > { %v2842_v60 = vsel %vm2821_vm4, %v2796_v44, %v2798_v4  ;;  %v2843_v6 = vsel %vm2821_vm4, %v2798_v4, %v8194_v63  ;;  %6746 = vmatmul.msk.f32.vlgmr.msrb.gmra.mxu0 %vm334_vm2, %v8233_v33  ;;  %4535 = vst [vmem:[#allocation1] ss:$4 sm:$0xff] %v7857_v56  ;;  %v2844_v44 = vsel %vm2821_vm4, %v8194_v63, %v2802_v37 }
 0x180   : > { %6748 = vmatmul.msk.f32.vlgmr.msrb.gmra.mxu1 %vm334_vm2, %v8233_v33  ;;  %6750 = vmatmul.msk.f32.vlgmr.msrb.gmra.mxu2 %vm334_vm2, %v8233_v33  ;;  %v2845_v4 = vsel %vm2821_vm4, %v2802_v37, %v2804_v32  ;;  %v4531_v37 = vld.sshfl [vmem:[#allocation1 + $0x20] sm:$0xff pattern:$0x73625140] }
 0x181   : > { %6752 = vmatmul.msk.f32.vlgmr.msrb.gmra.mxu3 %vm334_vm2, %v8233_v33  ;;  %6761 = vmatpush.msk.msrb.mxu0 %vm338_vm1, %v2842_v60 }
 0x182   : > { %6763 = vmatpush.msk.msrb.mxu1 %vm338_vm1, %v2843_v6  ;;  %6765 = vmatpush.msk.msrb.mxu2 %vm338_vm1, %v2844_v44  ;;  %v8405_v6 = vld.sshfl [vmem:[#allocation1 + $0x38] sm:$0xff pattern:$0x73625140] }
 0x183   : > { %6767 = vmatpush.msk.msrb.mxu3 %vm338_vm1, %v2845_v4  ;;  %v1448_v28 = vpop.f32.mrf.mxu2  ;;  %4557 = vrot.lane.b32.xlu1 %v8240_v15, %s7076_s30  ;;  %v8409_v15 = vld.sshfl [vmem:[#allocation1 + $0x28] sm:$0xff pattern:$0x73625140] }
 0x184   : > { %v8395_v56 = vadd.f32 %v1448_v28, %v7998_v25  ;;  %v8397_v63 = vpop.f32.mrf.mxu3  ;;  %4559 = vrot.lane.b32.xlu0 %v8238_v53, %s7076_s30  ;;  %v8401_v60 = vpop.f32.mrf.mxu0  ;;  %4571 = vrot.lane.b32.xlu2 %v8289_v5, %s7076_s30  ;;  %v8411_v28 = vld.sshfl [vmem:[#allocation1 + $0x30] sm:$0xff pattern:$0x73625140] }
 0x185   : > { %v8407_v44 = vpop.f32.mrf.mxu1  ;;  %v2806_v4 = vpop.permute.xlu1 %2805  ;;  %4536 = vst [vmem:[#allocation1 + $0x20] ss:$4 sm:$0xff] %v7903_v10  ;;  %v2849_v10 = vsel %vm2821_vm4, %v2810_v35, %v8242_v50 }
 0x186   : > { %v2808_v25 = vpop.permute.xlu0 %2807  ;;  %v2846_v14 = vsel %vm2821_vm4, %v2804_v32, %v2806_v4  ;;  %v8414_v22 = vpop.permute.xlu2 %3670 }
 0x187   : > { %v2848_v53 = vsel %vm2821_vm4, %v2808_v25, %v2810_v35  ;;  %v2847_v5 = vsel %vm2821_vm4, %v2806_v4, %v2808_v25  ;;  %6754 = vmatmul.msk.f32.vlgmr.msra.gmra.mxu0 %vm334_vm2, %v8233_v33  ;;  %v8445_v35 = vld.sshfl [vmem:[#allocation1 + $0x8] sm:$0xff pattern:$0x73625140] }
 0x188   : > { %6756 = vmatmul.msk.f32.vlgmr.msra.gmra.mxu1 %vm334_vm2, %v8233_v33  ;;  %6758 = vmatmul.msk.f32.vlgmr.msra.gmra.mxu2 %vm334_vm2, %v8233_v33 }
 0x189   : > { %6760 = vmatmul.msk.f32.vlgmr.msra.gmra.mxu3 %vm334_vm2, %v8233_v33  ;;  %6769 = vmatpush.msk.msra.mxu0 %vm338_vm1, %v2846_v14 }
 0x18a   : > { %6771 = vmatpush.msk.msra.mxu1 %vm338_vm1, %v2847_v5  ;;  %6773 = vmatpush.msk.msra.mxu2 %vm338_vm1, %v2848_v53 }
 0x18b   : > { %6775 = vmatpush.msk.msra.mxu3 %vm338_vm1, %v2849_v10  ;;  %v1528_v32 = vpop.f32.mrf.mxu2  ;;  %4569 = vrot.lane.b32.xlu1 %v8287_v11, %s7076_s30  ;;  %v8449_v10 = vld.sshfl [vmem:[#allocation1 + $0x10] sm:$0xff pattern:$0x73625140] }
 0x18c   : > { %v8436_v4 = vadd.f32 %v1528_v32, %v8049_v31  ;;  %v8438_v25 = vpop.f32.mrf.mxu3  ;;  %4573 = vrot.lane.b32.xlu0 %v4527_v46, %s7076_s30  ;;  %v8441_v14 = vpop.f32.mrf.mxu0  ;;  %4567 = vrot.lane.b32.xlu2 %v8275_v51, %s7076_s30  ;;  %v4537_v31 = vld.sshfl [vmem:[#allocation1] sm:$0xff pattern:$0x73625140]  ;;  %v8453_v32 = vld.sshfl [vmem:[#allocation1 + $0x18] sm:$0xff pattern:$0x73625140]  ;;  %v2850_v51 = vsel %vm2821_vm4, %v8242_v50, %v8328_v19 }
 0x18d   : > { %9720 = vst [vmem:[#allocation28_spill] sm:$0xff] %v8441_v14  ;;  %v8447_v53 = vpop.f32.mrf.mxu1  ;;  %v2816_v5 = vpop.permute.xlu1 %2815  ;;  %v4541_v29 = vld.sshfl [vmem:[#allocation1 + $0x20] sm:$0xff pattern:$0x73625140] }
 0x18e   : > { %9721 = vst [vmem:[#allocation29_spill] sm:$0xff] %v8447_v53  ;;  %v2820_v11 = vpop.permute.xlu0 %2819  ;;  %v8451_v49 = vpop.permute.xlu2 %3666  ;;  %v2852_v46 = vsel %vm2821_vm4, %v2816_v5, %v8291_v43  ;;  %v2851_v23 = vsel %vm2821_vm4, %v8328_v19, %v2816_v5  ;;  %v8522_v58 = vld.sshfl [vmem:[#allocation1 + $0x38] sm:$0xff pattern:$0x73625140]  ;;  %v5402_v53 = vld [vmem:[%s7113_s17 + $0x28] sm:$0xff] }
 0x18f   : > { %v2853_v2 = vsel %vm2821_vm4, %v8291_v43, %v2820_v11  ;;  %6762 = vmatmul.msk.f32.vlgmr.msrb.gmra.mxu0 %vm334_vm2, %v8233_v33  ;;  %4545 = vst [vmem:[#allocation1] ss:$4 sm:$0xff] %v7956_v40 }
 0x190   : > { %6764 = vmatmul.msk.f32.vlgmr.msrb.gmra.mxu1 %vm334_vm2, %v8233_v33  ;;  %6766 = vmatmul.msk.f32.vlgmr.msrb.gmra.mxu2 %vm334_vm2, %v8233_v33 }
 0x191   : > { %6768 = vmatmul.msk.f32.vlgmr.msrb.gmra.mxu3 %vm334_vm2, %v8233_v33  ;;  %6777 = vmatpush.msk.msrb.mxu0 %vm338_vm1, %v2850_v51 }
 0x192   : > { %6781 = vmatpush.msk.msrb.mxu2 %vm338_vm1, %v2852_v46  ;;  %6783 = vmatpush.msk.msrb.mxu3 %vm338_vm1, %v2853_v2 }
 0x193   : > { %6779 = vmatpush.msk.msrb.mxu1 %vm338_vm1, %v2851_v23  ;;  %v1608_v40 = vpop.f32.mrf.mxu2  ;;  %4581 = vrot.lane.b32.xlu1 %v4531_v37, %s7076_s30 }
 0x194   : > { %v8479_v43 = vadd.f32 %v1608_v40, %v8122_v12  ;;  %v8481_v50 = vpop.f32.mrf.mxu3  ;;  %4579 = vrot.lane.b32.xlu0 %v8367_v47, %s7076_s30  ;;  %v8485_v19 = vpop.f32.mrf.mxu0  ;;  %4577 = vrot.lane.b32.xlu2 %v8376_v13, %s7076_s30 }
 0x195   : > { %9723 = vst [vmem:[#allocation31_spill] sm:$0xff] %v8481_v50  ;;  %v8489_v2 = vpop.f32.mrf.mxu1  ;;  %v3665_v23 = vpop.permute.xlu1 %3664 }
 0x196   : > { %9722 = vst [vmem:[#allocation30_spill] sm:$0xff] %v8479_v43  ;;  %v3663_v5 = vpop.permute.xlu0 %3662  ;;  %v8491_v11 = vpop.permute.xlu2 %3676 }
 0x197   : > { %9724 = vst [vmem:[#allocation32_spill] sm:$0xff] %v8485_v19  ;;  %v3725_v12 = vsel %vm3722_vm5, %v8365_v39, %v3663_v5  ;;  %v3726_v37 = vsel %vm3722_vm5, %v3663_v5, %v3665_v23  ;;  %6770 = vmatmul.msk.f32.vlgmr.msra.gmra.mxu0 %vm334_vm2, %v8233_v33  ;;  %v5400_v19 = vld [vmem:[%s7113_s17 + $0x18] sm:$0xff] }
 0x198   : > { %9725 = vst [vmem:[#allocation33_spill] sm:$0xff] %v8489_v2  ;;  %6772 = vmatmul.msk.f32.vlgmr.msra.gmra.mxu1 %vm334_vm2, %v8233_v33  ;;  %6774 = vmatmul.msk.f32.vlgmr.msra.gmra.mxu2 %vm334_vm2, %v8233_v33 }
 0x199   : > { %6776 = vmatmul.msk.f32.vlgmr.msra.gmra.mxu3 %vm334_vm2, %v8233_v33  ;;  %6790 = vmatpush.msk.msra.mxu2 %vm338_vm1, %v3725_v12 }
 0x19a   : > { %6792 = vmatpush.msk.msra.mxu3 %vm338_vm1, %v3726_v37 }
 0x19b   : > { %v8506_v47 = vpop.f32.mrf.mxu2  ;;  %4587 = vrot.lane.b32.xlu1 %v8405_v6, %s7076_s30 }
 0x19c   : > { %9726 = vst [vmem:[#allocation34_spill] sm:$0xff] %v8506_v47  ;;  %v1708_v13 = vpop.f32.mrf.mxu3  ;;  %4575 = vrot.lane.b32.xlu0 %v8374_v8, %s7076_s30  ;;  %v8512_v46 = vpop.f32.mrf.mxu0  ;;  %4589 = vrot.lane.b32.xlu2 %v4537_v31, %s7076_s30  ;;  %v8529_v31 = vld.sshfl [vmem:[#allocation1 + $0x28] sm:$0xff pattern:$0x73625140] }
 0x19d   : > { %9727 = vst [vmem:[#allocation35_spill] sm:$0xff] %v8512_v46  ;;  %v8516_v51 = vadd.f32 %v1708_v13, %v8178_v27  ;;  %v8518_v40 = vpop.f32.mrf.mxu1  ;;  %v3657_v5 = vpop.permute.xlu1 %3656  ;;  %v8531_v27 = vld.sshfl [vmem:[#allocation1 + $0x30] sm:$0xff pattern:$0x73625140]  ;;  %v3727_v13 = vsel %vm3722_vm5, %v3665_v23, %v8451_v49  ;;  %v5398_v46 = vld [vmem:[%s7113_s17 + $0x8] sm:$0xff] }
 0x19e   : > { %9729 = vst [vmem:[#allocation37_spill] sm:$0xff] %v8518_v40  ;;  %v3659_v12 = vpop.permute.xlu0 %3658  ;;  %v8520_v37 = vpop.permute.xlu2 %3688 }
 0x19f   : > { %9728 = vst [vmem:[#allocation36_spill] sm:$0xff] %v8516_v51  ;;  %v3724_v6 = vsel %vm3722_vm5, %v3659_v12, %v8365_v39  ;;  %v3723_v8 = vsel %vm3722_vm5, %v3657_v5, %v3659_v12  ;;  %6778 = vmatmul.msk.f32.vlgmr.msrb.gmra.mxu0 %vm334_vm2, %v8233_v33  ;;  %v8558_v5 = vld [vmem:[%s9689_s1 + $0x10] sm:$0xf] }
 0x1a0   : > { %6788 = vmatpush.msk.msra.mxu1 %vm338_vm1, %v3724_v6  ;;  %6786 = vmatpush.msk.msra.mxu0 %vm338_vm1, %v3723_v8  ;;  %4546 = vst [vmem:[#allocation1 + $0x20] ss:$4 sm:$0xff] %v8054_v7  ;;  %v8564_v6 = vld.sshfl [vmem:[#allocation1 + $0x10] sm:$0xff pattern:$0x73625140] }
 0x1a1   : > { %6780 = vmatmul.msk.f32.vlgmr.msrb.gmra.mxu1 %vm334_vm2, %v8233_v33  ;;  %6782 = vmatmul.msk.f32.vlgmr.msrb.gmra.mxu2 %vm334_vm2, %v8233_v33 }
 0x1a2   : > { %6784 = vmatmul.msk.f32.vlgmr.msrb.gmra.mxu3 %vm334_vm2, %v8233_v33  ;;  %6794 = vmatpush.msk.msrb.mxu0 %vm338_vm1, %v3727_v13 }
 0x1a3   : > { %v8545_v39 = vpop.f32.mrf.mxu2  ;;  %4583 = vrot.lane.b32.xlu1 %v8409_v15, %s7076_s30  ;;  %v8566_v15 = vld.sshfl [vmem:[#allocation1 + $0x8] sm:$0xff pattern:$0x73625140] }
 0x1a4   : > { %9730 = vst [vmem:[#allocation38_spill] sm:$0xff] %v8545_v39  ;;  %v8549_v7 = vpop.f32.mrf.mxu3  ;;  %4585 = vrot.lane.b32.xlu0 %v8411_v28, %s7076_s30  ;;  %v8553_v23 = vpop.f32.mrf.mxu0  ;;  %4595 = vrot.lane.b32.xlu2 %v8453_v32, %s7076_s30 }
 0x1a5   : > { %9731 = vst [vmem:[#allocation39_spill] sm:$0xff] %v8549_v7  ;;  %v8562_v33 = vpop.f32.mrf.mxu1  ;;  %v3669_v12 = vpop.permute.xlu1 %3668  ;;  %v4550_v7 = vld.sshfl [vmem:[#allocation1 + $0x18] sm:$0xff pattern:$0x73625140] }
 0x1a6   : > { %9732 = vst [vmem:[#allocation40_spill] sm:$0xff] %v8553_v23  ;;  %v3728_v28 = vsel %vm3722_vm5, %v8451_v49, %v3669_v12  ;;  %v3729_v8 = vsel %vm3722_vm5, %v3669_v12, %v8414_v22  ;;  %v3673_v13 = vpop.permute.xlu0 %3672  ;;  %v8572_v23 = vpop.permute.xlu2 %3694 }
 0x1a7   : > { %9733 = vst [vmem:[#allocation41_spill] sm:$0xff] %v8562_v33  ;;  %v3730_v32 = vsel %vm3722_vm5, %v8414_v22, %v3673_v13  ;;  %6798 = vmatpush.msk.msrb.mxu2 %vm338_vm1, %v3729_v8  ;;  %6787 = vmatmul.msk.f32.vlgmr.msra.gmra.mxu0 %vm334_vm2, %v8558_v5  ;;  %v4547_v33 = vld.sshfl [vmem:[#allocation1] sm:$0xff pattern:$0x73625140] }
 0x1a8   : > { %6800 = vmatpush.msk.msrb.mxu3 %vm338_vm1, %v3730_v32  ;;  %6796 = vmatpush.msk.msrb.mxu1 %vm338_vm1, %v3728_v28  ;;  %4555 = vst [vmem:[#allocation1] ss:$4 sm:$0xff] %v4504_v16  ;;  %v8599_v12 = vld.sshfl [vmem:[#allocation1 + $0x28] sm:$0xff pattern:$0x73625140] }
 0x1a9   : > { %6789 = vmatmul.msk.f32.vlgmr.msra.gmra.mxu1 %vm334_vm2, %v8558_v5  ;;  %6791 = vmatmul.msk.f32.vlgmr.msra.gmra.mxu2 %vm334_vm2, %v8558_v5  ;;  %v8603_v32 = vld.sshfl [vmem:[#allocation1 + $0x30] sm:$0xff pattern:$0x73625140]  ;;  %v8605_v21 = vld.sshfl [vmem:[#allocation1 + $0x38] sm:$0xff pattern:$0x73625140] }
 0x1aa   : > { %6793 = vmatmul.msk.f32.vlgmr.msra.gmra.mxu3 %vm334_vm2, %v8558_v5  ;;  %v4551_v38 = vld.sshfl [vmem:[#allocation1 + $0x20] sm:$0xff pattern:$0x73625140] }
 0x1ab   : > { %v8588_v22 = vpop.f32.mrf.mxu2  ;;  %4593 = vrot.lane.b32.xlu1 %v8449_v10, %s7076_s30  ;;  %5417 = vst [vmem:[#allocation1 + $0x20] ss:$4 sm:$0xff] %v5398_v46 }
 0x1ac   : > { %v8592_v49 = vpop.f32.mrf.mxu3  ;;  %4597 = vrot.lane.b32.xlu0 %v4541_v29, %s7076_s30  ;;  %v8595_v16 = vpop.f32.mrf.mxu0  ;;  %4591 = vrot.lane.b32.xlu2 %v8445_v35, %s7076_s30  ;;  %v5397_v29 = vld [vmem:[%s7113_s17] sm:$0xff] }
 0x1ad   : > { %9734 = vst [vmem:[#allocation42_spill] sm:$0xff] %v8595_v16  ;;  %v8601_v28 = vpop.f32.mrf.mxu1  ;;  %v3681_v8 = vpop.permute.xlu1 %3680 }
 0x1ae   : > { %9735 = vst [vmem:[#allocation43_spill] sm:$0xff] %v8601_v28  ;;  %v3679_v39 = vpop.permute.xlu0 %3678  ;;  %v8607_v10 = vpop.permute.xlu2 %3690 }
 0x1af   : > { %v3733_v16 = vsel %vm3722_vm5, %v8491_v11, %v3679_v39  ;;  %v3734_v35 = vsel %vm3722_vm5, %v3679_v39, %v3681_v8  ;;  %6795 = vmatmul.msk.f32.vlgmr.msrb.gmra.mxu0 %vm334_vm2, %v8558_v5  ;;  %v8616_v28 = vld.sshfl [vmem:[#allocation1] sm:$0xff pattern:$0x73625140] }
 0x1b0   : > { %6806 = vmatpush.msk.msra.mxu2 %vm338_vm1, %v3733_v16  ;;  %6808 = vmatpush.msk.msra.mxu3 %vm338_vm1, %v3734_v35  ;;  %5415 = vst [vmem:[#allocation1] ss:$4 sm:$0xff] %v5397_v29 }
 0x1b1   : > { %6797 = vmatmul.msk.f32.vlgmr.msrb.gmra.mxu1 %vm334_vm2, %v8558_v5  ;;  %6799 = vmatmul.msk.f32.vlgmr.msrb.gmra.mxu2 %vm334_vm2, %v8558_v5 }
 0x1b2   : > { %6801 = vmatmul.msk.f32.vlgmr.msrb.gmra.mxu3 %vm334_vm2, %v8558_v5  ;;  %v5422_v51 = vld.sshfl [vmem:[#allocation1 + $0x20] sm:$0xff pattern:$0x73625140] }
 0x1b3   : > { %v8626_v39 = vpop.f32.mrf.mxu2  ;;  %4605 = vrot.lane.b32.xlu1 %v4547_v33, %s7076_s30 }
 0x1b4   : > { %v8629_v45 = vpop.f32.mrf.mxu3  ;;  %4603 = vrot.lane.b32.xlu0 %v8522_v58, %s7076_s30  ;;  %v8633_v46 = vpop.f32.mrf.mxu0  ;;  %4601 = vrot.lane.b32.xlu2 %v8531_v27, %s7076_s30 }
 0x1b5   : > { %9736 = vst [vmem:[#allocation44_spill] sm:$0xff] %v8633_v46  ;;  %v8637_v16 = vpop.f32.mrf.mxu1  ;;  %v3687_v29 = vpop.permute.xlu1 %3686 }
 0x1b6   : > { %9737 = vst [vmem:[#allocation45_spill] sm:$0xff] %v8637_v16  ;;  %v3738_v35 = vsel %vm3722_vm5, %v3687_v29, %v8520_v37  ;;  %v3675_v40 = vpop.permute.xlu0 %3674  ;;  %v8641_v57 = vpop.permute.xlu2 %3700 }
 0x1b7   : > { %v3731_v33 = vsel %vm3722_vm5, %v3673_v13, %v3675_v40  ;;  %v3732_v47 = vsel %vm3722_vm5, %v3675_v40, %v8491_v11  ;;  %6816 = vmatpush.msk.msrb.mxu3 %vm338_vm1, %v3738_v35  ;;  %v8667_v40 = vld.sshfl [vmem:[#allocation1 + $0x18] sm:$0xff pattern:$0x73625140]  ;;  %v8671_v35 = vld.sshfl [vmem:[#allocation1 + $0x8] sm:$0xff pattern:$0x73625140] }
 0x1b8   : > { %6804 = vmatpush.msk.msra.mxu1 %vm338_vm1, %v3732_v47  ;;  %6802 = vmatpush.msk.msra.mxu0 %vm338_vm1, %v3731_v33  ;;  %v8673_v33 = vld.sshfl [vmem:[#allocation1] sm:$0xff pattern:$0x73625140]  ;;  %v5420_v42 = vld.sshfl [vmem:[#allocation1 + $0x10] sm:$0xff pattern:$0x73625140] }
 0x1b9   : > { %6803 = vmatmul.msk.f32.vlgmr.msra.gmra.mxu0 %vm334_vm2, %v8558_v5  ;;  %6805 = vmatmul.msk.f32.vlgmr.msra.gmra.mxu1 %vm334_vm2, %v8558_v5 }
 0x1ba   : > { %6807 = vmatmul.msk.f32.vlgmr.msra.gmra.mxu2 %vm334_vm2, %v8558_v5  ;;  %6809 = vmatmul.msk.f32.vlgmr.msra.gmra.mxu3 %vm334_vm2, %v8558_v5 }
 0x1bb   : > { %v8657_v58 = vpop.f32.mrf.mxu2  ;;  %4611 = vrot.lane.b32.xlu1 %v4550_v7, %s7076_s30 }
 0x1bc   : > { %v8660_v11 = vpop.f32.mrf.mxu3  ;;  %4599 = vrot.lane.b32.xlu0 %v8529_v31, %s7076_s30  ;;  %v8664_v47 = vpop.f32.mrf.mxu0  ;;  %4613 = vrot.lane.b32.xlu2 %v4551_v38, %s7076_s30  ;;  %v5399_v31 = vld [vmem:[%s7113_s17 + $0x10] sm:$0xff] }
 0x1bd   : > { %9738 = vst [vmem:[#allocation46_spill] sm:$0xff] %v8664_v47  ;;  %v8669_v27 = vpop.f32.mrf.mxu1  ;;  %v3683_v13 = vpop.permute.xlu1 %3682 }
 0x1be   : > { %9739 = vst [vmem:[#allocation47_spill] sm:$0xff] %v8669_v27  ;;  %v3735_v7 = vsel %vm3722_vm5, %v3681_v8, %v3683_v13  ;;  %v3685_v46 = vpop.permute.xlu0 %3684  ;;  %v8676_v16 = vpop.permute.xlu2 %3712  ;;  %v3739_v8 = vsel %vm3722_vm5, %v8520_v37, %v8607_v10 }
 0x1bf   : > { %v3736_v47 = vsel %vm3722_vm5, %v3683_v13, %v3685_v46  ;;  %v3737_v38 = vsel %vm3722_vm5, %v3685_v46, %v3687_v29  ;;  %6810 = vmatpush.msk.msrb.mxu0 %vm338_vm1, %v3735_v7  ;;  %5426 = vst [vmem:[#allocation1] ss:$4 sm:$0xff] %v5399_v31  ;;  %v8712_v31 = vld.sshfl [vmem:[#allocation1 + $0x30] sm:$0xff pattern:$0x73625140] }
 0x1c0   : > { %6812 = vmatpush.msk.msrb.mxu1 %vm338_vm1, %v3736_v47  ;;  %6814 = vmatpush.msk.msrb.mxu2 %vm338_vm1, %v3737_v38  ;;  %v8706_v47 = vld.sshfl [vmem:[#allocation1 + $0x28] sm:$0xff pattern:$0x73625140]  ;;  %v5425_v38 = vld.sshfl [vmem:[#allocation1 + $0x38] sm:$0xff pattern:$0x73625140] }
 0x1c1   : > { %6811 = vmatmul.msk.f32.vlgmr.msrb.gmra.mxu0 %vm334_vm2, %v8558_v5  ;;  %6813 = vmatmul.msk.f32.vlgmr.msrb.gmra.mxu1 %vm334_vm2, %v8558_v5  ;;  %5427 = vst [vmem:[#allocation1 + $0x20] ss:$4 sm:$0xff] %v5400_v19 }
 0x1c2   : > { %6815 = vmatmul.msk.f32.vlgmr.msrb.gmra.mxu2 %vm334_vm2, %v8558_v5  ;;  %6817 = vmatmul.msk.f32.vlgmr.msrb.gmra.mxu3 %vm334_vm2, %v8558_v5 }
 0x1c3   : > { %6818 = vmatpush.msk.msra.mxu0 %vm338_vm1, %v3739_v8  ;;  %v8696_v46 = vpop.f32.mrf.mxu2  ;;  %4607 = vrot.lane.b32.xlu1 %v8566_v15, %s7076_s30 }
 0x1c4   : > { %v8700_v29 = vpop.f32.mrf.mxu3  ;;  %4609 = vrot.lane.b32.xlu0 %v8564_v6, %s7076_s30  ;;  %v8704_v37 = vpop.f32.mrf.mxu0  ;;  %4619 = vrot.lane.b32.xlu2 %v8605_v21, %s7076_s30 }
 0x1c5   : > { %v8710_v13 = vpop.f32.mrf.mxu1  ;;  %v3693_v7 = vpop.permute.xlu1 %3692 }
 0x1c6   : > { %v3697_v8 = vpop.permute.xlu0 %3696  ;;  %v3740_v15 = vsel %vm3722_vm5, %v8607_v10, %v3693_v7  ;;  %v3741_v6 = vsel %vm3722_vm5, %v3693_v7, %v8572_v23  ;;  %v8718_v27 = vpop.permute.xlu2 %3718 }
 0x1c7   : > { %v3742_v21 = vsel %vm3722_vm5, %v8572_v23, %v3697_v8  ;;  %6820 = vmatpush.msk.msra.mxu1 %vm338_vm1, %v3740_v15  ;;  %6822 = vmatpush.msk.msra.mxu2 %vm338_vm1, %v3741_v6 }
 0x1c8   : > { %6824 = vmatpush.msk.msra.mxu3 %vm338_vm1, %v3742_v21 }
 0x1c9   : > { %6819 = vmatmul.msk.f32.vlgmr.msra.gmra.mxu0 %vm334_vm2, %v8558_v5  ;;  %6821 = vmatmul.msk.f32.vlgmr.msra.gmra.mxu1 %vm334_vm2, %v8558_v5 }
 0x1ca   : > { %6823 = vmatmul.msk.f32.vlgmr.msra.gmra.mxu2 %vm334_vm2, %v8558_v5  ;;  %6825 = vmatmul.msk.f32.vlgmr.msra.gmra.mxu3 %vm334_vm2, %v8558_v5 }
 0x1cb   : > { %v8734_v23 = vpop.f32.mrf.mxu2  ;;  %4617 = vrot.lane.b32.xlu1 %v8603_v32, %s7076_s30 }
 0x1cc   : > { %v8738_v19 = vpop.f32.mrf.mxu3  ;;  %4621 = vrot.lane.b32.xlu0 %v8616_v28, %s7076_s30  ;;  %v8742_v10 = vpop.f32.mrf.mxu0  ;;  %4615 = vrot.lane.b32.xlu2 %v8599_v12, %s7076_s30 }
 0x1cd   : > { %9740 = vst [vmem:[#allocation48_spill] sm:$0xff] %v8738_v19  ;;  %v8746_v7 = vpop.f32.mrf.mxu1  ;;  %v3705_v15 = vpop.permute.xlu1 %3704 }
 0x1ce   : > { %9741 = vst [vmem:[#allocation49_spill] sm:$0xff] %v8742_v10  ;;  %v3703_v6 = vpop.permute.xlu0 %3702  ;;  %v8748_v21 = vpop.permute.xlu2 %3714 }
 0x1cf   : > { %9742 = vst [vmem:[#allocation50_spill] sm:$0xff] %v8746_v7  ;;  %v3745_v61 = vsel %vm3722_vm5, %v8641_v57, %v3703_v6  ;;  %v3746_v32 = vsel %vm3722_vm5, %v3703_v6, %v3705_v15 }
 0x1d0   : > { %6830 = vmatpush.msk.msrb.mxu2 %vm338_vm1, %v3745_v61  ;;  %6832 = vmatpush.msk.msrb.mxu3 %vm338_vm1, %v3746_v32 }
 0x1d2   : > { %6831 = vmatmul.msk.f32.vlgmr.msrb.gmra.mxu2 %vm334_vm2, %v8558_v5  ;;  %6833 = vmatmul.msk.f32.vlgmr.msrb.gmra.mxu3 %vm334_vm2, %v8558_v5 }
 0x1d3   : > { %v8759_v12 = vpop.f32.mrf.mxu2  ;;  %5466 = vrot.lane.b32.xlu1 %v5422_v51, %s7077_s6 }
 0x1d4   : > { %9743 = vst [vmem:[#allocation51_spill] sm:$0xff] %v8759_v12  ;;  %v8762_v28 = vpop.f32.mrf.mxu3  ;;  %5464 = vrot.lane.b32.xlu0 %v8667_v40, %s7077_s6  ;;  %v8766_v6 = vpop.f32.mrf.mxu0  ;;  %5462 = vrot.lane.b32.xlu2 %v5420_v42, %s7077_s6  ;;  %v5428_v42 = vld.sshfl [vmem:[#allocation1] sm:$0xff pattern:$0x73625140] }
 0x1d5   : > { %9744 = vst [vmem:[#allocation52_spill] sm:$0xff] %v8762_v28  ;;  %v8769_v61 = vpop.f32.mrf.mxu1  ;;  %v3711_v32 = vpop.permute.xlu1 %3710  ;;  %v5431_v40 = vld.sshfl [vmem:[#allocation1 + $0x18] sm:$0xff pattern:$0x73625140] }
 0x1d6   : > { %9745 = vst [vmem:[#allocation53_spill] sm:$0xff] %v8766_v6  ;;  %v3699_v2 = vpop.permute.xlu0 %3698  ;;  %v3750_v24 = vsel %vm3722_vm5, %v3711_v32, %v8676_v16  ;;  %v8773_v10 = vpop.permute.xlu2 %4561  ;;  %v8785_v6 = vld.sshfl [vmem:[#allocation1 + $0x8] sm:$0xff pattern:$0x73625140] }
 0x1d7   : > { %9746 = vst [vmem:[#allocation54_spill] sm:$0xff] %v8769_v61  ;;  %v3743_v51 = vsel %vm3722_vm5, %v3697_v8, %v3699_v2  ;;  %v3744_v7 = vsel %vm3722_vm5, %v3699_v2, %v8641_v57  ;;  %6840 = vmatpush.msk.msra.mxu3 %vm338_vm1, %v3750_v24  ;;  %v5401_v57 = vld [vmem:[%s7113_s17 + $0x20] sm:$0xff]  ;;  %v5430_v2 = vld.sshfl [vmem:[#allocation1 + $0x10] sm:$0xff pattern:$0x73625140] }
 0x1d8   : > { %6828 = vmatpush.msk.msrb.mxu1 %vm338_vm1, %v3744_v7  ;;  %6826 = vmatpush.msk.msrb.mxu0 %vm338_vm1, %v3743_v51  ;;  %5436 = vst [vmem:[#allocation1] ss:$4 sm:$0xff] %v5401_v57  ;;  %v5432_v51 = vld.sshfl [vmem:[#allocation1 + $0x20] sm:$0xff pattern:$0x73625140] }
 0x1d9   : > { %6827 = vmatmul.msk.f32.vlgmr.msrb.gmra.mxu0 %vm334_vm2, %v8558_v5  ;;  %6829 = vmatmul.msk.f32.vlgmr.msrb.gmra.mxu1 %vm334_vm2, %v8558_v5  ;;  %v8803_v12 = vld.sshfl [vmem:[#allocation1 + $0x28] sm:$0xff pattern:$0x73625140] }
 0x1da   : > { %6841 = vmatmul.msk.f32.vlgmr.msra.gmra.mxu3 %vm334_vm2, %v8558_v5 }
 0x1db   : > { %v8790_v24 = vpop.f32.mrf.mxu2  ;;  %5458 = vrot.lane.b32.xlu1 %v8673_v33, %s7077_s6 }
 0x1dc   : > { %9747 = vst [vmem:[#allocation55_spill] sm:$0xff] %v8790_v24  ;;  %v8794_v8 = vpop.f32.mrf.mxu3  ;;  %5460 = vrot.lane.b32.xlu0 %v8671_v35, %s7077_s6  ;;  %v8798_v7 = vpop.f32.mrf.mxu0  ;;  %5472 = vrot.lane.b32.xlu2 %v5425_v38, %s7077_s6  ;;  %v8805_v24 = vld.sshfl [vmem:[#allocation1 + $0x30] sm:$0xff pattern:$0x73625140]  ;;  %v3751_v38 = vsel %vm3722_vm5, %v8676_v16, %v8748_v21 }
 0x1dd   : > { %9748 = vst [vmem:[#allocation56_spill] sm:$0xff] %v8794_v8  ;;  %v8801_v61 = vpop.f32.mrf.mxu1  ;;  %v3707_v28 = vpop.permute.xlu1 %3706  ;;  %v5435_v8 = vld.sshfl [vmem:[#allocation1 + $0x38] sm:$0xff pattern:$0x73625140] }
 0x1de   : > { %9749 = vst [vmem:[#allocation57_spill] sm:$0xff] %v8798_v7  ;;  %v3709_v43 = vpop.permute.xlu0 %3708  ;;  %v3747_v33 = vsel %vm3722_vm5, %v3705_v15, %v3707_v28  ;;  %v8808_v57 = vpop.permute.xlu2 %4571 }
 0x1df   : > { %9750 = vst [vmem:[#allocation58_spill] sm:$0xff] %v8801_v61  ;;  %v3749_v35 = vsel %vm3722_vm5, %v3709_v43, %v3711_v32  ;;  %v3748_v7 = vsel %vm3722_vm5, %v3707_v28, %v3709_v43  ;;  %6834 = vmatpush.msk.msra.mxu0 %vm338_vm1, %v3747_v33  ;;  %v8837_v15 = vld.sshfl [vmem:[#allocation1 + $0x8] sm:$0xff pattern:$0x73625140] }
 0x1e0   : > { %5437 = vst [vmem:[#allocation1 + $0x20] ss:$4 sm:$0xff] %v5402_v53  ;;  %6836 = vmatpush.msk.msra.mxu1 %vm338_vm1, %v3748_v7  ;;  %6838 = vmatpush.msk.msra.mxu2 %vm338_vm1, %v3749_v35  ;;  %v8841_v7 = vld.sshfl [vmem:[#allocation1 + $0x10] sm:$0xff pattern:$0x73625140] }
 0x1e1   : > { %6835 = vmatmul.msk.f32.vlgmr.msra.gmra.mxu0 %vm334_vm2, %v8558_v5  ;;  %6837 = vmatmul.msk.f32.vlgmr.msra.gmra.mxu1 %vm334_vm2, %v8558_v5  ;;  %v5441_v33 = vld.sshfl [vmem:[#allocation1 + $0x18] sm:$0xff pattern:$0x73625140] }
 0x1e2   : > { %6839 = vmatmul.msk.f32.vlgmr.msra.gmra.mxu2 %vm334_vm2, %v8558_v5  ;;  %6842 = vmatpush.msk.msrb.mxu0 %vm338_vm1, %v3751_v38 }
 0x1e3   : > { %v8826_v53 = vpop.f32.mrf.mxu2  ;;  %5470 = vrot.lane.b32.xlu1 %v8712_v31, %s7077_s6 }
 0x1e4   : > { %9751 = vst [vmem:[#allocation59_spill] sm:$0xff] %v8826_v53  ;;  %v8830_v43 = vpop.f32.mrf.mxu3  ;;  %5474 = vrot.lane.b32.xlu0 %v5428_v42, %s7077_s6  ;;  %v8833_v16 = vpop.f32.mrf.mxu0  ;;  %5468 = vrot.lane.b32.xlu2 %v8706_v47, %s7077_s6 }
 0x1e5   : > { %9752 = vst [vmem:[#allocation60_spill] sm:$0xff] %v8830_v43  ;;  %v8839_v28 = vpop.f32.mrf.mxu1  ;;  %v3717_v32 = vpop.permute.xlu1 %3716  ;;  %v5403_v43 = vld [vmem:[%s7113_s17 + $0x30] sm:$0xff] }
 0x1e6   : > { %9753 = vst [vmem:[#allocation61_spill] sm:$0xff] %v8833_v16  ;;  %v3752_v31 = vsel %vm3722_vm5, %v8748_v21, %v3717_v32  ;;  %v3753_v35 = vsel %vm3722_vm5, %v3717_v32, %v8718_v27  ;;  %v3721_v42 = vpop.permute.xlu0 %3720  ;;  %v8847_v38 = vpop.permute.xlu2 %4567  ;;  %v5438_v16 = vld.sshfl [vmem:[#allocation1] sm:$0xff pattern:$0x73625140] }
 0x1e7   : > { %9754 = vst [vmem:[#allocation62_spill] sm:$0xff] %v8839_v28  ;;  %v3754_v47 = vsel %vm3722_vm5, %v8718_v27, %v3721_v42  ;;  %6844 = vmatpush.msk.msrb.mxu1 %vm338_vm1, %v3752_v31  ;;  %6846 = vmatpush.msk.msrb.mxu2 %vm338_vm1, %v3753_v35 }
 0x1e8   : > { %5446 = vst [vmem:[#allocation1] ss:$4 sm:$0xff] %v5403_v43  ;;  %6848 = vmatpush.msk.msrb.mxu3 %vm338_vm1, %v3754_v47 }
 0x1e9   : > { %6843 = vmatmul.msk.f32.vlgmr.msrb.gmra.mxu0 %vm334_vm2, %v8558_v5  ;;  %6845 = vmatmul.msk.f32.vlgmr.msrb.gmra.mxu1 %vm334_vm2, %v8558_v5 }
 0x1ea   : > { %6847 = vmatmul.msk.f32.vlgmr.msrb.gmra.mxu2 %vm334_vm2, %v8558_v5  ;;  %6849 = vmatmul.msk.f32.vlgmr.msrb.gmra.mxu3 %vm334_vm2, %v8558_v5 }
 0x1eb   : > { %v8863_v27 = vpop.f32.mrf.mxu2  ;;  %5482 = vrot.lane.b32.xlu1 %v5432_v51, %s7077_s6 }
 0x1ec   : > { %v8866_v21 = vpop.f32.mrf.mxu3  ;;  %5480 = vrot.lane.b32.xlu0 %v5431_v40, %s7077_s6  ;;  %v8869_v43 = vpop.f32.mrf.mxu0  ;;  %5478 = vrot.lane.b32.xlu2 %v5430_v2, %s7077_s6  ;;  %v8882_v40 = vld [vmem:[%s9689_s1 + $0x14] sm:$0xf] }
 0x1ed   : > { %9755 = vst [vmem:[#allocation63_spill] sm:$0xff] %v8869_v43  ;;  %v8872_v32 = vpop.f32.mrf.mxu1  ;;  %v4566_v31 = vpop.permute.xlu1 %4565 }
 0x1ee   : > { %9756 = vst [vmem:[#allocation64_spill] sm:$0xff] %v8872_v32  ;;  %v4564_v35 = vpop.permute.xlu0 %4563  ;;  %v8874_v42 = vpop.permute.xlu2 %4577 }
 0x1ef   : > { %v4626_v5 = vsel %vm4623_vm6, %v8773_v10, %v4564_v35  ;;  %v4627_v51 = vsel %vm4623_vm6, %v4564_v35, %v4566_v31  ;;  %v8932_v61 = vld.sshfl [vmem:[#allocation1 + $0x10] sm:$0xff pattern:$0x73625140] }
 0x1f0   : > { %6855 = vmatpush.msk.msra.mxu2 %vm338_vm1, %v4626_v5  ;;  %6857 = vmatpush.msk.msra.mxu3 %vm338_vm1, %v4627_v51 }
 0x1f2   : > { %6856 = vmatmul.msk.f32.vlgmr.msra.gmra.mxu2 %vm334_vm2, %v8882_v40  ;;  %6858 = vmatmul.msk.f32.vlgmr.msra.gmra.mxu3 %vm334_vm2, %v8882_v40 }
 0x1f3   : > { %v8890_v2 = vpop.f32.mrf.mxu2  ;;  %5488 = vrot.lane.b32.xlu1 %v5435_v8, %s7077_s6 }
 0x1f4   : > { %v8893_v47 = vpop.f32.mrf.mxu3  ;;  %5476 = vrot.lane.b32.xlu0 %v8785_v6, %s7077_s6  ;;  %v8897_v35 = vpop.f32.mrf.mxu0  ;;  %5490 = vrot.lane.b32.xlu2 %v5438_v16, %s7077_s6  ;;  %v4628_v6 = vsel %vm4623_vm6, %v4566_v31, %v8847_v38  ;;  %v5442_v16 = vld.sshfl [vmem:[#allocation1 + $0x20] sm:$0xff pattern:$0x73625140] }
 0x1f5   : > { %9757 = vst [vmem:[#allocation65_spill] sm:$0xff] %v8897_v35  ;;  %v8900_v5 = vpop.f32.mrf.mxu1  ;;  %v4558_v51 = vpop.permute.xlu1 %4557  ;;  %v5445_v35 = vld.sshfl [vmem:[#allocation1 + $0x38] sm:$0xff pattern:$0x73625140] }
 0x1f6   : > { %9758 = vst [vmem:[#allocation66_spill] sm:$0xff] %v8900_v5  ;;  %v4560_v43 = vpop.permute.xlu0 %4559  ;;  %v8902_v32 = vpop.permute.xlu2 %4589 }
 0x1f7   : > { %v4625_v28 = vsel %vm4623_vm6, %v4560_v43, %v8773_v10  ;;  %v4624_v8 = vsel %vm4623_vm6, %v4558_v51, %v4560_v43  ;;  %v5444_v10 = vld.sshfl [vmem:[#allocation1 + $0x30] sm:$0xff pattern:$0x73625140]  ;;  %v5404_v43 = vld [vmem:[%s7113_s17 + $0x38] sm:$0xff] }
 0x1f8   : > { %6853 = vmatpush.msk.msra.mxu1 %vm338_vm1, %v4625_v28  ;;  %6851 = vmatpush.msk.msra.mxu0 %vm338_vm1, %v4624_v8  ;;  %v8920_v28 = vld.sshfl [vmem:[#allocation1 + $0x28] sm:$0xff pattern:$0x73625140]  ;;  %v5448_v8 = vld.sshfl [vmem:[#allocation1] sm:$0xff pattern:$0x73625140] }
 0x1f9   : > { %6852 = vmatmul.msk.f32.vlgmr.msra.gmra.mxu0 %vm334_vm2, %v8882_v40  ;;  %6854 = vmatmul.msk.f32.vlgmr.msra.gmra.mxu1 %vm334_vm2, %v8882_v40  ;;  %5447 = vst [vmem:[#allocation1 + $0x20] ss:$4 sm:$0xff] %v5404_v43 }
 0x1fa   : > { %6859 = vmatpush.msk.msrb.mxu0 %vm338_vm1, %v4628_v6 }
 0x1fb   : > { %v8916_v5 = vpop.f32.mrf.mxu2  ;;  %5484 = vrot.lane.b32.xlu1 %v8803_v12, %s7077_s6  ;;  %v8934_v12 = vld.sshfl [vmem:[#allocation1 + $0x8] sm:$0xff pattern:$0x73625140] }
 0x1fc   : > { %v8923_v31 = vpop.f32.mrf.mxu3  ;;  %5486 = vrot.lane.b32.xlu0 %v8805_v24, %s7077_s6  ;;  %v8927_v51 = vpop.f32.mrf.mxu0  ;;  %5496 = vrot.lane.b32.xlu2 %v5441_v33, %s7077_s6  ;;  %v5405_v33 = vld [vmem:[%s7113_s17 + $0x40] sm:$0x3] }
 0x1fd   : > { %9759 = vst [vmem:[#allocation67_spill] sm:$0xff] %v8927_v51  ;;  %v8930_v6 = vpop.f32.mrf.mxu1  ;;  %v4570_v53 = vpop.permute.xlu1 %4569  ;;  %v5451_v51 = vld.sshfl [vmem:[#allocation1 + $0x18] sm:$0xff pattern:$0x73625140] }
 0x1fe   : > { %9760 = vst [vmem:[#allocation68_spill] sm:$0xff] %v8930_v6  ;;  %v4629_v36 = vsel %vm4623_vm6, %v8847_v38, %v4570_v53  ;;  %v4630_v14 = vsel %vm4623_vm6, %v4570_v53, %v8808_v57  ;;  %v4574_v24 = vpop.permute.xlu0 %4573  ;;  %v8940_v62 = vpop.permute.xlu2 %4595 }
 0x1ff   : > { %v4631_v43 = vsel %vm4623_vm6, %v8808_v57, %v4574_v24  ;;  %6861 = vmatpush.msk.msrb.mxu1 %vm338_vm1, %v4629_v36  ;;  %6863 = vmatpush.msk.msrb.mxu2 %vm338_vm1, %v4630_v14  ;;  %5456 = vst [vmem:[#allocation1] ss:$4 sm:$0xff] %v5405_v33 }
 0x200   : > { %6865 = vmatpush.msk.msrb.mxu3 %vm338_vm1, %v4631_v43  ;;  %6864 = vmatmul.msk.f32.vlgmr.msrb.gmra.mxu2 %vm334_vm2, %v8882_v40 }
 0x201   : > { %6860 = vmatmul.msk.f32.vlgmr.msrb.gmra.mxu0 %vm334_vm2, %v8882_v40  ;;  %6862 = vmatmul.msk.f32.vlgmr.msrb.gmra.mxu1 %vm334_vm2, %v8882_v40 }
 0x202   : > { %6866 = vmatmul.msk.f32.vlgmr.msrb.gmra.mxu3 %vm334_vm2, %v8882_v40 }
 0x203   : > { %v8956_v57 = vpop.f32.mrf.mxu2  ;;  %5494 = vrot.lane.b32.xlu1 %v8841_v7, %s7077_s6 }
 0x204   : > { %v8960_v36 = vpop.f32.mrf.mxu3  ;;  %5498 = vrot.lane.b32.xlu0 %v5442_v16, %s7077_s6  ;;  %v8963_v14 = vpop.f32.mrf.mxu0  ;;  %5492 = vrot.lane.b32.xlu2 %v8837_v15, %s7077_s6 }
 0x205   : > { %v8967_v53 = vpop.f32.mrf.mxu1  ;;  %v4582_v38 = vpop.permute.xlu1 %4581 }
 0x206   : > { %v4580_v33 = vpop.permute.xlu0 %4579  ;;  %v4592_v43 = vpop.permute.xlu2 %4591 }
 0x207   : > { %v4634_v6 = vsel %vm4623_vm6, %v8874_v42, %v4580_v33  ;;  %v4635_v50 = vsel %vm4623_vm6, %v4580_v33, %v4582_v38 }
 0x208   : > { %6871 = vmatpush.msk.msra.mxu2 %vm338_vm1, %v4634_v6  ;;  %6873 = vmatpush.msk.msra.mxu3 %vm338_vm1, %v4635_v50 }
 0x209   : > { %6872 = vmatmul.msk.f32.vlgmr.msra.gmra.mxu2 %vm334_vm2, %v8882_v40 }
 0x20a   : > { %6874 = vmatmul.msk.f32.vlgmr.msra.gmra.mxu3 %vm334_vm2, %v8882_v40 }
 0x20b   : > { %v8978_v15 = vpop.f32.mrf.mxu2  ;;  %5506 = vrot.lane.b32.xlu1 %v5448_v8, %s7077_s6 }
 0x20c   : > { %9761 = vst [vmem:[#allocation69_spill] sm:$0xff] %v8978_v15  ;;  %v8981_v7 = vpop.f32.mrf.mxu3  ;;  %5504 = vrot.lane.b32.xlu0 %v5445_v35, %s7077_s6  ;;  %v8984_v16 = vpop.f32.mrf.mxu0  ;;  %5502 = vrot.lane.b32.xlu2 %v5444_v10, %s7077_s6  ;;  %v5452_v35 = vld.sshfl [vmem:[#allocation1 + $0x20] sm:$0xff pattern:$0x73625140] }
 0x20d   : > { %9762 = vst [vmem:[#allocation70_spill] sm:$0xff] %v8984_v16  ;;  %v8987_v6 = vpop.f32.mrf.mxu1  ;;  %v4588_v50 = vpop.permute.xlu1 %4587 }
 0x20e   : > { %9763 = vst [vmem:[#allocation71_spill] sm:$0xff] %v8987_v6  ;;  %v4639_v33 = vsel %vm4623_vm6, %v4588_v50, %v8902_v32  ;;  %v4576_v0 = vpop.permute.xlu0 %4575  ;;  %v8991_v19 = vpop.permute.xlu2 %4601 }
 0x20f   : > { %v4632_v15 = vsel %vm4623_vm6, %v4574_v24, %v4576_v0  ;;  %v4633_v8 = vsel %vm4623_vm6, %v4576_v0, %v8874_v42  ;;  %6881 = vmatpush.msk.msrb.mxu3 %vm338_vm1, %v4639_v33 }
 0x210   : > { %6869 = vmatpush.msk.msra.mxu1 %vm338_vm1, %v4633_v8  ;;  %6867 = vmatpush.msk.msra.mxu0 %vm338_vm1, %v4632_v15 }
 0x211   : > { %6868 = vmatmul.msk.f32.vlgmr.msra.gmra.mxu0 %vm334_vm2, %v8882_v40  ;;  %6870 = vmatmul.msk.f32.vlgmr.msra.gmra.mxu1 %vm334_vm2, %v8882_v40 }
 0x212   : > { %6882 = vmatmul.msk.f32.vlgmr.msrb.gmra.mxu3 %vm334_vm2, %v8882_v40 }
 0x213   : > { %v9005_v10 = vpop.f32.mrf.mxu2  ;;  %5512 = vrot.lane.b32.xlu1 %v5451_v51, %s7077_s6 }
 0x214   : > { %v9008_v0 = vpop.f32.mrf.mxu3  ;;  %5500 = vrot.lane.b32.xlu0 %v8920_v28, %s7077_s6  ;;  %v9012_v42 = vpop.f32.mrf.mxu0  ;;  %5514 = vrot.lane.b32.xlu2 %v5452_v35, %s7077_s6  ;;  %v4640_v28 = vsel %vm4623_vm6, %v8902_v32, %v4592_v43 }
 0x215   : > { %v9015_v24 = vpop.f32.mrf.mxu1  ;;  %v4584_v15 = vpop.permute.xlu1 %4583 }
 0x216   : > { %v4636_v33 = vsel %vm4623_vm6, %v4582_v38, %v4584_v15  ;;  %v4586_v8 = vpop.permute.xlu0 %4585  ;;  %v9018_v16 = vpop.permute.xlu2 %4613  ;;  %v5455_v38 = vld.sshfl [vmem:[#allocation1 + $0x38] sm:$0xff pattern:$0x73625140] }
 0x217   : > { %v4637_v6 = vsel %vm4623_vm6, %v4584_v15, %v4586_v8  ;;  %v4638_v51 = vsel %vm4623_vm6, %v4586_v8, %v4588_v50  ;;  %6875 = vmatpush.msk.msrb.mxu0 %vm338_vm1, %v4636_v33 }
 0x218   : > { %6877 = vmatpush.msk.msrb.mxu1 %vm338_vm1, %v4637_v6  ;;  %6879 = vmatpush.msk.msrb.mxu2 %vm338_vm1, %v4638_v51 }
 0x219   : > { %6876 = vmatmul.msk.f32.vlgmr.msrb.gmra.mxu0 %vm334_vm2, %v8882_v40  ;;  %6878 = vmatmul.msk.f32.vlgmr.msrb.gmra.mxu1 %vm334_vm2, %v8882_v40 }
 0x21a   : > { %6880 = vmatmul.msk.f32.vlgmr.msrb.gmra.mxu2 %vm334_vm2, %v8882_v40  ;;  %6883 = vmatpush.msk.msra.mxu0 %vm338_vm1, %v4640_v28  ;;  %v5454_v28 = vld.sshfl [vmem:[#allocation1 + $0x30] sm:$0xff pattern:$0x73625140] }
 0x21b   : > { %v9034_v50 = vpop.f32.mrf.mxu2  ;;  %5508 = vrot.lane.b32.xlu1 %v8934_v12, %s7077_s6 }
 0x21c   : > { %9764 = vst [vmem:[#allocation72_spill] sm:$0xff] %v9034_v50  ;;  %v9038_v6 = vpop.f32.mrf.mxu3  ;;  %5510 = vrot.lane.b32.xlu0 %v8932_v61, %s7077_s6  ;;  %v9042_v32 = vpop.f32.mrf.mxu0  ;;  %5520 = vrot.lane.b32.xlu2 %v5455_v38, %s7077_s6  ;;  %v5453_v38 = vld.sshfl [vmem:[#allocation1 + $0x28] sm:$0xff pattern:$0x73625140] }
 0x21d   : > { %9765 = vst [vmem:[#allocation73_spill] sm:$0xff] %v9042_v32  ;;  %v4594_v35 = vpop.permute.xlu1 %4593 }
 0x21e   : > { %v9045_v15 = vpop.f32.mrf.mxu1  ;;  %v4598_v33 = vpop.permute.xlu0 %4597  ;;  %v4641_v8 = vsel %vm4623_vm6, %v4592_v43, %v4594_v35  ;;  %v4642_v51 = vsel %vm4623_vm6, %v4594_v35, %v8940_v62  ;;  %v5457_v43 = vld.sshfl [vmem:[#allocation1] sm:$0xff pattern:$0x73625140] }
 0x21f   : > { %9766 = vst [vmem:[#allocation74_spill] sm:$0xff] %v9045_v15  ;;  %v4643_v12 = vsel %vm4623_vm6, %v8940_v62, %v4598_v33  ;;  %6885 = vmatpush.msk.msra.mxu1 %vm338_vm1, %v4641_v8  ;;  %6887 = vmatpush.msk.msra.mxu2 %vm338_vm1, %v4642_v51  ;;  %v9054_v61 = vpop.permute.xlu2 %4619  ;;  %v1209_v15 = vadd.f32 %v8271_v54, %v7802_v30 }
 0x220   : > { %6889 = vmatpush.msk.msra.mxu3 %vm338_vm1, %v4643_v12 }
 0x221   : > { %6884 = vmatmul.msk.f32.vlgmr.msra.gmra.mxu0 %vm334_vm2, %v8882_v40  ;;  %6886 = vmatmul.msk.f32.vlgmr.msra.gmra.mxu1 %vm334_vm2, %v8882_v40 }
 0x222   : > { %6888 = vmatmul.msk.f32.vlgmr.msra.gmra.mxu2 %vm334_vm2, %v8882_v40  ;;  %6890 = vmatmul.msk.f32.vlgmr.msra.gmra.mxu3 %vm334_vm2, %v8882_v40 }
 0x223   : > { %5518 = vrot.lane.b32.xlu1 %v5454_v28, %s7077_s6 }
 0x224   : > { %v9066_v62 = vpop.f32.mrf.mxu2  ;;  %5522 = vrot.lane.b32.xlu0 %v5457_v43, %s7077_s6  ;;  %v9069_v35 = vpop.f32.mrf.mxu0  ;;  %5516 = vrot.lane.b32.xlu2 %v5453_v38, %s7077_s6  ;;  %v1229_v43 = vadd.f32 %v8277_v18, %v7796_v34  ;;  %v2662_v38 = vadd.f32 %v8588_v22, %v1209_v15 }
 0x225   : > { %9767 = vst [vmem:[#allocation75_spill] sm:$0xff] %v9066_v62  ;;  %v9072_v8 = vpop.f32.mrf.mxu3  ;;  %v4606_v51 = vpop.permute.xlu1 %4605 }
 0x226   : > { %9768 = vst [vmem:[#allocation76_spill] sm:$0xff] %v9069_v35  ;;  %v9074_v12 = vpop.f32.mrf.mxu1  ;;  %v4604_v32 = vpop.permute.xlu0 %4603  ;;  %v2663_v35 = vadd.f32 %v8592_v49, %v1229_v43  ;;  %v3563_v30 = vadd.f32 %v8863_v27, %v2662_v38  ;;  %v1289_v27 = vadd.f32 %v8314_v9, %v7876_v55 }
 0x227   : > { %v4646_v28 = vsel %vm4623_vm6, %v8991_v19, %v4604_v32  ;;  %v4647_v62 = vsel %vm4623_vm6, %v4604_v32, %v4606_v51  ;;  %v9081_v50 = vpop.permute.xlu2 %4615 }
 0x228   : > { %6895 = vmatpush.msk.msrb.mxu2 %vm338_vm1, %v4646_v28  ;;  %6897 = vmatpush.msk.msrb.mxu3 %vm338_vm1, %v4647_v62  ;;  %v3564_v54 = vadd.f32 %v8866_v21, %v2663_v35 }
 0x22a   : > { %6896 = vmatmul.msk.f32.vlgmr.msrb.gmra.mxu2 %vm334_vm2, %v8882_v40  ;;  %6898 = vmatmul.msk.f32.vlgmr.msrb.gmra.mxu3 %vm334_vm2, %v8882_v40 }
 0x22c   : > { %v3879_v32 = vpop.f32.mrf.mxu2  ;;  %v9095_v34 = vpop.f32.mrf.mxu0 }
 0x22d   : > { %v9097_v18 = vadd.f32 %v3879_v32, %v3563_v30  ;;  %v3899_v62 = vpop.f32.mrf.mxu3  ;;  %v4612_v28 = vpop.permute.xlu1 %4611  ;;  %v1309_v30 = vadd.f32 %v8318_v41, %v7852_v26 }
 0x22e   : > { %v9099_v22 = vadd.f32 %v3899_v62, %v3564_v54  ;;  %v9101_v49 = vpop.f32.mrf.mxu1  ;;  %v4600_v15 = vpop.permute.xlu0 %4599  ;;  %v4651_v43 = vsel %vm4623_vm6, %v4612_v28, %v9018_v16  ;;  %v2666_v54 = vadd.f32 %v8626_v39, %v1289_v27 }
 0x22f   : > { %v4644_v21 = vsel %vm4623_vm6, %v4598_v33, %v4600_v15  ;;  %v4645_v35 = vsel %vm4623_vm6, %v4600_v15, %v8991_v19  ;;  %6905 = vmatpush.msk.msra.mxu3 %vm338_vm1, %v4651_v43  ;;  %v9111_v38 = vpop.permute.xlu2 %5462  ;;  %v2667_v55 = vadd.f32 %v8629_v45, %v1309_v30 }
 0x230   : > { %6893 = vmatpush.msk.msrb.mxu1 %vm338_vm1, %v4645_v35  ;;  %6891 = vmatpush.msk.msrb.mxu0 %vm338_vm1, %v4644_v21  ;;  %v3567_v9 = vadd.f32 %v8890_v2, %v2666_v54 }
 0x231   : > { %6892 = vmatmul.msk.f32.vlgmr.msrb.gmra.mxu0 %vm334_vm2, %v8882_v40  ;;  %6894 = vmatmul.msk.f32.vlgmr.msrb.gmra.mxu1 %vm334_vm2, %v8882_v40  ;;  %v3568_v26 = vadd.f32 %v8893_v47, %v2667_v55  ;;  %v1389_v47 = vadd.f32 %v8355_v17, %v7928_v20  ;;  %v6296_v55 = vld [vmem:[%s9690_s2] sm:$0xf] }
 0x232   : > { %6906 = vmatmul.msk.f32.vlgmr.msra.gmra.mxu3 %vm334_vm2, %v8882_v40 }
 0x233   : > { %v2671_v35 = vadd.f32 %v8660_v11, %v1389_v47 }
 0x234   : > { %v3959_v41 = vpop.f32.mrf.mxu2 }
 0x235   : > { %v9127_v19 = vadd.f32 %v3959_v41, %v3567_v9  ;;  %v3979_v33 = vpop.f32.mrf.mxu3  ;;  %v4608_v39 = vpop.permute.xlu1 %4607  ;;  %v3572_v17 = vadd.f32 %v8923_v31, %v2671_v35 }
 0x236   : > { %v9129_v32 = vadd.f32 %v3979_v33, %v3568_v26  ;;  %v9131_v62 = vpop.f32.mrf.mxu1  ;;  %v4610_v15 = vpop.permute.xlu0 %4609  ;;  %v4648_v43 = vsel %vm4623_vm6, %v4606_v51, %v4608_v39  ;;  %v4652_v51 = vsel %vm4623_vm6, %v9018_v16, %v9081_v50  ;;  %v7078_v16 = vmov 0  }
 0x237   : > { %v4650_v45 = vsel %vm4623_vm6, %v4610_v15, %v4612_v28  ;;  %v4649_v27 = vsel %vm4623_vm6, %v4608_v39, %v4610_v15  ;;  %v9136_v21 = vpop.f32.mrf.mxu0  ;;  %6899 = vmatpush.msk.msra.mxu0 %vm338_vm1, %v4648_v43  ;;  %v9139_v2 = vpop.permute.xlu2 %5472  ;;  %v2670_v28 = vadd.f32 %v8657_v58, %v8353_v48  ;;  %6999 = vset.pattern.permute.xlu0 %v7078_v16 }
 0x238   : > { %6901 = vmatpush.msk.msra.mxu1 %vm338_vm1, %v4649_v27  ;;  %6903 = vmatpush.msk.msra.mxu2 %vm338_vm1, %v4650_v45  ;;  %v1469_v33 = vadd.f32 %v8397_v63, %v7988_v3  ;;  %v1489_v3 = vadd.f32 %v8401_v60, %v8025_v52  ;;  %v2674_v63 = vadd.f32 %v8696_v46, %v8395_v56 }
 0x239   : > { %6900 = vmatmul.msk.f32.vlgmr.msra.gmra.mxu0 %vm334_vm2, %v8882_v40  ;;  %6902 = vmatmul.msk.f32.vlgmr.msra.gmra.mxu1 %vm334_vm2, %v8882_v40  ;;  %v3571_v20 = vadd.f32 %v8916_v5, %v2670_v28 }
 0x23a   : > { %6904 = vmatmul.msk.f32.vlgmr.msra.gmra.mxu2 %vm334_vm2, %v8882_v40  ;;  %6907 = vmatpush.msk.msrb.mxu0 %vm338_vm1, %v4652_v51  ;;  %v3575_v52 = vadd.f32 %v8956_v57, %v2674_v63  ;;  %v9214_v57 = vld [vmem:[%s9689_s1 + $0x18] sm:$0xf] }
 0x23b   : > { %6299 = vperm.xlu0 %6999, %v6296_v55   ;;  %v9774_v63 = vld [vmem:[#allocation28_spill] sm:$0xff] }
 0x23d   : > { %v4039_v30 = vpop.f32.mrf.mxu2  ;;  %v4059_v54 = vpop.f32.mrf.mxu3 }
 0x23e   : > { %v9163_v48 = vadd.f32 %v4039_v30, %v3571_v20  ;;  %v9165_v58 = vadd.f32 %v4059_v54, %v3572_v17  ;;  %v9167_v11 = vpop.f32.mrf.mxu1  ;;  %v4618_v9 = vpop.permute.xlu1 %4617  ;;  %v2678_v20 = vadd.f32 %v8734_v23, %v8436_v4  ;;  %v9769_v17 = vld [vmem:[#allocation48_spill] sm:$0xff] }
 0x23f   : > { %v4653_v5 = vsel %vm4623_vm6, %v9081_v50, %v4618_v9  ;;  %v4654_v31 = vsel %vm4623_vm6, %v4618_v9, %v9054_v61  ;;  %v4622_v26 = vpop.permute.xlu0 %4621  ;;  %v9173_v41 = vpop.f32.mrf.mxu0  ;;  %v1509_v50 = vadd.f32 %v8407_v44, %v8027_v1  ;;  %v2676_v44 = vadd.f32 %v8704_v37, %v1489_v3  ;;  %v9771_v23 = vld [vmem:[#allocation12_spill] sm:$0xff]  ;;  %v9773_v3 = vld [vmem:[#allocation10_spill] sm:$0xff] }
 0x240   : > { %v4655_v39 = vsel %vm4623_vm6, %v9054_v61, %v4622_v26  ;;  %6909 = vmatpush.msk.msrb.mxu1 %vm338_vm1, %v4653_v5  ;;  %6911 = vmatpush.msk.msrb.mxu2 %vm338_vm1, %v4654_v31  ;;  %v9181_v15 = vpop.permute.xlu2 %5468  ;;  %v2675_v61 = vadd.f32 %v8700_v29, %v1469_v33  ;;  %v9772_v26 = vld [vmem:[#allocation31_spill] sm:$0xff] }
 0x241   : > { %6913 = vmatpush.msk.msrb.mxu3 %vm338_vm1, %v4655_v39  ;;  %6908 = vmatmul.msk.f32.vlgmr.msrb.gmra.mxu0 %vm334_vm2, %v8882_v40  ;;  %v2677_v1 = vadd.f32 %v8710_v13, %v1509_v50  ;;  %v3577_v43 = vadd.f32 %v8963_v14, %v2676_v44  ;;  %v1629_v33 = vadd.f32 %v9772_v26, %v9771_v23 }
 0x242   : > { %6910 = vmatmul.msk.f32.vlgmr.msrb.gmra.mxu1 %vm334_vm2, %v8882_v40  ;;  %6912 = vmatmul.msk.f32.vlgmr.msrb.gmra.mxu2 %vm334_vm2, %v8882_v40  ;;  %v3576_v60 = vadd.f32 %v8960_v36, %v2675_v61  ;;  %v1549_v36 = vadd.f32 %v8438_v25, %v8039_v59  ;;  %v9770_v59 = vld [vmem:[#allocation69_spill] sm:$0xff]  ;;  %v1569_v61 = vadd.f32 %v9774_v63, %v9773_v3 }
 0x243   : > { %6914 = vmatmul.msk.f32.vlgmr.msrb.gmra.mxu3 %vm334_vm2, %v8882_v40  ;;  %v3578_v56 = vadd.f32 %v8967_v53, %v2677_v1  ;;  %v3579_v25 = vadd.f32 %v9770_v59, %v2678_v20  ;;  %v9776_v1 = vld [vmem:[#allocation29_spill] sm:$0xff]  ;;  %v9782_v20 = vld [vmem:[#allocation71_spill] sm:$0xff]  ;;  %v9783_v59 = vld [vmem:[#allocation70_spill] sm:$0xff] }
 0x244   : > { %v2679_v16 = vadd.f32 %v9769_v17, %v1549_v36  ;;  %v9785_v3 = vld [vmem:[#allocation33_spill] sm:$0xff] }
 0x245   : > { %v4119_v46 = vpop.f32.mrf.mxu2  ;;  %v4139_v29 = vpop.f32.mrf.mxu3 }
 0x246   : > { %v9205_v45 = vadd.f32 %v4119_v46, %v3575_v52  ;;  %v9207_v27 = vadd.f32 %v4139_v29, %v3576_v60  ;;  %v4179_v13 = vpop.f32.mrf.mxu1  ;;  %v5467_v47 = vpop.permute.xlu1 %5466  ;;  %v3580_v30 = vadd.f32 %v8981_v7, %v2679_v16  ;;  %v9775_v7 = vld [vmem:[#allocation11_spill] sm:$0xff]  ;;  %v9777_v60 = vld [vmem:[#allocation30_spill] sm:$0xff]  ;;  %v9779_v29 = vld [vmem:[#allocation52_spill] sm:$0xff] }
 0x247   : > { %v9209_v40 = vadd.f32 %v4179_v13, %v3578_v56  ;;  %v5465_v37 = vpop.permute.xlu0 %5464  ;;  %v4159_v51 = vpop.f32.mrf.mxu0  ;;  %v1589_v44 = vadd.f32 %v9776_v1, %v9775_v7  ;;  %v9778_v56 = vld [vmem:[#allocation51_spill] sm:$0xff]  ;;  %v9780_v13 = vld [vmem:[#allocation50_spill] sm:$0xff]  ;;  %v9788_v1 = vld [vmem:[#allocation36_spill] sm:$0xff] }
 0x248   : > { %v5527_v14 = vsel %vm5524_vm7, %v9111_v38, %v5465_v37  ;;  %v5528_v53 = vsel %vm5524_vm7, %v5465_v37, %v5467_v47  ;;  %v9221_v28 = vadd.f32 %v4159_v51, %v3577_v43  ;;  %v9223_v35 = vpop.permute.xlu2 %5478  ;;  %v2682_v46 = vadd.f32 %v9778_v56, %v9777_v60  ;;  %v9781_v51 = vld [vmem:[#allocation49_spill] sm:$0xff]  ;;  %v9790_v60 = vld [vmem:[#allocation54_spill] sm:$0xff] }
 0x249   : > { %6920 = vmatpush.msk.msra.mxu2 %vm338_vm1, %v5527_v14  ;;  %6922 = vmatpush.msk.msra.mxu3 %vm338_vm1, %v5528_v53  ;;  %v2683_v43 = vadd.f32 %v9779_v29, %v1629_v33  ;;  %v2681_v37 = vadd.f32 %v9780_v13, %v1589_v44  ;;  %v2680_v36 = vadd.f32 %v9781_v51, %v1569_v61  ;;  %v9787_v61 = vld [vmem:[#allocation32_spill] sm:$0xff]  ;;  %v9791_v29 = vld [vmem:[#allocation53_spill] sm:$0xff] }
 0x24a   : > { %6921 = vmatmul.msk.f32.vlgmr.msra.gmra.mxu2 %vm334_vm2, %v9214_v57  ;;  %v3583_v14 = vadd.f32 %v9005_v10, %v2682_v46  ;;  %v9789_v44 = vld [vmem:[#allocation56_spill] sm:$0xff] }
 0x24b   : > { %6923 = vmatmul.msk.f32.vlgmr.msra.gmra.mxu3 %vm334_vm2, %v9214_v57  ;;  %v3584_v53 = vadd.f32 %v9008_v0, %v2683_v43  ;;  %v3582_v17 = vadd.f32 %v9782_v20, %v2681_v37 }
 0x24d   : > { %v4199_v54 = vpop.f32.mrf.mxu2  ;;  %v4219_v55 = vpop.f32.mrf.mxu3 }
 0x24e   : > { %v9236_v9 = vadd.f32 %v4199_v54, %v3579_v25  ;;  %v9238_v5 = vadd.f32 %v4219_v55, %v3580_v30  ;;  %v5459_v31 = vpop.permute.xlu1 %5458  ;;  %v3581_v25 = vadd.f32 %v9783_v59, %v2680_v36  ;;  %v9793_v59 = vld [vmem:[#allocation34_spill] sm:$0xff] }
 0x24f   : > { %v5461_v4 = vpop.permute.xlu0 %5460 }
 0x250   : > { %v5526_v39 = vsel %vm5524_vm7, %v5461_v4, %v9111_v38  ;;  %v5525_v50 = vsel %vm5524_vm7, %v5459_v31, %v5461_v4  ;;  %v9251_v52 = vpop.permute.xlu2 %5490  ;;  %v5529_v38 = vsel %vm5524_vm7, %v5467_v47, %v9181_v15 }
 0x251   : > { %6916 = vmatpush.msk.msra.mxu0 %vm338_vm1, %v5525_v50  ;;  %6918 = vmatpush.msk.msra.mxu1 %vm338_vm1, %v5526_v39  ;;  %v9784_v50 = vld [vmem:[#allocation14_spill] sm:$0xff] }
 0x252   : > { %6917 = vmatmul.msk.f32.vlgmr.msra.gmra.mxu0 %vm334_vm2, %v9214_v57  ;;  %6919 = vmatmul.msk.f32.vlgmr.msra.gmra.mxu1 %vm334_vm2, %v9214_v57  ;;  %v1669_v63 = vadd.f32 %v9785_v3, %v9784_v50  ;;  %v9798_v50 = vld [vmem:[#allocation55_spill] sm:$0xff] }
 0x253   : > { %6924 = vmatpush.msk.msrb.mxu0 %vm338_vm1, %v5529_v38 }
 0x254   : > { %v2685_v56 = vadd.f32 %v9790_v60, %v1669_v63  ;;  %v9799_v63 = vld [vmem:[#allocation58_spill] sm:$0xff] }
 0x255   : > { %v4279_v16 = vpop.f32.mrf.mxu2  ;;  %v4299_v47 = vpop.f32.mrf.mxu3 }
 0x256   : > { %v9269_v30 = vadd.f32 %v4279_v16, %v3583_v14  ;;  %v9271_v54 = vadd.f32 %v4299_v47, %v3584_v53  ;;  %v4259_v55 = vpop.f32.mrf.mxu1  ;;  %v5471_v31 = vpop.permute.xlu1 %5470  ;;  %v3586_v13 = vadd.f32 %v9015_v24, %v2685_v56  ;;  %v9792_v47 = vld [vmem:[#allocation15_spill] sm:$0xff] }
 0x257   : > { %v9273_v4 = vadd.f32 %v4259_v55, %v3582_v17  ;;  %v5530_v23 = vsel %vm5524_vm7, %v9181_v15, %v5471_v31  ;;  %v5531_v10 = vsel %vm5524_vm7, %v5471_v31, %v9139_v2  ;;  %v5475_v0 = vpop.permute.xlu0 %5474  ;;  %v4239_v26 = vpop.f32.mrf.mxu0  ;;  %v9786_v15 = vld [vmem:[#allocation13_spill] sm:$0xff] }
 0x258   : > { %v5532_v33 = vsel %vm5524_vm7, %v9139_v2, %v5475_v0  ;;  %v9281_v39 = vadd.f32 %v4239_v26, %v3581_v25  ;;  %6926 = vmatpush.msk.msrb.mxu1 %vm338_vm1, %v5530_v23  ;;  %6928 = vmatpush.msk.msrb.mxu2 %vm338_vm1, %v5531_v10  ;;  %v1649_v7 = vadd.f32 %v9787_v61, %v9786_v15  ;;  %v9301_v46 = vpop.permute.xlu2 %5496  ;;  %v9794_v31 = vld [vmem:[#allocation17_spill] sm:$0xff]  ;;  %v9796_v10 = vld [vmem:[#allocation16_spill] sm:$0xff]  ;;  %v9797_v26 = vld [vmem:[#allocation35_spill] sm:$0xff] }
 0x259   : > { %6930 = vmatpush.msk.msrb.mxu3 %vm338_vm1, %v5532_v33  ;;  %6929 = vmatmul.msk.f32.vlgmr.msrb.gmra.mxu2 %vm334_vm2, %v9214_v57  ;;  %v2687_v2 = vadd.f32 %v9789_v44, %v9788_v1  ;;  %v1689_v25 = vadd.f32 %v9793_v59, %v9792_v47  ;;  %v1729_v33 = vadd.f32 %v9797_v26, %v9796_v10  ;;  %v9800_v61 = vld [vmem:[#allocation57_spill] sm:$0xff]  ;;  %v9801_v1 = vld [vmem:[#allocation72_spill] sm:$0xff] }
 0x25a   : > { %6925 = vmatmul.msk.f32.vlgmr.msrb.gmra.mxu0 %vm334_vm2, %v9214_v57  ;;  %6927 = vmatmul.msk.f32.vlgmr.msrb.gmra.mxu1 %vm334_vm2, %v9214_v57  ;;  %v2684_v43 = vadd.f32 %v9791_v29, %v1649_v7 }
 0x25b   : > { %6931 = vmatmul.msk.f32.vlgmr.msrb.gmra.mxu3 %vm334_vm2, %v9214_v57  ;;  %v3588_v38 = vadd.f32 %v9038_v6, %v2687_v2  ;;  %v2686_v3 = vadd.f32 %v9798_v50, %v1689_v25  ;;  %v2688_v7 = vadd.f32 %v9800_v61, %v1729_v33  ;;  %v9802_v2 = vld [vmem:[#allocation74_spill] sm:$0xff]  ;;  %v9808_v33 = vld [vmem:[#allocation59_spill] sm:$0xff] }
 0x25c   : > { %v3585_v51 = vadd.f32 %v9012_v42, %v2684_v43  ;;  %v9795_v42 = vld [vmem:[#allocation37_spill] sm:$0xff] }
 0x25d   : > { %v4379_v37 = vpop.f32.mrf.mxu3  ;;  %v1749_v23 = vadd.f32 %v9795_v42, %v9794_v31  ;;  %v3587_v44 = vadd.f32 %v9801_v1, %v2686_v3  ;;  %v9803_v43 = vld [vmem:[#allocation73_spill] sm:$0xff]  ;;  %v9807_v31 = vld [vmem:[#allocation39_spill] sm:$0xff]  ;;  %v9809_v3 = vld [vmem:[#allocation60_spill] sm:$0xff] }
 0x25e   : > { %v9307_v36 = vadd.f32 %v4379_v37, %v3588_v38  ;;  %v4339_v14 = vpop.f32.mrf.mxu1  ;;  %v5483_v53 = vpop.permute.xlu1 %5482  ;;  %v3589_v38 = vadd.f32 %v9803_v43, %v2688_v7 }
 0x25f   : > { %v9309_v20 = vadd.f32 %v4339_v14, %v3586_v13  ;;  %v5481_v17 = vpop.permute.xlu0 %5480  ;;  %v4319_v16 = vpop.f32.mrf.mxu0  ;;  %v2689_v15 = vadd.f32 %v9799_v63, %v1749_v23  ;;  %v9804_v14 = vld [vmem:[#allocation18_spill] sm:$0xff] }
 0x260   : > { %v5535_v55 = vsel %vm5524_vm7, %v9223_v35, %v5481_v17  ;;  %v5536_v6 = vsel %vm5524_vm7, %v5481_v17, %v5483_v53  ;;  %v9316_v24 = vadd.f32 %v4319_v16, %v3585_v51  ;;  %v5493_v29 = vpop.permute.xlu2 %5492  ;;  %v9805_v17 = vld [vmem:[#allocation38_spill] sm:$0xff] }
 0x261   : > { %6936 = vmatpush.msk.msra.mxu2 %vm338_vm1, %v5535_v55  ;;  %6938 = vmatpush.msk.msra.mxu3 %vm338_vm1, %v5536_v6  ;;  %v3590_v60 = vadd.f32 %v9802_v2, %v2689_v15  ;;  %v1769_v16 = vadd.f32 %v9805_v17, %v9804_v14  ;;  %v9806_v6 = vld [vmem:[#allocation19_spill] sm:$0xff] }
 0x262   : > { %6937 = vmatmul.msk.f32.vlgmr.msra.gmra.mxu2 %vm334_vm2, %v9214_v57  ;;  %v1789_v42 = vadd.f32 %v9807_v31, %v9806_v6 }
 0x263   : > { %6939 = vmatmul.msk.f32.vlgmr.msra.gmra.mxu3 %vm334_vm2, %v9214_v57  ;;  %v2690_v50 = vadd.f32 %v9808_v33, %v1769_v16 }
 0x264   : > { %v2691_v63 = vadd.f32 %v9809_v3, %v1789_v42 }
 0x265   : > { %v4359_v56 = vpop.f32.mrf.mxu2 }
 0x266   : > { %v9334_v13 = vadd.f32 %v4359_v56, %v3587_v44  ;;  %v4419_v37 = vpop.f32.mrf.mxu1  ;;  %v5489_v51 = vpop.permute.xlu1 %5488  ;;  %v3592_v15 = vadd.f32 %v9072_v8, %v2691_v63  ;;  %v5541_v8 = vsel %vm5524_vm7, %v9251_v52, %v5493_v29 }
 0x267   : > { %v9338_v47 = vadd.f32 %v4419_v37, %v3590_v60  ;;  %v5540_v59 = vsel %vm5524_vm7, %v5489_v51, %v9251_v52  ;;  %v5477_v25 = vpop.permute.xlu0 %5476  ;;  %v4399_v55 = vpop.f32.mrf.mxu0 }
 0x268   : > { %v5533_v23 = vsel %vm5524_vm7, %v5475_v0, %v5477_v25  ;;  %v5534_v10 = vsel %vm5524_vm7, %v5477_v25, %v9223_v35  ;;  %v9347_v26 = vadd.f32 %v4399_v55, %v3589_v38  ;;  %6946 = vmatpush.msk.msrb.mxu3 %vm338_vm1, %v5540_v59  ;;  %v9810_v35 = vld [vmem:[#allocation75_spill] sm:$0xff]  ;;  %v5503_v43 = vpop.permute.xlu2 %5502 }
 0x269   : > { %6932 = vmatpush.msk.msra.mxu0 %vm338_vm1, %v5533_v23  ;;  %6934 = vmatpush.msk.msra.mxu1 %vm338_vm1, %v5534_v10  ;;  %v3591_v0 = vadd.f32 %v9810_v35, %v2690_v50 }
 0x26a   : > { %6933 = vmatmul.msk.f32.vlgmr.msra.gmra.mxu0 %vm334_vm2, %v9214_v57  ;;  %6935 = vmatmul.msk.f32.vlgmr.msra.gmra.mxu1 %vm334_vm2, %v9214_v57 }
 0x26b   : > { %6947 = vmatmul.msk.f32.vlgmr.msrb.gmra.mxu3 %vm334_vm2, %v9214_v57 }
 0x26d   : > { %v4439_v61 = vpop.f32.mrf.mxu2  ;;  %v4459_v7 = vpop.f32.mrf.mxu3 }
 0x26e   : > { %v9362_v1 = vadd.f32 %v4439_v61, %v3591_v0  ;;  %v9364_v44 = vadd.f32 %v4459_v7, %v3592_v15  ;;  %v5485_v2 = vpop.permute.xlu1 %5484  ;;  %v9811_v0 = vld [vmem:[#allocation7_spill] sm:$0xff]  ;;  %v9812_v15 = vld [vmem:[#allocation25_spill] sm:$0xff] }
 0x26f   : > { %v5537_v60 = vsel %vm5524_vm7, %v5483_v53, %v5485_v2  ;;  %v5487_v56 = vpop.permute.xlu0 %5486  ;;  %v1349_v61 = vadd.f32 %v9812_v15, %v9811_v0 }
 0x270   : > { %v5538_v38 = vsel %vm5524_vm7, %v5485_v2, %v5487_v56  ;;  %v5539_v37 = vsel %vm5524_vm7, %v5487_v56, %v5489_v51  ;;  %6940 = vmatpush.msk.msrb.mxu0 %vm338_vm1, %v5537_v60  ;;  %v9389_v16 = vpop.permute.xlu2 %5514  ;;  %v9813_v56 = vld [vmem:[#allocation6_spill] sm:$0xff] }
 0x271   : > { %6942 = vmatpush.msk.msrb.mxu1 %vm338_vm1, %v5538_v38  ;;  %6944 = vmatpush.msk.msrb.mxu2 %vm338_vm1, %v5539_v37  ;;  %v9814_v38 = vld [vmem:[#allocation24_spill] sm:$0xff] }
 0x272   : > { %6941 = vmatmul.msk.f32.vlgmr.msrb.gmra.mxu0 %vm334_vm2, %v9214_v57  ;;  %6943 = vmatmul.msk.f32.vlgmr.msrb.gmra.mxu1 %vm334_vm2, %v9214_v57 }
 0x273   : > { %6945 = vmatmul.msk.f32.vlgmr.msrb.gmra.mxu2 %vm334_vm2, %v9214_v57  ;;  %6948 = vmatpush.msk.msra.mxu0 %vm338_vm1, %v5541_v8 }
 0x275   : > { %v9403_v59 = vpop.f32.mrf.mxu3 }
 0x276   : > { %v5495_v53 = vpop.permute.xlu1 %5494  ;;  %v9405_v25 = vpop.f32.mrf.mxu0 }
 0x277   : > { %v5499_v51 = vpop.permute.xlu0 %5498  ;;  %v5542_v14 = vsel %vm5524_vm7, %v5493_v29, %v5495_v53  ;;  %v5543_v17 = vsel %vm5524_vm7, %v5495_v53, %v9301_v46  ;;  %v9395_v29 = vpop.f32.mrf.mxu2 }
 0x278   : > { %v5544_v52 = vsel %vm5524_vm7, %v9301_v46, %v5499_v51  ;;  %6950 = vmatpush.msk.msra.mxu1 %vm338_vm1, %v5542_v14  ;;  %6952 = vmatpush.msk.msra.mxu2 %vm338_vm1, %v5543_v17  ;;  %v9401_v46 = vpop.f32.mrf.mxu1  ;;  %v9415_v10 = vpop.permute.xlu2 %5520  ;;  %v9816_v14 = vld [vmem:[#allocation44_spill] sm:$0xff] }
 0x279   : > { %6954 = vmatpush.msk.msra.mxu3 %vm338_vm1, %v5544_v52  ;;  %v9817_v52 = vld [vmem:[#allocation66_spill] sm:$0xff] }
 0x27a   : > { %6949 = vmatmul.msk.f32.vlgmr.msra.gmra.mxu0 %vm334_vm2, %v9214_v57  ;;  %6951 = vmatmul.msk.f32.vlgmr.msra.gmra.mxu1 %vm334_vm2, %v9214_v57 }
 0x27b   : > { %6953 = vmatmul.msk.f32.vlgmr.msra.gmra.mxu2 %vm334_vm2, %v9214_v57  ;;  %6955 = vmatmul.msk.f32.vlgmr.msra.gmra.mxu3 %vm334_vm2, %v9214_v57 }
 0x27e   : > { %v5507_v55 = vpop.permute.xlu1 %5506  ;;  %v9427_v7 = vpop.f32.mrf.mxu0 }
 0x27f   : > { %v5505_v6 = vpop.permute.xlu0 %5504 }
 0x280   : > { %v5547_v31 = vsel %vm5524_vm7, %v5503_v43, %v5505_v6  ;;  %v5548_v42 = vsel %vm5524_vm7, %v5505_v6, %v5507_v55  ;;  %v9420_v3 = vpop.f32.mrf.mxu1  ;;  %v5517_v0 = vpop.permute.xlu2 %5516 }
 0x281   : > { %6960 = vmatpush.msk.msrb.mxu2 %vm338_vm1, %v5547_v31  ;;  %6962 = vmatpush.msk.msrb.mxu3 %vm338_vm1, %v5548_v42 }
 0x283   : > { %6961 = vmatmul.msk.f32.vlgmr.msrb.gmra.mxu2 %vm334_vm2, %v9214_v57  ;;  %6963 = vmatmul.msk.f32.vlgmr.msrb.gmra.mxu3 %vm334_vm2, %v9214_v57  ;;  %v4860_v23 = vpop.f32.mrf.mxu2 }
 0x284   : > { %v9418_v33 = vadd.f32 %v4860_v23, %v9127_v19  ;;  %v1329_v19 = vadd.f32 %v9814_v38, %v9813_v56  ;;  %v9819_v56 = vld [vmem:[#allocation9_spill] sm:$0xff]  ;;  %v9820_v38 = vld [vmem:[#allocation27_spill] sm:$0xff] }
 0x285   : > { %v4880_v50 = vpop.f32.mrf.mxu3 }
 0x286   : > { %v9423_v63 = vadd.f32 %v4880_v50, %v9129_v32  ;;  %v5513_v35 = vpop.permute.xlu1 %5512  ;;  %v9815_v32 = vld [vmem:[#allocation45_spill] sm:$0xff]  ;;  %v2668_v17 = vadd.f32 %v9816_v14, %v1329_v19  ;;  %v1429_v19 = vadd.f32 %v9820_v38, %v9819_v56 }
 0x287   : > { %v5501_v2 = vpop.permute.xlu0 %5500  ;;  %v5552_v60 = vsel %vm5524_vm7, %v5513_v35, %v9389_v16  ;;  %v2669_v53 = vadd.f32 %v9815_v32, %v1349_v61 }
 0x288   : > { %v5545_v37 = vsel %vm5524_vm7, %v5499_v51, %v5501_v2  ;;  %v5546_v8 = vsel %vm5524_vm7, %v5501_v2, %v5503_v43  ;;  %6970 = vmatpush.msk.msra.mxu3 %vm338_vm1, %v5552_v60  ;;  %v9818_v43 = vld [vmem:[#allocation65_spill] sm:$0xff] }
 0x289   : > { %6956 = vmatpush.msk.msrb.mxu0 %vm338_vm1, %v5545_v37  ;;  %6958 = vmatpush.msk.msrb.mxu1 %vm338_vm1, %v5546_v8  ;;  %v3570_v51 = vadd.f32 %v9817_v52, %v2669_v53  ;;  %v3569_v6 = vadd.f32 %v9818_v43, %v2668_v17  ;;  %v9822_v53 = vld [vmem:[#allocation26_spill] sm:$0xff]  ;;  %v9823_v52 = vld [vmem:[#allocation47_spill] sm:$0xff] }
 0x28a   : > { %6957 = vmatmul.msk.f32.vlgmr.msrb.gmra.mxu0 %vm334_vm2, %v9214_v57  ;;  %6959 = vmatmul.msk.f32.vlgmr.msrb.gmra.mxu1 %vm334_vm2, %v9214_v57  ;;  %v9824_v43 = vld [vmem:[#allocation46_spill] sm:$0xff] }
 0x28b   : > { %6971 = vmatmul.msk.f32.vlgmr.msra.gmra.mxu3 %vm334_vm2, %v9214_v57  ;;  %v4471_v42 = vadd.f32 %v9131_v62, %v3570_v51  ;;  %v4470_v15 = vadd.f32 %v9136_v21, %v3569_v6  ;;  %v2673_v51 = vadd.f32 %v9823_v52, %v1429_v19  ;;  %v5553_v6 = vsel %vm5524_vm7, %v9389_v16, %v5517_v0 }
 0x28c   : > { %v4940_v31 = vpop.f32.mrf.mxu2 }
 0x28d   : > { %v9450_v23 = vadd.f32 %v4940_v31, %v9163_v48  ;;  %v4960_v50 = vpop.f32.mrf.mxu3  ;;  %v9821_v48 = vld [vmem:[#allocation8_spill] sm:$0xff] }
 0x28e   : > { %v9454_v61 = vadd.f32 %v4960_v50, %v9165_v58  ;;  %v4920_v2 = vpop.f32.mrf.mxu1  ;;  %v5509_v60 = vpop.permute.xlu1 %5508  ;;  %v1409_v14 = vadd.f32 %v9822_v53, %v9821_v48 }
 0x28f   : > { %v9458_v37 = vadd.f32 %v4920_v2, %v4471_v42  ;;  %v5511_v8 = vpop.permute.xlu0 %5510  ;;  %v5549_v62 = vsel %vm5524_vm7, %v5507_v55, %v5509_v60  ;;  %v4900_v32 = vpop.f32.mrf.mxu0  ;;  %v9826_v42 = vld [vmem:[#allocation67_spill] sm:$0xff] }
 0x290   : > { %v5551_v17 = vsel %vm5524_vm7, %v5511_v8, %v5513_v35  ;;  %v5550_v21 = vsel %vm5524_vm7, %v5509_v60, %v5511_v8  ;;  %v9465_v58 = vadd.f32 %v4900_v32, %v4470_v15  ;;  %6964 = vmatpush.msk.msra.mxu0 %vm338_vm1, %v5549_v62  ;;  %v2672_v55 = vadd.f32 %v9824_v43, %v1409_v14  ;;  %v9825_v35 = vld [vmem:[#allocation68_spill] sm:$0xff] }
 0x291   : > { %6966 = vmatpush.msk.msra.mxu1 %vm338_vm1, %v5550_v21  ;;  %6968 = vmatpush.msk.msra.mxu2 %vm338_vm1, %v5551_v17  ;;  %v3574_v31 = vadd.f32 %v9825_v35, %v2673_v51 }
 0x292   : > { %6965 = vmatmul.msk.f32.vlgmr.msra.gmra.mxu0 %vm334_vm2, %v9214_v57  ;;  %6967 = vmatmul.msk.f32.vlgmr.msra.gmra.mxu1 %vm334_vm2, %v9214_v57  ;;  %v3573_v50 = vadd.f32 %v9826_v42, %v2672_v55 }
 0x293   : > { %6969 = vmatmul.msk.f32.vlgmr.msra.gmra.mxu2 %vm334_vm2, %v9214_v57  ;;  %6972 = vmatpush.msk.msrb.mxu0 %vm338_vm1, %v5553_v6  ;;  %v4475_v15 = vadd.f32 %v9167_v11, %v3574_v31 }
 0x294   : > { %v4474_v16 = vadd.f32 %v9173_v41, %v3573_v50 }
 0x295   : > { %v5040_v2 = vpop.f32.mrf.mxu3 }
 0x296   : > { %v9486_v60 = vadd.f32 %v5040_v2, %v9207_v27  ;;  %v5000_v56 = vpop.f32.mrf.mxu1  ;;  %v5519_v38 = vpop.permute.xlu1 %5518 }
 0x297   : > { %v9488_v19 = vadd.f32 %v5000_v56, %v4475_v15  ;;  %v5554_v8 = vsel %vm5524_vm7, %v5517_v0, %v5519_v38  ;;  %v5555_v62 = vsel %vm5524_vm7, %v5519_v38, %v9415_v10  ;;  %v5523_v32 = vpop.permute.xlu0 %5522  ;;  %v4980_v48 = vpop.f32.mrf.mxu0  ;;  %v9827_v38 = vld [vmem:[#allocation2_spill] sm:$0xff] }
 0x298   : > { %v5556_v11 = vsel %vm5524_vm7, %v9415_v10, %v5523_v32  ;;  %v9495_v53 = vadd.f32 %v4980_v48, %v4474_v16  ;;  %6974 = vmatpush.msk.msrb.mxu1 %vm338_vm1, %v5554_v8  ;;  %6976 = vmatpush.msk.msrb.mxu2 %vm338_vm1, %v5555_v62  ;;  %v9828_v8 = vld [vmem:[#allocation20_spill] sm:$0xff]  ;;  %v9829_v62 = vld [vmem:[#allocation3_spill] sm:$0xff]  ;;  %v9830_v32 = vld [vmem:[#allocation21_spill] sm:$0xff] }
 0x299   : > { %6978 = vmatpush.msk.msrb.mxu3 %vm338_vm1, %v5556_v11 }
 0x29a   : > { %6973 = vmatmul.msk.f32.vlgmr.msrb.gmra.mxu0 %vm334_vm2, %v9214_v57  ;;  %6975 = vmatmul.msk.f32.vlgmr.msrb.gmra.mxu1 %vm334_vm2, %v9214_v57 }
 0x29b   : > { %6977 = vmatmul.msk.f32.vlgmr.msrb.gmra.mxu2 %vm334_vm2, %v9214_v57  ;;  %6979 = vmatmul.msk.f32.vlgmr.msrb.gmra.mxu3 %vm334_vm2, %v9214_v57 }
 0x29d   : > { %v5020_v41 = vpop.f32.mrf.mxu2 }
 0x29e   : > { %v9509_v27 = vadd.f32 %v5020_v41, %v9205_v45  ;;  %v5080_v10 = vpop.f32.mrf.mxu1 }
 0x29f   : > { %v5060_v0 = vpop.f32.mrf.mxu0  ;;  %v9512_v14 = vadd.f32 %v5080_v10, %v9209_v40  ;;  %v9832_v10 = vld [vmem:[#allocation40_spill] sm:$0xff] }
 0x2a0   : > { %v9515_v17 = vadd.f32 %v5060_v0, %v9221_v28 }
 0x2a5   : > { %v5100_v21 = vpop.f32.mrf.mxu2  ;;  %v5120_v52 = vpop.f32.mrf.mxu3 }
 0x2a6   : > { %v9518_v51 = vadd.f32 %v5100_v21, %v9236_v9  ;;  %v9521_v43 = vadd.f32 %v5120_v52, %v9238_v5  ;;  %v9834_v52 = vld [vmem:[#allocation61_spill] sm:$0xff] }
 0x2ad   : > { %v5180_v57 = vpop.f32.mrf.mxu2  ;;  %v5200_v55 = vpop.f32.mrf.mxu3 }
 0x2ae   : > { %v9524_v45 = vadd.f32 %v5180_v57, %v9269_v30  ;;  %v9527_v6 = vadd.f32 %v5200_v55, %v9271_v54  ;;  %v5140_v40 = vpop.f32.mrf.mxu0  ;;  %v5160_v35 = vpop.f32.mrf.mxu1 }
 0x2af   : > { %v9530_v28 = vadd.f32 %v5140_v40, %v9281_v39  ;;  %v9533_v31 = vadd.f32 %v5160_v35, %v9273_v4  ;;  %v9835_v40 = vld [vmem:[#allocation76_spill] sm:$0xff] }
 0x2b5   : > { %v5280_v9 = vpop.f32.mrf.mxu3 }
 0x2b6   : > { %v9536_v5 = vadd.f32 %v5280_v9, %v9307_v36  ;;  %v5220_v42 = vpop.f32.mrf.mxu0  ;;  %v5240_v50 = vpop.f32.mrf.mxu1  ;;  %v9836_v9 = vld [vmem:[#allocation4_spill] sm:$0xff] }
 0x2b7   : > { %v9539_v30 = vadd.f32 %v5220_v42, %v9316_v24  ;;  %v9542_v54 = vadd.f32 %v5240_v50, %v9309_v20  ;;  %v1169_v24 = vadd.f32 %v9828_v8, %v9827_v38  ;;  %v1189_v20 = vadd.f32 %v9830_v32, %v9829_v62  ;;  %v9837_v42 = vld [vmem:[#allocation22_spill] sm:$0xff] }
 0x2b8   : > { %v1249_v50 = vadd.f32 %v9837_v42, %v9836_v9  ;;  %v9840_v32 = vld [vmem:[#allocation42_spill] sm:$0xff] }
 0x2b9   : > { %v2660_v0 = vadd.f32 %v9832_v10, %v1169_v24 }
 0x2bb   : > { %v3561_v57 = vadd.f32 %v9834_v52, %v2660_v0 }
 0x2bd   : > { %v5260_v15 = vpop.f32.mrf.mxu2  ;;  %v4462_v35 = vadd.f32 %v9835_v40, %v3561_v57 }
 0x2be   : > { %v9545_v2 = vadd.f32 %v5260_v15, %v9334_v13  ;;  %v5300_v39 = vpop.f32.mrf.mxu0 }
 0x2bf   : > { %v9548_v4 = vadd.f32 %v5300_v39, %v9347_v26  ;;  %v5320_v16 = vpop.f32.mrf.mxu1  ;;  %v9831_v26 = vld [vmem:[#allocation41_spill] sm:$0xff]  ;;  %v9575_v39 = vpop.permute.xlu0 %6299 }
 0x2c0   : > { %v9551_v36 = vadd.f32 %v5320_v16, %v9338_v47  ;;  %v2661_v41 = vadd.f32 %v9831_v26, %v1189_v20  ;;  %v9833_v47 = vld [vmem:[#allocation62_spill] sm:$0xff]  ;;  %v9838_v16 = vld [vmem:[#allocation5_spill] sm:$0xff]  ;;  %v9841_v26 = vld [vmem:[#allocation43_spill] sm:$0xff] }
 0x2c2   : > { %v3562_v21 = vadd.f32 %v9833_v47, %v2661_v41  ;;  %v9842_v47 = vld [vmem:[#allocation64_spill] sm:$0xff] }
 0x2c4   : > { %v4463_v55 = vadd.f32 %v9074_v12, %v3562_v21  ;;  %v5363_v12 = vadd.f32 %v9405_v25, %v4462_v35  ;;  %v9843_v21 = vld [vmem:[#allocation63_spill] sm:$0xff] }
 0x2c5   : > { %v5340_v56 = vpop.f32.mrf.mxu2 }
 0x2c6   : > { %v9558_v48 = vadd.f32 %v5340_v56, %v9362_v1  ;;  %v5360_v13 = vpop.f32.mrf.mxu3  ;;  %v5365_v1 = vadd.f32 %v9395_v29, %v9097_v18  ;;  %v9839_v56 = vld [vmem:[#allocation23_spill] sm:$0xff]  ;;  %v5364_v8 = vadd.f32 %v9401_v46, %v4463_v55  ;;  %v2664_v18 = vadd.f32 %v9840_v32, %v1249_v50 }
 0x2c7   : > { %v9561_v11 = vadd.f32 %v5360_v13, %v9364_v44  ;;  %v5366_v44 = vadd.f32 %v9403_v59, %v9099_v22  ;;  %v1269_v38 = vadd.f32 %v9839_v56, %v9838_v16 }
 0x2c8   : > { %v3565_v25 = vadd.f32 %v9843_v21, %v2664_v18 }
 0x2c9   : > { %v2665_v41 = vadd.f32 %v9841_v26, %v1269_v38 }
 0x2ca   : > { %v4466_v40 = vadd.f32 %v9095_v34, %v3565_v25 }
 0x2cb   : > { %v3566_v46 = vadd.f32 %v9842_v47, %v2665_v41 }
 0x2cd   : > { %v5681_v15 = vpop.f32.mrf.mxu2  ;;  %v4467_v55 = vadd.f32 %v9101_v49, %v3566_v46 }
 0x2ce   : > { %v6266_v24 = vadd.f32 %v5681_v15, %v5365_v1  ;;  %v5701_v62 = vpop.f32.mrf.mxu3  ;;  %v5367_v1 = vadd.f32 %v9427_v7, %v4466_v40 }
 0x2cf   : > { %v6267_v29 = vadd.f32 %v5701_v62, %v5366_v44  ;;  %v5661_v20 = vpop.f32.mrf.mxu1  ;;  %v5641_v13 = vpop.f32.mrf.mxu0  ;;  %v5368_v35 = vadd.f32 %v9420_v3, %v4467_v55 }
 0x2d0   : > { %v6265_v22 = vadd.f32 %v5661_v20, %v5364_v8  ;;  %v6264_v59 = vadd.f32 %v5641_v13, %v5363_v12  ;;  %v6304_v10 = vadd.f32 %v9575_v39, %v6266_v24 }
 0x2d1   : > { %v6305_v0 = vadd.f32 %v9575_v39, %v6267_v29 }
 0x2d2   : > { %v6303_v52 = vadd.f32 %v9575_v39, %v6265_v22  ;;  %v6302_v57 = vadd.f32 %v9575_v39, %v6264_v59 }
 0x2d3   : > { %7000 = vtanh.f32 %v6305_v0 }
 0x2d4   : > { %7002 = vtanh.f32 %v6304_v10 }
 0x2d5   : > { %7004 = vtanh.f32 %v6303_v52 }
 0x2d6   : > { %7006 = vtanh.f32 %v6302_v57 }
 0x2d7   : > { %v5721_v9 = vpop.f32.mrf.mxu0  ;;  %v5741_v42 = vpop.f32.mrf.mxu1 }
 0x2d8   : > { %v6268_v50 = vadd.f32 %v5721_v9, %v5367_v1  ;;  %v6269_v44 = vadd.f32 %v5741_v42, %v5368_v35 }
 0x2d9   : > { %v7001_v15 = vpop.eup %7000 }
 0x2da   : > { %v7003_v16 = vpop.eup %7002  ;;  %v6399_v34 = vrot.slane %v7001_v15, 4  ;;  %v6307_v49 = vadd.f32 %v9575_v39, %v6269_v44  ;;  %v6306_v7 = vadd.f32 %v9575_v39, %v6268_v50 }
 0x2db   : > { %v7005_v3 = vpop.eup %7004 }
 0x2dc   : > { %v6398_v56 = vrot.slane %v7005_v3, 4  ;;  %v6416_v38 = vsel %vm6414_vm8, %v7003_v16, %v6399_v34  ;;  %v5761_v8 = vpop.f32.mrf.mxu2  ;;  %v7007_v12 = vpop.eup %7006  ;;  %7008 = vtanh.f32 %v6307_v49 }
 0x2dd   : > { %6448 = vst [vmem:[%s9597_s18 + $0x8] sm:$0xff] %v6416_v38  ;;  %v6270_v24 = vadd.f32 %v5761_v8, %v9418_v33  ;;  %7010 = vtanh.f32 %v6306_v7 }
 0x2de   : > { %v6415_v62 = vsel %vm6414_vm8, %v7007_v12, %v6398_v56  ;;  %v5781_v32 = vpop.f32.mrf.mxu3 }
 0x2df   : > { %6447 = vst [vmem:[%s9597_s18] sm:$0xff] %v6415_v62  ;;  %v6271_v18 = vadd.f32 %v5781_v32, %v9423_v63  ;;  %v6308_v29 = vadd.f32 %v9575_v39, %v6270_v24 }
 0x2e1   : > { %v6309_v20 = vadd.f32 %v9575_v39, %v6271_v18 }
 0x2e2   : > { %v7009_v13 = vpop.eup %7008 }
 0x2e3   : > { %7012 = vtanh.f32 %v6309_v20  ;;  %v6400_v26 = vrot.slane %v7009_v13, 4  ;;  %v7011_v41 = vpop.eup %7010 }
 0x2e4   : > { %7014 = vtanh.f32 %v6308_v29 }
 0x2e5   : > { %v5841_v22 = vpop.f32.mrf.mxu2  ;;  %v6417_v33 = vsel %vm6414_vm8, %v7011_v41, %v6400_v26 }
 0x2e6   : > { %v6274_v59 = vadd.f32 %v5841_v22, %v9450_v23  ;;  %v5861_v10 = vpop.f32.mrf.mxu3  ;;  %6449 = vst [vmem:[%s9597_s18 + $0x10] sm:$0xff] %v6417_v33 }
 0x2e7   : > { %v6275_v0 = vadd.f32 %v5861_v10, %v9454_v61  ;;  %v5801_v63 = vpop.f32.mrf.mxu0  ;;  %v5821_v47 = vpop.f32.mrf.mxu1 }
 0x2e8   : > { %v6312_v46 = vadd.f32 %v9575_v39, %v6274_v59  ;;  %v6272_v21 = vadd.f32 %v5801_v63, %v9465_v58  ;;  %v6273_v25 = vadd.f32 %v5821_v47, %v9458_v37 }
 0x2e9   : > { %v7013_v52 = vpop.eup %7012  ;;  %v6313_v57 = vadd.f32 %v9575_v39, %v6275_v0 }
 0x2ea   : > { %v6401_v55 = vrot.slane %v7013_v52, 4  ;;  %v6311_v40 = vadd.f32 %v9575_v39, %v6273_v25  ;;  %v7015_v23 = vpop.eup %7014  ;;  %v6310_v35 = vadd.f32 %v9575_v39, %v6272_v21 }
 0x2eb   : > { %7016 = vtanh.f32 %v6313_v57 }
 0x2ec   : > { %v6418_v61 = vsel %vm6414_vm8, %v7015_v23, %v6401_v55  ;;  %7018 = vtanh.f32 %v6312_v46 }
 0x2ed   : > { %6450 = vst [vmem:[%s9597_s18 + $0x18] sm:$0xff] %v6418_v61  ;;  %7020 = vtanh.f32 %v6311_v40 }
 0x2ee   : > { %v5941_v1 = vpop.f32.mrf.mxu3  ;;  %7022 = vtanh.f32 %v6310_v35 }
 0x2ef   : > { %v6279_v37 = vadd.f32 %v5941_v1, %v9486_v60  ;;  %v5881_v58 = vpop.f32.mrf.mxu0  ;;  %v5901_v9 = vpop.f32.mrf.mxu1 }
 0x2f0   : > { %v6276_v42 = vadd.f32 %v5881_v58, %v9495_v53  ;;  %v6277_v50 = vadd.f32 %v5901_v9, %v9488_v19 }
 0x2f1   : > { %v7017_v44 = vpop.eup %7016  ;;  %v6317_v34 = vadd.f32 %v9575_v39, %v6279_v37 }
 0x2f2   : > { %v7019_v15 = vpop.eup %7018  ;;  %v6403_v16 = vrot.slane %v7017_v44, 4  ;;  %v6315_v49 = vadd.f32 %v9575_v39, %v6277_v50  ;;  %v6314_v7 = vadd.f32 %v9575_v39, %v6276_v42 }
 0x2f3   : > { %v7021_v3 = vpop.eup %7020 }
 0x2f4   : > { %v6420_v56 = vsel %vm6414_vm8, %v7019_v15, %v6403_v16  ;;  %v6402_v60 = vrot.slane %v7021_v3, 4  ;;  %v7023_v38 = vpop.eup %7022  ;;  %7024 = vtanh.f32 %v6315_v49 }
 0x2f5   : > { %6452 = vst [vmem:[%s9597_s18 + $0x28] sm:$0xff] %v6420_v56  ;;  %7026 = vtanh.f32 %v6317_v34 }
 0x2f6   : > { %v6419_v53 = vsel %vm6414_vm8, %v7023_v38, %v6402_v60  ;;  %v5921_v19 = vpop.f32.mrf.mxu2  ;;  %7028 = vtanh.f32 %v6314_v7 }
 0x2f7   : > { %6451 = vst [vmem:[%s9597_s18 + $0x20] sm:$0xff] %v6419_v53  ;;  %v6278_v8 = vadd.f32 %v5921_v19, %v9509_v27  ;;  %v5961_v12 = vpop.f32.mrf.mxu0  ;;  %v5981_v24 = vpop.f32.mrf.mxu1 }
 0x2f8   : > { %v6280_v62 = vadd.f32 %v5961_v12, %v9515_v17  ;;  %v6281_v32 = vadd.f32 %v5981_v24, %v9512_v14 }
 0x2f9   : > { %v6316_v18 = vadd.f32 %v9575_v39, %v6278_v8 }
 0x2fa   : > { %v6319_v29 = vadd.f32 %v9575_v39, %v6281_v32  ;;  %v7025_v20 = vpop.eup %7024  ;;  %v6318_v13 = vadd.f32 %v9575_v39, %v6280_v62 }
 0x2fb   : > { %7030 = vtanh.f32 %v6316_v18  ;;  %v7027_v26 = vpop.eup %7026  ;;  %v6404_v41 = vrot.slane %v7025_v20, 4 }
 0x2fc   : > { %v7029_v22 = vpop.eup %7028  ;;  %7032 = vtanh.f32 %v6319_v29  ;;  %v6405_v10 = vrot.slane %v7027_v26, 4 }
 0x2fd   : > { %v6421_v27 = vsel %vm6414_vm8, %v7029_v22, %v6404_v41  ;;  %7034 = vtanh.f32 %v6318_v13 }
 0x2fe   : > { %v6001_v33 = vpop.f32.mrf.mxu2  ;;  %v6021_v59 = vpop.f32.mrf.mxu3  ;;  %6453 = vst [vmem:[%s9597_s18 + $0x30] sm:$0xff] %v6421_v27 }
 0x2ff   : > { %v6282_v14 = vadd.f32 %v6001_v33, %v9518_v51  ;;  %v6283_v17 = vadd.f32 %v6021_v59, %v9521_v43 }
 0x301   : > { %v7031_v0 = vpop.eup %7030  ;;  %v6321_v63 = vadd.f32 %v9575_v39, %v6283_v17  ;;  %v6320_v46 = vadd.f32 %v9575_v39, %v6282_v14 }
 0x302   : > { %v6422_v47 = vsel %vm6414_vm8, %v7031_v0, %v6405_v10  ;;  %v7033_v21 = vpop.eup %7032 }
 0x303   : > { %6454 = vst [vmem:[%s9597_s18 + $0x38] sm:$0xff] %v6422_v47  ;;  %v6406_v25 = vrot.slane %v7033_v21, 4  ;;  %7036 = vtanh.f32 %v6321_v63  ;;  %v7035_v52 = vpop.eup %7034 }
 0x304   : > { %7038 = vtanh.f32 %v6320_v46 }
 0x305   : > { %v6423_v57 = vsel %vm6414_vm8, %v7035_v52, %v6406_v25 }
 0x306   : > { %v6081_v51 = vpop.f32.mrf.mxu2  ;;  %v6101_v55 = vpop.f32.mrf.mxu3  ;;  %6455 = vst [vmem:[%s9597_s18 + $0x40] sm:$0xff] %v6423_v57 }
 0x307   : > { %v6286_v43 = vadd.f32 %v6081_v51, %v9524_v45  ;;  %v6287_v40 = vadd.f32 %v6101_v55, %v9527_v6  ;;  %v6041_v23 = vpop.f32.mrf.mxu0  ;;  %v6061_v35 = vpop.f32.mrf.mxu1 }
 0x308   : > { %v6284_v61 = vadd.f32 %v6041_v23, %v9530_v28  ;;  %v6285_v1 = vadd.f32 %v6061_v35, %v9533_v31 }
 0x309   : > { %v6324_v37 = vadd.f32 %v9575_v39, %v6286_v43  ;;  %v6325_v58 = vadd.f32 %v9575_v39, %v6287_v40  ;;  %v7037_v9 = vpop.eup %7036 }
 0x30a   : > { %v6323_v42 = vadd.f32 %v9575_v39, %v6285_v1  ;;  %v6407_v50 = vrot.slane %v7037_v9, 4  ;;  %v7039_v44 = vpop.eup %7038  ;;  %v6322_v45 = vadd.f32 %v9575_v39, %v6284_v61 }
 0x30b   : > { %7040 = vtanh.f32 %v6325_v58 }
 0x30c   : > { %v6424_v6 = vsel %vm6414_vm8, %v7039_v44, %v6407_v50  ;;  %7042 = vtanh.f32 %v6324_v37 }
 0x30d   : > { %6456 = vst [vmem:[%s9597_s18 + $0x48] sm:$0xff] %v6424_v6  ;;  %7044 = vtanh.f32 %v6323_v42 }
 0x30e   : > { %v6181_v28 = vpop.f32.mrf.mxu3  ;;  %7046 = vtanh.f32 %v6322_v45 }
 0x30f   : > { %v6291_v31 = vadd.f32 %v6181_v28, %v9536_v5  ;;  %v6121_v15 = vpop.f32.mrf.mxu0  ;;  %v6141_v16 = vpop.f32.mrf.mxu1 }
 0x310   : > { %v6288_v34 = vadd.f32 %v6121_v15, %v9539_v30  ;;  %v6289_v49 = vadd.f32 %v6141_v16, %v9542_v54 }
 0x311   : > { %v7041_v3 = vpop.eup %7040  ;;  %v6329_v7 = vadd.f32 %v9575_v39, %v6291_v31 }
 0x312   : > { %v6327_v56 = vadd.f32 %v9575_v39, %v6289_v49  ;;  %v7043_v60 = vpop.eup %7042  ;;  %v6409_v38 = vrot.slane %v7041_v3, 4  ;;  %v6326_v53 = vadd.f32 %v9575_v39, %v6288_v34 }
 0x313   : > { %v7045_v19 = vpop.eup %7044 }
 0x314   : > { %v6426_v5 = vsel %vm6414_vm8, %v7043_v60, %v6409_v38  ;;  %v6408_v8 = vrot.slane %v7045_v19, 4  ;;  %7048 = vtanh.f32 %v6327_v56  ;;  %v7047_v12 = vpop.eup %7046 }
 0x315   : > { %6458 = vst [vmem:[%s9597_s18 + $0x58] sm:$0xff] %v6426_v5  ;;  %7050 = vtanh.f32 %v6329_v7 }
 0x316   : > { %v6161_v30 = vpop.f32.mrf.mxu2  ;;  %v6425_v54 = vsel %vm6414_vm8, %v7047_v12, %v6408_v8  ;;  %7052 = vtanh.f32 %v6326_v53 }
 0x317   : > { %v6290_v24 = vadd.f32 %v6161_v30, %v9545_v2  ;;  %v6201_v62 = vpop.f32.mrf.mxu0  ;;  %v6221_v32 = vpop.f32.mrf.mxu1  ;;  %6457 = vst [vmem:[%s9597_s18 + $0x50] sm:$0xff] %v6425_v54 }
 0x318   : > { %v6292_v18 = vadd.f32 %v6201_v62, %v9548_v4  ;;  %v6293_v29 = vadd.f32 %v6221_v32, %v9551_v36 }
 0x319   : > { %v6328_v20 = vadd.f32 %v9575_v39, %v6290_v24 }
 0x31a   : > { %v6331_v13 = vadd.f32 %v9575_v39, %v6293_v29  ;;  %v7049_v26 = vpop.eup %7048  ;;  %v6330_v41 = vadd.f32 %v9575_v39, %v6292_v18 }
 0x31b   : > { %7054 = vtanh.f32 %v6328_v20  ;;  %v7051_v22 = vpop.eup %7050  ;;  %v6410_v27 = vrot.slane %v7049_v26, 4 }
 0x31c   : > { %v7053_v2 = vpop.eup %7052  ;;  %7056 = vtanh.f32 %v6331_v13  ;;  %v6411_v17 = vrot.slane %v7051_v22, 4 }
 0x31d   : > { %v6427_v33 = vsel %vm6414_vm8, %v7053_v2, %v6410_v27  ;;  %7058 = vtanh.f32 %v6330_v41 }
 0x31e   : > { %v6241_v59 = vpop.f32.mrf.mxu2  ;;  %v6261_v14 = vpop.f32.mrf.mxu3  ;;  %6459 = vst [vmem:[%s9597_s18 + $0x60] sm:$0xff] %v6427_v33 }
 0x31f   : > { %v6294_v4 = vadd.f32 %v6241_v59, %v9558_v48  ;;  %v6295_v36 = vadd.f32 %v6261_v14, %v9561_v11 }
 0x321   : > { %v7055_v10 = vpop.eup %7054  ;;  %v6333_v0 = vadd.f32 %v9575_v39, %v6295_v36  ;;  %v6332_v47 = vadd.f32 %v9575_v39, %v6294_v4 }
 0x322   : > { %v6428_v63 = vsel %vm6414_vm8, %v7055_v10, %v6411_v17  ;;  %v7057_v46 = vpop.eup %7056 }
 0x323   : > { %6460 = vst [vmem:[%s9597_s18 + $0x68] sm:$0xff] %v6428_v63  ;;  %v6412_v21 = vrot.slane %v7057_v46, 4  ;;  %7060 = vtanh.f32 %v6333_v0  ;;  %v7059_v25 = vpop.eup %7058 }
 0x324   : > { %7062 = vtanh.f32 %v6332_v47 }
 0x325   : > { %v6429_v52 = vsel %vm6414_vm8, %v7059_v25, %v6412_v21 }
 0x326   : > { %6461 = vst [vmem:[%s9597_s18 + $0x70] sm:$0xff] %v6429_v52 }
 0x329   : > { %v7061_v48 = vpop.eup %7060 }
 0x32a   : > { %v6413_v11 = vrot.slane %v7061_v48, 4  ;;  %v7063_v57 = vpop.eup %7062 }
 0x32c   : > { %v6430_v51 = vsel %vm6414_vm8, %v7063_v57, %v6413_v11 }
 0x32d   : > { %6462 = vst [vmem:[%s9597_s18 + $0x78] sm:$0xff] %v6430_v51 }
 0x32e PF: > { %s13_s12 = sadd.s32 1, %s7070_s12  }
 0x32f   : > { %p10_p4 = scmp.ge.s32.totalorder %s13_s12, 4  }
 0x331   :  { %12 = sbr.rel (!%p10_p4) target bundleno = 1 (0x1), region = 75 }

</bundles_post_ra>
